<compile_context>
chip_gen: v6e
topology: v6e:2x2x1
jax: 0.10.0
libtpu: 0.0.40
codegen_flags: <defaults>
</compile_context>

<pallas_src>
import functools

import jax
import jax.numpy as jnp
from jax.experimental import pallas as pl
from jax.experimental.pallas import tpu as pltpu


QK_SCALE = 8.0          # fixed attention scale used by LocalAttention when qk_rmsnorm=True
LN_EPS = 1e-5           # torch.nn.LayerNorm default
NEG_INF = -3.4e38       # ~ -finfo(f32).max, matches the reference mask value

# cached decision: can constant-index specs be single-buffered on this jax/runtime?
_SINGLE_BUFFER_OK = [None]


# ----------------------------- in-kernel helpers -----------------------------

def _erf(x):
    # Abramowitz & Stegun 7.1.26, |err| < 1.5e-7 (matches exact-erf GELU to f32 tolerance).
    # TODO(synk): lax.erf has no Mosaic lowering rule; keep the polynomial (its exp hits the EUP).
    a1, a2, a3, a4, a5 = 0.254829592, -0.284496736, 1.421413741, -1.453152027, 1.061405429
    p = 0.3275911
    s = jnp.where(x >= 0.0, 1.0, -1.0)
    ax = jnp.abs(x)
    t = 1.0 / (1.0 + p * ax)
    poly = ((((a5 * t + a4) * t + a3) * t + a2) * t + a1) * t
    return s * (1.0 - poly * jnp.exp(-ax * ax))


def _gelu_exact(x):
    return 0.5 * x * (1.0 + _erf(x * 0.7071067811865476))


# ------------------------------- fused kernel --------------------------------

def layer_kernel(*args, heads, dim_head, window_size, tile_q, n_chunks, n_tiles):
    x_refs = args[:n_chunks]
    (qcos_ref, qsin_ref, kcos_ref, ksin_ref,
     wq_ref, wkv_ref, qscale_ref, kscale_ref, wout_ref,
     lng_ref, lnb_ref, w1v_ref, w1g_ref, w2_ref,
     o_ref) = args[n_chunks:]

    H, dh = heads, dim_head
    half = dh // 2
    hd = H * dh
    band = n_chunks * tile_q
    bf16 = jnp.bfloat16

    i = pl.program_id(1)
    q0 = i * tile_q

    # ---- assemble query tile and key/value band from the pipelined neighbour chunks ----
    if n_chunks == 3:
        start_blk = jnp.clip(i - 1, 0, n_tiles - 3)        # first band tile (matches index maps)
        c = i - start_blk                                   # which chunk holds the query tile
        ch0, ch1, ch2 = x_refs[0][0], x_refs[1][0], x_refs[2][0]        # (tile_q, D) each
        xq = jnp.where(c == 0, ch0, jnp.where(c == 1, ch1, ch2))        # residual/query rows
        xb_b = jnp.concatenate([ch0.astype(bf16), ch1.astype(bf16), ch2.astype(bf16)], axis=0)
        k_start = start_blk * tile_q
    else:
        xq = x_refs[0][0]                                   # (N, D): whole sequence in one tile
        xb_b = xq.astype(bf16)
        k_start = 0

    # --- projections: bf16 operands, f32 accumulation on the MXU (fused K|V weight) ---
    xq_b = xq.astype(bf16)
    q2 = jnp.dot(xq_b, wq_ref[...], preferred_element_type=jnp.float32)      # (TQ, H*dh)
    kv2 = jnp.dot(xb_b, wkv_ref[...], preferred_element_type=jnp.float32)    # (BAND, 2*H*dh)
    k2 = kv2[:, :hd]                                                         # lane-aligned when
    v2 = kv2[:, hd:]                                                         # H*dh % 128 == 0

    # head-batched layout (H, rows, dh) for the MXU batch dim
    q = jnp.transpose(q2.reshape(tile_q, H, dh), (1, 0, 2))                  # (H, TQ, dh)
    k = jnp.transpose(k2.reshape(band, H, dh), (1, 0, 2))                    # (H, BAND, dh)
    v = jnp.transpose(v2.reshape(band, H, dh), (1, 0, 2))

    # qk rmsnorm (F.normalize, eps=1e-12) + learned per-dim scales (qk_scale=8 pre-folded)
    q = q * jax.lax.rsqrt(jnp.maximum(jnp.sum(q * q, axis=-1, keepdims=True), 1e-24))
    k = k * jax.lax.rsqrt(jnp.maximum(jnp.sum(k * k, axis=-1, keepdims=True), 1e-24))
    q = q * qscale_ref[...]                                                  # (1,1,dh) broadcast
    k = k * kscale_ref[...]

    # rotary + xpos: tables already hold cos*xs and sign-folded sin*xs
    qc = qcos_ref[...][None]                         # (1, TQ, dh)
    qs = qsin_ref[...][None]
    kc = kcos_ref[0][None]                           # (1, BAND, dh), banded per tile
    ks = ksin_ref[0][None]

    def _roll_half(u):
        # pure half-rotation; the rotate_half sign lives in the precomputed sin table.
        # TODO(synk): switch to pltpu.roll once dim_head is lane-aligned (128).
        return jnp.concatenate([u[..., half:], u[..., :half]], axis=-1)

    q = q * qc + _roll_half(q) * qs
    k = k * kc + _roll_half(k) * ks

    # --- local attention over the lane-dense band only: O(TQ * BAND) ---
    sim = jnp.einsum('hqd,hkd->hqk', q.astype(bf16), k.astype(bf16),
                     preferred_element_type=jnp.float32)                     # (H, TQ, BAND)
    t_idx = q0 + jax.lax.broadcasted_iota(jnp.int32, (tile_q, band), 0)
    j_idx = k_start + jax.lax.broadcasted_iota(jnp.int32, (tile_q, band), 1)
    allowed = jnp.abs(t_idx - j_idx) <= window_size
    sim = jnp.where(allowed[None], sim, NEG_INF)
    sim = sim - jnp.max(sim, axis=-1, keepdims=True)
    p = jnp.exp(sim)
    p = p * pl.reciprocal(jnp.sum(p, axis=-1, keepdims=True), approx=True)

    out = jnp.einsum('hqk,hkd->hqd', p.astype(bf16), v.astype(bf16),
                     preferred_element_type=jnp.float32)                     # (H, TQ, dh)
    attn = jnp.transpose(out, (1, 0, 2)).reshape(tile_q, hd)                 # head merge

    y = jnp.dot(attn.astype(bf16), wout_ref[...],
                preferred_element_type=jnp.float32) + xq                     # MHA residual

    # --- FeedForward (LayerNorm -> GEGLU -> Linear), fused, + residual ---
    mu = jnp.mean(y, axis=-1, keepdims=True)
    var = jnp.mean(jnp.square(y - mu), axis=-1, keepdims=True)
    h = (y - mu) * jax.lax.rsqrt(var + LN_EPS) * lng_ref[...] + lnb_ref[...]
    h_b = h.astype(bf16)
    val = jnp.dot(h_b, w1v_ref[...], preferred_element_type=jnp.float32)     # (TQ, ffi_pad)
    gate = jnp.dot(h_b, w1g_ref[...], preferred_element_type=jnp.float32)
    f = val * _gelu_exact(gate)                                              # GEGLU
    o = jnp.dot(f.astype(bf16), w2_ref[...], preferred_element_type=jnp.float32) + y
    o_ref[0] = o.astype(o_ref.dtype)


# --------------------------------- wrappers ----------------------------------

def _const_spec(shape, single_buffer):
    nd = len(shape)
    imap = lambda b, i, _nd=nd: (0,) * _nd
    if single_buffer:
        # constant block index -> one DMA for the whole grid; skip the second buffer.
        return pl.BlockSpec(shape, imap, pipeline_mode=pl.Buffered(1))
    return pl.BlockSpec(shape, imap)


def _default_vmem_limit():
    try:
        cap = int(pltpu.get_tpu_info().vmem_capacity_bytes)
        if cap <= 0:
            raise ValueError
        return max(32 * 1024 * 1024, min(3 * cap // 4, 96 * 1024 * 1024))
    except Exception:
        return 32 * 1024 * 1024


def fused_layer(x, prm, rot, *, heads, dim_head, window_size, tile_q, n_chunks,
                single_buffer_consts, vmem_limit):
    B, N, D = x.shape
    dh = dim_head
    hd = heads * dim_head
    n_tiles = N // tile_q
    band = n_chunks * tile_q
    qcos, qsin, kcos_b, ksin_b = rot
    bf16 = jnp.bfloat16

    # ---- host-side weight prep (once per call): fused KV weight, 128-padded FF, bf16 casts ----
    ffi = prm["w2"].shape[0]
    ffi_pad = max(128, ((ffi + 127) // 128) * 128)
    pad = ffi_pad - ffi

    wq = prm["wqkv"][:, :hd].astype(bf16)
    wkv = prm["wqkv"][:, hd:].astype(bf16)                 # (D, 2*H*dh) fused K|V projection
    wout = prm["wout"].astype(bf16)
    w1v = prm["w1"][:, :ffi]
    w1g = prm["w1"][:, ffi:]
    w2 = prm["w2"]
    if pad:
        w1v = jnp.pad(w1v, ((0, 0), (0, pad)))             # zero-pad: exact through GEGLU + w2
        w1g = jnp.pad(w1g, ((0, 0), (0, pad)))
        w2 = jnp.pad(w2, ((0, pad), (0, 0)))
    w1v, w1g, w2 = w1v.astype(bf16), w1g.astype(bf16), w2.astype(bf16)
    q_scale = (prm["q_scale"] * QK_SCALE).reshape(1, 1, dh)   # fixed qk_scale=8 folded in
    k_scale = prm["k_scale"].reshape(1, 1, dh)

    kernel = functools.partial(layer_kernel, heads=heads, dim_head=dim_head,
                               window_size=window_size, tile_q=tile_q,
                               n_chunks=n_chunks, n_tiles=n_tiles)

    # ---- specs ----
    if n_chunks == 3:
        def chunk_spec(c):
            return pl.BlockSpec(
                (1, tile_q, D),
                lambda b, i, _c=c: (b, jnp.clip(i - 1, 0, n_tiles - 3) + _c, 0))
        x_specs = [chunk_spec(0), chunk_spec(1), chunk_spec(2)]
        x_args = [x, x, x]
    else:
        x_specs = [pl.BlockSpec((1, N, D), lambda b, i: (b, 0, 0))]
        x_args = [x]

    qrot_spec = pl.BlockSpec((tile_q, dh), lambda b, i: (i, 0))       # q rotary rows of this tile
    krot_spec = pl.BlockSpec((1, band, dh), lambda b, i: (i, 0, 0))   # banded k rotary rows

    consts = (wq, wkv, q_scale, k_scale, wout,
              prm["ln_gamma"], prm["ln_beta"], w1v, w1g, w2)
    const_specs = [_const_spec(c.shape, single_buffer_consts) for c in consts]

    in_specs = x_specs + [qrot_spec, qrot_spec, krot_spec, krot_spec] + const_specs
    out_spec = pl.BlockSpec((1, tile_q, D), lambda b, i: (b, i, 0))

    return pl.pallas_call(
        kernel,
        out_shape=jax.ShapeDtypeStruct((B, N, D), x.dtype),
        grid=(B, n_tiles),
        in_specs=in_specs,
        out_specs=out_spec,
        compiler_params=pltpu.CompilerParams(
            dimension_semantics=("parallel", "parallel"),   # shards across v7x's 2 TCs even at B=1
            vmem_limit_bytes=vmem_limit),
    )(*x_args, qcos, qsin, kcos_b, ksin_b, *consts)


# ------------------------- params / positional tables ------------------------

def build_rotary_tables(n, dim_head, window_size, tile_q, n_chunks):
    """Per-absolute-position rotary+xpos tables with the xpos scale and the rotate-half sign
    pre-folded in.  q uses effective position t+w, k uses j; only the q-k difference
    (w + (t - j)) enters the scores, identical to the reference's bucket-relative positions.
    The k tables are produced in banded per-query-tile form (n_tiles, band, dh)."""
    inv_freq = 1.0 / (10000.0 ** (jnp.arange(0, dim_head, 2, dtype=jnp.float32) / dim_head))
    scale_vec = (jnp.arange(0, dim_head, 2, dtype=jnp.float32) + 0.4 * dim_head) / (1.4 * dim_head)
    scale_full = jnp.concatenate([scale_vec, scale_vec])[None, :]         # (1, dh)
    sb = max(window_size // 2, 1)                                         # xpos scale_base
    c = (3 * window_size) // 2                                            # seq_len//2 in reference
    n_tiles = n // tile_q
    band = n_chunks * tile_q

    def tables(p, sign):
        fr = p[:, None] * inv_freq[None, :]                               # (rows, dh/2)
        cos = jnp.concatenate([jnp.cos(fr), jnp.cos(fr)], axis=-1)        # (rows, dh)
        sin_signed = jnp.concatenate([-jnp.sin(fr), jnp.sin(fr)], axis=-1)  # rotate_half sign folded
        xs = scale_full ** (sign * ((p - c) / sb)[:, None])               # (rows, dh)
        return cos * xs, sin_signed * xs

    pos = jnp.arange(n, dtype=jnp.float32)
    qcos, qsin = tables(pos + window_size, +1.0)                          # (n, dh)

    if n_chunks == 3:
        starts = jnp.clip(jnp.arange(n_tiles) - 1, 0, n_tiles - 3) * tile_q
    else:
        starts = jnp.zeros((n_tiles,), jnp.int32)
    band_pos = (starts[:, None] + jnp.arange(band)[None, :]).astype(jnp.float32).reshape(-1)
    kcos, ksin = tables(band_pos, -1.0)
    kcos = kcos.reshape(n_tiles, band, dim_head)
    ksin = ksin.reshape(n_tiles, band, dim_head)
    return qcos, qsin, kcos, ksin


def init_params(key, *, dim, depth, heads, dim_head):
    inner_dim = heads * dim_head
    ff_inner = int(dim * 4 * 2 / 3)
    layers = []
    for _ in range(depth):
        key, k1, k2, k3, k4 = jax.random.split(key, 5)
        layers.append({
            "wqkv": 0.02 * jax.random.normal(k1, (dim, 3 * inner_dim), jnp.float32),
            "q_scale": jnp.ones((1, dim_head), jnp.float32),
            "k_scale": jnp.ones((1, dim_head), jnp.float32),
            "wout": 0.02 * jax.random.normal(k2, (inner_dim, dim), jnp.float32),
            "ln_gamma": jnp.ones((1, dim), jnp.float32),
            "ln_beta": jnp.zeros((1, dim), jnp.float32),
            "w1": 0.02 * jax.random.normal(k3, (dim, 2 * ff_inner), jnp.float32),
            "w2": 0.02 * jax.random.normal(k4, (ff_inner, dim), jnp.float32),
        })
    return layers


def local_transformer_forward(x, layers, *, window_size, heads, dim_head, tile_q=None):
    B, N, D = x.shape
    # TODO(synk): autopad path (seq_len % window_size != 0) not implemented.
    assert N % window_size == 0, "this kernel assumes seq_len % window_size == 0"
    # TODO(synk): dynamic_pos_bias=True (DynamicPositionBias attn_bias) branch not implemented.

    # generation-aware tile choice: 256 fills the v6e/v7x 2x256^2 MXU M dim, 128 suits v5e
    # (pass tile_q=128 explicitly on v5e); small sequences fall back to a single tile.
    if tile_q is None:
        if N % 256 == 0 and N // 256 >= 3:
            tile_q = 256
        elif N % 128 == 0 and N // 128 >= 3:
            tile_q = 128
        else:
            tile_q = N
    assert N % tile_q == 0, "seq_len must be divisible by the query tile"
    n_tiles = N // tile_q
    banded = (n_tiles >= 3) and (tile_q >= window_size) and (tile_q % 8 == 0)
    if not banded:
        tile_q, n_tiles = N, 1
    n_chunks = 3 if banded else 1           # band = 3*tile_q (lane-dense when tile_q % 128 == 0)

    rot = build_rotary_tables(N, dim_head, window_size, tile_q, n_chunks)
    vmem_limit = _default_vmem_limit()
    common = dict(heads=heads, dim_head=dim_head, window_size=window_size,
                  tile_q=tile_q, n_chunks=n_chunks, vmem_limit=vmem_limit)

    for prm in layers:
        if _SINGLE_BUFFER_OK[0] is None:
            # try single-buffered constant weights once; fall back if the runtime rejects it.
            try:
                y = fused_layer(x, prm, rot, single_buffer_consts=True, **common)
                jax.block_until_ready(y)
                _SINGLE_BUFFER_OK[0] = True
            except Exception:
                _SINGLE_BUFFER_OK[0] = False
                y = fused_layer(x, prm, rot, single_buffer_consts=False, **common)
        else:
            y = fused_layer(x, prm, rot, single_buffer_consts=_SINGLE_BUFFER_OK[0], **common)
        x = y
    return x


# ----------------------------------- main -------------------------------------

if __name__ == "__main__":
    # Small, deterministic test config (production: tile_q=256 on v6e/v7x, 128 on v5e,
    # and optionally a bf16 residual stream by passing bf16 x).
    B, N, D = 2, 48, 64
    heads, dim_head, window_size, depth = 2, 64, 8, 2

    key = jax.random.PRNGKey(0)
    kx, kp = jax.random.split(key)
    x = jax.random.normal(kx, (B, N, D), dtype=jnp.float32)
    layers = init_params(kp, dim=D, depth=depth, heads=heads, dim_head=dim_head)

    # tile_q=16 exercises the banded path: 3 query tiles, 3-chunk (48-wide) key/value band.
    y = local_transformer_forward(x, layers, window_size=window_size, heads=heads,
                                  dim_head=dim_head, tile_q=16)
    jax.block_until_ready(y)
    assert y.shape == (B, N, D) and y.dtype == jnp.float32
    assert bool(jnp.all(jnp.isfinite(y)))
    print("KERNEL_OK")
</pallas_src>

<mosaic_0001>
module attributes {stable_mosaic.version = 11 : i64} {
  func.func @layer_kernel(%arg0: i32, %arg1: i32, %arg2: memref<1x16x64xf32, #tpu.memory_space<vmem>>, %arg3: memref<1x16x64xf32, #tpu.memory_space<vmem>>, %arg4: memref<1x16x64xf32, #tpu.memory_space<vmem>>, %arg5: memref<16x64xf32, #tpu.memory_space<vmem>>, %arg6: memref<16x64xf32, #tpu.memory_space<vmem>>, %arg7: memref<1x48x64xf32, #tpu.memory_space<vmem>>, %arg8: memref<1x48x64xf32, #tpu.memory_space<vmem>>, %arg9: memref<64x128xbf16, #tpu.memory_space<vmem>>, %arg10: memref<64x256xbf16, #tpu.memory_space<vmem>>, %arg11: memref<1x1x64xf32, #tpu.memory_space<vmem>>, %arg12: memref<1x1x64xf32, #tpu.memory_space<vmem>>, %arg13: memref<128x64xbf16, #tpu.memory_space<vmem>>, %arg14: memref<1x64xf32, #tpu.memory_space<vmem>>, %arg15: memref<1x64xf32, #tpu.memory_space<vmem>>, %arg16: memref<64x256xbf16, #tpu.memory_space<vmem>>, %arg17: memref<64x256xbf16, #tpu.memory_space<vmem>>, %arg18: memref<256x64xbf16, #tpu.memory_space<vmem>>, %arg19: memref<1x16x64xf32, #tpu.memory_space<vmem>>) attributes {dimension_semantics = [#tpu.dimension_semantics<parallel>, #tpu.dimension_semantics<parallel>], iteration_bounds = array<i64: 2, 3>, scalar_prefetch = 0 : i64, scratch_operands = 0 : i64, tpu.core_type = #tpu.core_type<tc>, window_params = [{transform_indices = @transform_0, window_bounds = array<i64: 1, 16, 64>}, {transform_indices = @transform_1, window_bounds = array<i64: 1, 16, 64>}, {transform_indices = @transform_2, window_bounds = array<i64: 1, 16, 64>}, {transform_indices = @transform_3, window_bounds = array<i64: 16, 64>}, {transform_indices = @transform_4, window_bounds = array<i64: 16, 64>}, {transform_indices = @transform_5, window_bounds = array<i64: 1, 48, 64>}, {transform_indices = @transform_6, window_bounds = array<i64: 1, 48, 64>}, {pipeline_mode = #tpu.pipeline_mode<synchronous>, transform_indices = @transform_7, window_bounds = array<i64: 64, 128>}, {pipeline_mode = #tpu.pipeline_mode<synchronous>, transform_indices = @transform_8, window_bounds = array<i64: 64, 256>}, {pipeline_mode = #tpu.pipeline_mode<synchronous>, transform_indices = @transform_9, window_bounds = array<i64: 1, 1, 64>}, {pipeline_mode = #tpu.pipeline_mode<synchronous>, transform_indices = @transform_10, window_bounds = array<i64: 1, 1, 64>}, {pipeline_mode = #tpu.pipeline_mode<synchronous>, transform_indices = @transform_11, window_bounds = array<i64: 128, 64>}, {pipeline_mode = #tpu.pipeline_mode<synchronous>, transform_indices = @transform_12, window_bounds = array<i64: 1, 64>}, {pipeline_mode = #tpu.pipeline_mode<synchronous>, transform_indices = @transform_13, window_bounds = array<i64: 1, 64>}, {pipeline_mode = #tpu.pipeline_mode<synchronous>, transform_indices = @transform_14, window_bounds = array<i64: 64, 256>}, {pipeline_mode = #tpu.pipeline_mode<synchronous>, transform_indices = @transform_15, window_bounds = array<i64: 64, 256>}, {pipeline_mode = #tpu.pipeline_mode<synchronous>, transform_indices = @transform_16, window_bounds = array<i64: 256, 64>}, {transform_indices = @transform_17, window_bounds = array<i64: 1, 16, 64>}]} {
    %c16_i32 = arith.constant 16 : i32
    %0 = arith.muli %arg1, %c16_i32 : i32
    %c1_i32 = arith.constant 1 : i32
    %1 = arith.subi %arg1, %c1_i32 : i32
    %c0_i32 = arith.constant 0 : i32
    %c0_i32_0 = arith.constant 0 : i32
    %2 = arith.maxsi %c0_i32, %1 : i32
    %3 = arith.minsi %c0_i32_0, %2 : i32
    %4 = arith.subi %arg1, %3 : i32
    %c0 = arith.constant 0 : index
    %c0_1 = arith.constant 0 : index
    %c0_2 = arith.constant 0 : index
    %5 = vector.load %arg2[%c0, %c0_1, %c0_2] : memref<1x16x64xf32, #tpu.memory_space<vmem>>, vector<1x16x64xf32>
    %6 = vector.shape_cast %5 : vector<1x16x64xf32> to vector<16x64xf32>
    %c0_3 = arith.constant 0 : index
    %c0_4 = arith.constant 0 : index
    %c0_5 = arith.constant 0 : index
    %7 = vector.load %arg3[%c0_3, %c0_4, %c0_5] : memref<1x16x64xf32, #tpu.memory_space<vmem>>, vector<1x16x64xf32>
    %8 = vector.shape_cast %7 : vector<1x16x64xf32> to vector<16x64xf32>
    %c0_6 = arith.constant 0 : index
    %c0_7 = arith.constant 0 : index
    %c0_8 = arith.constant 0 : index
    %9 = vector.load %arg4[%c0_6, %c0_7, %c0_8] : memref<1x16x64xf32, #tpu.memory_space<vmem>>, vector<1x16x64xf32>
    %10 = vector.shape_cast %9 : vector<1x16x64xf32> to vector<16x64xf32>
    %c0_i32_9 = arith.constant 0 : i32
    %11 = arith.cmpi eq, %4, %c0_i32_9 : i32
    %c1_i32_10 = arith.constant 1 : i32
    %12 = arith.cmpi eq, %4, %c1_i32_10 : i32
    %13 = arith.select %12, %8, %10 : vector<16x64xf32>
    %14 = arith.select %11, %6, %13 : vector<16x64xf32>
    %15 = arith.truncf %6 : vector<16x64xf32> to vector<16x64xbf16>
    %16 = arith.truncf %8 : vector<16x64xf32> to vector<16x64xbf16>
    %17 = arith.truncf %10 : vector<16x64xf32> to vector<16x64xbf16>
    %18 = tpu.concatenate %15, %16, %17 in 0 : vector<16x64xbf16>, vector<16x64xbf16>, vector<16x64xbf16> -> vector<48x64xbf16>
    %c16_i32_11 = arith.constant 16 : i32
    %19 = arith.muli %3, %c16_i32_11 : i32
    %20 = arith.truncf %14 : vector<16x64xf32> to vector<16x64xbf16>
    %c0_12 = arith.constant 0 : index
    %c0_13 = arith.constant 0 : index
    %21 = vector.load %arg9[%c0_12, %c0_13] : memref<64x128xbf16, #tpu.memory_space<vmem>>, vector<64x128xbf16>
    %cst = arith.constant dense<0.000000e+00> : vector<16x128xf32>
    %22 = tpu.matmul %20, %21, %cst {dimension_numbers = #tpu.dot_dimension_numbers<[1], [0], [0], [1], [0, 0, 1, 1], [], []>} : vector<16x64xbf16>, vector<64x128xbf16>, vector<16x128xf32> -> vector<16x128xf32>
    %c0_14 = arith.constant 0 : index
    %c0_15 = arith.constant 0 : index
    %23 = vector.load %arg10[%c0_14, %c0_15] : memref<64x256xbf16, #tpu.memory_space<vmem>>, vector<64x256xbf16>
    %cst_16 = arith.constant dense<0.000000e+00> : vector<48x256xf32>
    %24 = tpu.matmul %18, %23, %cst_16 {dimension_numbers = #tpu.dot_dimension_numbers<[1], [0], [0], [1], [0, 0, 1, 1], [], []>} : vector<48x64xbf16>, vector<64x256xbf16>, vector<48x256xf32> -> vector<48x256xf32>
    %25 = vector.extract_strided_slice %24 {offsets = [0, 0], sizes = [48, 128], strides = [1, 1]} : vector<48x256xf32> to vector<48x128xf32>
    %26 = vector.extract_strided_slice %24 {offsets = [0, 128], sizes = [48, 128], strides = [1, 1]} : vector<48x256xf32> to vector<48x128xf32>
    %27 = vector.shape_cast %22 : vector<16x128xf32> to vector<16x2x64xf32>
    %28 = tpu.transpose %27, [1, 0, 2] : vector<16x2x64xf32> -> vector<2x16x64xf32>
    %29 = vector.shape_cast %25 : vector<48x128xf32> to vector<48x2x64xf32>
    %30 = tpu.transpose %29, [1, 0, 2] : vector<48x2x64xf32> -> vector<2x48x64xf32>
    %31 = vector.shape_cast %26 : vector<48x128xf32> to vector<48x2x64xf32>
    %32 = tpu.transpose %31, [1, 0, 2] : vector<48x2x64xf32> -> vector<2x48x64xf32>
    %33 = arith.mulf %28, %28 : vector<2x16x64xf32>
    %cst_17 = arith.constant dense<0.000000e+00> : vector<2x16xf32>
    %34 = vector.multi_reduction <add>, %33, %cst_17 [2] : vector<2x16x64xf32> to vector<2x16xf32>
    %35 = vector.shape_cast %34 : vector<2x16xf32> to vector<2x16x1xf32>
    %cst_18 = arith.constant 1.000000e-24 : f32
    %36 = vector.broadcast %cst_18 : f32 to vector<2x16x1xf32>
    %37 = arith.maximumf %35, %36 : vector<2x16x1xf32>
    %38 = math.rsqrt %37 : vector<2x16x1xf32>
    %39 = vector.broadcast %38 : vector<2x16x1xf32> to vector<2x16x64xf32>
    %40 = arith.mulf %28, %39 : vector<2x16x64xf32>
    %41 = arith.mulf %30, %30 : vector<2x48x64xf32>
    %cst_19 = arith.constant dense<0.000000e+00> : vector<2x48xf32>
    %42 = vector.multi_reduction <add>, %41, %cst_19 [2] : vector<2x48x64xf32> to vector<2x48xf32>
    %43 = vector.shape_cast %42 : vector<2x48xf32> to vector<2x48x1xf32>
    %cst_20 = arith.constant 1.000000e-24 : f32
    %44 = vector.broadcast %cst_20 : f32 to vector<2x48x1xf32>
    %45 = arith.maximumf %43, %44 : vector<2x48x1xf32>
    %46 = math.rsqrt %45 : vector<2x48x1xf32>
    %47 = vector.broadcast %46 : vector<2x48x1xf32> to vector<2x48x64xf32>
    %48 = arith.mulf %30, %47 : vector<2x48x64xf32>
    %c0_21 = arith.constant 0 : index
    %c0_22 = arith.constant 0 : index
    %c0_23 = arith.constant 0 : index
    %49 = vector.load %arg11[%c0_21, %c0_22, %c0_23] : memref<1x1x64xf32, #tpu.memory_space<vmem>>, vector<1x1x64xf32>
    %50 = vector.broadcast %49 : vector<1x1x64xf32> to vector<2x16x64xf32>
    %51 = arith.mulf %40, %50 : vector<2x16x64xf32>
    %c0_24 = arith.constant 0 : index
    %c0_25 = arith.constant 0 : index
    %c0_26 = arith.constant 0 : index
    %52 = vector.load %arg12[%c0_24, %c0_25, %c0_26] : memref<1x1x64xf32, #tpu.memory_space<vmem>>, vector<1x1x64xf32>
    %53 = vector.broadcast %52 : vector<1x1x64xf32> to vector<2x48x64xf32>
    %54 = arith.mulf %48, %53 : vector<2x48x64xf32>
    %c0_27 = arith.constant 0 : index
    %c0_28 = arith.constant 0 : index
    %55 = vector.load %arg5[%c0_27, %c0_28] : memref<16x64xf32, #tpu.memory_space<vmem>>, vector<16x64xf32>
    %56 = vector.shape_cast %55 : vector<16x64xf32> to vector<1x16x64xf32>
    %c0_29 = arith.constant 0 : index
    %c0_30 = arith.constant 0 : index
    %57 = vector.load %arg6[%c0_29, %c0_30] : memref<16x64xf32, #tpu.memory_space<vmem>>, vector<16x64xf32>
    %58 = vector.shape_cast %57 : vector<16x64xf32> to vector<1x16x64xf32>
    %c0_31 = arith.constant 0 : index
    %c0_32 = arith.constant 0 : index
    %c0_33 = arith.constant 0 : index
    %59 = vector.load %arg7[%c0_31, %c0_32, %c0_33] : memref<1x48x64xf32, #tpu.memory_space<vmem>>, vector<1x48x64xf32>
    %60 = vector.shape_cast %59 : vector<1x48x64xf32> to vector<48x64xf32>
    %61 = vector.shape_cast %60 : vector<48x64xf32> to vector<1x48x64xf32>
    %c0_34 = arith.constant 0 : index
    %c0_35 = arith.constant 0 : index
    %c0_36 = arith.constant 0 : index
    %62 = vector.load %arg8[%c0_34, %c0_35, %c0_36] : memref<1x48x64xf32, #tpu.memory_space<vmem>>, vector<1x48x64xf32>
    %63 = vector.shape_cast %62 : vector<1x48x64xf32> to vector<48x64xf32>
    %64 = vector.shape_cast %63 : vector<48x64xf32> to vector<1x48x64xf32>
    %65 = vector.broadcast %56 : vector<1x16x64xf32> to vector<2x16x64xf32>
    %66 = arith.mulf %51, %65 : vector<2x16x64xf32>
    %67 = vector.extract_strided_slice %51 {offsets = [0, 0, 32], sizes = [2, 16, 32], strides = [1, 1, 1]} : vector<2x16x64xf32> to vector<2x16x32xf32>
    %68 = vector.extract_strided_slice %51 {offsets = [0, 0, 0], sizes = [2, 16, 32], strides = [1, 1, 1]} : vector<2x16x64xf32> to vector<2x16x32xf32>
    %69 = tpu.concatenate %67, %68 in 2 : vector<2x16x32xf32>, vector<2x16x32xf32> -> vector<2x16x64xf32>
    %70 = vector.broadcast %58 : vector<1x16x64xf32> to vector<2x16x64xf32>
    %71 = arith.mulf %69, %70 : vector<2x16x64xf32>
    %72 = arith.addf %66, %71 : vector<2x16x64xf32>
    %73 = vector.broadcast %61 : vector<1x48x64xf32> to vector<2x48x64xf32>
    %74 = arith.mulf %54, %73 : vector<2x48x64xf32>
    %75 = vector.extract_strided_slice %54 {offsets = [0, 0, 32], sizes = [2, 48, 32], strides = [1, 1, 1]} : vector<2x48x64xf32> to vector<2x48x32xf32>
    %76 = vector.extract_strided_slice %54 {offsets = [0, 0, 0], sizes = [2, 48, 32], strides = [1, 1, 1]} : vector<2x48x64xf32> to vector<2x48x32xf32>
    %77 = tpu.concatenate %75, %76 in 2 : vector<2x48x32xf32>, vector<2x48x32xf32> -> vector<2x48x64xf32>
    %78 = vector.broadcast %64 : vector<1x48x64xf32> to vector<2x48x64xf32>
    %79 = arith.mulf %77, %78 : vector<2x48x64xf32>
    %80 = arith.addf %74, %79 : vector<2x48x64xf32>
    %81 = arith.truncf %72 : vector<2x16x64xf32> to vector<2x16x64xbf16>
    %82 = arith.truncf %80 : vector<2x48x64xf32> to vector<2x48x64xbf16>
    "tpu.trace_start"() <{level = 10 : i32, message = "hqd,hkd->hqk"}> : () -> ()
    %cst_37 = arith.constant dense<0.000000e+00> : vector<2x16x48xf32>
    %83 = tpu.matmul %81, %82, %cst_37 {dimension_numbers = #tpu.dot_dimension_numbers<[2], [2], [1], [1], [0, 0, 0, 1, 1, 1], [0], [0]>} : vector<2x16x64xbf16>, vector<2x48x64xbf16>, vector<2x16x48xf32> -> vector<2x16x48xf32>
    "tpu.trace_stop"() : () -> ()
    %84 = tpu.iota {dimensions = array<i32: 0>} : vector<16x48xi32>
    %85 = vector.broadcast %0 : i32 to vector<16x48xi32>
    %86 = arith.addi %85, %84 : vector<16x48xi32>
    %87 = tpu.iota {dimensions = array<i32: 1>} : vector<16x48xi32>
    %88 = vector.broadcast %19 : i32 to vector<16x48xi32>
    %89 = arith.addi %88, %87 : vector<16x48xi32>
    %90 = arith.subi %86, %89 : vector<16x48xi32>
    %91 = math.absi %90 : vector<16x48xi32>
    %c8_i32 = arith.constant 8 : i32
    %92 = vector.broadcast %c8_i32 : i32 to vector<16x48xi32>
    %93 = arith.cmpi sle, %91, %92 : vector<16x48xi32>
    %94 = vector.shape_cast %93 : vector<16x48xi1> to vector<1x16x48xi1>
    %cst_38 = arith.constant -3.400000e+38 : f32
    %95 = vector.shape_cast %94 : vector<1x16x48xi1> to vector<1x16x48xi1>
    %96 = vector.broadcast %95 : vector<1x16x48xi1> to vector<2x16x48xi1>
    %97 = vector.broadcast %cst_38 : f32 to vector<2x16x48xf32>
    %98 = arith.select %96, %83, %97 : vector<2x16x48xi1>, vector<2x16x48xf32>
    %cst_39 = arith.constant dense<0xFF800000> : vector<2x16xf32>
    %99 = vector.multi_reduction <maximumf>, %98, %cst_39 [2] : vector<2x16x48xf32> to vector<2x16xf32>
    %100 = vector.shape_cast %99 : vector<2x16xf32> to vector<2x16x1xf32>
    %101 = vector.broadcast %100 : vector<2x16x1xf32> to vector<2x16x48xf32>
    %102 = arith.subf %98, %101 : vector<2x16x48xf32>
    %103 = math.exp %102 : vector<2x16x48xf32>
    %cst_40 = arith.constant dense<0.000000e+00> : vector<2x16xf32>
    %104 = vector.multi_reduction <add>, %103, %cst_40 [2] : vector<2x16x48xf32> to vector<2x16xf32>
    %105 = vector.shape_cast %104 : vector<2x16xf32> to vector<2x16x1xf32>
    %106 = tpu.reciprocal %105 {approx = true} : vector<2x16x1xf32> -> vector<2x16x1xf32>
    %107 = vector.broadcast %106 : vector<2x16x1xf32> to vector<2x16x48xf32>
    %108 = arith.mulf %103, %107 : vector<2x16x48xf32>
    %109 = arith.truncf %108 : vector<2x16x48xf32> to vector<2x16x48xbf16>
    %110 = arith.truncf %32 : vector<2x48x64xf32> to vector<2x48x64xbf16>
    "tpu.trace_start"() <{level = 10 : i32, message = "hqk,hkd->hqd"}> : () -> ()
    %cst_41 = arith.constant dense<0.000000e+00> : vector<2x16x64xf32>
    %111 = tpu.matmul %109, %110, %cst_41 {dimension_numbers = #tpu.dot_dimension_numbers<[2], [1], [1], [2], [0, 0, 0, 1, 1, 2], [0], [0]>} : vector<2x16x48xbf16>, vector<2x48x64xbf16>, vector<2x16x64xf32> -> vector<2x16x64xf32>
    "tpu.trace_stop"() : () -> ()
    %112 = tpu.transpose %111, [1, 0, 2] : vector<2x16x64xf32> -> vector<16x2x64xf32>
    %113 = vector.shape_cast %112 : vector<16x2x64xf32> to vector<16x128xf32>
    %114 = arith.truncf %113 : vector<16x128xf32> to vector<16x128xbf16>
    %c0_42 = arith.constant 0 : index
    %c0_43 = arith.constant 0 : index
    %115 = vector.load %arg13[%c0_42, %c0_43] : memref<128x64xbf16, #tpu.memory_space<vmem>>, vector<128x64xbf16>
    %cst_44 = arith.constant dense<0.000000e+00> : vector<16x64xf32>
    %116 = tpu.matmul %114, %115, %cst_44 {dimension_numbers = #tpu.dot_dimension_numbers<[1], [0], [0], [1], [0, 0, 1, 1], [], []>} : vector<16x128xbf16>, vector<128x64xbf16>, vector<16x64xf32> -> vector<16x64xf32>
    %117 = arith.addf %116, %14 : vector<16x64xf32>
    %cst_45 = arith.constant dense<0.000000e+00> : vector<16xf32>
    %118 = vector.multi_reduction <add>, %117, %cst_45 [1] : vector<16x64xf32> to vector<16xf32>
    %119 = vector.shape_cast %118 : vector<16xf32> to vector<16x1xf32>
    %cst_46 = arith.constant 6.400000e+01 : f32
    %120 = vector.broadcast %cst_46 : f32 to vector<16x1xf32>
    %121 = arith.divf %119, %120 : vector<16x1xf32>
    %122 = vector.broadcast %121 : vector<16x1xf32> to vector<16x64xf32>
    %123 = arith.subf %117, %122 : vector<16x64xf32>
    %124 = arith.mulf %123, %123 : vector<16x64xf32>
    %cst_47 = arith.constant dense<0.000000e+00> : vector<16xf32>
    %125 = vector.multi_reduction <add>, %124, %cst_47 [1] : vector<16x64xf32> to vector<16xf32>
    %126 = vector.shape_cast %125 : vector<16xf32> to vector<16x1xf32>
    %cst_48 = arith.constant 6.400000e+01 : f32
    %127 = vector.broadcast %cst_48 : f32 to vector<16x1xf32>
    %128 = arith.divf %126, %127 : vector<16x1xf32>
    %129 = vector.broadcast %121 : vector<16x1xf32> to vector<16x64xf32>
    %130 = arith.subf %117, %129 : vector<16x64xf32>
    %cst_49 = arith.constant 9.99999974E-6 : f32
    %131 = vector.broadcast %cst_49 : f32 to vector<16x1xf32>
    %132 = arith.addf %128, %131 : vector<16x1xf32>
    %133 = math.rsqrt %132 : vector<16x1xf32>
    %134 = vector.broadcast %133 : vector<16x1xf32> to vector<16x64xf32>
    %135 = arith.mulf %130, %134 : vector<16x64xf32>
    %c0_50 = arith.constant 0 : index
    %c0_51 = arith.constant 0 : index
    %136 = vector.load %arg14[%c0_50, %c0_51] : memref<1x64xf32, #tpu.memory_space<vmem>>, vector<1x64xf32>
    %137 = vector.broadcast %136 : vector<1x64xf32> to vector<16x64xf32>
    %138 = arith.mulf %135, %137 : vector<16x64xf32>
    %c0_52 = arith.constant 0 : index
    %c0_53 = arith.constant 0 : index
    %139 = vector.load %arg15[%c0_52, %c0_53] : memref<1x64xf32, #tpu.memory_space<vmem>>, vector<1x64xf32>
    %140 = vector.broadcast %139 : vector<1x64xf32> to vector<16x64xf32>
    %141 = arith.addf %138, %140 : vector<16x64xf32>
    %142 = arith.truncf %141 : vector<16x64xf32> to vector<16x64xbf16>
    %c0_54 = arith.constant 0 : index
    %c0_55 = arith.constant 0 : index
    %143 = vector.load %arg16[%c0_54, %c0_55] : memref<64x256xbf16, #tpu.memory_space<vmem>>, vector<64x256xbf16>
    %cst_56 = arith.constant dense<0.000000e+00> : vector<16x256xf32>
    %144 = tpu.matmul %142, %143, %cst_56 {dimension_numbers = #tpu.dot_dimension_numbers<[1], [0], [0], [1], [0, 0, 1, 1], [], []>} : vector<16x64xbf16>, vector<64x256xbf16>, vector<16x256xf32> -> vector<16x256xf32>
    %c0_57 = arith.constant 0 : index
    %c0_58 = arith.constant 0 : index
    %145 = vector.load %arg17[%c0_57, %c0_58] : memref<64x256xbf16, #tpu.memory_space<vmem>>, vector<64x256xbf16>
    %cst_59 = arith.constant dense<0.000000e+00> : vector<16x256xf32>
    %146 = tpu.matmul %142, %145, %cst_59 {dimension_numbers = #tpu.dot_dimension_numbers<[1], [0], [0], [1], [0, 0, 1, 1], [], []>} : vector<16x64xbf16>, vector<64x256xbf16>, vector<16x256xf32> -> vector<16x256xf32>
    %cst_60 = arith.constant 5.000000e-01 : f32
    %147 = vector.broadcast %cst_60 : f32 to vector<16x256xf32>
    %148 = arith.mulf %147, %146 : vector<16x256xf32>
    %cst_61 = arith.constant 0.707106769 : f32
    %149 = vector.broadcast %cst_61 : f32 to vector<16x256xf32>
    %150 = arith.mulf %146, %149 : vector<16x256xf32>
    %cst_62 = arith.constant 0.000000e+00 : f32
    %151 = vector.broadcast %cst_62 : f32 to vector<16x256xf32>
    %152 = arith.cmpf oge, %150, %151 : vector<16x256xf32>
    %cst_63 = arith.constant 1.000000e+00 : f32
    %cst_64 = arith.constant -1.000000e+00 : f32
    %153 = vector.broadcast %cst_63 : f32 to vector<16x256xf32>
    %154 = vector.broadcast %cst_64 : f32 to vector<16x256xf32>
    %155 = arith.select %152, %153, %154 : vector<16x256xi1>, vector<16x256xf32>
    %156 = math.absf %150 : vector<16x256xf32>
    %cst_65 = arith.constant 0.327591091 : f32
    %157 = vector.broadcast %cst_65 : f32 to vector<16x256xf32>
    %158 = arith.mulf %157, %156 : vector<16x256xf32>
    %cst_66 = arith.constant 1.000000e+00 : f32
    %159 = vector.broadcast %cst_66 : f32 to vector<16x256xf32>
    %160 = arith.addf %159, %158 : vector<16x256xf32>
    %cst_67 = arith.constant 1.000000e+00 : f32
    %161 = vector.broadcast %cst_67 : f32 to vector<16x256xf32>
    %162 = arith.divf %161, %160 : vector<16x256xf32>
    %cst_68 = arith.constant 1.06140542 : f32
    %163 = vector.broadcast %cst_68 : f32 to vector<16x256xf32>
    %164 = arith.mulf %163, %162 : vector<16x256xf32>
    %cst_69 = arith.constant -1.45315206 : f32
    %165 = vector.broadcast %cst_69 : f32 to vector<16x256xf32>
    %166 = arith.addf %164, %165 : vector<16x256xf32>
    %167 = arith.mulf %166, %162 : vector<16x256xf32>
    %cst_70 = arith.constant 1.42141378 : f32
    %168 = vector.broadcast %cst_70 : f32 to vector<16x256xf32>
    %169 = arith.addf %167, %168 : vector<16x256xf32>
    %170 = arith.mulf %169, %162 : vector<16x256xf32>
    %cst_71 = arith.constant -0.284496725 : f32
    %171 = vector.broadcast %cst_71 : f32 to vector<16x256xf32>
    %172 = arith.addf %170, %171 : vector<16x256xf32>
    %173 = arith.mulf %172, %162 : vector<16x256xf32>
    %cst_72 = arith.constant 0.254829586 : f32
    %174 = vector.broadcast %cst_72 : f32 to vector<16x256xf32>
    %175 = arith.addf %173, %174 : vector<16x256xf32>
    %176 = arith.mulf %175, %162 : vector<16x256xf32>
    %cst_73 = arith.constant 0.000000e+00 : f32
    %177 = vector.broadcast %cst_73 : f32 to vector<16x256xf32>
    %178 = arith.subf %177, %156 : vector<16x256xf32>
    %179 = arith.mulf %178, %156 : vector<16x256xf32>
    %180 = math.exp %179 : vector<16x256xf32>
    %181 = arith.mulf %176, %180 : vector<16x256xf32>
    %cst_74 = arith.constant 1.000000e+00 : f32
    %182 = vector.broadcast %cst_74 : f32 to vector<16x256xf32>
    %183 = arith.subf %182, %181 : vector<16x256xf32>
    %184 = arith.mulf %155, %183 : vector<16x256xf32>
    %cst_75 = arith.constant 1.000000e+00 : f32
    %185 = vector.broadcast %cst_75 : f32 to vector<16x256xf32>
    %186 = arith.addf %185, %184 : vector<16x256xf32>
    %187 = arith.mulf %148, %186 : vector<16x256xf32>
    %188 = arith.mulf %144, %187 : vector<16x256xf32>
    %189 = arith.truncf %188 : vector<16x256xf32> to vector<16x256xbf16>
    %c0_76 = arith.constant 0 : index
    %c0_77 = arith.constant 0 : index
    %190 = vector.load %arg18[%c0_76, %c0_77] : memref<256x64xbf16, #tpu.memory_space<vmem>>, vector<256x64xbf16>
    %cst_78 = arith.constant dense<0.000000e+00> : vector<16x64xf32>
    %191 = tpu.matmul %189, %190, %cst_78 {dimension_numbers = #tpu.dot_dimension_numbers<[1], [0], [0], [1], [0, 0, 1, 1], [], []>} : vector<16x256xbf16>, vector<256x64xbf16>, vector<16x64xf32> -> vector<16x64xf32>
    %192 = arith.addf %191, %117 : vector<16x64xf32>
    %c0_79 = arith.constant 0 : index
    %c0_80 = arith.constant 0 : index
    %c0_81 = arith.constant 0 : index
    %193 = vector.load %arg19[%c0_79, %c0_80, %c0_81] : memref<1x16x64xf32, #tpu.memory_space<vmem>>, vector<1x16x64xf32>
    %194 = vector.shape_cast %193 : vector<1x16x64xf32> to vector<16x64xf32>
    %195 = vector.shape_cast %192 : vector<16x64xf32> to vector<1x16x64xf32>
    tpu.vector_store %arg19[%c0_79, %c0_80, %c0_81], %195 {strides = array<i32>} : memref<1x16x64xf32, #tpu.memory_space<vmem>>, vector<1x16x64xf32>,
    return
  }
  func.func @transform_0(%arg0: i32, %arg1: i32) -> (i32, i32, i32) {
    %c1_i32 = arith.constant 1 : i32
    %0 = arith.subi %arg1, %c1_i32 : i32
    %c0_i32 = arith.constant 0 : i32
    %c0_i32_0 = arith.constant 0 : i32
    %1 = arith.maxsi %c0_i32, %0 : i32
    %2 = arith.minsi %c0_i32_0, %1 : i32
    %c0_i32_1 = arith.constant 0 : i32
    %3 = arith.addi %2, %c0_i32_1 : i32
    %c0_i32_2 = arith.constant 0 : i32
    %c0_i32_3 = arith.constant 0 : i32
    return %arg0, %3, %c0_i32_2 : i32, i32, i32
  }
  func.func @transform_1(%arg0: i32, %arg1: i32) -> (i32, i32, i32) {
    %c1_i32 = arith.constant 1 : i32
    %0 = arith.subi %arg1, %c1_i32 : i32
    %c0_i32 = arith.constant 0 : i32
    %c0_i32_0 = arith.constant 0 : i32
    %1 = arith.maxsi %c0_i32, %0 : i32
    %2 = arith.minsi %c0_i32_0, %1 : i32
    %c1_i32_1 = arith.constant 1 : i32
    %3 = arith.addi %2, %c1_i32_1 : i32
    %c0_i32_2 = arith.constant 0 : i32
    %c0_i32_3 = arith.constant 0 : i32
    return %arg0, %3, %c0_i32_2 : i32, i32, i32
  }
  func.func @transform_2(%arg0: i32, %arg1: i32) -> (i32, i32, i32) {
    %c1_i32 = arith.constant 1 : i32
    %0 = arith.subi %arg1, %c1_i32 : i32
    %c0_i32 = arith.constant 0 : i32
    %c0_i32_0 = arith.constant 0 : i32
    %1 = arith.maxsi %c0_i32, %0 : i32
    %2 = arith.minsi %c0_i32_0, %1 : i32
    %c2_i32 = arith.constant 2 : i32
    %3 = arith.addi %2, %c2_i32 : i32
    %c0_i32_1 = arith.constant 0 : i32
    %c0_i32_2 = arith.constant 0 : i32
    return %arg0, %3, %c0_i32_1 : i32, i32, i32
  }
  func.func @transform_3(%arg0: i32, %arg1: i32) -> (i32, i32) {
    %c0_i32 = arith.constant 0 : i32
    %c0_i32_0 = arith.constant 0 : i32
    return %arg1, %c0_i32 : i32, i32
  }
  func.func @transform_4(%arg0: i32, %arg1: i32) -> (i32, i32) {
    %c0_i32 = arith.constant 0 : i32
    %c0_i32_0 = arith.constant 0 : i32
    return %arg1, %c0_i32 : i32, i32
  }
  func.func @transform_5(%arg0: i32, %arg1: i32) -> (i32, i32, i32) {
    %c0_i32 = arith.constant 0 : i32
    %c0_i32_0 = arith.constant 0 : i32
    %c0_i32_1 = arith.constant 0 : i32
    return %arg1, %c0_i32, %c0_i32_0 : i32, i32, i32
  }
  func.func @transform_6(%arg0: i32, %arg1: i32) -> (i32, i32, i32) {
    %c0_i32 = arith.constant 0 : i32
    %c0_i32_0 = arith.constant 0 : i32
    %c0_i32_1 = arith.constant 0 : i32
    return %arg1, %c0_i32, %c0_i32_0 : i32, i32, i32
  }
  func.func @transform_7(%arg0: i32, %arg1: i32) -> (i32, i32) {
    %c0_i32 = arith.constant 0 : i32
    %c0_i32_0 = arith.constant 0 : i32
    %c0_i32_1 = arith.constant 0 : i32
    return %c0_i32, %c0_i32_0 : i32, i32
  }
  func.func @transform_8(%arg0: i32, %arg1: i32) -> (i32, i32) {
    %c0_i32 = arith.constant 0 : i32
    %c0_i32_0 = arith.constant 0 : i32
    %c0_i32_1 = arith.constant 0 : i32
    return %c0_i32, %c0_i32_0 : i32, i32
  }
  func.func @transform_9(%arg0: i32, %arg1: i32) -> (i32, i32, i32) {
    %c0_i32 = arith.constant 0 : i32
    %c0_i32_0 = arith.constant 0 : i32
    %c0_i32_1 = arith.constant 0 : i32
    %c0_i32_2 = arith.constant 0 : i32
    return %c0_i32, %c0_i32_0, %c0_i32_1 : i32, i32, i32
  }
  func.func @transform_10(%arg0: i32, %arg1: i32) -> (i32, i32, i32) {
    %c0_i32 = arith.constant 0 : i32
    %c0_i32_0 = arith.constant 0 : i32
    %c0_i32_1 = arith.constant 0 : i32
    %c0_i32_2 = arith.constant 0 : i32
    return %c0_i32, %c0_i32_0, %c0_i32_1 : i32, i32, i32
  }
  func.func @transform_11(%arg0: i32, %arg1: i32) -> (i32, i32) {
    %c0_i32 = arith.constant 0 : i32
    %c0_i32_0 = arith.constant 0 : i32
    %c0_i32_1 = arith.constant 0 : i32
    return %c0_i32, %c0_i32_0 : i32, i32
  }
  func.func @transform_12(%arg0: i32, %arg1: i32) -> (i32, i32) {
    %c0_i32 = arith.constant 0 : i32
    %c0_i32_0 = arith.constant 0 : i32
    %c0_i32_1 = arith.constant 0 : i32
    return %c0_i32, %c0_i32_0 : i32, i32
  }
  func.func @transform_13(%arg0: i32, %arg1: i32) -> (i32, i32) {
    %c0_i32 = arith.constant 0 : i32
    %c0_i32_0 = arith.constant 0 : i32
    %c0_i32_1 = arith.constant 0 : i32
    return %c0_i32, %c0_i32_0 : i32, i32
  }
  func.func @transform_14(%arg0: i32, %arg1: i32) -> (i32, i32) {
    %c0_i32 = arith.constant 0 : i32
    %c0_i32_0 = arith.constant 0 : i32
    %c0_i32_1 = arith.constant 0 : i32
    return %c0_i32, %c0_i32_0 : i32, i32
  }
  func.func @transform_15(%arg0: i32, %arg1: i32) -> (i32, i32) {
    %c0_i32 = arith.constant 0 : i32
    %c0_i32_0 = arith.constant 0 : i32
    %c0_i32_1 = arith.constant 0 : i32
    return %c0_i32, %c0_i32_0 : i32, i32
  }
  func.func @transform_16(%arg0: i32, %arg1: i32) -> (i32, i32) {
    %c0_i32 = arith.constant 0 : i32
    %c0_i32_0 = arith.constant 0 : i32
    %c0_i32_1 = arith.constant 0 : i32
    return %c0_i32, %c0_i32_0 : i32, i32
  }
  func.func @transform_17(%arg0: i32, %arg1: i32) -> (i32, i32, i32) {
    %c0_i32 = arith.constant 0 : i32
    %c0_i32_0 = arith.constant 0 : i32
    return %arg0, %arg1, %c0_i32 : i32, i32, i32
  }
}

module attributes {stable_mosaic.version = 11 : i64} {
  func.func @layer_kernel(%arg0: i32, %arg1: i32, %arg2: memref<1x16x64xf32, #tpu.memory_space<vmem>>, %arg3: memref<1x16x64xf32, #tpu.memory_space<vmem>>, %arg4: memref<1x16x64xf32, #tpu.memory_space<vmem>>, %arg5: memref<16x64xf32, #tpu.memory_space<vmem>>, %arg6: memref<16x64xf32, #tpu.memory_space<vmem>>, %arg7: memref<1x48x64xf32, #tpu.memory_space<vmem>>, %arg8: memref<1x48x64xf32, #tpu.memory_space<vmem>>, %arg9: memref<64x128xbf16, #tpu.memory_space<vmem>>, %arg10: memref<64x256xbf16, #tpu.memory_space<vmem>>, %arg11: memref<1x1x64xf32, #tpu.memory_space<vmem>>, %arg12: memref<1x1x64xf32, #tpu.memory_space<vmem>>, %arg13: memref<128x64xbf16, #tpu.memory_space<vmem>>, %arg14: memref<1x64xf32, #tpu.memory_space<vmem>>, %arg15: memref<1x64xf32, #tpu.memory_space<vmem>>, %arg16: memref<64x256xbf16, #tpu.memory_space<vmem>>, %arg17: memref<64x256xbf16, #tpu.memory_space<vmem>>, %arg18: memref<256x64xbf16, #tpu.memory_space<vmem>>, %arg19: memref<1x16x64xf32, #tpu.memory_space<vmem>>) attributes {dimension_semantics = [#tpu.dimension_semantics<parallel>, #tpu.dimension_semantics<parallel>], iteration_bounds = array<i64: 2, 3>, scalar_prefetch = 0 : i64, scratch_operands = 0 : i64, tpu.core_type = #tpu.core_type<tc>, window_params = [{transform_indices = @transform_0, window_bounds = array<i64: 1, 16, 64>}, {transform_indices = @transform_1, window_bounds = array<i64: 1, 16, 64>}, {transform_indices = @transform_2, window_bounds = array<i64: 1, 16, 64>}, {transform_indices = @transform_3, window_bounds = array<i64: 16, 64>}, {transform_indices = @transform_4, window_bounds = array<i64: 16, 64>}, {transform_indices = @transform_5, window_bounds = array<i64: 1, 48, 64>}, {transform_indices = @transform_6, window_bounds = array<i64: 1, 48, 64>}, {pipeline_mode = #tpu.pipeline_mode<synchronous>, transform_indices = @transform_7, window_bounds = array<i64: 64, 128>}, {pipeline_mode = #tpu.pipeline_mode<synchronous>, transform_indices = @transform_8, window_bounds = array<i64: 64, 256>}, {pipeline_mode = #tpu.pipeline_mode<synchronous>, transform_indices = @transform_9, window_bounds = array<i64: 1, 1, 64>}, {pipeline_mode = #tpu.pipeline_mode<synchronous>, transform_indices = @transform_10, window_bounds = array<i64: 1, 1, 64>}, {pipeline_mode = #tpu.pipeline_mode<synchronous>, transform_indices = @transform_11, window_bounds = array<i64: 128, 64>}, {pipeline_mode = #tpu.pipeline_mode<synchronous>, transform_indices = @transform_12, window_bounds = array<i64: 1, 64>}, {pipeline_mode = #tpu.pipeline_mode<synchronous>, transform_indices = @transform_13, window_bounds = array<i64: 1, 64>}, {pipeline_mode = #tpu.pipeline_mode<synchronous>, transform_indices = @transform_14, window_bounds = array<i64: 64, 256>}, {pipeline_mode = #tpu.pipeline_mode<synchronous>, transform_indices = @transform_15, window_bounds = array<i64: 64, 256>}, {pipeline_mode = #tpu.pipeline_mode<synchronous>, transform_indices = @transform_16, window_bounds = array<i64: 256, 64>}, {transform_indices = @transform_17, window_bounds = array<i64: 1, 16, 64>}]} {
    %c16_i32 = arith.constant 16 : i32
    %0 = arith.muli %arg1, %c16_i32 : i32
    %c1_i32 = arith.constant 1 : i32
    %1 = arith.subi %arg1, %c1_i32 : i32
    %c0_i32 = arith.constant 0 : i32
    %c0_i32_0 = arith.constant 0 : i32
    %2 = arith.maxsi %c0_i32, %1 : i32
    %3 = arith.minsi %c0_i32_0, %2 : i32
    %4 = arith.subi %arg1, %3 : i32
    %c0 = arith.constant 0 : index
    %c0_1 = arith.constant 0 : index
    %c0_2 = arith.constant 0 : index
    %5 = vector.load %arg2[%c0, %c0_1, %c0_2] : memref<1x16x64xf32, #tpu.memory_space<vmem>>, vector<1x16x64xf32>
    %6 = vector.shape_cast %5 : vector<1x16x64xf32> to vector<16x64xf32>
    %c0_3 = arith.constant 0 : index
    %c0_4 = arith.constant 0 : index
    %c0_5 = arith.constant 0 : index
    %7 = vector.load %arg3[%c0_3, %c0_4, %c0_5] : memref<1x16x64xf32, #tpu.memory_space<vmem>>, vector<1x16x64xf32>
    %8 = vector.shape_cast %7 : vector<1x16x64xf32> to vector<16x64xf32>
    %c0_6 = arith.constant 0 : index
    %c0_7 = arith.constant 0 : index
    %c0_8 = arith.constant 0 : index
    %9 = vector.load %arg4[%c0_6, %c0_7, %c0_8] : memref<1x16x64xf32, #tpu.memory_space<vmem>>, vector<1x16x64xf32>
    %10 = vector.shape_cast %9 : vector<1x16x64xf32> to vector<16x64xf32>
    %c0_i32_9 = arith.constant 0 : i32
    %11 = arith.cmpi eq, %4, %c0_i32_9 : i32
    %c1_i32_10 = arith.constant 1 : i32
    %12 = arith.cmpi eq, %4, %c1_i32_10 : i32
    %13 = arith.select %12, %8, %10 : vector<16x64xf32>
    %14 = arith.select %11, %6, %13 : vector<16x64xf32>
    %15 = arith.truncf %6 : vector<16x64xf32> to vector<16x64xbf16>
    %16 = arith.truncf %8 : vector<16x64xf32> to vector<16x64xbf16>
    %17 = arith.truncf %10 : vector<16x64xf32> to vector<16x64xbf16>
    %18 = tpu.concatenate %15, %16, %17 in 0 : vector<16x64xbf16>, vector<16x64xbf16>, vector<16x64xbf16> -> vector<48x64xbf16>
    %c16_i32_11 = arith.constant 16 : i32
    %19 = arith.muli %3, %c16_i32_11 : i32
    %20 = arith.truncf %14 : vector<16x64xf32> to vector<16x64xbf16>
    %c0_12 = arith.constant 0 : index
    %c0_13 = arith.constant 0 : index
    %21 = vector.load %arg9[%c0_12, %c0_13] : memref<64x128xbf16, #tpu.memory_space<vmem>>, vector<64x128xbf16>
    %cst = arith.constant dense<0.000000e+00> : vector<16x128xf32>
    %22 = tpu.matmul %20, %21, %cst {dimension_numbers = #tpu.dot_dimension_numbers<[1], [0], [0], [1], [0, 0, 1, 1], [], []>} : vector<16x64xbf16>, vector<64x128xbf16>, vector<16x128xf32> -> vector<16x128xf32>
    %c0_14 = arith.constant 0 : index
    %c0_15 = arith.constant 0 : index
    %23 = vector.load %arg10[%c0_14, %c0_15] : memref<64x256xbf16, #tpu.memory_space<vmem>>, vector<64x256xbf16>
    %cst_16 = arith.constant dense<0.000000e+00> : vector<48x256xf32>
    %24 = tpu.matmul %18, %23, %cst_16 {dimension_numbers = #tpu.dot_dimension_numbers<[1], [0], [0], [1], [0, 0, 1, 1], [], []>} : vector<48x64xbf16>, vector<64x256xbf16>, vector<48x256xf32> -> vector<48x256xf32>
    %25 = vector.extract_strided_slice %24 {offsets = [0, 0], sizes = [48, 128], strides = [1, 1]} : vector<48x256xf32> to vector<48x128xf32>
    %26 = vector.extract_strided_slice %24 {offsets = [0, 128], sizes = [48, 128], strides = [1, 1]} : vector<48x256xf32> to vector<48x128xf32>
    %27 = vector.shape_cast %22 : vector<16x128xf32> to vector<16x2x64xf32>
    %28 = tpu.transpose %27, [1, 0, 2] : vector<16x2x64xf32> -> vector<2x16x64xf32>
    %29 = vector.shape_cast %25 : vector<48x128xf32> to vector<48x2x64xf32>
    %30 = tpu.transpose %29, [1, 0, 2] : vector<48x2x64xf32> -> vector<2x48x64xf32>
    %31 = vector.shape_cast %26 : vector<48x128xf32> to vector<48x2x64xf32>
    %32 = tpu.transpose %31, [1, 0, 2] : vector<48x2x64xf32> -> vector<2x48x64xf32>
    %33 = arith.mulf %28, %28 : vector<2x16x64xf32>
    %cst_17 = arith.constant dense<0.000000e+00> : vector<2x16xf32>
    %34 = vector.multi_reduction <add>, %33, %cst_17 [2] : vector<2x16x64xf32> to vector<2x16xf32>
    %35 = vector.shape_cast %34 : vector<2x16xf32> to vector<2x16x1xf32>
    %cst_18 = arith.constant 1.000000e-24 : f32
    %36 = vector.broadcast %cst_18 : f32 to vector<2x16x1xf32>
    %37 = arith.maximumf %35, %36 : vector<2x16x1xf32>
    %38 = math.rsqrt %37 : vector<2x16x1xf32>
    %39 = vector.broadcast %38 : vector<2x16x1xf32> to vector<2x16x64xf32>
    %40 = arith.mulf %28, %39 : vector<2x16x64xf32>
    %41 = arith.mulf %30, %30 : vector<2x48x64xf32>
    %cst_19 = arith.constant dense<0.000000e+00> : vector<2x48xf32>
    %42 = vector.multi_reduction <add>, %41, %cst_19 [2] : vector<2x48x64xf32> to vector<2x48xf32>
    %43 = vector.shape_cast %42 : vector<2x48xf32> to vector<2x48x1xf32>
    %cst_20 = arith.constant 1.000000e-24 : f32
    %44 = vector.broadcast %cst_20 : f32 to vector<2x48x1xf32>
    %45 = arith.maximumf %43, %44 : vector<2x48x1xf32>
    %46 = math.rsqrt %45 : vector<2x48x1xf32>
    %47 = vector.broadcast %46 : vector<2x48x1xf32> to vector<2x48x64xf32>
    %48 = arith.mulf %30, %47 : vector<2x48x64xf32>
    %c0_21 = arith.constant 0 : index
    %c0_22 = arith.constant 0 : index
    %c0_23 = arith.constant 0 : index
    %49 = vector.load %arg11[%c0_21, %c0_22, %c0_23] : memref<1x1x64xf32, #tpu.memory_space<vmem>>, vector<1x1x64xf32>
    %50 = vector.broadcast %49 : vector<1x1x64xf32> to vector<2x16x64xf32>
    %51 = arith.mulf %40, %50 : vector<2x16x64xf32>
    %c0_24 = arith.constant 0 : index
    %c0_25 = arith.constant 0 : index
    %c0_26 = arith.constant 0 : index
    %52 = vector.load %arg12[%c0_24, %c0_25, %c0_26] : memref<1x1x64xf32, #tpu.memory_space<vmem>>, vector<1x1x64xf32>
    %53 = vector.broadcast %52 : vector<1x1x64xf32> to vector<2x48x64xf32>
    %54 = arith.mulf %48, %53 : vector<2x48x64xf32>
    %c0_27 = arith.constant 0 : index
    %c0_28 = arith.constant 0 : index
    %55 = vector.load %arg5[%c0_27, %c0_28] : memref<16x64xf32, #tpu.memory_space<vmem>>, vector<16x64xf32>
    %56 = vector.shape_cast %55 : vector<16x64xf32> to vector<1x16x64xf32>
    %c0_29 = arith.constant 0 : index
    %c0_30 = arith.constant 0 : index
    %57 = vector.load %arg6[%c0_29, %c0_30] : memref<16x64xf32, #tpu.memory_space<vmem>>, vector<16x64xf32>
    %58 = vector.shape_cast %57 : vector<16x64xf32> to vector<1x16x64xf32>
    %c0_31 = arith.constant 0 : index
    %c0_32 = arith.constant 0 : index
    %c0_33 = arith.constant 0 : index
    %59 = vector.load %arg7[%c0_31, %c0_32, %c0_33] : memref<1x48x64xf32, #tpu.memory_space<vmem>>, vector<1x48x64xf32>
    %60 = vector.shape_cast %59 : vector<1x48x64xf32> to vector<48x64xf32>
    %61 = vector.shape_cast %60 : vector<48x64xf32> to vector<1x48x64xf32>
    %c0_34 = arith.constant 0 : index
    %c0_35 = arith.constant 0 : index
    %c0_36 = arith.constant 0 : index
    %62 = vector.load %arg8[%c0_34, %c0_35, %c0_36] : memref<1x48x64xf32, #tpu.memory_space<vmem>>, vector<1x48x64xf32>
    %63 = vector.shape_cast %62 : vector<1x48x64xf32> to vector<48x64xf32>
    %64 = vector.shape_cast %63 : vector<48x64xf32> to vector<1x48x64xf32>
    %65 = vector.broadcast %56 : vector<1x16x64xf32> to vector<2x16x64xf32>
    %66 = arith.mulf %51, %65 : vector<2x16x64xf32>
    %67 = vector.extract_strided_slice %51 {offsets = [0, 0, 32], sizes = [2, 16, 32], strides = [1, 1, 1]} : vector<2x16x64xf32> to vector<2x16x32xf32>
    %68 = vector.extract_strided_slice %51 {offsets = [0, 0, 0], sizes = [2, 16, 32], strides = [1, 1, 1]} : vector<2x16x64xf32> to vector<2x16x32xf32>
    %69 = tpu.concatenate %67, %68 in 2 : vector<2x16x32xf32>, vector<2x16x32xf32> -> vector<2x16x64xf32>
    %70 = vector.broadcast %58 : vector<1x16x64xf32> to vector<2x16x64xf32>
    %71 = arith.mulf %69, %70 : vector<2x16x64xf32>
    %72 = arith.addf %66, %71 : vector<2x16x64xf32>
    %73 = vector.broadcast %61 : vector<1x48x64xf32> to vector<2x48x64xf32>
    %74 = arith.mulf %54, %73 : vector<2x48x64xf32>
    %75 = vector.extract_strided_slice %54 {offsets = [0, 0, 32], sizes = [2, 48, 32], strides = [1, 1, 1]} : vector<2x48x64xf32> to vector<2x48x32xf32>
    %76 = vector.extract_strided_slice %54 {offsets = [0, 0, 0], sizes = [2, 48, 32], strides = [1, 1, 1]} : vector<2x48x64xf32> to vector<2x48x32xf32>
    %77 = tpu.concatenate %75, %76 in 2 : vector<2x48x32xf32>, vector<2x48x32xf32> -> vector<2x48x64xf32>
    %78 = vector.broadcast %64 : vector<1x48x64xf32> to vector<2x48x64xf32>
    %79 = arith.mulf %77, %78 : vector<2x48x64xf32>
    %80 = arith.addf %74, %79 : vector<2x48x64xf32>
    %81 = arith.truncf %72 : vector<2x16x64xf32> to vector<2x16x64xbf16>
    %82 = arith.truncf %80 : vector<2x48x64xf32> to vector<2x48x64xbf16>
    "tpu.trace_start"() <{level = 10 : i32, message = "hqd,hkd->hqk"}> : () -> ()
    %cst_37 = arith.constant dense<0.000000e+00> : vector<2x16x48xf32>
    %83 = tpu.matmul %81, %82, %cst_37 {dimension_numbers = #tpu.dot_dimension_numbers<[2], [2], [1], [1], [0, 0, 0, 1, 1, 1], [0], [0]>} : vector<2x16x64xbf16>, vector<2x48x64xbf16>, vector<2x16x48xf32> -> vector<2x16x48xf32>
    "tpu.trace_stop"() : () -> ()
    %84 = tpu.iota {dimensions = array<i32: 0>} : vector<16x48xi32>
    %85 = vector.broadcast %0 : i32 to vector<16x48xi32>
    %86 = arith.addi %85, %84 : vector<16x48xi32>
    %87 = tpu.iota {dimensions = array<i32: 1>} : vector<16x48xi32>
    %88 = vector.broadcast %19 : i32 to vector<16x48xi32>
    %89 = arith.addi %88, %87 : vector<16x48xi32>
    %90 = arith.subi %86, %89 : vector<16x48xi32>
    %91 = math.absi %90 : vector<16x48xi32>
    %c8_i32 = arith.constant 8 : i32
    %92 = vector.broadcast %c8_i32 : i32 to vector<16x48xi32>
    %93 = arith.cmpi sle, %91, %92 : vector<16x48xi32>
    %94 = vector.shape_cast %93 : vector<16x48xi1> to vector<1x16x48xi1>
    %cst_38 = arith.constant -3.400000e+38 : f32
    %95 = vector.shape_cast %94 : vector<1x16x48xi1> to vector<1x16x48xi1>
    %96 = vector.broadcast %95 : vector<1x16x48xi1> to vector<2x16x48xi1>
    %97 = vector.broadcast %cst_38 : f32 to vector<2x16x48xf32>
    %98 = arith.select %96, %83, %97 : vector<2x16x48xi1>, vector<2x16x48xf32>
    %cst_39 = arith.constant dense<0xFF800000> : vector<2x16xf32>
    %99 = vector.multi_reduction <maximumf>, %98, %cst_39 [2] : vector<2x16x48xf32> to vector<2x16xf32>
    %100 = vector.shape_cast %99 : vector<2x16xf32> to vector<2x16x1xf32>
    %101 = vector.broadcast %100 : vector<2x16x1xf32> to vector<2x16x48xf32>
    %102 = arith.subf %98, %101 : vector<2x16x48xf32>
    %103 = math.exp %102 : vector<2x16x48xf32>
    %cst_40 = arith.constant dense<0.000000e+00> : vector<2x16xf32>
    %104 = vector.multi_reduction <add>, %103, %cst_40 [2] : vector<2x16x48xf32> to vector<2x16xf32>
    %105 = vector.shape_cast %104 : vector<2x16xf32> to vector<2x16x1xf32>
    %106 = tpu.reciprocal %105 {approx = true} : vector<2x16x1xf32> -> vector<2x16x1xf32>
    %107 = vector.broadcast %106 : vector<2x16x1xf32> to vector<2x16x48xf32>
    %108 = arith.mulf %103, %107 : vector<2x16x48xf32>
    %109 = arith.truncf %108 : vector<2x16x48xf32> to vector<2x16x48xbf16>
    %110 = arith.truncf %32 : vector<2x48x64xf32> to vector<2x48x64xbf16>
    "tpu.trace_start"() <{level = 10 : i32, message = "hqk,hkd->hqd"}> : () -> ()
    %cst_41 = arith.constant dense<0.000000e+00> : vector<2x16x64xf32>
    %111 = tpu.matmul %109, %110, %cst_41 {dimension_numbers = #tpu.dot_dimension_numbers<[2], [1], [1], [2], [0, 0, 0, 1, 1, 2], [0], [0]>} : vector<2x16x48xbf16>, vector<2x48x64xbf16>, vector<2x16x64xf32> -> vector<2x16x64xf32>
    "tpu.trace_stop"() : () -> ()
    %112 = tpu.transpose %111, [1, 0, 2] : vector<2x16x64xf32> -> vector<16x2x64xf32>
    %113 = vector.shape_cast %112 : vector<16x2x64xf32> to vector<16x128xf32>
    %114 = arith.truncf %113 : vector<16x128xf32> to vector<16x128xbf16>
    %c0_42 = arith.constant 0 : index
    %c0_43 = arith.constant 0 : index
    %115 = vector.load %arg13[%c0_42, %c0_43] : memref<128x64xbf16, #tpu.memory_space<vmem>>, vector<128x64xbf16>
    %cst_44 = arith.constant dense<0.000000e+00> : vector<16x64xf32>
    %116 = tpu.matmul %114, %115, %cst_44 {dimension_numbers = #tpu.dot_dimension_numbers<[1], [0], [0], [1], [0, 0, 1, 1], [], []>} : vector<16x128xbf16>, vector<128x64xbf16>, vector<16x64xf32> -> vector<16x64xf32>
    %117 = arith.addf %116, %14 : vector<16x64xf32>
    %cst_45 = arith.constant dense<0.000000e+00> : vector<16xf32>
    %118 = vector.multi_reduction <add>, %117, %cst_45 [1] : vector<16x64xf32> to vector<16xf32>
    %119 = vector.shape_cast %118 : vector<16xf32> to vector<16x1xf32>
    %cst_46 = arith.constant 6.400000e+01 : f32
    %120 = vector.broadcast %cst_46 : f32 to vector<16x1xf32>
    %121 = arith.divf %119, %120 : vector<16x1xf32>
    %122 = vector.broadcast %121 : vector<16x1xf32> to vector<16x64xf32>
    %123 = arith.subf %117, %122 : vector<16x64xf32>
    %124 = arith.mulf %123, %123 : vector<16x64xf32>
    %cst_47 = arith.constant dense<0.000000e+00> : vector<16xf32>
    %125 = vector.multi_reduction <add>, %124, %cst_47 [1] : vector<16x64xf32> to vector<16xf32>
    %126 = vector.shape_cast %125 : vector<16xf32> to vector<16x1xf32>
    %cst_48 = arith.constant 6.400000e+01 : f32
    %127 = vector.broadcast %cst_48 : f32 to vector<16x1xf32>
    %128 = arith.divf %126, %127 : vector<16x1xf32>
    %129 = vector.broadcast %121 : vector<16x1xf32> to vector<16x64xf32>
    %130 = arith.subf %117, %129 : vector<16x64xf32>
    %cst_49 = arith.constant 9.99999974E-6 : f32
    %131 = vector.broadcast %cst_49 : f32 to vector<16x1xf32>
    %132 = arith.addf %128, %131 : vector<16x1xf32>
    %133 = math.rsqrt %132 : vector<16x1xf32>
    %134 = vector.broadcast %133 : vector<16x1xf32> to vector<16x64xf32>
    %135 = arith.mulf %130, %134 : vector<16x64xf32>
    %c0_50 = arith.constant 0 : index
    %c0_51 = arith.constant 0 : index
    %136 = vector.load %arg14[%c0_50, %c0_51] : memref<1x64xf32, #tpu.memory_space<vmem>>, vector<1x64xf32>
    %137 = vector.broadcast %136 : vector<1x64xf32> to vector<16x64xf32>
    %138 = arith.mulf %135, %137 : vector<16x64xf32>
    %c0_52 = arith.constant 0 : index
    %c0_53 = arith.constant 0 : index
    %139 = vector.load %arg15[%c0_52, %c0_53] : memref<1x64xf32, #tpu.memory_space<vmem>>, vector<1x64xf32>
    %140 = vector.broadcast %139 : vector<1x64xf32> to vector<16x64xf32>
    %141 = arith.addf %138, %140 : vector<16x64xf32>
    %142 = arith.truncf %141 : vector<16x64xf32> to vector<16x64xbf16>
    %c0_54 = arith.constant 0 : index
    %c0_55 = arith.constant 0 : index
    %143 = vector.load %arg16[%c0_54, %c0_55] : memref<64x256xbf16, #tpu.memory_space<vmem>>, vector<64x256xbf16>
    %cst_56 = arith.constant dense<0.000000e+00> : vector<16x256xf32>
    %144 = tpu.matmul %142, %143, %cst_56 {dimension_numbers = #tpu.dot_dimension_numbers<[1], [0], [0], [1], [0, 0, 1, 1], [], []>} : vector<16x64xbf16>, vector<64x256xbf16>, vector<16x256xf32> -> vector<16x256xf32>
    %c0_57 = arith.constant 0 : index
    %c0_58 = arith.constant 0 : index
    %145 = vector.load %arg17[%c0_57, %c0_58] : memref<64x256xbf16, #tpu.memory_space<vmem>>, vector<64x256xbf16>
    %cst_59 = arith.constant dense<0.000000e+00> : vector<16x256xf32>
    %146 = tpu.matmul %142, %145, %cst_59 {dimension_numbers = #tpu.dot_dimension_numbers<[1], [0], [0], [1], [0, 0, 1, 1], [], []>} : vector<16x64xbf16>, vector<64x256xbf16>, vector<16x256xf32> -> vector<16x256xf32>
    %cst_60 = arith.constant 5.000000e-01 : f32
    %147 = vector.broadcast %cst_60 : f32 to vector<16x256xf32>
    %148 = arith.mulf %147, %146 : vector<16x256xf32>
    %cst_61 = arith.constant 0.707106769 : f32
    %149 = vector.broadcast %cst_61 : f32 to vector<16x256xf32>
    %150 = arith.mulf %146, %149 : vector<16x256xf32>
    %cst_62 = arith.constant 0.000000e+00 : f32
    %151 = vector.broadcast %cst_62 : f32 to vector<16x256xf32>
    %152 = arith.cmpf oge, %150, %151 : vector<16x256xf32>
    %cst_63 = arith.constant 1.000000e+00 : f32
    %cst_64 = arith.constant -1.000000e+00 : f32
    %153 = vector.broadcast %cst_63 : f32 to vector<16x256xf32>
    %154 = vector.broadcast %cst_64 : f32 to vector<16x256xf32>
    %155 = arith.select %152, %153, %154 : vector<16x256xi1>, vector<16x256xf32>
    %156 = math.absf %150 : vector<16x256xf32>
    %cst_65 = arith.constant 0.327591091 : f32
    %157 = vector.broadcast %cst_65 : f32 to vector<16x256xf32>
    %158 = arith.mulf %157, %156 : vector<16x256xf32>
    %cst_66 = arith.constant 1.000000e+00 : f32
    %159 = vector.broadcast %cst_66 : f32 to vector<16x256xf32>
    %160 = arith.addf %159, %158 : vector<16x256xf32>
    %cst_67 = arith.constant 1.000000e+00 : f32
    %161 = vector.broadcast %cst_67 : f32 to vector<16x256xf32>
    %162 = arith.divf %161, %160 : vector<16x256xf32>
    %cst_68 = arith.constant 1.06140542 : f32
    %163 = vector.broadcast %cst_68 : f32 to vector<16x256xf32>
    %164 = arith.mulf %163, %162 : vector<16x256xf32>
    %cst_69 = arith.constant -1.45315206 : f32
    %165 = vector.broadcast %cst_69 : f32 to vector<16x256xf32>
    %166 = arith.addf %164, %165 : vector<16x256xf32>
    %167 = arith.mulf %166, %162 : vector<16x256xf32>
    %cst_70 = arith.constant 1.42141378 : f32
    %168 = vector.broadcast %cst_70 : f32 to vector<16x256xf32>
    %169 = arith.addf %167, %168 : vector<16x256xf32>
    %170 = arith.mulf %169, %162 : vector<16x256xf32>
    %cst_71 = arith.constant -0.284496725 : f32
    %171 = vector.broadcast %cst_71 : f32 to vector<16x256xf32>
    %172 = arith.addf %170, %171 : vector<16x256xf32>
    %173 = arith.mulf %172, %162 : vector<16x256xf32>
    %cst_72 = arith.constant 0.254829586 : f32
    %174 = vector.broadcast %cst_72 : f32 to vector<16x256xf32>
    %175 = arith.addf %173, %174 : vector<16x256xf32>
    %176 = arith.mulf %175, %162 : vector<16x256xf32>
    %cst_73 = arith.constant 0.000000e+00 : f32
    %177 = vector.broadcast %cst_73 : f32 to vector<16x256xf32>
    %178 = arith.subf %177, %156 : vector<16x256xf32>
    %179 = arith.mulf %178, %156 : vector<16x256xf32>
    %180 = math.exp %179 : vector<16x256xf32>
    %181 = arith.mulf %176, %180 : vector<16x256xf32>
    %cst_74 = arith.constant 1.000000e+00 : f32
    %182 = vector.broadcast %cst_74 : f32 to vector<16x256xf32>
    %183 = arith.subf %182, %181 : vector<16x256xf32>
    %184 = arith.mulf %155, %183 : vector<16x256xf32>
    %cst_75 = arith.constant 1.000000e+00 : f32
    %185 = vector.broadcast %cst_75 : f32 to vector<16x256xf32>
    %186 = arith.addf %185, %184 : vector<16x256xf32>
    %187 = arith.mulf %148, %186 : vector<16x256xf32>
    %188 = arith.mulf %144, %187 : vector<16x256xf32>
    %189 = arith.truncf %188 : vector<16x256xf32> to vector<16x256xbf16>
    %c0_76 = arith.constant 0 : index
    %c0_77 = arith.constant 0 : index
    %190 = vector.load %arg18[%c0_76, %c0_77] : memref<256x64xbf16, #tpu.memory_space<vmem>>, vector<256x64xbf16>
    %cst_78 = arith.constant dense<0.000000e+00> : vector<16x64xf32>
    %191 = tpu.matmul %189, %190, %cst_78 {dimension_numbers = #tpu.dot_dimension_numbers<[1], [0], [0], [1], [0, 0, 1, 1], [], []>} : vector<16x256xbf16>, vector<256x64xbf16>, vector<16x64xf32> -> vector<16x64xf32>
    %192 = arith.addf %191, %117 : vector<16x64xf32>
    %c0_79 = arith.constant 0 : index
    %c0_80 = arith.constant 0 : index
    %c0_81 = arith.constant 0 : index
    %193 = vector.load %arg19[%c0_79, %c0_80, %c0_81] : memref<1x16x64xf32, #tpu.memory_space<vmem>>, vector<1x16x64xf32>
    %194 = vector.shape_cast %193 : vector<1x16x64xf32> to vector<16x64xf32>
    %195 = vector.shape_cast %192 : vector<16x64xf32> to vector<1x16x64xf32>
    tpu.vector_store %arg19[%c0_79, %c0_80, %c0_81], %195 {strides = array<i32>} : memref<1x16x64xf32, #tpu.memory_space<vmem>>, vector<1x16x64xf32>,
    return
  }
  func.func @transform_0(%arg0: i32, %arg1: i32) -> (i32, i32, i32) {
    %c1_i32 = arith.constant 1 : i32
    %0 = arith.subi %arg1, %c1_i32 : i32
    %c0_i32 = arith.constant 0 : i32
    %c0_i32_0 = arith.constant 0 : i32
    %1 = arith.maxsi %c0_i32, %0 : i32
    %2 = arith.minsi %c0_i32_0, %1 : i32
    %c0_i32_1 = arith.constant 0 : i32
    %3 = arith.addi %2, %c0_i32_1 : i32
    %c0_i32_2 = arith.constant 0 : i32
    %c0_i32_3 = arith.constant 0 : i32
    return %arg0, %3, %c0_i32_2 : i32, i32, i32
  }
  func.func @transform_1(%arg0: i32, %arg1: i32) -> (i32, i32, i32) {
    %c1_i32 = arith.constant 1 : i32
    %0 = arith.subi %arg1, %c1_i32 : i32
    %c0_i32 = arith.constant 0 : i32
    %c0_i32_0 = arith.constant 0 : i32
    %1 = arith.maxsi %c0_i32, %0 : i32
    %2 = arith.minsi %c0_i32_0, %1 : i32
    %c1_i32_1 = arith.constant 1 : i32
    %3 = arith.addi %2, %c1_i32_1 : i32
    %c0_i32_2 = arith.constant 0 : i32
    %c0_i32_3 = arith.constant 0 : i32
    return %arg0, %3, %c0_i32_2 : i32, i32, i32
  }
  func.func @transform_2(%arg0: i32, %arg1: i32) -> (i32, i32, i32) {
    %c1_i32 = arith.constant 1 : i32
    %0 = arith.subi %arg1, %c1_i32 : i32
    %c0_i32 = arith.constant 0 : i32
    %c0_i32_0 = arith.constant 0 : i32
    %1 = arith.maxsi %c0_i32, %0 : i32
    %2 = arith.minsi %c0_i32_0, %1 : i32
    %c2_i32 = arith.constant 2 : i32
    %3 = arith.addi %2, %c2_i32 : i32
    %c0_i32_1 = arith.constant 0 : i32
    %c0_i32_2 = arith.constant 0 : i32
    return %arg0, %3, %c0_i32_1 : i32, i32, i32
  }
  func.func @transform_3(%arg0: i32, %arg1: i32) -> (i32, i32) {
    %c0_i32 = arith.constant 0 : i32
    %c0_i32_0 = arith.constant 0 : i32
    return %arg1, %c0_i32 : i32, i32
  }
  func.func @transform_4(%arg0: i32, %arg1: i32) -> (i32, i32) {
    %c0_i32 = arith.constant 0 : i32
    %c0_i32_0 = arith.constant 0 : i32
    return %arg1, %c0_i32 : i32, i32
  }
  func.func @transform_5(%arg0: i32, %arg1: i32) -> (i32, i32, i32) {
    %c0_i32 = arith.constant 0 : i32
    %c0_i32_0 = arith.constant 0 : i32
    %c0_i32_1 = arith.constant 0 : i32
    return %arg1, %c0_i32, %c0_i32_0 : i32, i32, i32
  }
  func.func @transform_6(%arg0: i32, %arg1: i32) -> (i32, i32, i32) {
    %c0_i32 = arith.constant 0 : i32
    %c0_i32_0 = arith.constant 0 : i32
    %c0_i32_1 = arith.constant 0 : i32
    return %arg1, %c0_i32, %c0_i32_0 : i32, i32, i32
  }
  func.func @transform_7(%arg0: i32, %arg1: i32) -> (i32, i32) {
    %c0_i32 = arith.constant 0 : i32
    %c0_i32_0 = arith.constant 0 : i32
    %c0_i32_1 = arith.constant 0 : i32
    return %c0_i32, %c0_i32_0 : i32, i32
  }
  func.func @transform_8(%arg0: i32, %arg1: i32) -> (i32, i32) {
    %c0_i32 = arith.constant 0 : i32
    %c0_i32_0 = arith.constant 0 : i32
    %c0_i32_1 = arith.constant 0 : i32
    return %c0_i32, %c0_i32_0 : i32, i32
  }
  func.func @transform_9(%arg0: i32, %arg1: i32) -> (i32, i32, i32) {
    %c0_i32 = arith.constant 0 : i32
    %c0_i32_0 = arith.constant 0 : i32
    %c0_i32_1 = arith.constant 0 : i32
    %c0_i32_2 = arith.constant 0 : i32
    return %c0_i32, %c0_i32_0, %c0_i32_1 : i32, i32, i32
  }
  func.func @transform_10(%arg0: i32, %arg1: i32) -> (i32, i32, i32) {
    %c0_i32 = arith.constant 0 : i32
    %c0_i32_0 = arith.constant 0 : i32
    %c0_i32_1 = arith.constant 0 : i32
    %c0_i32_2 = arith.constant 0 : i32
    return %c0_i32, %c0_i32_0, %c0_i32_1 : i32, i32, i32
  }
  func.func @transform_11(%arg0: i32, %arg1: i32) -> (i32, i32) {
    %c0_i32 = arith.constant 0 : i32
    %c0_i32_0 = arith.constant 0 : i32
    %c0_i32_1 = arith.constant 0 : i32
    return %c0_i32, %c0_i32_0 : i32, i32
  }
  func.func @transform_12(%arg0: i32, %arg1: i32) -> (i32, i32) {
    %c0_i32 = arith.constant 0 : i32
    %c0_i32_0 = arith.constant 0 : i32
    %c0_i32_1 = arith.constant 0 : i32
    return %c0_i32, %c0_i32_0 : i32, i32
  }
  func.func @transform_13(%arg0: i32, %arg1: i32) -> (i32, i32) {
    %c0_i32 = arith.constant 0 : i32
    %c0_i32_0 = arith.constant 0 : i32
    %c0_i32_1 = arith.constant 0 : i32
    return %c0_i32, %c0_i32_0 : i32, i32
  }
  func.func @transform_14(%arg0: i32, %arg1: i32) -> (i32, i32) {
    %c0_i32 = arith.constant 0 : i32
    %c0_i32_0 = arith.constant 0 : i32
    %c0_i32_1 = arith.constant 0 : i32
    return %c0_i32, %c0_i32_0 : i32, i32
  }
  func.func @transform_15(%arg0: i32, %arg1: i32) -> (i32, i32) {
    %c0_i32 = arith.constant 0 : i32
    %c0_i32_0 = arith.constant 0 : i32
    %c0_i32_1 = arith.constant 0 : i32
    return %c0_i32, %c0_i32_0 : i32, i32
  }
  func.func @transform_16(%arg0: i32, %arg1: i32) -> (i32, i32) {
    %c0_i32 = arith.constant 0 : i32
    %c0_i32_0 = arith.constant 0 : i32
    %c0_i32_1 = arith.constant 0 : i32
    return %c0_i32, %c0_i32_0 : i32, i32
  }
  func.func @transform_17(%arg0: i32, %arg1: i32) -> (i32, i32, i32) {
    %c0_i32 = arith.constant 0 : i32
    %c0_i32_0 = arith.constant 0 : i32
    return %arg0, %arg1, %c0_i32 : i32, i32, i32
  }
}

</mosaic_0001>

<bundles_post_ra>
// kernel: tpu_custom_call.1
= control target key start
LH: loop header
LB: loop body
LE: loop exit
PB: predicated region body
PF: predicated region fallthrough
CT: control target
= control target key end

     0   :  { %s7209_s0 = inlined_call_operand.hbm [shape: f32[2,48,64], index: 0, kind: input, shape index: {}]   ;;  %s7210_s1 = inlined_call_operand.hbm [shape: f32[2,48,64], index: 1, kind: input, shape index: {}]   ;;  %s7211_s2 = inlined_call_operand.hbm [shape: f32[2,48,64], index: 2, kind: input, shape index: {}]   ;;  %s7212_s3 = inlined_call_operand.hbm [shape: f32[48,64], index: 3, kind: input, shape index: {}]   ;;  %s7213_s4 = inlined_call_operand.hbm [shape: f32[48,64], index: 4, kind: input, shape index: {}]   ;;  %s7214_s5 = inlined_call_operand.vmem [shape: f32[3,48,64], index: 5, kind: input, shape index: {}]   ;;  %s7215_s6 = inlined_call_operand.vmem [shape: f32[3,48,64], index: 6, kind: input, shape index: {}]   ;;  %s7216_s7 = inlined_call_operand.hbm [shape: bf16[64,128], index: 7, kind: input, shape index: {}]   ;;  %s7217_s8 = inlined_call_operand.hbm [shape: bf16[64,256], index: 8, kind: input, shape index: {}]   ;;  %s7218_s9 = inlined_call_operand.vmem [shape: f32[1,1,64], index: 9, kind: input, shape index: {}]   ;;  %s7219_s10 = inlined_call_operand.vmem [shape: f32[1,1,64], index: 10, kind: input, shape index: {}]   ;;  %s7220_s11 = inlined_call_operand.vmem [shape: bf16[128,64], index: 11, kind: input, shape index: {}]   ;;  %s7221_s12 = inlined_call_operand.vmem [shape: f32[1,64], index: 12, kind: input, shape index: {}]   ;;  %s7222_s13 = inlined_call_operand.vmem [shape: f32[1,64], index: 13, kind: input, shape index: {}]   ;;  %s7223_s14 = inlined_call_operand.hbm [shape: bf16[64,256], index: 14, kind: input, shape index: {}]   ;;  %s7224_s15 = inlined_call_operand.hbm [shape: bf16[64,256], index: 15, kind: input, shape index: {}]   ;;  %s7225_s16 = inlined_call_operand.vmem [shape: bf16[256,64], index: 16, kind: input, shape index: {}]   ;;  %s7226_s17 = inlined_call_operand.hbm [shape: f32[2,48,64], index: 17, kind: output, shape index: {}]  }
   0x1   :  { %7265 = sst [smem:[#allocation43_spill]] %s7209_s0 }
   0x2   :  { %7266 = sst [smem:[#allocation44_spill]] %s7210_s1 }
   0x3   :  { %7267 = sst [smem:[#allocation45_spill]] %s7211_s2 }
   0x4   :  { %7268 = sst [smem:[#allocation46_spill]] %s7212_s3 }
   0x5   :  { %7269 = sst [smem:[#allocation47_spill]] %s7213_s4 }
   0x6   :  { %7270 = sst [smem:[#allocation48_spill]] %s7214_s5 }
   0x7   :  { %7271 = sst [smem:[#allocation49_spill]] %s7215_s6 }
   0x8   :  { %7272 = sst [smem:[#allocation50_spill]] %s7216_s7 }
   0x9   :  { %7273 = sst [smem:[#allocation51_spill]] %s7217_s8 }
   0xa   :  { %7274 = sst [smem:[#allocation52_spill]] %s7218_s9 }
   0xb   :  { %7275 = sst [smem:[#allocation53_spill]] %s7219_s10 }
   0xc   :  { %7276 = sst [smem:[#allocation54_spill]] %s7220_s11 }
   0xd   :  { %7277 = sst [smem:[#allocation55_spill]] %s7221_s12 }
   0xe   :  { %7278 = sst [smem:[#allocation56_spill]] %s7222_s13 }
   0xf   :  { %7279 = sst [smem:[#allocation57_spill]] %s7223_s14 }
  0x10   :  { %7280 = sst [smem:[#allocation58_spill]] %s7225_s16 }
  0x11   :  { %7281 = sst [smem:[#allocation59_spill]] %s7226_s17 }
  0x12   :  { %22 = vsyncpa [#allocation3], 0 }
  0x13   :  { %24 = vsyncpa [#allocation3 + $0x1], 0 }
  0x14   :  { %25 = vsyncpa [#allocation6], 0 }
  0x15   :  { %27 = vsyncpa [#allocation6 + $0x1], 0 }
  0x16   :  { %28 = vsyncpa [#allocation9], 0 }
  0x17   :  { %30 = vsyncpa [#allocation9 + $0x1], 0 }
  0x18   :  { %31 = vsyncpa [#allocation12], 0 }
  0x19   :  { %32 = vsyncpa [#allocation15], 0 }
  0x1a   :  { %33 = vsyncpa [#allocation4], 0 }
  0x1b   :  { %35 = vsyncpa [#allocation4 + $0x1], 0  ;;  %s5768_s24 = smov 0   ;;  %s5770_s25 = smov 0  }
  0x1c   :  { %s5772_s26 = smov 0   ;;  %s5774_s27 = smov 0  }
  0x1d   :  { %s5776_s28 = smov 0   ;;  %s5778_s29 = smov 0  }
  0x1e   :  { %s5780_s0 = smov 0   ;;  %s5782_s30 = smov 0  }
  0x1f   :  { %s5784_s18 = smov 0   ;;  %s5786_s19 = smov 0  }
  0x20   :  { %s5788_s1 = smov 0   ;;  %s5790_s20 = smov 0  }
  0x21   :  { %s5792_s21 = smov 0   ;;  %s5794_s22 = smov 0  }
  0x22 LB: > { %7282 = sst [smem:[#allocation24_spill]] %s5615_s28  ;;  %s5837_s23 = sadd.s32 4294967295, %s5651_s22   ;;  %s5651_s22 = sphi %s5794_s22, %s41_s22   ;;  %s5647_s21 = sphi %s5792_s21, %s7371_s21   ;;  %s5643_s20 = sphi %s5790_s20, %s7370_s20   ;;  %s5639_s1 = sphi %s5788_s1, %s7377_s1   ;;  %s5635_s19 = sphi %s5786_s19, %s7368_s19   ;;  %s5631_s18 = sphi %s5784_s18, %s7376_s18   ;;  %s5627_s30 = sphi %s5782_s30, %s7375_s30   ;;  %s5623_s0 = sphi %s5780_s0, %s7366_s0   ;;  %s5619_s29 = sphi %s5778_s29, %s7365_s29   ;;  %s5615_s28 = sphi %s5776_s28, %s7364_s28   ;;  %s5611_s27 = sphi %s5774_s27, %s7363_s27   ;;  %s5607_s26 = sphi %s5772_s26, %s7374_s26   ;;  %s5603_s25 = sphi %s5770_s25, %s7373_s25   ;;  %s5599_s24 = sphi %s5768_s24, %s7372_s24  }
  0x23   : > { %7283 = sst [smem:[#allocation25_spill]] %s5619_s29  ;;  %p85_p0 = scmp.ne.s32.totalorder %s5627_s30, %s5623_s0 }
  0x24   : > { %7284 = sst [smem:[#allocation26_spill]] %s5627_s30  ;;  %p7259_p1 = scmp.eq.s32.totalorder %s5837_s23, 0 }
  0x25   : > { %7285 = sst [smem:[#allocation27_spill]] %s5635_s19  ;;  %p4609_p3 = scmp.ge.s32.totalorder %s5651_s22, 1 }
  0x26   : > { %7286 = sst [smem:[#allocation28_spill]] %s5639_s1  ;;  %p518_p4 = scmp.lt.s32.totalorder %s5651_s22, 7 }
  0x27   : > { %7287 = sst [smem:[#allocation29_spill]] %s5643_s20  ;;  %p5846_p5 = por %p7259_p1, %p85_p0 }
  0x28   : > { %7288 = sst [smem:[#allocation30_spill]] %s5647_s21  ;;  %p5850_p6 = pnand %p4609_p3, %p518_p4 }
  0x29   : > { %7289 = sst [smem:[#allocation31_spill]] %s5837_s23  ;;  %s5653_s16 = smov [#allocation11]  }
  0x2a   : > { %s7290_s17 = scalar_select %p5846_p5, 1, 0 }
  0x2b   : > { %s7292_s1 = scalar_select %p5850_p6, 1, 0 }
  0x2c   : > { %7291 = sst [smem:[#allocation32_spill]] %s7290_s17  ;;  %s530_s13 = sshll.u32 %s5653_s16, 4  ;;  %s531_s13 = int_to_ptr.vmem [resolvable:$true] %s530_s13 }
  0x2d   : > { %7293 = sst [smem:[#allocation33_spill]] %s7292_s1  ;;  %p4933_p7 = pneg %p5850_p6 }
  0x2e   : > { %s5654_s12 = smov [#allocation14]   ;;  %s5256_s5 = scalar_lea.vmem %s531_s13, 512 }
  0x2f   : > { %p5858_p8 = pnand %p4933_p7, %p7259_p1  ;;  %s571_s11 = sshll.u32 %s5654_s12, 4  ;;  %s572_s11 = int_to_ptr.vmem [resolvable:$true] %s571_s11 }
  0x30   : > { %p5257_p10 = scmp.ne.s32.totalorder %s531_s13, %s5256_s5  ;;  %p5264_p13 = scmp.lt.s32.totalorder %s531_s13, %s531_s13 }
  0x31   : > { %p7240_p9 = pneg %p5858_p8  ;;  %p5265_p0 = scmp.lt.s32.totalorder %s5256_s5, %s5256_s5 }
  0x33   : > { %p5259_p11 = pnand %p5257_p10, %p7240_p9  ;;  %p5266_p3 = por %p5265_p0, %p5264_p13 }
  0x35   : > { %p5260_p12 = pneg %p5259_p11 }
  0x37   : > { %p5267_p4 = pnand %p5266_p3, %p5260_p12 }
  0x39   : > { %5270 = shalt.err (!%p5267_p4)
}
  0x3a   : > { %s5655_s16 = smov 64   ;;  %s5656_s6 = smov 4  }
  0x3b   : > { %s7295_s7 = sld [smem:[#allocation50_spill]]  ;;  %s5282_s10 = scalar_lea.vmem %s572_s11, 1024 }
  0x3c   : > { %p5283_p7 = scmp.ne.s32.totalorder %s572_s11, %s5282_s10  ;;  %p5290_p2 = scmp.lt.s32.totalorder %s572_s11, %s572_s11 }
  0x3d   : > { %p5291_p13 = scmp.lt.s32.totalorder %s5282_s10, %s5282_s10 }
  0x3e   : > { %p5285_p10 = pnand %p5283_p7, %p7240_p9 }
  0x3f   : > { %p5292_p12 = por %p5291_p13, %p5290_p2 }
  0x40   : > { %p5286_p11 = pneg %p5285_p10 }
  0x41   : > { %4936 = dma.hbm_to_vmem [thread:$0]  (!%p5858_p8), %s7295_s7, 512, %s531_s13, [#allocation12], %s5655_s16, %s5655_s16, %s5656_s6  }
  0x42   : > { %p5293_p0 = pnand %p5292_p12, %p5286_p11 }
  0x44   : > { %5296 = shalt.err (!%p5293_p0)
}
  0x45   : > { %s7231_s5 = smov 128   ;;  %s7233_s6 = smov 8  }
  0x46   : > { %s7296_s14 = sld [smem:[#allocation57_spill]]  ;;  %p79_p2 = scmp.ne.s32.totalorder %s5631_s18, %s5627_s30 }
  0x47   : > { %p80_p3 = scmp.eq.s32.totalorder %s5651_s22, 0  ;;  %p7241_p4 = scmp.lt.s32.totalorder %s5651_s22, 6 }
  0x48   : > { %s7235_s16 = sand.u32 1, %s5631_s18   ;;  %s7242_s7 = sand.u32 1, %s5651_s22  }
  0x49   : > { %p81_p7 = por %p80_p3, %p79_p2  ;;  %s5893_s12 = sshll.u32 %s7235_s16, 4 }
  0x4a   : > { %s5897_s19 = smul.u32 768, %s5647_s21  ;;  %s7299_s13 = sld [smem:[#allocation44_spill]] }
  0x4b   : > { %p5901_p10 = pnand %p7241_p4, %p81_p7  ;;  %s5912_s17 = scalar_lea.sflag [#allocation6], %s7242_s7 }
  0x4c   : > { %4942 = dma.hbm_to_vmem [thread:$0]  (!%p5858_p8), %s7296_s14, 1024, %s572_s11, [#allocation15], %s7231_s5, %s7231_s5, %s7233_s6  }
  0x4d   : > { %s7297_s9 = scalar_select %p5901_p10, 1, 0 }
  0x4e   : > { %s633_s14 = scalar_lea.vmem [#allocation5], %s5893_s12  ;;  %7300 = sst [smem:[#allocation35_spill]] %s5912_s17 }
  0x4f   : > { %7298 = sst [smem:[#allocation34_spill]] %s7297_s9  ;;  %s648_s16 = sshll.u32 %s633_s14, 4  ;;  %s649_s16 = int_to_ptr.vmem [resolvable:$true] %s648_s16 }
  0x50   : > { %s4375_s5 = scalar_lea.hbm %s7299_s13, %s5897_s19  ;;  %p7245_p11 = pneg %p5901_p10 }
  0x51   : > { %s4376_s6 = scalar_lea.hbm %s4375_s5, 256  ;;  %s5310_s30 = scalar_lea.vmem %s649_s16, 256 }
  0x52   : > { %p5311_p13 = scmp.ne.s32.totalorder %s649_s16, %s5310_s30  ;;  %s5659_s1 = smov [#allocation5]  }
  0x53   : > { %s5315_s11 = sshll.u32 %s5659_s1, 4  ;;  %s5316_s11 = int_to_ptr.vmem [resolvable:$false] %s5315_s11 }
  0x54   : > { %p5313_p12 = pnand %p5311_p13, %p7245_p11  ;;  %s5317_s10 = scalar_lea.vmem %s5316_s11, 512 }
  0x55   : > { %p5318_p2 = scmp.lt.s32.totalorder %s649_s16, %s5316_s11  ;;  %p5319_p7 = scmp.lt.s32.totalorder %s5317_s10, %s5310_s30 }
  0x56   : > { %p5314_p0 = pneg %p5313_p12 }
  0x57   : > { %p5320_p9 = por %p5319_p7, %p5318_p2 }
  0x59   : > { %p5321_p4 = pnand %p5320_p9, %p5314_p0 }
  0x5b   : > { %5324 = shalt.err (!%p5321_p4)
}
  0x5c   : > { %s7301_s14 = smov 8   ;;  %s7302_s5 = smov 128  }
  0x5d   : > { %4952 = dma.hbm_to_vmem [thread:$0]  (!%p5901_p10), %s4376_s6, 256, %s649_s16, %s5912_s17, %s7302_s5, %s7302_s5, %s7301_s14  }
  0x5e   : > { %s4572_s30 = sadd.s32 4294967294, %s5651_s22   ;;  %s50_s1 = sadd.s32 1, %s5643_s20 }
  0x5f   : > { %s53_s13 = sadd.s32 1, %s5647_s21  ;;  %p51_p9 = scmp.ge.s32.totalorder %s50_s1, 3 }
  0x60   : > { %s178_s11 = sadd.s32 1, %s5619_s29  ;;  %p185_p4 = scmp.ne.s32.totalorder %s5619_s29, %s5615_s28 }
  0x61   : > { %p191_p13 = scmp.ne.s32.totalorder %s5615_s28, %s5611_s27  ;;  %s7379_s1 = smov (%p51_p9, %s50_s1), 0 }
  0x62   : > { %7303 = sst [smem:[#allocation36_spill]] %s7379_s1  ;;  %s7381_s13 = smov (!%p51_p9, %s53_s13), %s5647_s21 }
  0x63   : > { %s175_s6 = ssub.s32 %s5643_s20, %s7379_s1  ;;  %p5940_p12 = por %p185_p4, %p80_p3 }
  0x64   : > { %p55_p0 = scmp.ge.s32.totalorder %s7381_s13, 2  ;;  %p176_p2 = scmp.eq.s32.totalorder %s175_s6, 0 }
  0x65   : > { %p5946_p7 = por %p191_p13, %p7259_p1  ;;  %s494_s10 = sadd.s32 1, %s5607_s26 }
  0x66   : > { %s7383_s13 = smov (%p55_p0, %s7381_s13), 0  ;;  %p504_p3 = scmp.ne.s32.totalorder %s5607_s26, %s5603_s25 }
  0x67   : > { %s7305_s27 = scalar_select %p5946_p7, 1, 0 }
  0x68   : > { %7307 = sst [smem:[#allocation38_spill]] %s7383_s13  ;;  %s67_s1 = ssub.s32 %s5647_s21, %s7383_s13 }
  0x69   : > { %7306 = sst [smem:[#allocation37_spill]] %s7305_s27  ;;  %p70_p9 = scmp.eq.s32.totalorder %s67_s1, 0 }
  0x6a   : > { %s5954_s7 = scalar_select %p176_p2, %s5619_s29, %s178_s11  }
  0x6b   : > { %s491_s28 = sor.u32 %s175_s6, %s67_s1  ;;  %p7309_p11 = scmp.eq.s32.totalorder %s5837_s23, 5 }
  0x6c   : > { %7308 = sst [smem:[#allocation39_spill]] %s5954_s7  ;;  %p492_p4 = scmp.eq.s32.totalorder %s491_s28, 0 }
  0x6d   : > { %p5962_p5 = por %p7309_p11, %p504_p3  ;;  %s7312_s27 = sadd.s32 1, %s5631_s18 }
  0x6e   : > { %s5969_s2 = scalar_select %p70_p9, %s5631_s18, %s7312_s27  }
  0x6f   : > { %s7310_s17 = scalar_select %p5962_p5, 1, 0 }
  0x70   : > { %7313 = sst [smem:[#allocation41_spill]] %s5969_s2  ;;  %p510_p13 = scmp.ne.s32.totalorder %s5603_s25, %s5599_s24 }
  0x71   : > { %7311 = sst [smem:[#allocation40_spill]] %s7310_s17  ;;  %p511_p0 = scmp.eq.s32.totalorder %s4572_s30, 5 }
  0x72   : > { %s5972_s9 = scalar_select %p492_p4, %s5607_s26, %s494_s10  }
  0x73   : > { %s689_s11 = sand.u32 1, %s5619_s29   ;;  %p5977_p2 = por %p511_p0, %p510_p13 }
  0x74   : > { %7314 = sst [smem:[#allocation42_spill]] %s5972_s9  ;;  %s4642_s1 = sshll.u32 %s689_s11, 4 }
  0x75   : > { %s7315_s13 = scalar_select %p5977_p2, 1, 0 }
  0x76   : > { %s4776_s28 = sshll.u32 %s5643_s20, 8  ;;  %s7316_s3 = sld [smem:[#allocation46_spill]] }
  0x77   : > { %s691_s17 = scalar_lea.vmem [#allocation8], %s4642_s1  ;;  %p7317_p11 = scmp.lt.s32.totalorder %s5651_s22, 6 }
  0x78   : > { %s698_s23 = sshll.u32 %s691_s17, 4  ;;  %s7319_s4 = sld [smem:[#allocation47_spill]]  ;;  %s699_s23 = int_to_ptr.vmem [resolvable:$true] %s698_s23 }
  0x79   : > { %p5989_p3 = pnand %p7317_p11, %p5940_p12  ;;  %s712_s20 = scalar_lea.vmem [#allocation10], %s4642_s1 }
  0x7a   : > { %s719_s2 = sshll.u32 %s712_s20, 4  ;;  %s7320_s21 = sand.u32 1, %s5651_s22   ;;  %s6013_s2 = int_to_ptr.vmem [resolvable:$true] %s719_s2 }
  0x7b   : > { %s6000_s6 = scalar_lea.sflag [#allocation9], %s7320_s21  ;;  %p7260_p9 = pneg %p5989_p3 }
  0x7c   : > { %s697_s7 = scalar_lea.hbm %s7316_s3, %s4776_s28  ;;  %s5339_s17 = scalar_lea.vmem %s699_s23, 256 }
  0x7d   : > { %p5340_p4 = scmp.ne.s32.totalorder %s699_s23, %s5339_s17  ;;  %s5660_s16 = smov [#allocation8]  }
  0x7e   : > { %s5996_s11 = scalar_lea.hbm %s7319_s4, %s4776_s28  ;;  %s5344_s3 = sshll.u32 %s5660_s16, 4  ;;  %s5345_s3 = int_to_ptr.vmem [resolvable:$false] %s5344_s3 }
  0x7f   : > { %p5342_p12 = pnand %p5340_p4, %p7260_p9  ;;  %s5346_s30 = scalar_lea.vmem %s5345_s3, 512 }
  0x80   : > { %p5347_p0 = scmp.lt.s32.totalorder %s699_s23, %s5345_s3  ;;  %p5348_p11 = scmp.lt.s32.totalorder %s5346_s30, %s5339_s17 }
  0x81   : > { %p5343_p13 = pneg %p5342_p12 }
  0x82   : > { %p5349_p1 = por %p5348_p11, %p5347_p0 }
  0x84   : > { %p5350_p2 = pnand %p5349_p1, %p5343_p13 }
  0x86   : > { %5353 = shalt.err (!%p5350_p2)
}
  0x87   : > { %4958 = dma.hbm_to_vmem [thread:$0]  (!%p5989_p3), %s697_s7, 256, %s699_s23, %s6000_s6, %s7302_s5, %s7302_s5, %s7301_s14  }
  0x88   : > { %s5661_s20 = smov [#allocation13]   ;;  %s5662_s28 = smov [#allocation16]  }
  0x89   : > { %s543_s1 = sshll.u32 %s5661_s20, 4  ;;  %s584_s10 = sshll.u32 %s5662_s28, 4  ;;  %s544_s1 = int_to_ptr.vmem [resolvable:$true] %s543_s1  ;;  %s585_s10 = int_to_ptr.vmem [resolvable:$true] %s584_s10 }
  0x8a   : > { %s5365_s3 = scalar_lea.vmem %s544_s1, 1024  ;;  %p7321_p1 = pneg %p5858_p8 }
  0x8b   : > { %p5366_p4 = scmp.ne.s32.totalorder %s544_s1, %s5365_s3  ;;  %p5373_p13 = scmp.lt.s32.totalorder %s544_s1, %s544_s1 }
  0x8c   : > { %p5374_p0 = scmp.lt.s32.totalorder %s5365_s3, %s5365_s3 }
  0x8d   : > { %p5368_p2 = pnand %p5366_p4, %p7321_p1 }
  0x8e   : > { %p5375_p11 = por %p5374_p0, %p5373_p13 }
  0x8f   : > { %p5369_p12 = pneg %p5368_p2 }
  0x91   : > { %p5376_p9 = pnand %p5375_p11, %p5369_p12 }
  0x93   : > { %5379 = shalt.err (!%p5376_p9)
}
  0x94   : > { %s7322_s8 = sld [smem:[#allocation51_spill]]  ;;  %s5391_s21 = scalar_lea.vmem %s585_s10, 1024 }
  0x95   : > { %p5392_p5 = scmp.ne.s32.totalorder %s585_s10, %s5391_s21  ;;  %p7323_p4 = pmov %p7321_p1 }
  0x96   : > { %p5399_p13 = scmp.lt.s32.totalorder %s585_s10, %s585_s10  ;;  %p5400_p12 = scmp.lt.s32.totalorder %s5391_s21, %s5391_s21 }
  0x97   : > { %p5394_p1 = pnand %p5392_p5, %p7323_p4 }
  0x98   : > { %p5401_p9 = por %p5400_p12, %p5399_p13 }
  0x99   : > { %p5395_p2 = pneg %p5394_p1 }
  0x9a   : > { %4939 = dma.hbm_to_vmem [thread:$0]  (!%p5858_p8), %s7322_s8, 1024, %s544_s1, [#allocation12], %s7302_s5, %s7302_s5, %s7301_s14  }
  0x9b   : > { %p5402_p0 = pnand %p5401_p9, %p5395_p2 }
  0x9d   : > { %5405 = shalt.err (!%p5402_p0)
}
  0x9e   : > { %4945 = dma.hbm_to_vmem [thread:$0]  (!%p5858_p8), %s7224_s15, 1024, %s585_s10, [#allocation15], %s7302_s5, %s7302_s5, %s7301_s14  }
  0x9f   : > { %s7325_s28 = sld [smem:[#allocation43_spill]]  ;;  %s605_s7 = scalar_lea.vmem [#allocation2], %s5893_s12 }
  0xa0   : > { %s619_s23 = sshll.u32 %s605_s7, 4  ;;  %s7326_s4 = sld [smem:[#allocation45_spill]]  ;;  %s620_s23 = int_to_ptr.vmem [resolvable:$true] %s619_s23 }
  0xa1   : > { %s7327_s29 = sand.u32 1, %s5631_s18   ;;  %s5419_s17 = scalar_lea.vmem %s620_s23, 256 }
  0xa2   : > { %s602_s9 = scalar_lea.sflag [#allocation3], %s7327_s29  ;;  %p5420_p5 = scmp.ne.s32.totalorder %s620_s23, %s5419_s17 }
  0xa3   : > { %p7328_p11 = pneg %p5901_p10  ;;  %s5663_s10 = smov [#allocation2]  }
  0xa4   : > { %s5424_s16 = sshll.u32 %s5663_s10, 4  ;;  %s5425_s16 = int_to_ptr.vmem [resolvable:$false] %s5424_s16 }
  0xa5   : > { %s618_s3 = scalar_lea.hbm %s7325_s28, %s5897_s19  ;;  %p5422_p4 = pnand %p5420_p5, %p7328_p11 }
  0xa6   : > { %s4384_s8 = scalar_lea.hbm %s7326_s4, %s5897_s19  ;;  %s5426_s20 = scalar_lea.vmem %s5425_s16, 512 }
  0xa7   : > { %p5423_p1 = pneg %p5422_p4  ;;  %p5427_p8 = scmp.lt.s32.totalorder %s620_s23, %s5425_s16 }
  0xa8   : > { %p5428_p2 = scmp.lt.s32.totalorder %s5426_s20, %s5419_s17 }
  0xaa   : > { %p5429_p13 = por %p5428_p2, %p5427_p8 }
  0xac   : > { %p5430_p12 = pnand %p5429_p13, %p5423_p1 }
  0xae   : > { %5433 = shalt.err (!%p5430_p12)
}
  0xaf   : > { %4949 = dma.hbm_to_vmem [thread:$0]  (!%p5901_p10), %s618_s3, 256, %s620_s23, %s602_s9, %s7302_s5, %s7302_s5, %s7301_s14  }
  0xb0   : > { %s4385_s4 = scalar_lea.hbm %s4384_s8, 512  ;;  %s662_s29 = scalar_lea.vmem [#allocation7], %s5893_s12 }
  0xb1   : > { %s677_s19 = sshll.u32 %s662_s29, 4  ;;  %p7329_p0 = pmov %p7328_p11  ;;  %s678_s19 = int_to_ptr.vmem [resolvable:$true] %s677_s19 }
  0xb2   : > { %s5447_s1 = scalar_lea.vmem %s678_s19, 256  ;;  %s5664_s28 = smov [#allocation7]  }
  0xb3   : > { %p5448_p9 = scmp.ne.s32.totalorder %s678_s19, %s5447_s1  ;;  %s5452_s7 = sshll.u32 %s5664_s28, 4  ;;  %s5453_s7 = int_to_ptr.vmem [resolvable:$false] %s5452_s7 }
  0xb4   : > { %s5454_s0 = scalar_lea.vmem %s5453_s7, 512  ;;  %p5455_p4 = scmp.lt.s32.totalorder %s678_s19, %s5453_s7 }
  0xb5   : > { %p5450_p5 = pnand %p5448_p9, %p7329_p0  ;;  %p5456_p1 = scmp.lt.s32.totalorder %s5454_s0, %s5447_s1 }
  0xb7   : > { %p5451_p11 = pneg %p5450_p5  ;;  %p5457_p8 = por %p5456_p1, %p5455_p4 }
  0xb9   : > { %p5458_p2 = pnand %p5457_p8, %p5451_p11 }
  0xbb   : > { %5461 = shalt.err (!%p5458_p2)
}
  0xbc   : > { %s7330_s8 = sld [smem:[#allocation35_spill]]  ;;  %s5476_s12 = scalar_lea.vmem %s6013_s2, 256 }
  0xbd   : > { %p5477_p13 = scmp.ne.s32.totalorder %s6013_s2, %s5476_s12  ;;  %p7331_p12 = pneg %p5989_p3 }
  0xbe   : > { %s5665_s9 = smov [#allocation10]  }
  0xbf   : > { %p5479_p9 = pnand %p5477_p13, %p7331_p12  ;;  %s5481_s3 = sshll.u32 %s5665_s9, 4  ;;  %s5482_s3 = int_to_ptr.vmem [resolvable:$false] %s5481_s3 }
  0xc0   : > { %s5483_s23 = scalar_lea.vmem %s5482_s3, 512  ;;  %p5484_p5 = scmp.lt.s32.totalorder %s6013_s2, %s5482_s3 }
  0xc1   : > { %p5480_p0 = pneg %p5479_p9  ;;  %p5485_p11 = scmp.lt.s32.totalorder %s5483_s23, %s5476_s12 }
  0xc2   : > { %4955 = dma.hbm_to_vmem [thread:$0]  (!%p5901_p10), %s4385_s4, 256, %s678_s19, %s7330_s8, %s7302_s5, %s7302_s5, %s7301_s14  }
  0xc3   : > { %p5486_p4 = por %p5485_p11, %p5484_p5 }
  0xc5   : > { %p5487_p1 = pnand %p5486_p4, %p5480_p0 }
  0xc7   : > { %5490 = shalt.err (!%p5487_p1)
}
  0xc8   : > { %4961 = dma.hbm_to_vmem [thread:$0]  (!%p5989_p3), %s5996_s11, 256, %s6013_s2, %s6000_s6, %s7302_s5, %s7302_s5, %s7301_s14  }
  0xc9   : > { %747 = sbr.rel (%p5850_p6) target bundleno = 2861 (0xb2d), region = 88  ;;  %s7333_s21 = sld [smem:[#allocation26_spill]] (!%p5850_p6) }
  0xca   : > { %s7334_s17 = sld [smem:[#allocation32_spill]] (!%p5850_p6) }
  0xcf   : > { %s749_s10 = sand.u32 1, %s7333_s21  }
  0xd0   : > { %s6083_s16 = sshll.u32 %s749_s10, 4  ;;  %s750_s20 = scalar_lea.sflag [#allocation3], %s749_s10 }
  0xd1   : > { %s753_s4 = scalar_lea.vmem [#allocation2], %s6083_s16  ;;  %p7335_p10 = scmp.ne.s32.totalorder %s7334_s17, 0 }
  0xd3   : > { %5574 = dma.done.wait (%p7335_p10), %s750_s20, 256  }
  0xd4   : > { %5576 = vsyncadd (%p7335_p10), %s750_s20, 4294967040  ;;  %s7336_s27 = sld [smem:[#allocation31_spill]]  ;;  %s762_s5 = scalar_lea.vmem [#allocation5], %s6083_s16 }
  0xda   : > { %s758_s2 = sand.u32 1, %s7336_s27  }
  0xdb   : > { %s759_s14 = scalar_lea.sflag [#allocation6], %s758_s2 }
  0xdc   : > { %5578 = dma.done.wait (%p7335_p10), %s759_s14, 512  }
  0xdd   : > { %5580 = vsyncadd (%p7335_p10), %s759_s14, 4294966784  ;;  %s7337_s11 = sld [smem:[#allocation24_spill]]  ;;  %s771_s1 = scalar_lea.vmem [#allocation7], %s6083_s16 }
  0xde   : > { %s777_s28 = scalar_lea.sflag [#allocation9], %s758_s2 }
  0xe3   : > { %s778_s29 = sand.u32 1, %s7337_s11  }
  0xe4   : > { %s6097_s19 = sshll.u32 %s778_s29, 4 }
  0xe5   : > { %s780_s7 = scalar_lea.vmem [#allocation8], %s6097_s19 }
  0xe6   : > { %5582 = dma.done.wait (%p5946_p7), %s777_s28, 512  }
  0xe7   : > { %5584 = vsyncadd (%p5946_p7), %s777_s28, 4294966784  ;;  %s789_s0 = scalar_lea.vmem [#allocation10], %s6097_s19  ;;  %p7339_p6 = scmp.eq.s32.totalorder %s7336_s27, 0 }
  0xe9   : > { %5586 = dma.done.wait (%p7339_p6), [#allocation12], 1536   ;;  %p7340_p3 = pmov %p7339_p6 }
  0xeb   : > { %5588 = vsyncadd (%p7340_p3), [#allocation12], 4294965760  ;;  %p7341_p8 = pmov %p7340_p3 }
  0xec   : > { %p7342_p2 = pmov %p7340_p3 }
  0xed   : > { %5590 = dma.done.wait (%p7341_p8), [#allocation15], 2048  }
  0xee   : > { %5592 = vsyncadd (%p7342_p2), [#allocation15], 4294965248  ;;  %s7343_s8 = sld [smem:[#allocation27_spill]]  ;;  %v5666_v0 = vmov 0.0   ;;  %vm5667_vm0 = vmmov 0   ;;  %v5113_v1 = vld [vmem:[#allocation11 + $0x18] sm:$0xff]   ;;  %v1159_v48 = vlaneseq }
  0xef   : > { %4830 = vmatprep.subr.bf16.mxu1 %v5666_v0  ;;  %4838 = vmatprep.mubr.msk.bf16.mxu1 %vm5667_vm0, %v5666_v0  ;;  %v5114_v3 = vld [vmem:[#allocation11 + $0x10] sm:$0xff]   ;;  %v5115_v4 = vld [vmem:[#allocation11 + $0x8] sm:$0xff]   ;;  %v5116_v15 = vld [vmem:[#allocation11] sm:$0xff]   ;;  %vm982_vm3 = vcmask 523264   ;;  %v7263_v24 = vmov 0   ;;  %s5669_s3 = smov 64  }
  0xf0   : > { %4842 = vmatprep.subr.bf16.mxu0 %v5666_v0  ;;  %4848 = vmatprep.mubr.msk.bf16.mxu0 %vm5667_vm0, %v5666_v0  ;;  %v929_v5 = vld [vmem:[%s762_s5] sm:$0xff]  ;;  %v930_v8 = vld [vmem:[%s762_s5 + $0x8] sm:$0xff]  ;;  %v5670_v46 = vmov 1983009808   ;;  %v6183_v50 = vshrl.u32 %v1159_v48, 7  ;;  %s7346_s21 = sld [smem:[#allocation53_spill]] }
  0xf1   : > { %4831 = vmatpush3.bf16.msra.mxu1 %v5113_v1  ;;  %v931_v9 = vld [vmem:[%s771_s1] sm:$0xff]  ;;  %v932_v10 = vld [vmem:[%s771_s1 + $0x8] sm:$0xff]  ;;  %v946_v29 = vpack.c.bf16 %v930_v8, %v929_v5  ;;  %v1157_v47 = vunpack.c.l.s4 %v5670_v46  ;;  %v5671_v51 = vmov 1934713408   ;;  %s5672_s17 = smov 96   ;;  %s5673_s10 = smov 32  }
  0xf2   : > { %4832 = vmatprep.subr.bf16.mxu1 %v5666_v0  ;;  %v927_v11 = vld [vmem:[%s753_s4] sm:$0xff]  ;;  %v928_v12 = vld [vmem:[%s753_s4 + $0x8] sm:$0xff]  ;;  %v947_v30 = vpack.c.bf16 %v932_v10, %v931_v9  ;;  %v1188_v52 = vunpack.c.l.s4 %v5671_v51  ;;  %s7347_s4 = sld [smem:[#allocation52_spill]]  ;;  %vm3017_vm4 = vcmask 261120   ;;  %vm3304_vm6 = vcmask 392192   ;;  %s883_s5 = sand.u32 1, %s5603_s25  }
  0xf3   : > { %v5119_v18 = vld [vmem:[#allocation13 + $0x34] ss:$8 sps:$4 sm:$0xff]   ;;  %v5117_v19 = vld [vmem:[#allocation13 + $0x30] ss:$8 sps:$4 sm:$0xff]   ;;  %v5122_v21 = vld [vmem:[#allocation13 + $0x24] ss:$8 sps:$4 sm:$0xff]   ;;  %v945_v28 = vpack.c.bf16 %v928_v12, %v927_v11  ;;  %v1158_v49 = vunpack.c.0.s8 %v1157_v47 }
  0xf4   : > { %p934_p13 = scmp.eq.s32.totalorder %s7343_s8, 1  ;;  %p933_p7 = scmp.eq.s32.totalorder %s7343_s8, 0  ;;  %v5120_v22 = vld [vmem:[#allocation13 + $0x20] ss:$8 sps:$4 sm:$0xff]   ;;  %v5125_v23 = vld [vmem:[#allocation13 + $0x14] ss:$8 sps:$4 sm:$0xff]   ;;  %v1189_v54 = vunpack.c.0.s8 %v1188_v52 }
  0xf5   : > { %4833 = vmatpush3.bf16.msra.mxu1 %v5114_v3  ;;  %v5123_v25 = vld [vmem:[#allocation13 + $0x10] ss:$8 sps:$4 sm:$0xff]   ;;  %v5128_v26 = vld [vmem:[#allocation13 + $0x4] ss:$8 sps:$4 sm:$0xff]   ;;  %v5126_v27 = vld [vmem:[#allocation13] ss:$8 sps:$4 sm:$0xff]   ;;  %v6186_v53 = vsub.s32 %v1158_v49, %v6183_v50 }
  0xf6   : > { %s935_s12 = scalar_select %p934_p13, 1, 0  ;;  %4834 = vmatprep.subr.bf16.mxu1 %v5666_v0  ;;  %v6197_v1 = vsub.s32 %v1189_v54, %v6183_v50 }
  0xf7   : > { %s940_s9 = scalar_select %p933_p7, 1, 0 }
  0xf8   : > { %v936_v2 = vstv %s935_s12  ;;  %p908_p12 = scmp.lt.s32.totalorder %s7343_s8, 2  ;;  %s7348_s11 = sld [smem:[#allocation49_spill]] }
  0xf9   : > { %vm6125_vm1 = vcmp.eq.s32.totalorder %v936_v2, 1  ;;  %v941_v7 = vstv %s940_s9  ;;  %4835 = vmatpush3.bf16.msra.mxu1 %v5115_v4  ;;  %s7349_s28 = sld [smem:[#allocation48_spill]]  ;;  %s4661_s19 = sshll.u32 %s7343_s8, 4 }
  0xfa   : > { %v938_v13 = vsel %vm6125_vm1, %v929_v5, %v931_v9  ;;  %v939_v14 = vsel %vm6125_vm1, %v930_v8, %v932_v10  ;;  %vm942_vm2 = vcmp.eq.s32.totalorder %v941_v7, 1  ;;  %4836 = vmatprep.subr.bf16.mxu1 %v5666_v0  ;;  %s909_s27 = scalar_select %p908_p12, %s7343_s8, 2 }
  0xfb   : > { %v6144_v16 = vsel %vm942_vm2, %v927_v11, %v938_v13  ;;  %v6146_v17 = vsel %vm942_vm2, %v928_v12, %v939_v14  ;;  %s7351_s9 = sld [smem:[#allocation54_spill]]  ;;  %s5675_s16 = smov [#allocation17]  }
  0xfc   : > { %v949_v20 = vpack.c.bf16 %v6146_v17, %v6144_v16  ;;  %s4903_s2 = smul.u32 48, %s909_s27  ;;  %s7352_s1 = sld [smem:[#allocation55_spill]] }
  0xfd   : > { %4837 = vmatpush3.bf16.msra.mxu1 %v5116_v15  ;;  %s7354_s23 = sld [smem:[#allocation58_spill]]  ;;  %s5495_s20 = sshll.u32 %s5675_s16, 4  ;;  %s5496_s20 = int_to_ptr.vmem [resolvable:$false] %s5495_s20 }
  0xfe   : > { %1092 = vmatprep.subr.bf16.mxu1 %v5119_v18  ;;  %s6673_s6 = scalar_lea.vmem %s7348_s11, %s4903_s2  ;;  %s7355_s14 = sld [smem:[#allocation28_spill]] }
  0xff   : > { %s6678_s12 = scalar_lea.vmem %s7349_s28, %s4903_s2  ;;  %s7357_s30 = sld [smem:[#allocation59_spill]] }
 0x100   : > { %4839 = vmatmul.mubr.msk.bf16.vlgmr.msra.gmra.mxu1 %vm982_vm3, %v949_v20 }
 0x101   : > { %1093 = vmatpush1.bf16.msra.mxu1 %v5117_v19  ;;  %1116 = vmatprep.mubr.bf16.mxu1 %v7263_v24 }
 0x102   : > { %1094 = vmatprep.subr.bf16.mxu1 %v5122_v21 }
 0x104   : > { %s4904_s11 = smul.u32 6, %s7355_s14 }
 0x105   : > { %1095 = vmatpush1.bf16.msra.mxu1 %v5120_v22 }
 0x106   : > { %1096 = vmatprep.subr.bf16.mxu1 %v5125_v23 }
 0x109   : > { %1097 = vmatpush1.bf16.msra.mxu1 %v5123_v25 }
 0x10a   : > { %1098 = vmatprep.subr.bf16.mxu1 %v5128_v26 }
 0x10d   : > { %1099 = vmatpush1.bf16.msra.mxu1 %v5126_v27 }
 0x10e   : > { %4852 = vmatprep.subr.bf16.mxu1 %v5666_v0 }
 0x110   : > { %4682 = vmatmul.mubr.msk.bf16.vlgmr.msra.gmra.mxu1 %vm982_vm3, %v945_v28 }
 0x111   : > { %1126 = vmatprep.mubr.bf16.mxu1 %v7263_v24 }
 0x118   : > { %4683 = vmatmul.mubr.msk.bf16.gmra.mxu1 %vm982_vm3, %v946_v29 }
 0x119   : > { %1136 = vmatprep.mubr.bf16.mxu1 %v7263_v24 }
 0x120   : > { %4684 = vmatmul.mubr.msk.bf16.gmra.mxu1 %vm982_vm3, %v947_v30 }
 0x121   : > { %4858 = vmatprep.mubr.msk.bf16.mxu1 %vm5667_vm0, %v5666_v0 }
 0x1c0   : > { %v1020_v31 = vpop.f32.mrf.mxu1 }
 0x1c1   : > { %v1155_v55 = vcombine.high %v1020_v31, %v5666_v0  ;;  %v6200_v2 = vrot.slane %v1020_v31, %v6186_v53 }
 0x1c2   : > { %v4840_v32 = vpop.f32.mrf.mxu1 }
 0x1c3   : > { %v6203_v3 = vrot.slane %v1155_v55, %v6186_v53 }
 0x1c4   : > { %v1023_v33 = vpop.f32.mrf.mxu1 }
 0x1c5   : > { %v1221_v57 = vcombine.high %v1023_v33, %v5666_v0  ;;  %v6206_v4 = vrot.slane %v1023_v33, %v6186_v53 }
 0x1c6   : > { %v4841_v34 = vpop.f32.mrf.mxu1 }
 0x1c7   : > { %v6210_v7 = vrot.slane %v1221_v57, %v6186_v53 }
 0x1d0   : > { %v1118_v35 = vpop.f32.mrf.mxu1 }
 0x1d1   : > { %v1411_v61 = vcombine.high %v1118_v35, %v5666_v0  ;;  %v6218_v15 = vrot.slane %v1118_v35, %v6186_v53 }
 0x1d2   : > { %v6161_v36 = vpop.f32.mrf.mxu1 }
 0x1d3   : > { %v6221_v18 = vrot.slane %v1411_v61, %v6186_v53 }
 0x1d4   : > { %v1122_v37 = vpop.f32.mrf.mxu1 }
 0x1d5   : > { %v1477_v62 = vcombine.high %v1122_v37, %v5666_v0  ;;  %v1484_v19 = vrot.slane %v1122_v37, %v6186_v53 }
 0x1d6   : > { %v6163_v38 = vpop.f32.mrf.mxu1 }
 0x1d7   : > { %v6225_v20 = vrot.slane %v1477_v62, %v6186_v53 }
 0x1d8   : > { %v1128_v39 = vpop.f32.mrf.mxu1 }
 0x1d9   : > { %1397 = vrot.lane.b32.xlu1 %v1128_v39, %s5669_s3  ;;  %v1543_v60 = vcombine.high %v1128_v39, %v5666_v0  ;;  %v1550_v63 = vrot.slane %v1128_v39, %v6186_v53 }
 0x1da   : > { %v6166_v40 = vpop.f32.mrf.mxu1 }
 0x1db   : > { %v1557_v11 = vrot.slane %v1543_v60, %v6186_v53 }
 0x1dc   : > { %v1132_v41 = vpop.f32.mrf.mxu1 }
 0x1dd   : > { %1399 = vrot.lane.b32.xlu1 %v1132_v41, %s5669_s3  ;;  %v1609_v8 = vcombine.high %v1132_v41, %v5666_v0  ;;  %v1616_v12 = vrot.slane %v1132_v41, %v6186_v53 }
 0x1de   : > { %v6169_v42 = vpop.f32.mrf.mxu1 }
 0x1df   : > { %v1623_v28 = vrot.slane %v1609_v8, %v6186_v53 }
 0x1e0   : > { %v1138_v43 = vpop.f32.mrf.mxu1 }
 0x1e1   : > { %1395 = vrot.lane.b32.xlu1 %v1122_v37, %s5669_s3  ;;  %1401 = vrot.lane.b32.xlu0 %v1138_v43, %s5669_s3  ;;  %v1675_v32 = vcombine.high %v1138_v43, %v5666_v0 }
 0x1e2   : > { %v6173_v44 = vpop.f32.mrf.mxu1 }
 0x1e3   : > { %v1689_v57 = vrot.slane %v1675_v32, %v6186_v53 }
 0x1e4   : > { %v6175_v45 = vpop.f32.mrf.mxu1 }
 0x1e5   : > { %1151 = vrot.lane.b32.xlu1 %v1023_v33, %s5669_s3  ;;  %1403 = vrot.lane.b32.xlu0 %v6175_v45, %s5669_s3  ;;  %v1682_v33 = vrot.slane %v1138_v43, %v6186_v53  ;;  %v1741_v34 = vcombine.high %v6175_v45, %v5666_v0  ;;  %v1748_v62 = vrot.slane %v6175_v45, %v6186_v53 }
 0x1e9   : > { %1393 = vrot.lane.b32.xlu0 %v1118_v35, %s5669_s3 }
 0x1ed   : > { %1149 = vrot.lane.b32.xlu0 %v1020_v31, %s5669_s3 }
 0x24b   : > { %v1398_v56 = vpop.permute.xlu1 %1397 }
 0x24c   : > { %v1558_v58 = vcombine.high %v1398_v56, %v5666_v0  ;;  %v1565_v59 = vrot.slane %v1398_v56, %v6186_v53 }
 0x24e   : > { %v1572_v5 = vrot.slane %v1558_v58, %v6186_v53  ;;  %v1573_v9 = vcombine.low %v1550_v63, %v1565_v59  ;;  %v1574_v10 = vcombine.high %v1550_v63, %v1565_v59  ;;  %v6253_v63 = vrot.slane %v1741_v34, %v6186_v53 }
 0x24f   : > { %v1400_v6 = vpop.permute.xlu1 %1399 }
 0x250   : > { %v1624_v13 = vcombine.high %v1400_v6, %v5666_v0  ;;  %v1631_v14 = vrot.slane %v1400_v6, %v6186_v53  ;;  %v1589_v21 = vcombine.low %v1557_v11, %v1572_v5  ;;  %v1581_v29 = vrot.slane %v1573_v9, %v6197_v1 }
 0x251   : > { %v1588_v30 = vrot.slane %v1574_v10, %v6197_v1  ;;  %v1590_v31 = vcombine.high %v1557_v11, %v1572_v5 }
 0x252   : > { %v1638_v22 = vrot.slane %v1624_v13, %v6186_v53  ;;  %v1639_v23 = vcombine.low %v1616_v12, %v1631_v14  ;;  %v1640_v25 = vcombine.high %v1616_v12, %v1631_v14  ;;  %v6241_v47 = vrot.slane %v1589_v21, %v6197_v1 }
 0x253   : > { %v1396_v26 = vpop.permute.xlu1 %1395  ;;  %v1402_v27 = vpop.permute.xlu0 %1401  ;;  %v6245_v52 = vrot.slane %v1590_v31, %v6197_v1  ;;  %v1907_v54 = vcombine.low %v1581_v29, %v1588_v30  ;;  %v4693_v55 = vcombine.high %v1581_v29, %v1588_v30 }
 0x254   : > { %v1647_v35 = vrot.slane %v1639_v23, %v6197_v1  ;;  %v1654_v37 = vrot.slane %v1640_v25, %v6197_v1  ;;  %v1492_v39 = vcombine.high %v1396_v26, %v5666_v0  ;;  %v1499_v41 = vrot.slane %v1396_v26, %v6186_v53 }
 0x255   : > { %v1690_v46 = vcombine.high %v1402_v27, %v5666_v0  ;;  %v1655_v49 = vcombine.low %v1623_v28, %v1638_v22  ;;  %v1656_v51 = vcombine.high %v1623_v28, %v1638_v22  ;;  %v1697_v43 = vrot.slane %v1402_v27, %v6186_v53 }
 0x256   : > { %v1507_v56 = vcombine.low %v1484_v19, %v1499_v41  ;;  %v1506_v58 = vrot.slane %v1492_v39, %v6186_v53  ;;  %v1508_v59 = vcombine.high %v1484_v19, %v1499_v41  ;;  %v1957_v5 = vcombine.low %v1647_v35, %v1654_v37 }
 0x257   : > { %v1704_v60 = vrot.slane %v1690_v46, %v6186_v53  ;;  %v1404_v61 = vpop.permute.xlu0 %1403  ;;  %v4695_v6 = vcombine.high %v1647_v35, %v1654_v37  ;;  %v6256_v8 = vrot.slane %v1655_v49, %v6197_v1  ;;  %v6259_v9 = vrot.slane %v1656_v51, %v6197_v1  ;;  %v1152_v25 = vpop.permute.xlu1 %1151 }
 0x258   : > { %v1705_v10 = vcombine.low %v1682_v33, %v1697_v43  ;;  %v1706_v11 = vcombine.high %v1682_v33, %v1697_v43  ;;  %v6262_v12 = vrot.slane %v1907_v54, %v6186_v53  ;;  %v6265_v13 = vrot.slane %v4693_v55, %v6186_v53 }
 0x259   : > { %v1923_v45 = vcombine.low %v6241_v47, %v6245_v52  ;;  %v6270_v14 = vrot.slane %v1507_v56, %v6197_v1  ;;  %v6273_v19 = vrot.slane %v1508_v59, %v6197_v1  ;;  %v1523_v21 = vcombine.low %v6225_v20, %v1506_v58 }
 0x25a   : > { %v1524_v22 = vcombine.high %v6225_v20, %v1506_v58  ;;  %v1721_v23 = vcombine.low %v1689_v57, %v1704_v60  ;;  %v4694_v26 = vcombine.high %v6241_v47, %v6245_v52  ;;  %v6280_v27 = vrot.slane %v1957_v5, %v6186_v53 }
 0x25b   : > { %v6283_v28 = vrot.slane %v4695_v6, %v6186_v53  ;;  %v1722_v29 = vcombine.high %v1689_v57, %v1704_v60  ;;  %v1973_v30 = vcombine.low %v6256_v8, %v6259_v9  ;;  %v4696_v31 = vcombine.high %v6256_v8, %v6259_v9  ;;  %v1394_v33 = vpop.permute.xlu0 %1393 }
 0x25c   : > { %v1713_v20 = vrot.slane %v1705_v10, %v6197_v1  ;;  %v1720_v32 = vrot.slane %v1706_v11, %v6197_v1  ;;  %v1236_v34 = vcombine.high %v1152_v25, %v5666_v0  ;;  %v1243_v35 = vrot.slane %v1152_v25, %v6186_v53 }
 0x25d   : > { %v1756_v37 = vcombine.high %v1404_v61, %v5666_v0  ;;  %v1763_v39 = vrot.slane %v1404_v61, %v6186_v53  ;;  %v6296_v41 = vrot.slane %v1523_v21, %v6197_v1  ;;  %v6299_v46 = vrot.slane %v1524_v22, %v6197_v1 }
 0x25e   : > { %v1857_v49 = vcombine.low %v6270_v14, %v6273_v19  ;;  %v6304_v51 = vrot.slane %v1721_v23, %v6197_v1  ;;  %v6307_v43 = vrot.slane %v1722_v29, %v6197_v1  ;;  %v1426_v55 = vcombine.high %v1394_v33, %v5666_v0 }
 0x25f   : > { %v1770_v54 = vrot.slane %v1756_v37, %v6186_v53  ;;  %v1433_v56 = vrot.slane %v1394_v33, %v6186_v53  ;;  %v2007_v57 = vcombine.low %v1713_v20, %v1720_v32  ;;  %v4697_v58 = vcombine.high %v1713_v20, %v1720_v32 }
 0x260   : > { %v1771_v59 = vcombine.low %v1748_v62, %v1763_v39  ;;  %v1772_v60 = vcombine.high %v1748_v62, %v1763_v39  ;;  %v4691_v61 = vcombine.high %v6270_v14, %v6273_v19  ;;  %v1250_v5 = vrot.slane %v1236_v34, %v6186_v53 }
 0x261   : > { %v1251_v6 = vcombine.low %v6206_v4, %v1243_v35  ;;  %v1252_v10 = vcombine.high %v6206_v4, %v1243_v35  ;;  %v1787_v22 = vcombine.low %v6253_v63, %v1770_v54  ;;  %v1788_v23 = vcombine.high %v6253_v63, %v1770_v54  ;;  %v1150_v54 = vpop.permute.xlu0 %1149 }
 0x262   : > { %v1779_v11 = vrot.slane %v1771_v59, %v6197_v1  ;;  %v1786_v21 = vrot.slane %v1772_v60, %v6197_v1  ;;  %v1873_v62 = vcombine.low %v6296_v41, %v6299_v46  ;;  %v4692_v25 = vcombine.high %v6296_v41, %v6299_v46 }
 0x263   : > { %v1440_v29 = vrot.slane %v1426_v55, %v6186_v53  ;;  %v1441_v20 = vcombine.low %v6218_v15, %v1433_v56  ;;  %v6328_v4 = vrot.slane %v2007_v57, %v6186_v53  ;;  %v2022_v32 = vrot.slane %v4697_v58, %v6186_v53 }
 0x264   : > { %v2023_v33 = vcombine.low %v6304_v51, %v6307_v43  ;;  %v4698_v63 = vcombine.high %v6304_v51, %v6307_v43  ;;  %v6336_v34 = vrot.slane %v1251_v6, %v6197_v1  ;;  %v6339_v35 = vrot.slane %v1252_v10, %v6197_v1 }
 0x265   : > { %v1267_v37 = vcombine.low %v6210_v7, %v1250_v5  ;;  %v1268_v39 = vcombine.high %v6210_v7, %v1250_v5  ;;  %v1795_v55 = vrot.slane %v1787_v22, %v6197_v1  ;;  %v1802_v57 = vrot.slane %v1788_v23, %v6197_v1 }
 0x266   : > { %v2057_v58 = vcombine.low %v1779_v11, %v1786_v21  ;;  %v4699_v59 = vcombine.high %v1779_v11, %v1786_v21  ;;  %v1442_v60 = vcombine.high %v6218_v15, %v1433_v56  ;;  %v1449_v51 = vrot.slane %v1441_v20, %v6197_v1 }
 0x267   : > { %v1457_v43 = vcombine.low %v6221_v18, %v1440_v29  ;;  %v1458_v6 = vcombine.high %v6221_v18, %v1440_v29  ;;  %v1170_v10 = vcombine.high %v1150_v54, %v5666_v0  ;;  %v1177_v24 = vrot.slane %v1150_v54, %v6186_v53 }
 0x268   : > { %v1930_v7 = vrot.slane %v1923_v45, %v6186_v53  ;;  %v1938_v5 = vrot.slane %v4694_v26, %v6186_v53  ;;  %v1456_v11 = vrot.slane %v1442_v60, %v6197_v1  ;;  %v1939_v18 = vcombine.low %v6262_v12, %v6265_v13 }
 0x269   : > { %v1465_v15 = vrot.slane %v1457_v43, %v6197_v1  ;;  %v1472_v56 = vrot.slane %v1458_v6, %v6197_v1  ;;  %v1184_v21 = vrot.slane %v1170_v10, %v6186_v53  ;;  %v1185_v22 = vcombine.low %v6200_v2, %v1177_v24 }
 0x26a   : > { %v1186_v23 = vcombine.high %v6200_v2, %v1177_v24  ;;  %v1947_v29 = vcombine.low %v1930_v7, %v1938_v5  ;;  %v6365_v47 = vrot.slane %v1267_v37, %v6197_v1  ;;  %v6368_v52 = vrot.slane %v1268_v39, %v6197_v1 }
 0x26b   : > { %v2064_v45 = vrot.slane %v2057_v58, %v6186_v53  ;;  %v1807_v26 = vcombine.low %v1449_v51, %v1456_v11  ;;  %v4689_v20 = vcombine.high %v1449_v51, %v1456_v11  ;;  %v1193_v54 = vrot.slane %v1185_v22, %v6197_v1 }
 0x26c   : > { %v1200_v12 = vrot.slane %v1186_v23, %v6197_v1  ;;  %v1201_v13 = vcombine.low %v6203_v3, %v1184_v21  ;;  %v2072_v60 = vrot.slane %v4699_v59, %v6186_v53  ;;  %v2073_v24 = vcombine.low %v1795_v55, %v1802_v57 }
 0x26d   : > { %v1946_v2 = vrot.slane %v1939_v18, %v6197_v1  ;;  %v1954_v37 = vrot.slane %v1947_v29, %v6197_v1  ;;  %v4700_v43 = vcombine.high %v1795_v55, %v1802_v57  ;;  %v1823_v39 = vcombine.low %v1465_v15, %v1472_v56 }
 0x26e   : > { %v4690_v6 = vcombine.high %v1465_v15, %v1472_v56  ;;  %v1202_v58 = vcombine.high %v6203_v3, %v1184_v21  ;;  %v2030_v51 = vrot.slane %v2023_v33, %v6186_v53  ;;  %v2038_v7 = vrot.slane %v4698_v63, %v6186_v53 }
 0x26f   : > { %v6378_v10 = vcombine.low %v1946_v2, %v1954_v37  ;;  %v2039_v5 = vcombine.low %v6328_v4, %v2022_v32  ;;  %v1814_v59 = vrot.slane %v1807_v26, %v6186_v53  ;;  %v1822_v11 = vrot.slane %v4689_v20, %v6186_v53 }
 0x270   : > { %v1209_v18 = vrot.slane %v1201_v13, %v6197_v1  ;;  %v1287_v22 = vcombine.low %v1193_v54, %v1200_v12  ;;  %v4685_v55 = vcombine.high %v1193_v54, %v1200_v12  ;;  %v2047_v3 = vcombine.low %v2030_v51, %v2038_v7 }
 0x271   : > { %v2857_v57 = vmul.f32 %v6378_v10, %v6378_v10  ;;  %v2080_v15 = vrot.slane %v2073_v24, %v6186_v53  ;;  %v1216_v33 = vrot.slane %v1202_v58, %v6197_v1  ;;  %v2088_v63 = vrot.slane %v4700_v43, %v6186_v53 }
 0x272   : > { %v2089_v56 = vcombine.low %v2064_v45, %v2072_v60  ;;  %v1980_v4 = vrot.slane %v1973_v30, %v6186_v53  ;;  %v2046_v21 = vrot.slane %v2039_v5, %v6197_v1  ;;  %v2054_v23 = vrot.slane %v2047_v3, %v6197_v1 }
 0x273   : > { %v2873_v32 = vsel %vm982_vm3, %v2857_v57, 0.0  ;;  %v1988_v29 = vrot.slane %v4696_v31, %v6186_v53  ;;  %v1294_v26 = vrot.slane %v1287_v22, %v6186_v53  ;;  %v2097_v45 = vcombine.low %v2080_v15, %v2088_v63 }
 0x274   : > { %2874 = vadd.xlane.f32.xlu1 %v2873_v32  ;;  %v1989_v20 = vcombine.low %v6280_v27, %v6283_v28  ;;  %v1830_v30 = vrot.slane %v1823_v39, %v6186_v53  ;;  %v1302_v54 = vrot.slane %v4685_v55, %v6186_v53  ;;  %v6407_v12 = vcombine.low %v2046_v21, %v2054_v23 }
 0x275   : > { %v6409_v13 = vcombine.high %v2046_v21, %v2054_v23  ;;  %v1997_v60 = vcombine.low %v1980_v4, %v1988_v29  ;;  %v2096_v24 = vrot.slane %v2089_v56, %v6197_v1  ;;  %v2104_v8 = vrot.slane %v2097_v45, %v6197_v1 }
 0x276   : > { %v1838_v9 = vrot.slane %v4690_v6, %v6186_v53  ;;  %v1839_v31 = vcombine.low %v1814_v59, %v1822_v11  ;;  %v1303_v43 = vcombine.low %v1209_v18, %v1216_v33  ;;  %v4686_v58 = vcombine.high %v1209_v18, %v1216_v33 }
 0x277   : > { %v2859_v27 = vmul.f32 %v6407_v12, %v6407_v12  ;;  %v6416_v28 = vcombine.high %v1946_v2, %v1954_v37  ;;  %v6418_v39 = vcombine.low %v2096_v24, %v2104_v8  ;;  %v1996_v51 = vrot.slane %v1989_v20, %v6197_v1 }
 0x278   : > { %v2004_v7 = vrot.slane %v1997_v60, %v6197_v1  ;;  %v1847_v5 = vcombine.low %v1830_v30, %v1838_v9  ;;  %v2865_v6 = vmul.f32 %v6409_v13, %v6409_v13  ;;  %v6425_v59 = vcombine.high %v2096_v24, %v2104_v8 }
 0x279   : > { %v2879_v22 = vsel %vm982_vm3, %v2859_v27, 0.0  ;;  %v1880_v2 = vrot.slane %v1873_v62, %v6186_v53  ;;  %v2860_v37 = vmul.f32 %v6418_v39, %v6418_v39  ;;  %v1846_v11 = vrot.slane %v1839_v31, %v6197_v1 }
 0x27a   : > { %2880 = vadd.xlane.f32.xlu0 %v2879_v22  ;;  %v1854_v18 = vrot.slane %v1847_v5, %v6197_v1  ;;  %v1888_v55 = vrot.slane %v4692_v25, %v6186_v53  ;;  %v1864_v57 = vrot.slane %v1857_v49, %v6186_v53  ;;  %v1872_v62 = vrot.slane %v4691_v61, %v6186_v53 }
 0x27b   : > { %v1353_v3 = vcombine.low %v6365_v47, %v6368_v52  ;;  %v2863_v15 = vmul.f32 %v6416_v28, %v6416_v28  ;;  %v2882_v33 = vsel %vm982_vm3, %v2860_v37, 0.0  ;;  %v6452_v41 = vcombine.low %v1996_v51, %v2004_v7 }
 0x27c   : > { %v6454_v46 = vcombine.low %v1846_v11, %v1854_v18  ;;  %v1310_v25 = vrot.slane %v1303_v43, %v6186_v53  ;;  %v4688_v49 = vcombine.high %v6365_v47, %v6368_v52  ;;  %v2897_v14 = vsel %vm982_vm3, %v2865_v6, 0.0  ;;  %2883 = vadd.xlane.f32.xlu1 %v2882_v33 }
 0x27d   : > { %v2866_v19 = vmul.f32 %v6425_v59, %v6425_v59  ;;  %v1897_v61 = vcombine.low %v1880_v2, %v1888_v55  ;;  %v1337_v63 = vcombine.low %v6336_v34, %v6339_v35  ;;  %v1318_v56 = vrot.slane %v4686_v58, %v6186_v53 }
 0x27e   : > { %2898 = vadd.xlane.f32.xlu0 %v2897_v14  ;;  %v1319_v4 = vcombine.low %v1294_v26, %v1302_v54  ;;  %v4687_v32 = vcombine.high %v6336_v34, %v6339_v35  ;;  %v2891_v21 = vsel %vm982_vm3, %v2863_v15, 0.0  ;;  %v6468_v47 = vcombine.high %v1996_v51, %v2004_v7 }
 0x27f   : > { %v1889_v52 = vcombine.low %v1864_v57, %v1872_v62  ;;  %v2858_v23 = vmul.f32 %v6452_v41, %v6452_v41  ;;  %v2855_v29 = vmul.f32 %v6454_v46, %v6454_v46  ;;  %v6474_v45 = vcombine.high %v1846_v11, %v1854_v18 }
 0x280   : > { %v1327_v20 = vcombine.low %v1310_v25, %v1318_v56  ;;  %v2900_v30 = vsel %vm982_vm3, %v2866_v19, 0.0  ;;  %2892 = vadd.xlane.f32.xlu1 %v2891_v21  ;;  %v1904_v26 = vrot.slane %v1897_v61, %v6197_v1  ;;  %v1360_v34 = vrot.slane %v1353_v3, %v6186_v53 }
 0x281   : > { %v1368_v35 = vrot.slane %v4688_v49, %v6186_v53  ;;  %v1326_v54 = vrot.slane %v1319_v4, %v6197_v1  ;;  %v1344_v24 = vrot.slane %v1337_v63, %v6186_v53  ;;  %v1352_v8 = vrot.slane %v4687_v32, %v6186_v53 }
 0x282   : > { %2901 = vadd.xlane.f32.xlu0 %v2900_v30  ;;  %v1334_v60 = vrot.slane %v1327_v20, %v6197_v1  ;;  %v1896_v9 = vrot.slane %v1889_v52, %v6197_v1  ;;  %v2867_v31 = vsel %vm982_vm3, %v2855_v29, 0.0  ;;  %v2861_v43 = vmul.f32 %v6474_v45, %v6474_v45 }
 0x283   : > { %v2876_v27 = vsel %vm982_vm3, %v2858_v23, 0.0  ;;  %v2864_v51 = vmul.f32 %v6468_v47, %v6468_v47  ;;  %v1377_v5 = vcombine.low %v1360_v34, %v1368_v35  ;;  %v1369_v22 = vcombine.low %v1344_v24, %v1352_v8 }
 0x284   : > { %v6488_v58 = vcombine.low %v1326_v54, %v1334_v60  ;;  %2868 = vadd.xlane.f32.xlu1 %v2867_v31  ;;  %v6493_v7 = vcombine.low %v1896_v9, %v1904_v26  ;;  %v2885_v6 = vsel %vm982_vm3, %v2861_v43, 0.0  ;;  %v6498_v37 = vcombine.high %v1326_v54, %v1334_v60 }
 0x285   : > { %v2894_v11 = vsel %vm982_vm3, %v2864_v51, 0.0  ;;  %v6503_v55 = vcombine.high %v1896_v9, %v1904_v26  ;;  %v1384_v57 = vrot.slane %v1377_v5, %v6197_v1  ;;  %v1376_v62 = vrot.slane %v1369_v22, %v6197_v1 }
 0x286   : > { %2877 = vadd.xlane.f32.xlu0 %v2876_v27  ;;  %v2827_v2 = vmul.f32 %v6488_v58, %v6488_v58  ;;  %v2856_v18 = vmul.f32 %v6493_v7, %v6493_v7  ;;  %v2829_v15 = vmul.f32 %v6498_v37, %v6498_v37 }
 0x287   : > { %v2862_v25 = vmul.f32 %v6503_v55, %v6503_v55  ;;  %v6513_v49 = vcombine.low %v1376_v62, %v1384_v57  ;;  %v6519_v63 = vcombine.high %v1376_v62, %v1384_v57 }
 0x288   : > { %2886 = vadd.xlane.f32.xlu1 %v2885_v6  ;;  %v2831_v3 = vsel %vm982_vm3, %v2827_v2, 0.0  ;;  %v2870_v33 = vsel %vm982_vm3, %v2856_v18, 0.0  ;;  %v2837_v14 = vsel %vm982_vm3, %v2829_v15, 0.0 }
 0x289   : > { %v2888_v19 = vsel %vm982_vm3, %v2862_v25, 0.0  ;;  %v2828_v61 = vmul.f32 %v6513_v49, %v6513_v49  ;;  %v2830_v4 = vmul.f32 %v6519_v63, %v6519_v63 }
 0x28a   : > { %2895 = vadd.xlane.f32.xlu0 %v2894_v11  ;;  %v6531_v11 = vld [vmem:[%s7346_s21] ss:$0 sm:$0xff]  ;;  %s7134_s21 = scalar_lea.sflag [#allocation4], %s883_s5 }
 0x28b   : > { %v2834_v56 = vsel %vm982_vm3, %v2828_v61, 0.0  ;;  %v2840_v32 = vsel %vm982_vm3, %v2830_v4, 0.0 }
 0x28c   : > { %2832 = vadd.xlane.f32.xlu1 %v2831_v3 }
 0x28e   : > { %2871 = vadd.xlane.f32.xlu0 %v2870_v33 }
 0x290   : > { %2838 = vadd.xlane.f32.xlu1 %v2837_v14 }
 0x292   : > { %2889 = vadd.xlane.f32.xlu0 %v2888_v19 }
 0x296   : > { %2835 = vadd.xlane.f32.xlu0 %v2834_v56 }
 0x29a   : > { %2841 = vadd.xlane.f32.xlu0 %v2840_v32 }
 0x2fd   : > { %v2875_v21 = vpop.xlane.xlu1 %2874 }
 0x2fe   : > { %v2905_v54 = vmax.f32 %v2875_v21, 1e-24 }
 0x303   : > { %v2881_v52 = vpop.xlane.xlu0 %2880 }
 0x304   : > { %v2907_v57 = vmax.f32 %v2881_v52, 1e-24 }
 0x305   : > { %v2884_v23 = vpop.xlane.xlu1 %2883 }
 0x306   : > { %v2908_v56 = vmax.f32 %v2884_v23, 1e-24 }
 0x307   : > { %v2899_v29 = vpop.xlane.xlu0 %2898 }
 0x309   : > { %v2893_v20 = vpop.xlane.xlu1 %2892 }
 0x30a   : > { %v2911_v9 = vmax.f32 %v2893_v20, 1e-24 }
 0x30b   : > { %v6525_v30 = vpop.xlane.xlu0 %2901 }
 0x30d   : > { %v2869_v26 = vpop.xlane.xlu1 %2868 }
 0x30e   : > { %v2903_v35 = vmax.f32 %v2869_v26, 1e-24 }
 0x30f   : > { %v2878_v34 = vpop.xlane.xlu0 %2877 }
 0x310   : > { %5177 = vrsqrt.f32 %v2903_v35  ;;  %v2906_v27 = vmax.f32 %v2878_v34, 1e-24 }
 0x311   : > { %v2887_v60 = vpop.xlane.xlu1 %2886  ;;  %5179 = vrsqrt.f32 %v2905_v54 }
 0x312   : > { %v2909_v8 = vmax.f32 %v2887_v60, 1e-24 }
 0x313   : > { %v2896_v24 = vpop.xlane.xlu0 %2895 }
 0x314   : > { %5181 = vrsqrt.f32 %v2909_v8  ;;  %v2912_v6 = vmax.f32 %v2896_v24, 1e-24 }
 0x315   : > { %5183 = vrsqrt.f32 %v2911_v9  ;;  %v2833_v20 = vpop.xlane.xlu1 %2832 }
 0x317   : > { %v2872_v31 = vpop.xlane.xlu0 %2871 }
 0x318   : > { %v2904_v43 = vmax.f32 %v2872_v31, 1e-24 }
 0x319   : > { %v2839_v24 = vpop.xlane.xlu1 %2838 }
 0x31a   : > { %5185 = vrsqrt.f32 %v2904_v43 }
 0x31b   : > { %v2890_v51 = vpop.xlane.xlu0 %2889  ;;  %5187 = vrsqrt.f32 %v2906_v27 }
 0x31c   : > { %v2910_v5 = vmax.f32 %v2890_v51, 1e-24 }
 0x31d   : > { %v5178_v22 = vpop.eup %5177 }
 0x31e   : > { %5189 = vrsqrt.f32 %v2910_v5  ;;  %v2927_v2 = vmul.f32 %v5178_v22, %v6454_v46  ;;  %v5180_v18 = vpop.eup %5179  ;;  %v2913_v46 = vmax.f32 %v2899_v29, 1e-24 }
 0x31f   : > { %5191 = vrsqrt.f32 %v2912_v6  ;;  %v2929_v25 = vmul.f32 %v5180_v18, %v6378_v10 }
 0x320   : > { %v6534_v62 = vmul.f32 %v6531_v11, %v2927_v2  ;;  %5193 = vrsqrt.f32 %v2907_v57 }
 0x321   : > { %v5182_v3 = vpop.eup %5181  ;;  %5195 = vrsqrt.f32 %v2913_v46  ;;  %v6547_v4 = vmul.f32 %v6531_v11, %v2929_v25 }
 0x322   : > { %3054 = vrot.lane.b32.xlu0 %v6534_v62, %s5672_s17  ;;  %v2933_v15 = vmul.f32 %v5182_v3, %v6474_v45  ;;  %v5184_v14 = vpop.eup %5183  ;;  %5197 = vrsqrt.f32 %v2908_v56 }
 0x323   : > { %v2935_v45 = vmul.f32 %v5184_v14, %v6416_v28 }
 0x324   : > { %v6540_v33 = vmul.f32 %v6531_v11, %v2933_v15  ;;  %v4713_v15 = vld [vmem:[%s7347_s4] ss:$0 sm:$0xff]  ;;  %s5497_s4 = scalar_lea.vmem %s5496_s20, 512 }
 0x326   : > { %3066 = vrot.lane.b32.xlu0 %v6540_v33, %s5672_s17 }
 0x327   : > { %v5186_v19 = vpop.eup %5185 }
 0x328   : > { %v2928_v61 = vmul.f32 %v5186_v19, %v6493_v7  ;;  %v5188_v32 = vpop.eup %5187  ;;  %v6559_v7 = vmul.f32 %v6531_v11, %v2935_v45 }
 0x329   : > { %v2930_v28 = vmul.f32 %v5188_v32, %v6452_v41  ;;  %v2843_v41 = vmax.f32 %v2833_v20, 1e-24 }
 0x32a   : > { %v6551_v21 = vmul.f32 %v6531_v11, %v2928_v61  ;;  %3058 = vrot.lane.b32.xlu0 %v6547_v4, %s5672_s17 }
 0x32b   : > { %v5190_v52 = vpop.eup %5189  ;;  %v6571_v34 = vmul.f32 %v6531_v11, %v2930_v28 }
 0x32c   : > { %3056 = vrot.lane.b32.xlu1 %v6551_v21, %s5672_s17  ;;  %v2934_v10 = vmul.f32 %v5190_v52, %v6503_v55  ;;  %v5192_v29 = vpop.eup %5191  ;;  %v2914_v55 = vmax.f32 %v6525_v30, 1e-24 }
 0x32d   : > { %v5194_v26 = vpop.eup %5193  ;;  %v2936_v35 = vmul.f32 %v5192_v29, %v6468_v47  ;;  %v2845_v47 = vmax.f32 %v2839_v24, 1e-24 }
 0x32e   : > { %v6562_v23 = vmul.f32 %v6531_v11, %v2934_v10  ;;  %3070 = vrot.lane.b32.xlu0 %v6559_v7, %s5672_s17  ;;  %v2931_v54 = vmul.f32 %v5194_v26, %v6407_v12  ;;  %v5196_v60 = vpop.eup %5195  ;;  %5199 = vrsqrt.f32 %v2914_v55  ;;  %v2981_v26 = vld [vmem:[%s6673_s6 + $0x10] sm:$0xff] }
 0x32f   : > { %v6580_v30 = vmul.f32 %v6531_v11, %v2936_v35  ;;  %5201 = vrsqrt.f32 %v2843_v41  ;;  %v2937_v9 = vmul.f32 %v5196_v60, %v6409_v13  ;;  %v5198_v12 = vpop.eup %5197  ;;  %v2836_v13 = vpop.xlane.xlu0 %2835  ;;  %v2975_v35 = vld [vmem:[%s6678_s12 + $0x10] sm:$0xff]  ;;  %v2982_v60 = vld [vmem:[%s6673_s6 + $0x18] sm:$0xff] }
 0x330   : > { %3068 = vrot.lane.b32.xlu1 %v6562_v23, %s5672_s17  ;;  %v6587_v8 = vmul.f32 %v6531_v11, %v2931_v54  ;;  %5203 = vrsqrt.f32 %v2845_v47  ;;  %v2932_v43 = vmul.f32 %v5198_v12, %v6418_v39  ;;  %v2844_v22 = vmax.f32 %v2836_v13, 1e-24  ;;  %v2976_v54 = vld [vmem:[%s6678_s12 + $0x18] sm:$0xff] }
 0x331   : > { %v6595_v31 = vmul.f32 %v6531_v11, %v2937_v9  ;;  %v3033_v13 = vmul.f32 %v2976_v54, %v6571_v34 }
 0x332   : > { %3094 = vrot.lane.b32.xlu0 %v6547_v4, %s5673_s10  ;;  %v6603_v27 = vmul.f32 %v6531_v11, %v2932_v43  ;;  %5205 = vrsqrt.f32 %v2844_v22  ;;  %v3032_v43 = vmul.f32 %v2975_v35, %v6547_v4 }
 0x333   : > { %v2842_v6 = vpop.xlane.xlu0 %2841 }
 0x334   : > { %3060 = vrot.lane.b32.xlu1 %v6571_v34, %s5672_s17  ;;  %v2846_v57 = vmax.f32 %v2842_v6, 1e-24 }
 0x336   : > { %3106 = vrot.lane.b32.xlu0 %v6559_v7, %s5673_s10  ;;  %5207 = vrsqrt.f32 %v2846_v57  ;;  %v3038_v57 = vmul.f32 %v2975_v35, %v6559_v7 }
 0x338   : > { %3072 = vrot.lane.b32.xlu1 %v6580_v30, %s5672_s17 }
 0x33a   : > { %3098 = vrot.lane.b32.xlu0 %v6587_v8, %s5673_s10 }
 0x33b   : > { %v5200_v51 = vpop.eup %5199 }
 0x33c   : > { %3096 = vrot.lane.b32.xlu1 %v6571_v34, %s5673_s10  ;;  %v5202_v5 = vpop.eup %5201  ;;  %v2938_v39 = vmul.f32 %v5200_v51, %v6425_v59 }
 0x33d   : > { %v2851_v2 = vmul.f32 %v5202_v5, %v6488_v58  ;;  %v5204_v18 = vpop.eup %5203 }
 0x33e   : > { %3110 = vrot.lane.b32.xlu0 %v6595_v31, %s5673_s10  ;;  %v6616_v3 = vmul.f32 %v6531_v11, %v2938_v39  ;;  %v2853_v58 = vmul.f32 %v5204_v18, %v6498_v37 }
 0x33f   : > { %v6625_v59 = vmul.f32 %v4713_v15, %v2851_v2  ;;  %v5206_v46 = vpop.eup %5205 }
 0x340   : > { %3108 = vrot.lane.b32.xlu1 %v6580_v30, %s5673_s10  ;;  %v6632_v11 = vmul.f32 %v4713_v15, %v2853_v58  ;;  %v2852_v37 = vmul.f32 %v5206_v46, %v6513_v49 }
 0x342   : > { %3064 = vrot.lane.b32.xlu0 %v6603_v27, %s5672_s17  ;;  %v6647_v14 = vmul.f32 %v4713_v15, %v2852_v37 }
 0x343   : > { %v5208_v25 = vpop.eup %5207 }
 0x344   : > { %3062 = vrot.lane.b32.xlu1 %v6587_v8, %s5672_s17  ;;  %v2854_v19 = vmul.f32 %v5208_v25, %v6519_v63 }
 0x346   : > { %3090 = vrot.lane.b32.xlu0 %v6534_v62, %s5673_s10  ;;  %v6652_v61 = vmul.f32 %v4713_v15, %v2854_v19  ;;  %v3039_v15 = vmul.f32 %v2976_v54, %v6580_v30 }
 0x348   : > { %3074 = vrot.lane.b32.xlu1 %v6595_v31, %s5672_s17 }
 0x34a   : > { %3102 = vrot.lane.b32.xlu0 %v6540_v33, %s5673_s10 }
 0x34c   : > { %3076 = vrot.lane.b32.xlu1 %v6616_v3, %s5672_s17 }
 0x34e   : > { %2993 = vrot.lane.b32.xlu0 %v6625_v59, %s5672_s17 }
 0x350   : > { %3100 = vrot.lane.b32.xlu1 %v6603_v27, %s5673_s10 }
 0x352   : > { %2997 = vrot.lane.b32.xlu0 %v6632_v11, %s5672_s17 }
 0x354   : > { %3112 = vrot.lane.b32.xlu1 %v6616_v3, %s5673_s10 }
 0x356   : > { %3005 = vrot.lane.b32.xlu0 %v6625_v59, %s5673_s10 }
 0x358   : > { %3092 = vrot.lane.b32.xlu1 %v6551_v21, %s5673_s10 }
 0x35a   : > { %3009 = vrot.lane.b32.xlu0 %v6632_v11, %s5673_s10 }
 0x35c   : > { %3104 = vrot.lane.b32.xlu1 %v6562_v23, %s5673_s10 }
 0x360   : > { %2995 = vrot.lane.b32.xlu1 %v6647_v14, %s5672_s17 }
 0x364   : > { %2999 = vrot.lane.b32.xlu1 %v6652_v61, %s5672_s17  ;;  %s7358_s17 = smov %s7357_s30 }
 0x368   : > { %3007 = vrot.lane.b32.xlu1 %v6647_v14, %s5673_s10 }
 0x36c   : > { %3011 = vrot.lane.b32.xlu1 %v6652_v61, %s5673_s10 }
 0x394   : > { %v6660_v49 = vpop.permute.xlu0 %3054 }
 0x398   : > { %v6662_v56 = vpop.permute.xlu0 %3066 }
 0x39c   : > { %v3059_v45 = vpop.permute.xlu0 %3058 }
 0x39e   : > { %v6664_v63 = vpop.permute.xlu1 %3056 }
 0x3a0   : > { %v3071_v32 = vpop.permute.xlu0 %3070 }
 0x3a2   : > { %v6667_v52 = vpop.permute.xlu1 %3068 }
 0x3a4   : > { %v3095_v10 = vpop.permute.xlu0 %3094 }
 0x3a5   : > { %v3128_v55 = vsel %vm3017_vm4, %v3059_v45, %v3095_v10  ;;  %v2983_v10 = vld [vmem:[%s6673_s6 + $0x20] sm:$0xff] }
 0x3a6   : > { %v3061_v28 = vpop.permute.xlu1 %3060  ;;  %v3140_v24 = vmul.f32 %v3128_v55, %v2981_v26 }
 0x3a8   : > { %v3107_v29 = vpop.permute.xlu0 %3106  ;;  %v6689_v22 = vadd.f32 %v3140_v24, %v3032_v43 }
 0x3a9   : > { %v3134_v9 = vsel %vm3017_vm4, %v3071_v32, %v3107_v29  ;;  %v2977_v29 = vld [vmem:[%s6678_s12 + $0x20] sm:$0xff] }
 0x3aa   : > { %v3073_v20 = vpop.permute.xlu1 %3072  ;;  %v3146_v39 = vmul.f32 %v3134_v9, %v2981_v26  ;;  %v2978_v26 = vld [vmem:[%s6678_s12 + $0x28] sm:$0xff] }
 0x3ab   : > { %v3035_v9 = vmul.f32 %v2978_v26, %v6603_v27  ;;  %v2980_v27 = vld [vmem:[%s6673_s6 + $0x8] sm:$0xff] }
 0x3ac   : > { %v3099_v41 = vpop.permute.xlu0 %3098  ;;  %v6698_v46 = vadd.f32 %v3146_v39, %v3038_v57  ;;  %v2979_v39 = vld [vmem:[%s6673_s6] sm:$0xff]  ;;  %v3041_v57 = vmul.f32 %v2978_v26, %v6616_v3 }
 0x3ae   : > { %v3097_v47 = vpop.permute.xlu1 %3096 }
 0x3af   : > { %v3129_v12 = vsel %vm3017_vm4, %v3061_v28, %v3097_v47  ;;  %v3034_v47 = vmul.f32 %v2977_v29, %v6587_v8 }
 0x3b0   : > { %v3141_v51 = vmul.f32 %v3129_v12, %v2982_v60  ;;  %v3111_v5 = vpop.permute.xlu0 %3110 }
 0x3b2   : > { %v6691_v6 = vadd.f32 %v3141_v51, %v3033_v13  ;;  %v3109_v2 = vpop.permute.xlu1 %3108 }
 0x3b3   : > { %v3135_v18 = vsel %vm3017_vm4, %v3073_v20, %v3109_v2  ;;  %v2984_v20 = vld [vmem:[%s6673_s6 + $0x28] sm:$0xff]  ;;  %s4770_s6 = sshll.u32 %s7343_s8, 1 }
 0x3b4   : > { %v3147_v4 = vmul.f32 %v3135_v18, %v2982_v60  ;;  %v3165_v34 = vpack.c.bf16 %v6691_v6, %v6689_v22  ;;  %v3065_v58 = vpop.permute.xlu0 %3064  ;;  %v3040_v18 = vmul.f32 %v2977_v29, %v6595_v31  ;;  %v2969_v22 = vld [vmem:[%s780_s7] sm:$0xff]  ;;  %v2970_v6 = vld [vmem:[%s780_s7 + $0x8] sm:$0xff]  ;;  %s4322_s29 = sadd.s32 %s4904_s11, %s4770_s6 }
 0x3b5   : > { %s4771_s28 = sshll.u32 %s4322_s29, 7 }
 0x3b6   : > { %v6700_v37 = vadd.f32 %v3147_v4, %v3039_v15  ;;  %v3063_v25 = vpop.permute.xlu1 %3062  ;;  %v2973_v4 = vld [vmem:[%s6678_s12] sm:$0xff]  ;;  %s7128_s8 = scalar_lea.hbm %s7357_s30, %s4771_s28 }
 0x3b7   : > { %v3130_v30 = vsel %vm3017_vm4, %v3063_v25, %v3099_v41  ;;  %v3030_v31 = vmul.f32 %v2973_v4, %v6534_v62  ;;  %v3036_v62 = vmul.f32 %v2973_v4, %v6540_v33 }
 0x3b8   : > { %v3168_v19 = vpack.c.bf16 %v6700_v37, %v6698_v46  ;;  %v3091_v45 = vpop.permute.xlu0 %3090  ;;  %v3142_v55 = vmul.f32 %v3130_v30, %v2983_v10 }
 0x3b9   : > { %v3126_v2 = vsel %vm3017_vm4, %v6660_v49, %v3091_v45 }
 0x3ba   : > { %v3075_v32 = vpop.permute.xlu1 %3074  ;;  %v3154_v13 = vadd.f32 %v3142_v55, %v3034_v47  ;;  %v3138_v25 = vmul.f32 %v3126_v2, %v2979_v39 }
 0x3bb   : > { %v3136_v54 = vsel %vm3017_vm4, %v3075_v32, %v3111_v5 }
 0x3bc   : > { %v3103_v28 = vpop.permute.xlu0 %3102  ;;  %v3148_v41 = vmul.f32 %v3136_v54, %v2983_v10  ;;  %v3150_v26 = vadd.f32 %v3138_v25, %v3030_v31  ;;  %v3283_v31 = vand.u32 127, %v1159_v48 }
 0x3bd   : > { %v3132_v49 = vsel %vm3017_vm4, %v6662_v56, %v3103_v28 }
 0x3be   : > { %v3077_v7 = vpop.permute.xlu1 %3076  ;;  %v3160_v32 = vadd.f32 %v3148_v41, %v3040_v18 }
 0x3c0   : > { %v2994_v12 = vpop.permute.xlu0 %2993 }
 0x3c2   : > { %v3101_v35 = vpop.permute.xlu1 %3100 }
 0x3c3   : > { %v3131_v60 = vsel %vm3017_vm4, %v3065_v58, %v3101_v35  ;;  %v2974_v58 = vld [vmem:[%s6678_s12 + $0x8] sm:$0xff]  ;;  %v3144_v35 = vmul.f32 %v3132_v49, %v2979_v39 }
 0x3c4   : > { %v3143_v24 = vmul.f32 %v3131_v60, %v2984_v20  ;;  %v2998_v3 = vpop.permute.xlu0 %2997 }
 0x3c5   : > { %v3156_v47 = vadd.f32 %v3144_v35, %v3036_v62  ;;  %v1144_v62 = vpop.f32.mrf.mxu1 }
 0x3c6   : > { %v3113_v43 = vpop.permute.xlu1 %3112  ;;  %v3155_v51 = vadd.f32 %v3143_v24, %v3035_v9 }
 0x3c7   : > { %v3137_v5 = vsel %vm3017_vm4, %v3077_v7, %v3113_v43  ;;  %v3031_v7 = vmul.f32 %v2974_v58, %v6551_v21 }
 0x3c8   : > { %v3149_v15 = vmul.f32 %v3137_v5, %v2984_v20  ;;  %v3166_v8 = vpack.c.bf16 %v3155_v51, %v3154_v13  ;;  %v3006_v9 = vpop.permute.xlu0 %3005  ;;  %v3230_v13 = vsel %vm982_vm3, %v3168_v19, 0  ;;  %v2971_v51 = vld [vmem:[%s789_s0] sm:$0xff] }
 0x3c9   : > { %v3018_v39 = vsel %vm3017_vm4, %v2994_v12, %v3006_v9  ;;  %v2985_v12 = vmul.f32 %v2969_v22, %v6625_v59  ;;  %v2988_v59 = vmul.f32 %v2970_v6, %v6652_v61 }
 0x3ca   : > { %v3161_v10 = vadd.f32 %v3149_v15, %v3041_v57  ;;  %v3093_v30 = vpop.permute.xlu1 %3092  ;;  %v3180_v55 = vsel %vm982_vm3, %v3166_v8, 0  ;;  %v3022_v5 = vmul.f32 %v3018_v39, %v2971_v51  ;;  %v2986_v57 = vmul.f32 %v2970_v6, %v6647_v14 }
 0x3cb   : > { %v3127_v45 = vsel %vm3017_vm4, %v6664_v63, %v3093_v30  ;;  %4843 = vmatpush3.bf16.xpose.msra.mxu0 %v3180_v55  ;;  %v3037_v63 = vmul.f32 %v2974_v58, %v6562_v23 }
 0x3cc   : > { %v3139_v29 = vmul.f32 %v3127_v45, %v2980_v27  ;;  %v3169_v20 = vpack.c.bf16 %v3161_v10, %v3160_v32  ;;  %4844 = vmatprep.subr.bf16.mxu0 %v5666_v0  ;;  %v3010_v2 = vpop.permute.xlu0 %3009  ;;  %v3026_v8 = vadd.f32 %v3022_v5, %v2985_v12  ;;  %v2987_v10 = vmul.f32 %v2969_v22, %v6632_v11 }
 0x3cd   : > { %v3020_v37 = vsel %vm3017_vm4, %v2998_v3, %v3010_v2  ;;  %v3279_v11 = vstv %s4661_s19  ;;  %v3278_v3 = vadd.s32 8, %v6183_v50  ;;  %v2402_v12 = vrot.slane %v6173_v44, %v6186_v53  ;;  %s7353_s19 = sld [smem:[#allocation56_spill]] }
 0x3ce   : > { %v3151_v54 = vadd.f32 %v3139_v29, %v3031_v7  ;;  %v3105_v60 = vpop.permute.xlu1 %3104  ;;  %v3233_v24 = vsel %vm982_vm3, %v3169_v20, 0  ;;  %v3024_v4 = vmul.f32 %v3020_v37, %v2971_v51  ;;  %v3280_v61 = vadd.s32 %v3279_v11, %v6183_v50 }
 0x3cf   : > { %v3133_v56 = vsel %vm3017_vm4, %v6667_v52, %v3105_v60  ;;  %4853 = vmatpush3.bf16.xpose.msra.mxu1 %v3233_v24  ;;  %v3177_v52 = vsel %vm982_vm3, %v3165_v34, 0  ;;  %v2972_v34 = vld [vmem:[%s789_s0 + $0x8] sm:$0xff]  ;;  %v3281_v29 = vadd.s32 %v3279_v11, %v3278_v3 }
 0x3d0   : > { %v3145_v21 = vmul.f32 %v3133_v56, %v2980_v27  ;;  %4854 = vmatprep.subr.bf16.mxu1 %v5666_v0  ;;  %v3164_v28 = vpack.c.bf16 %v3151_v54, %v3150_v26  ;;  %v3028_v14 = vadd.f32 %v3024_v4, %v2987_v10  ;;  %v3286_v7 = vsub.s32 %v3280_v61, %v3283_v31 }
 0x3d1   : > { %v3287_v26 = vsub.s32 %v3281_v29, %v3283_v31 }
 0x3d2   : > { %v3157_v41 = vadd.f32 %v3145_v21, %v3037_v63  ;;  %v2996_v43 = vpop.permute.xlu1 %2995  ;;  %v3174_v46 = vsel %vm982_vm3, %v3164_v28, 0  ;;  %v3289_v20 = vsub.s32 0, %v3286_v7 }
 0x3d3   : > { %4845 = vmatpush3.bf16.xpose.msra.mxu0 %v3177_v52  ;;  %v3292_v54 = vsub.s32 0, %v3287_v26 }
 0x3d4   : > { %4846 = vmatprep.subr.bf16.mxu0 %v5666_v0  ;;  %v3167_v33 = vpack.c.bf16 %v3157_v41, %v3156_v47  ;;  %v4717_v35 = vmin.u32 %v3289_v20, %v3286_v7 }
 0x3d5   : > { %v4718_v60 = vmin.u32 %v3292_v54, %v3287_v26 }
 0x3d6   : > { %v3000_v23 = vpop.permute.xlu1 %2999  ;;  %v3227_v25 = vsel %vm982_vm3, %v3167_v33, 0  ;;  %vm3294_vm5 = vcmp.le.s32.totalorder %v4717_v35, 8  ;;  %v2468_v35 = vrot.slane %v1144_v62, %v6186_v53 }
 0x3d7   : > { %4855 = vmatpush3.bf16.xpose.msra.mxu1 %v3230_v13  ;;  %vm3295_vm7 = vcmp.le.s32.totalorder %v4718_v60, 8 }
 0x3d8   : > { %4856 = vmatprep.subr.bf16.mxu1 %v5666_v0 }
 0x3da   : > { %v3008_v18 = vpop.permute.xlu1 %3007 }
 0x3db   : > { %v3019_v19 = vsel %vm3017_vm4, %v2996_v43, %v3008_v18  ;;  %4847 = vmatpush3.bf16.xpose.msra.mxu0 %v3174_v46  ;;  %v2395_v46 = vcombine.high %v6173_v44, %v5666_v0 }
 0x3dc   : > { %v3023_v15 = vmul.f32 %v3019_v19, %v2972_v34  ;;  %4862 = vmatprep.subr.bf16.mxu0 %v5666_v0 }
 0x3de   : > { %v3027_v58 = vadd.f32 %v3023_v15, %v2986_v57  ;;  %v3012_v27 = vpop.permute.xlu1 %3011 }
 0x3df   : > { %v3021_v32 = vsel %vm3017_vm4, %v3000_v23, %v3012_v27  ;;  %4857 = vmatpush3.bf16.xpose.msra.mxu1 %v3227_v25  ;;  %v2409_v27 = vrot.slane %v2395_v46, %v6186_v53 }
 0x3e0   : > { %v3162_v30 = vpack.c.bf16 %v3027_v58, %v3026_v8  ;;  %v3025_v55 = vmul.f32 %v3021_v32, %v2972_v34  ;;  %4872 = vmatprep.subr.bf16.mxu1 %v5666_v0 }
 0x3e2   : > { %v3029_v49 = vadd.f32 %v3025_v55, %v2988_v59  ;;  %4849 = vmatmul.mubr.msk.bf16.vlgmr.msra.gmra.mxu0 %vm982_vm3, %v3162_v30 }
 0x3e3   : > { %4868 = vmatprep.mubr.msk.bf16.mxu0 %vm5667_vm0, %v5666_v0 }
 0x3e4   : > { %v3163_v45 = vpack.c.bf16 %v3029_v49, %v3028_v14 }
 0x3e6   : > { %4859 = vmatmul.mubr.msk.bf16.vlgmr.msra.gmra.mxu1 %vm982_vm3, %v3163_v45  ;;  %v2461_v45 = vcombine.high %v1144_v62, %v5666_v0 }
 0x3e7   : > { %4878 = vmatprep.mubr.msk.bf16.mxu1 %vm5667_vm0, %v5666_v0 }
 0x3e8   : > { %v2475_v54 = vrot.slane %v2461_v45, %v6186_v53 }
 0x4a2   : > { %v3216_v24 = vpop.f32.mrf.mxu0 }
 0x4a3   : > { %v3300_v56 = vsel %vm3294_vm5, %v3216_v24, -3.4e+38 }
 0x4a4   : > { %v4850_v63 = vpop.f32.mrf.mxu0  ;;  %v3305_v21 = vsel %vm3304_vm6, %v3300_v56, -inf }
 0x4a5   : > { %3306 = vmax.xlane.f32.xlu0 %v3305_v21 }
 0x4a6   : > { %v3219_v48 = vpop.f32.mrf.mxu0  ;;  %v3269_v28 = vpop.f32.mrf.mxu1 }
 0x4a7   : > { %v3301_v50 = vsel %vm3295_vm7, %v3219_v48, -3.4e+38  ;;  %v3302_v47 = vsel %vm3294_vm5, %v3269_v28, -3.4e+38 }
 0x4a8   : > { %v4851_v9 = vpop.f32.mrf.mxu0  ;;  %v4860_v41 = vpop.f32.mrf.mxu1  ;;  %v3308_v43 = vsel %vm3304_vm6, %v3301_v50, -inf  ;;  %v3311_v52 = vsel %vm3304_vm6, %v3302_v47, -inf }
 0x4a9   : > { %3309 = vmax.xlane.f32.xlu1 %v3308_v43  ;;  %3312 = vmax.xlane.f32.xlu0 %v3311_v52 }
 0x4aa   : > { %v3272_v33 = vpop.f32.mrf.mxu1 }
 0x4ab   : > { %v3303_v23 = vsel %vm3295_vm7, %v3272_v33, -3.4e+38 }
 0x4ac   : > { %v4861_v13 = vpop.f32.mrf.mxu1  ;;  %v3314_v51 = vsel %vm3304_vm6, %v3303_v23, -inf }
 0x4ad   : > { %3315 = vmax.xlane.f32.xlu0 %v3314_v51 }
 0x4ba   : > { %2121 = vrot.lane.b32.xlu1 %v6173_v44, %s5669_s3 }
 0x4be   : > { %2117 = vrot.lane.b32.xlu1 %v6166_v40, %s5669_s3 }
 0x4c3   : > { %2123 = vrot.lane.b32.xlu0 %v1144_v62, %s5669_s3 }
 0x52e   : > { %v3307_v39 = vpop.xlane.xlu0 %3306 }
 0x52f   : > { %v3317_v2 = vsub.f32 %v3300_v56, %v3307_v39 }
 0x531   : > { %v3321_v22 = vmul.f32 1.442695, %v3317_v2 }
 0x532   : > { %v3310_v6 = vpop.xlane.xlu1 %3309  ;;  %v3313_v34 = vpop.xlane.xlu0 %3312 }
 0x533   : > { %v3318_v5 = vsub.f32 %v3301_v50, %v3310_v6  ;;  %v3319_v18 = vsub.f32 %v3302_v47, %v3313_v34  ;;  %5209 = vpow2.f32 %v3321_v22 }
 0x535   : > { %v3323_v37 = vmul.f32 1.442695, %v3318_v5  ;;  %v3325_v19 = vmul.f32 1.442695, %v3319_v18 }
 0x536   : > { %v2122_v57 = vpop.permute.xlu1 %2121  ;;  %v3316_v15 = vpop.xlane.xlu0 %3315 }
 0x537   : > { %5211 = vpow2.f32 %v3323_v37  ;;  %v2410_v8 = vcombine.high %v2122_v57, %v5666_v0  ;;  %v2417_v4 = vrot.slane %v2122_v57, %v6186_v53  ;;  %v3320_v58 = vsub.f32 %v3303_v23, %v3316_v15 }
 0x538   : > { %5213 = vpow2.f32 %v3325_v19 }
 0x539   : > { %v2424_v25 = vrot.slane %v2410_v8, %v6186_v53  ;;  %v2425_v32 = vcombine.low %v2402_v12, %v2417_v4  ;;  %v2426_v10 = vcombine.high %v2402_v12, %v2417_v4  ;;  %v3327_v30 = vmul.f32 1.442695, %v3320_v58 }
 0x53a   : > { %v2124_v59 = vpop.permute.xlu0 %2123 }
 0x53b   : > { %v2441_v55 = vcombine.low %v2409_v27, %v2424_v25  ;;  %v2442_v44 = vcombine.high %v2409_v27, %v2424_v25  ;;  %v2433_v14 = vrot.slane %v2425_v32, %v6197_v1  ;;  %v2440_v49 = vrot.slane %v2426_v10, %v6197_v1 }
 0x53c   : > { %5215 = vpow2.f32 %v3327_v30  ;;  %v2476_v31 = vcombine.high %v2124_v59, %v5666_v0  ;;  %v2483_v3 = vrot.slane %v2124_v59, %v6186_v53 }
 0x53d   : > { %v2449_v11 = vrot.slane %v2441_v55, %v6197_v1  ;;  %v2456_v61 = vrot.slane %v2442_v44, %v6197_v1  ;;  %v2727_v7 = vcombine.low %v2433_v14, %v2440_v49  ;;  %v4709_v29 = vcombine.high %v2433_v14, %v2440_v49  ;;  %v2118_v49 = vpop.permute.xlu1 %2117 }
 0x53e   : > { %v2490_v60 = vrot.slane %v2476_v31, %v6186_v53  ;;  %v2491_v56 = vcombine.low %v2468_v35, %v2483_v3  ;;  %v2492_v63 = vcombine.high %v2468_v35, %v2483_v3  ;;  %v2278_v45 = vcombine.high %v2118_v49, %v5666_v0 }
 0x53f   : > { %v2743_v20 = vcombine.low %v2449_v11, %v2456_v61  ;;  %v4710_v26 = vcombine.high %v2449_v11, %v2456_v61  ;;  %v2734_v50 = vrot.slane %v2727_v7, %v6186_v53  ;;  %v2742_v47 = vrot.slane %v4709_v29, %v6186_v53 }
 0x540   : > { %v6803_v24 = vpop.eup %5209  ;;  %v2507_v21 = vcombine.low %v2475_v54, %v2490_v60  ;;  %v2508_v48 = vcombine.high %v2475_v54, %v2490_v60  ;;  %v2499_v43 = vrot.slane %v2491_v56, %v6197_v1  ;;  %v2506_v52 = vrot.slane %v2492_v63, %v6197_v1 }
 0x541   : > { %v2750_v9 = vrot.slane %v2743_v20, %v6186_v53  ;;  %v2758_v62 = vrot.slane %v4710_v26, %v6186_v53  ;;  %v3329_v13 = vsel %vm3304_vm6, %v6803_v24, 0.0  ;;  %v2759_v6 = vcombine.low %v2734_v50, %v2742_v47 }
 0x542   : > { %v2515_v33 = vrot.slane %v2507_v21, %v6197_v1  ;;  %v2522_v23 = vrot.slane %v2508_v48, %v6197_v1  ;;  %v2777_v51 = vcombine.low %v2499_v43, %v2506_v52  ;;  %v4711_v39 = vcombine.high %v2499_v43, %v2506_v52  ;;  %3330 = vadd.xlane.f32.xlu1 %v3329_v13 }
 0x543   : > { %v2767_v18 = vcombine.low %v2750_v9, %v2758_v62  ;;  %v2766_v27 = vrot.slane %v2759_v6, %v6197_v1  ;;  %v2263_v11 = vcombine.high %v6166_v40, %v5666_v0  ;;  %v2285_v61 = vrot.slane %v2118_v49, %v6186_v53 }
 0x544   : > { %v6805_v28 = vpop.eup %5211  ;;  %v2793_v2 = vcombine.low %v2515_v33, %v2522_v23  ;;  %v4712_v22 = vcombine.high %v2515_v33, %v2522_v23  ;;  %v2784_v37 = vrot.slane %v2777_v51, %v6186_v53  ;;  %v2792_v19 = vrot.slane %v4711_v39, %v6186_v53 }
 0x545   : > { %v6811_v41 = vpop.eup %5213  ;;  %v3332_v5 = vsel %vm3304_vm6, %v6805_v28, 0.0  ;;  %v2774_v4 = vrot.slane %v2767_v18, %v6197_v1  ;;  %v2292_v31 = vrot.slane %v2278_v45, %v6186_v53  ;;  %v2270_v3 = vrot.slane %v6166_v40, %v6186_v53 }
 0x546   : > { %v3335_v34 = vsel %vm3304_vm6, %v6811_v41, 0.0  ;;  %v2800_v12 = vrot.slane %v2793_v2, %v6186_v53  ;;  %v2808_v57 = vrot.slane %v4712_v22, %v6186_v53  ;;  %3333 = vadd.xlane.f32.xlu0 %v3332_v5  ;;  %v2809_v8 = vcombine.low %v2784_v37, %v2792_v19 }
 0x547   : > { %3336 = vadd.xlane.f32.xlu1 %v3335_v34  ;;  %v2775_v10 = vcombine.low %v2766_v27, %v2774_v4  ;;  %v2776_v59 = vcombine.high %v2766_v27, %v2774_v4  ;;  %v2277_v7 = vrot.slane %v2263_v11, %v6186_v53  ;;  %v2293_v29 = vcombine.low %v2270_v3, %v2285_v61 }
 0x548   : > { %v2817_v58 = vcombine.low %v2800_v12, %v2808_v57  ;;  %v2816_v25 = vrot.slane %v2809_v8, %v6197_v1  ;;  %v2294_v20 = vcombine.high %v2270_v3, %v2285_v61  ;;  %v2131_v40 = vcombine.high %v6161_v36, %v5666_v0 }
 0x549   : > { %v6823_v46 = vpop.eup %5215  ;;  %v2309_v26 = vcombine.low %v2277_v7, %v2292_v31  ;;  %v2310_v35 = vcombine.high %v2277_v7, %v2292_v31  ;;  %v2301_v56 = vrot.slane %v2293_v29, %v6197_v1  ;;  %v2197_v47 = vcombine.high %v6163_v38, %v5666_v0 }
 0x54a   : > { %v3338_v15 = vsel %vm3304_vm6, %v6823_v46, 0.0  ;;  %v2824_v32 = vrot.slane %v2817_v58, %v6197_v1  ;;  %v2308_v63 = vrot.slane %v2294_v20, %v6197_v1  ;;  %v2329_v9 = vcombine.high %v6169_v42, %v5666_v0 }
 0x54b   : > { %3339 = vadd.xlane.f32.xlu0 %v3338_v15  ;;  %v2317_v21 = vrot.slane %v2309_v26, %v6197_v1  ;;  %v2324_v48 = vrot.slane %v2310_v35, %v6197_v1  ;;  %v2138_v51 = vrot.slane %v6161_v36, %v6186_v53  ;;  %v2145_v39 = vrot.slane %v2131_v40, %v6186_v53 }
 0x54c   : > { %v2825_v30 = vcombine.low %v2816_v25, %v2824_v32  ;;  %v2826_v55 = vcombine.high %v2816_v25, %v2824_v32  ;;  %v2627_v43 = vcombine.low %v2301_v56, %v2308_v63  ;;  %v4705_v52 = vcombine.high %v2301_v56, %v2308_v63 }
 0x54d   : > { %v2643_v33 = vcombine.low %v2317_v21, %v2324_v48  ;;  %v4706_v23 = vcombine.high %v2317_v21, %v2324_v48  ;;  %v2204_v6 = vrot.slane %v6163_v38, %v6186_v53  ;;  %v2211_v34 = vrot.slane %v2197_v47, %v6186_v53 }
 0x54e   : > { %v3353_v44 = vpack.c.bf16 %v2825_v30, %v2775_v10  ;;  %v3356_v14 = vpack.c.bf16 %v2826_v55, %v2776_v59  ;;  %v2336_v5 = vrot.slane %v6169_v42, %v6186_v53  ;;  %v2343_v18 = vrot.slane %v2329_v9, %v6186_v53 }
 0x54f   : > { %v6873_v19 = vrot.slane %v2627_v43, %v6186_v53  ;;  %v6877_v15 = vrot.slane %v4705_v52, %v6186_v53  ;;  %v6883_v8 = vrot.slane %v4706_v23, %v6186_v53 }
 0x550   : > { %4863 = vmatpush3.bf16.msra.mxu0 %v3353_v44  ;;  %4873 = vmatpush3.bf16.msra.mxu1 %v3356_v14 }
 0x551   : > { %4864 = vmatprep.subr.bf16.mxu0 %v5666_v0  ;;  %4874 = vmatprep.subr.bf16.mxu1 %v5666_v0 }
 0x558   : > { %2113 = vrot.lane.b32.xlu1 %v6161_v36, %s5669_s3 }
 0x55c   : > { %2115 = vrot.lane.b32.xlu1 %v6163_v38, %s5669_s3  ;;  %v6880_v38 = vrot.slane %v2643_v33, %v6186_v53 }
 0x55e   : > { %v2667_v56 = vcombine.low %v6880_v38, %v6883_v8  ;;  %v2659_v38 = vcombine.low %v6873_v19, %v6877_v15 }
 0x560   : > { %v2666_v19 = vrot.slane %v2659_v38, %v6197_v1 }
 0x561   : > { %2119 = vrot.lane.b32.xlu0 %v6169_v42, %s5669_s3 }
 0x5cb   : > { %v3331_v54 = vpop.xlane.xlu1 %3330 }
 0x5cc   : > { %5217 = vrcp.f32 %v3331_v54 }
 0x5cf   : > { %v3334_v60 = vpop.xlane.xlu0 %3333 }
 0x5d0   : > { %v3337_v50 = vpop.xlane.xlu1 %3336  ;;  %5219 = vrcp.f32 %v3334_v60 }
 0x5d1   : > { %5221 = vrcp.f32 %v3337_v50 }
 0x5d4   : > { %v3340_v62 = vpop.xlane.xlu0 %3339  ;;  %v2114_v13 = vpop.permute.xlu1 %2113 }
 0x5d5   : > { %v2146_v2 = vcombine.high %v2114_v13, %v5666_v0  ;;  %v2153_v22 = vrot.slane %v2114_v13, %v6186_v53  ;;  %5223 = vrcp.f32 %v3340_v62 }
 0x5d7   : > { %v2160_v36 = vrot.slane %v2146_v2, %v6186_v53  ;;  %v2161_v12 = vcombine.low %v2138_v51, %v2153_v22  ;;  %v2162_v57 = vcombine.high %v2138_v51, %v2153_v22 }
 0x5d8   : > { %v2120_v37 = vpop.permute.xlu0 %2119  ;;  %v2116_v42 = vpop.permute.xlu1 %2115 }
 0x5d9   : > { %v2351_v4 = vrot.slane %v2120_v37, %v6186_v53  ;;  %v2177_v58 = vcombine.low %v2145_v39, %v2160_v36  ;;  %v2178_v27 = vcombine.high %v2145_v39, %v2160_v36  ;;  %v2344_v25 = vcombine.high %v2120_v37, %v5666_v0 }
 0x5da   : > { %v2169_v32 = vrot.slane %v2161_v12, %v6197_v1  ;;  %v2212_v10 = vcombine.high %v2116_v42, %v5666_v0  ;;  %v2219_v30 = vrot.slane %v2116_v42, %v6186_v53  ;;  %v2176_v59 = vrot.slane %v2162_v57, %v6197_v1  ;;  %v5218_v57 = vpop.eup %5217 }
 0x5db   : > { %v2185_v55 = vrot.slane %v2177_v58, %v6197_v1  ;;  %v2192_v44 = vrot.slane %v2178_v27, %v6197_v1  ;;  %v2359_v14 = vcombine.low %v2336_v5, %v2351_v4  ;;  %v2358_v3 = vrot.slane %v2344_v25, %v6186_v53 }
 0x5dc   : > { %v2226_v49 = vrot.slane %v2212_v10, %v6186_v53  ;;  %v2227_v45 = vcombine.low %v2204_v6, %v2219_v30  ;;  %v2228_v11 = vcombine.high %v2204_v6, %v2219_v30  ;;  %v2360_v7 = vcombine.high %v2336_v5, %v2351_v4 }
 0x5dd   : > { %v2543_v61 = vcombine.low %v2185_v55, %v2192_v44  ;;  %v4702_v31 = vcombine.high %v2185_v55, %v2192_v44  ;;  %v2527_v54 = vcombine.low %v2169_v32, %v2176_v59  ;;  %v2367_v60 = vrot.slane %v2359_v14, %v6197_v1  ;;  %v5220_v4 = vpop.eup %5219 }
 0x5de   : > { %v2235_v29 = vrot.slane %v2227_v45, %v6197_v1  ;;  %v2242_v20 = vrot.slane %v2228_v11, %v6197_v1  ;;  %v2243_v26 = vcombine.low %v2211_v34, %v2226_v49  ;;  %v2244_v35 = vcombine.high %v2211_v34, %v2226_v49  ;;  %v5222_v30 = vpop.eup %5221 }
 0x5df   : > { %v4701_v40 = vcombine.high %v2169_v32, %v2176_v59  ;;  %v2374_v47 = vrot.slane %v2360_v7, %v6197_v1  ;;  %v2375_v9 = vcombine.low %v2343_v18, %v2358_v3  ;;  %v2376_v43 = vcombine.high %v2343_v18, %v2358_v3 }
 0x5e0   : > { %v2251_v63 = vrot.slane %v2243_v26, %v6197_v1  ;;  %v2258_v21 = vrot.slane %v2244_v35, %v6197_v1  ;;  %v2577_v48 = vcombine.low %v2235_v29, %v2242_v20  ;;  %v4703_v50 = vcombine.high %v2235_v29, %v2242_v20 }
 0x5e1   : > { %v2550_v52 = vrot.slane %v2543_v61, %v6186_v53  ;;  %v2558_v62 = vrot.slane %v4702_v31, %v6186_v53  ;;  %v2383_v13 = vrot.slane %v2375_v9, %v6197_v1  ;;  %v2390_v51 = vrot.slane %v2376_v43, %v6197_v1 }
 0x5e2   : > { %v2593_v33 = vcombine.low %v2251_v63, %v2258_v21  ;;  %v4704_v23 = vcombine.high %v2251_v63, %v2258_v21  ;;  %v2677_v39 = vcombine.low %v2367_v60, %v2374_v47  ;;  %v4707_v2 = vcombine.high %v2367_v60, %v2374_v47  ;;  %v5224_v11 = vpop.eup %5223 }
 0x5e3   : > { %v2584_v22 = vrot.slane %v2577_v48, %v6186_v53  ;;  %v2592_v6 = vrot.slane %v4703_v50, %v6186_v53  ;;  %v2693_v36 = vcombine.low %v2383_v13, %v2390_v51  ;;  %v4708_v12 = vcombine.high %v2383_v13, %v2390_v51  ;;  %v5134_v13 = vld [vmem:[%s7351_s9 + $0x10] sm:$0xff]   ;;  %v5135_v51 = vld [vmem:[%s7351_s9 + $0x8] sm:$0xff]  }
 0x5e4   : > { %v2600_v34 = vrot.slane %v2593_v33, %v6186_v53  ;;  %v2608_v5 = vrot.slane %v4704_v23, %v6186_v53  ;;  %v2684_v18 = vrot.slane %v2677_v39, %v6186_v53  ;;  %v2692_v37 = vrot.slane %v4707_v2, %v6186_v53  ;;  %v5132_v33 = vld [vmem:[%s7351_s9 + $0x20] sm:$0xff]   ;;  %v5133_v23 = vld [vmem:[%s7351_s9 + $0x18] sm:$0xff]  }
 0x5e5   : > { %v2534_v8 = vrot.slane %v2527_v54, %v6186_v53  ;;  %v2542_v42 = vrot.slane %v4701_v40, %v6186_v53  ;;  %v2700_v58 = vrot.slane %v2693_v36, %v6186_v53  ;;  %v2708_v27 = vrot.slane %v4708_v12, %v6186_v53 }
 0x5e6   : > { %v2709_v25 = vcombine.low %v2684_v18, %v2692_v37  ;;  %v2617_v32 = vcombine.low %v2600_v34, %v2608_v5  ;;  %v2674_v10 = vrot.slane %v2667_v56, %v6197_v1  ;;  %v2609_v59 = vcombine.low %v2584_v22, %v2592_v6 }
 0x5e7   : > { %v2717_v55 = vcombine.low %v2700_v58, %v2708_v27  ;;  %v2567_v44 = vcombine.low %v2550_v52, %v2558_v62  ;;  %v2559_v14 = vcombine.low %v2534_v8, %v2542_v42  ;;  %v3346_v48 = vmul.f32 %v5220_v4, %v6805_v28 }
 0x5e8   : > { %v2716_v15 = vrot.slane %v2709_v25, %v6197_v1  ;;  %v2624_v45 = vrot.slane %v2617_v32, %v6197_v1  ;;  %v2675_v61 = vcombine.low %v2666_v19, %v2674_v10  ;;  %v2676_v31 = vcombine.high %v2666_v19, %v2674_v10 }
 0x5e9   : > { %v2724_v49 = vrot.slane %v2717_v55, %v6197_v1  ;;  %v2574_v29 = vrot.slane %v2567_v44, %v6197_v1  ;;  %v2616_v20 = vrot.slane %v2609_v59, %v6197_v1  ;;  %v2566_v26 = vrot.slane %v2559_v14, %v6197_v1 }
 0x5ea   : > { %v3348_v50 = vmul.f32 %v5224_v11, %v6823_v46  ;;  %v3345_v9 = vmul.f32 %v5218_v57, %v6803_v24  ;;  %v3347_v43 = vmul.f32 %v5222_v30, %v6811_v41  ;;  %v7350_v28 = vmov 0   ;;  %v5129_v24 = vld [vmem:[%s7351_s9 + $0x38] sm:$0xff]   ;;  %v5130_v41 = vld [vmem:[%s7351_s9 + $0x30] sm:$0xff]   ;;  %v5131_v46 = vld [vmem:[%s7351_s9 + $0x28] sm:$0xff]  }
 0x5eb   : > { %v2725_v3 = vcombine.low %v2716_v15, %v2724_v49  ;;  %v2726_v7 = vcombine.high %v2716_v15, %v2724_v49  ;;  %v2625_v60 = vcombine.low %v2616_v20, %v2624_v45  ;;  %v2626_v56 = vcombine.high %v2616_v20, %v2624_v45 }
 0x5ec   : > { %v2575_v63 = vcombine.low %v2566_v26, %v2574_v29  ;;  %v2576_v21 = vcombine.high %v2566_v26, %v2574_v29  ;;  %v3349_v52 = vpack.c.bf16 %v3346_v48, %v3345_v9  ;;  %v3350_v62 = vpack.c.bf16 %v3348_v50, %v3347_v43 }
 0x5ed   : > { %v3352_v35 = vpack.c.bf16 %v2725_v3, %v2675_v61  ;;  %v3355_v54 = vpack.c.bf16 %v2726_v7, %v2676_v31 }
 0x5ee   : > { %v3351_v40 = vpack.c.bf16 %v2625_v60, %v2575_v63  ;;  %v3354_v47 = vpack.c.bf16 %v2626_v56, %v2576_v21 }
 0x5ef   : > { %4865 = vmatpush3.bf16.msra.mxu0 %v3352_v35  ;;  %4875 = vmatpush3.bf16.msra.mxu1 %v3355_v54 }
 0x5f0   : > { %4866 = vmatprep.subr.bf16.mxu0 %v5666_v0  ;;  %4876 = vmatprep.subr.bf16.mxu1 %v5666_v0 }
 0x5f3   : > { %4867 = vmatpush3.bf16.msra.mxu0 %v3351_v40  ;;  %4877 = vmatpush3.bf16.msra.mxu1 %v3354_v47 }
 0x5f4   : > { %4882 = vmatprep.subr.bf16.mxu0 %v5666_v0 }
 0x5f6   : > { %4869 = vmatmul.mubr.msk.bf16.vlgmr.msra.gmra.mxu0 %vm3304_vm6, %v3349_v52  ;;  %4879 = vmatmul.mubr.msk.bf16.vlgmr.msra.gmra.mxu1 %vm3304_vm6, %v3350_v62 }
 0x5f7   : > { %4898 = vmatprep.mubr.msk.bf16.mxu0 %vm5667_vm0, %v5666_v0  ;;  %3922 = vmatprep.mubr.bf16.mxu1 %v7350_v28 }
 0x5f8   : > { %4883 = vmatpush3.bf16.msra.mxu0 %v5129_v24 }
 0x5f9   : > { %4884 = vmatprep.subr.bf16.mxu0 %v5666_v0 }
 0x5fc   : > { %4885 = vmatpush3.bf16.msra.mxu0 %v5130_v41 }
 0x5fd   : > { %4886 = vmatprep.subr.bf16.mxu0 %v5666_v0 }
 0x600   : > { %4887 = vmatpush3.bf16.msra.mxu0 %v5131_v46 }
 0x601   : > { %4888 = vmatprep.subr.bf16.mxu0 %v5666_v0 }
 0x604   : > { %4889 = vmatpush3.bf16.msra.mxu0 %v5132_v33 }
 0x605   : > { %4890 = vmatprep.subr.bf16.mxu0 %v5666_v0 }
 0x608   : > { %4891 = vmatpush3.bf16.msra.mxu0 %v5133_v23 }
 0x609   : > { %4892 = vmatprep.subr.bf16.mxu0 %v5666_v0 }
 0x60c   : > { %4893 = vmatpush3.bf16.msra.mxu0 %v5134_v13  ;;  %v5136_v13 = vld [vmem:[%s7351_s9] sm:$0xff]  }
 0x60d   : > { %4894 = vmatprep.subr.bf16.mxu0 %v5666_v0 }
 0x610   : > { %4895 = vmatpush3.bf16.msra.mxu0 %v5135_v51 }
 0x611   : > { %4896 = vmatprep.subr.bf16.mxu0 %v5666_v0 }
 0x614   : > { %4897 = vmatpush3.bf16.msra.mxu0 %v5136_v13  ;;  %v5155_v13 = vld [vmem:[#allocation16 + $0x10] ss:$8 sps:$4 sm:$0xff]  }
 0x6b6   : > { %v3394_v39 = vpop.f32.mrf.mxu0  ;;  %v3438_v2 = vpop.f32.mrf.mxu1 }
 0x6b7   : > { %v3445_v22 = vcombine.high %v3394_v39, %v5666_v0  ;;  %v3452_v6 = vrot.slane %v3394_v39, %v6186_v53  ;;  %v3460_v34 = vcombine.high %v3438_v2, %v5666_v0  ;;  %v3467_v5 = vrot.slane %v3438_v2, %v6186_v53 }
 0x6b8   : > { %v4870_v18 = vpop.f32.mrf.mxu0  ;;  %v4880_v37 = vpop.f32.mrf.mxu1 }
 0x6b9   : > { %v3459_v36 = vrot.slane %v3445_v22, %v6186_v53  ;;  %v3474_v12 = vrot.slane %v3460_v34, %v6186_v53  ;;  %v3475_v57 = vcombine.low %v3452_v6, %v3467_v5  ;;  %v3476_v38 = vcombine.high %v3452_v6, %v3467_v5 }
 0x6ba   : > { %v3397_v8 = vpop.f32.mrf.mxu0  ;;  %v3441_v42 = vpop.f32.mrf.mxu1 }
 0x6bb   : > { %v3483_v4 = vrot.slane %v3475_v57, %v6197_v1  ;;  %v3490_v58 = vrot.slane %v3476_v38, %v6197_v1  ;;  %v3491_v27 = vcombine.low %v3459_v36, %v3474_v12  ;;  %v3492_v25 = vcombine.high %v3459_v36, %v3474_v12 }
 0x6bc   : > { %v3511_v32 = vcombine.high %v3397_v8, %v5666_v0  ;;  %v3518_v10 = vrot.slane %v3397_v8, %v6186_v53  ;;  %v3526_v30 = vcombine.high %v3441_v42, %v5666_v0  ;;  %v3533_v59 = vrot.slane %v3441_v42, %v6186_v53  ;;  %v4871_v55 = vpop.f32.mrf.mxu0  ;;  %v4881_v44 = vpop.f32.mrf.mxu1 }
 0x6bd   : > { %v3499_v14 = vrot.slane %v3491_v27, %v6197_v1  ;;  %v3506_v19 = vrot.slane %v3492_v25, %v6197_v1  ;;  %v3577_v15 = vcombine.low %v3483_v4, %v3490_v58  ;;  %v4721_v49 = vcombine.high %v3483_v4, %v3490_v58 }
 0x6be   : > { %v3525_v45 = vrot.slane %v3511_v32, %v6186_v53  ;;  %v3540_v11 = vrot.slane %v3526_v30, %v6186_v53  ;;  %v3541_v61 = vcombine.low %v3518_v10, %v3533_v59  ;;  %v3542_v31 = vcombine.high %v3518_v10, %v3533_v59 }
 0x6bf   : > { %v3584_v3 = vrot.slane %v3577_v15, %v6186_v53  ;;  %v3592_v0 = vrot.slane %v4721_v49, %v6186_v53  ;;  %v3593_v7 = vcombine.low %v3499_v14, %v3506_v19  ;;  %v4722_v29 = vcombine.high %v3499_v14, %v3506_v19  ;;  %v5139_v49 = vld [vmem:[#allocation14 + $0x34] ss:$8 sps:$4 sm:$0xff]  }
 0x6c0   : > { %v3549_v20 = vrot.slane %v3541_v61, %v6197_v1  ;;  %v3556_v26 = vrot.slane %v3542_v31, %v6197_v1  ;;  %v3557_v35 = vcombine.low %v3525_v45, %v3540_v11  ;;  %v3558_v54 = vcombine.high %v3525_v45, %v3540_v11  ;;  %v5137_v45 = vld [vmem:[#allocation14 + $0x30] ss:$8 sps:$4 sm:$0xff]   ;;  %3898 = vmatprep.subr.bf16.mxu1 %v5139_v49  ;;  %v5142_v11 = vld [vmem:[#allocation14 + $0x24] ss:$8 sps:$4 sm:$0xff]   ;;  %v5140_v61 = vld [vmem:[#allocation14 + $0x20] ss:$8 sps:$4 sm:$0xff]  }
 0x6c1   : > { %v3600_v60 = vrot.slane %v3593_v7, %v6186_v53  ;;  %v3608_v56 = vrot.slane %v4722_v29, %v6186_v53  ;;  %v3609_v63 = vcombine.low %v3584_v3, %v3592_v0  ;;  %3899 = vmatpush1.bf16.msra.mxu1 %v5137_v45  ;;  %v5145_v31 = vld [vmem:[#allocation14 + $0x14] ss:$8 sps:$4 sm:$0xff]   ;;  %v5143_v3 = vld [vmem:[#allocation14 + $0x10] ss:$8 sps:$4 sm:$0xff]   ;;  %v5148_v0 = vld [vmem:[#allocation14 + $0x4] ss:$8 sps:$4 sm:$0xff]  }
 0x6c2   : > { %v3565_v21 = vrot.slane %v3557_v35, %v6197_v1  ;;  %v3572_v48 = vrot.slane %v3558_v54, %v6197_v1  ;;  %v3627_v50 = vcombine.low %v3549_v20, %v3556_v26  ;;  %v4723_v40 = vcombine.high %v3549_v20, %v3556_v26  ;;  %3900 = vmatprep.subr.bf16.mxu1 %v5142_v11  ;;  %v5146_v7 = vld [vmem:[#allocation14] ss:$8 sps:$4 sm:$0xff]   ;;  %v5151_v29 = vld [vmem:[#allocation16 + $0x34] ss:$8 sps:$4 sm:$0xff]  }
 0x6c3   : > { %v3617_v47 = vcombine.low %v3600_v60, %v3608_v56  ;;  %v3616_v24 = vrot.slane %v3609_v63, %v6197_v1 }
 0x6c4   : > { %v3634_v9 = vrot.slane %v3627_v50, %v6186_v53  ;;  %v3642_v43 = vrot.slane %v4723_v40, %v6186_v53  ;;  %v3643_v52 = vcombine.low %v3565_v21, %v3572_v48  ;;  %v4724_v62 = vcombine.high %v3565_v21, %v3572_v48  ;;  %v4733_v48 = vld [vmem:[%s7352_s1] ss:$0 sm:$0xff]  ;;  %s7356_s1 = sld [smem:[#allocation40_spill]] }
 0x6c5   : > { %v3624_v41 = vrot.slane %v3617_v47, %v6197_v1  ;;  %3901 = vmatpush1.bf16.msra.mxu1 %v5140_v61 }
 0x6c6   : > { %v3650_v46 = vrot.slane %v3643_v52, %v6186_v53  ;;  %v3658_v33 = vrot.slane %v4724_v62, %v6186_v53  ;;  %v3659_v23 = vcombine.low %v3634_v9, %v3642_v43  ;;  %3902 = vmatprep.subr.bf16.mxu1 %v5145_v31  ;;  %v4734_v9 = vld [vmem:[%s7353_s19] ss:$0 sm:$0xff] }
 0x6c7   : > { %v3625_v51 = vcombine.low %v3616_v24, %v3624_v41  ;;  %v3626_v6 = vcombine.high %v3616_v24, %v3624_v41  ;;  %v5149_v24 = vld [vmem:[#allocation16 + $0x30] ss:$8 sps:$4 sm:$0xff]  }
 0x6c8   : > { %v3667_v39 = vcombine.low %v3650_v46, %v3658_v33  ;;  %v3666_v2 = vrot.slane %v3659_v23, %v6197_v1  ;;  %v5154_v46 = vld [vmem:[#allocation16 + $0x24] ss:$8 sps:$4 sm:$0xff]   ;;  %v5152_v33 = vld [vmem:[#allocation16 + $0x20] ss:$8 sps:$4 sm:$0xff]   ;;  %v5157_v23 = vld [vmem:[#allocation16 + $0x14] ss:$8 sps:$4 sm:$0xff]  }
 0x6c9   : > { %3903 = vmatpush1.bf16.msra.mxu1 %v5143_v3 }
 0x6ca   : > { %v3674_v22 = vrot.slane %v3667_v39, %v6197_v1  ;;  %3904 = vmatprep.subr.bf16.mxu1 %v5148_v0  ;;  %v5158_v39 = vld [vmem:[#allocation16] ss:$8 sps:$4 sm:$0xff]   ;;  %p7359_p0 = scmp.ne.s32.totalorder %s7356_s1, 0 }
 0x6cc   : > { %v3676_v34 = vcombine.high %v3666_v2, %v3674_v22  ;;  %v3675_v5 = vcombine.low %v3666_v2, %v3674_v22  ;;  %v5161_v2 = vld [vmem:[%s7354_s23 + $0x78] sm:$0xff]   ;;  %v5163_v22 = vld [vmem:[%s7354_s23 + $0x70] sm:$0xff]  }
 0x6cd   : > { %3905 = vmatpush1.bf16.msra.mxu1 %v5146_v7  ;;  %4808 = vmatprep.subr.bf16.mxu0 %v5161_v2 }
 0x6ce   : > { %v5108_v18 = vpack.i.bf16 %v3676_v34, %v3626_v6  ;;  %3989 = vmatprep.subr.bf16.mxu1 %v5151_v29  ;;  %v5164_v6 = vld [vmem:[%s7354_s23 + $0x30] sm:$0xff]   ;;  %v5165_v34 = vld [vmem:[%s7354_s23 + $0x68] sm:$0xff]  }
 0x6d0   : > { %5109 = vrot.lane.b32.xlu0 %v5108_v18, %s5669_s3  ;;  %v5167_v18 = vld [vmem:[%s7354_s23 + $0x60] sm:$0xff]   ;;  %s4658_s3 = sshll.u32 %s883_s5, 4 }
 0x6d1   : > { %s885_s12 = scalar_lea.vmem [#allocation17], %s4658_s3 }
 0x6d2   : > { %s4325_s19 = sshll.u32 %s885_s12, 4  ;;  %s7130_s19 = int_to_ptr.vmem [resolvable:$true] %s4325_s19 }
 0x6d3   : > { %s5491_s10 = scalar_lea.vmem %s7130_s19, 256  ;;  %p5498_p4 = scmp.lt.s32.totalorder %s7130_s19, %s5496_s20 }
 0x6d4   : > { %p5492_p9 = scmp.ne.s32.totalorder %s7130_s19, %s5491_s10  ;;  %p5499_p1 = scmp.lt.s32.totalorder %s5497_s4, %s5491_s10 }
 0x6d6   : > { %p5493_p5 = pnand %p5492_p9, %p7359_p0  ;;  %p5500_p10 = por %p5499_p1, %p5498_p4 }
 0x6d8   : > { %p5494_p11 = pneg %p5493_p5 }
 0x6da   : > { %p5501_p6 = pnand %p5500_p10, %p5494_p11 }
 0x742   : > { %v5110_v37 = vpop.permute.xlu0 %5109 }
 0x743   : > { %v5112_v53 = vunpack.i.h.bf16 %v5110_v37  ;;  %v5111_v36 = vunpack.i.l.bf16 %v5110_v37  ;;  %v5168_v37 = vld [vmem:[%s7354_s23 + $0x20] sm:$0xff]  }
 0x745   : > { %v3685_v12 = vsel %vm982_vm3, %v3625_v51, %v5111_v36  ;;  %v3686_v57 = vsel %vm982_vm3, %v3675_v5, %v5112_v53  ;;  %v5160_v51 = vld [vmem:[#allocation16 + $0x4] ss:$8 sps:$4 sm:$0xff]   ;;  %v5169_v53 = vld [vmem:[%s7354_s23 + $0x58] sm:$0xff]  }
 0x746   : > { %v3687_v38 = vpack.c.bf16 %v3686_v57, %v3685_v12  ;;  %v5166_v5 = vld [vmem:[%s7354_s23 + $0x28] sm:$0xff]   ;;  %v5170_v36 = vld [vmem:[%s7354_s23 + $0x18] sm:$0xff]   ;;  %v5171_v12 = vld [vmem:[%s7354_s23 + $0x50] sm:$0xff]  }
 0x747   : > { %v5172_v57 = vld [vmem:[%s7354_s23 + $0x10] sm:$0xff]  }
 0x748   : > { %4899 = vmatmul.mubr.bf16.vlgmr.msra.gmra.mxu0 %v3687_v38  ;;  %v5173_v38 = vld [vmem:[%s7354_s23 + $0x48] sm:$0xff]  }
 0x808   : > { %v3786_v8 = vpop.f32.mrf.mxu0 }
 0x809   : > { %v7006_v42 = vadd.f32 %v3786_v8, %v6144_v16  ;;  %v5174_v8 = vld [vmem:[%s7354_s23 + $0x8] sm:$0xff]  }
 0x80a   : > { %v4900_v1 = vpop.f32.mrf.mxu0 }
 0x80b   : > { %v3793_v4 = vsel %vm982_vm3, %v7006_v42, 0.0  ;;  %v5175_v1 = vld [vmem:[%s7354_s23 + $0x40] sm:$0xff]  }
 0x80c   : > { %3794 = vadd.xlane.f32.xlu1 %v3793_v4  ;;  %v3789_v58 = vpop.f32.mrf.mxu0  ;;  %v5176_v4 = vld [vmem:[%s7354_s23] sm:$0xff]  }
 0x80d   : > { %v7011_v27 = vadd.f32 %v3789_v58, %v6146_v17 }
 0x80e   : > { %v4901_v25 = vpop.f32.mrf.mxu0 }
 0x80f   : > { %v3796_v32 = vsel %vm982_vm3, %v7011_v27, 0.0 }
 0x810   : > { %3797 = vadd.xlane.f32.xlu0 %v3796_v32 }
 0x895   : > { %v3795_v10 = vpop.xlane.xlu1 %3794 }
 0x896   : > { %v3800_v30 = vmul.f32 0.015625, %v3795_v10 }
 0x898   : > { %v3802_v59 = vsub.f32 %v7006_v42, %v3800_v30 }
 0x899   : > { %v3798_v16 = vpop.xlane.xlu0 %3797 }
 0x89a   : > { %v3801_v55 = vmul.f32 0.015625, %v3798_v16  ;;  %v3804_v44 = vmul.f32 %v3802_v59, %v3802_v59 }
 0x89c   : > { %v3803_v14 = vsub.f32 %v7011_v27, %v3801_v55  ;;  %v3806_v19 = vsel %vm982_vm3, %v3804_v44, 0.0 }
 0x89d   : > { %3807 = vadd.xlane.f32.xlu0 %v3806_v19 }
 0x89e   : > { %v3805_v15 = vmul.f32 %v3803_v14, %v3803_v14 }
 0x8a0   : > { %v3809_v17 = vsel %vm982_vm3, %v3805_v15, 0.0 }
 0x8a1   : > { %3810 = vadd.xlane.f32.xlu1 %v3809_v17 }
 0x926   : > { %v3808_v20 = vpop.xlane.xlu0 %3807 }
 0x927   : > { %v3812_v26 = vmul.f32 0.015625, %v3808_v20 }
 0x929   : > { %v3814_v35 = vadd.f32 1e-05, %v3812_v26 }
 0x92a   : > { %v3811_v54 = vpop.xlane.xlu1 %3810 }
 0x92b   : > { %5225 = vrsqrt.f32 %v3814_v35  ;;  %v3813_v60 = vmul.f32 0.015625, %v3811_v54 }
 0x92d   : > { %v3815_v56 = vadd.f32 1e-05, %v3813_v60 }
 0x92f   : > { %5227 = vrsqrt.f32 %v3815_v56 }
 0x938   : > { %v5226_v63 = vpop.eup %5225 }
 0x939   : > { %v3818_v21 = vmul.f32 %v5226_v63, %v3802_v59 }
 0x93b   : > { %v3827_v47 = vmul.f32 %v4733_v48, %v3818_v21 }
 0x93c   : > { %v5228_v50 = vpop.eup %5227 }
 0x93d   : > { %v3819_v40 = vmul.f32 %v5228_v50, %v3803_v14  ;;  %v3836_v52 = vadd.f32 %v4734_v9, %v3827_v47 }
 0x93f   : > { %v3828_v43 = vmul.f32 %v4733_v48, %v3819_v40 }
 0x941   : > { %v3837_v62 = vadd.f32 %v4734_v9, %v3828_v43 }
 0x943   : > { %v3838_v41 = vpack.c.bf16 %v3837_v62, %v3836_v52 }
 0x945   : > { %4743 = vmatmul.mubr.msk.bf16.vlgmr.msra.gmra.mxu1 %vm982_vm3, %v3838_v41 }
 0x946   : > { %3990 = vmatpush1.bf16.msra.mxu1 %v5149_v24  ;;  %4013 = vmatprep.mubr.bf16.mxu1 %v7350_v28  ;;  %v5162_v28 = vld [vmem:[%s7354_s23 + $0x38] sm:$0xff]  }
 0x947   : > { %3991 = vmatprep.subr.bf16.mxu1 %v5154_v46  ;;  %4809 = vmatpush3.bf16.msra.mxu0 %v5162_v28 }
 0x948   : > { %4810 = vmatprep.subr.bf16.mxu0 %v5163_v22 }
 0x94a   : > { %3992 = vmatpush1.bf16.msra.mxu1 %v5152_v33 }
 0x94b   : > { %3993 = vmatprep.subr.bf16.mxu1 %v5157_v23  ;;  %4811 = vmatpush3.bf16.msra.mxu0 %v5164_v6 }
 0x94c   : > { %4812 = vmatprep.subr.bf16.mxu0 %v5165_v34 }
 0x94e   : > { %3994 = vmatpush1.bf16.msra.mxu1 %v5155_v13 }
 0x94f   : > { %3995 = vmatprep.subr.bf16.mxu1 %v5160_v51  ;;  %4813 = vmatpush3.bf16.msra.mxu0 %v5166_v5 }
 0x950   : > { %4814 = vmatprep.subr.bf16.mxu0 %v5167_v18 }
 0x952   : > { %3996 = vmatpush1.bf16.msra.mxu1 %v5158_v39 }
 0x953   : > { %4815 = vmatpush3.bf16.msra.mxu0 %v5168_v37 }
 0x954   : > { %4816 = vmatprep.subr.bf16.mxu0 %v5169_v53 }
 0x955   : > { %4752 = vmatmul.mubr.msk.bf16.vlgmr.msra.gmra.mxu1 %vm982_vm3, %v3838_v41 }
 0x957   : > { %4817 = vmatpush3.bf16.msra.mxu0 %v5170_v36 }
 0x958   : > { %4818 = vmatprep.subr.bf16.mxu0 %v5171_v12 }
 0x95b   : > { %4819 = vmatpush3.bf16.msra.mxu0 %v5172_v57 }
 0x95c   : > { %4820 = vmatprep.subr.bf16.mxu0 %v5173_v38 }
 0x95f   : > { %4821 = vmatpush3.bf16.msra.mxu0 %v5174_v8 }
 0x960   : > { %4822 = vmatprep.subr.bf16.mxu0 %v5175_v1 }
 0x963   : > { %4823 = vmatpush3.bf16.msra.mxu0 %v5176_v4 }
 0xa05   : > { %v7076_v58 = vpop.f32.mrf.mxu1 }
 0xa07   : > { %v7078_v25 = vpop.f32.mrf.mxu1 }
 0xa09   : > { %v7080_v32 = vpop.f32.mrf.mxu1 }
 0xa0b   : > { %v7082_v10 = vpop.f32.mrf.mxu1 }
 0xa15   : > { %v7084_v30 = vpop.f32.mrf.mxu1 }
 0xa16   : > { %v7087_v59 = vmul.f32 0.70710677, %v7084_v30 }
 0xa17   : > { %v7089_v16 = vpop.f32.mrf.mxu1 }
 0xa18   : > { %v4040_v55 = vand.u32 2147483647, %v7087_v59  ;;  %v7093_v44 = vmul.f32 0.70710677, %v7089_v16  ;;  %vm4032_vm8 = vcmp.ge.f32.partialorder %v7087_v59, 0.0 }
 0xa19   : > { %v7095_v14 = vpop.f32.mrf.mxu1 }
 0xa1a   : > { %v4044_v19 = vmul.f32 0.3275911, %v4040_v55  ;;  %v4041_v15 = vand.u32 2147483647, %v7093_v44  ;;  %v7099_v17 = vmul.f32 0.70710677, %v7095_v14 }
 0xa1b   : > { %v7101_v49 = vpop.f32.mrf.mxu1  ;;  %v4096_v26 = vsub.f32 0.0, %v4040_v55  ;;  %vm4033_vm9 = vcmp.ge.f32.partialorder %v7093_v44, 0.0 }
 0xa1c   : > { %v4048_v45 = vadd.f32 1.0, %v4044_v19  ;;  %v4045_v11 = vmul.f32 0.3275911, %v4041_v15  ;;  %v4042_v61 = vand.u32 2147483647, %v7099_v17  ;;  %v4097_v54 = vsub.f32 0.0, %v4041_v15 }
 0xa1d   : > { %v7105_v31 = vmul.f32 0.70710677, %v7101_v49  ;;  %v4100_v60 = vmul.f32 %v4096_v26, %v4040_v55  ;;  %vm4034_vm10 = vcmp.ge.f32.partialorder %v7099_v17, 0.0 }
 0xa1e   : > { %5229 = vrcp.f32 %v4048_v45  ;;  %v4049_v3 = vadd.f32 1.0, %v4045_v11  ;;  %v4046_v0 = vmul.f32 0.3275911, %v4042_v61  ;;  %v4098_v56 = vsub.f32 0.0, %v4042_v61 }
 0xa1f   : > { %v4043_v7 = vand.u32 2147483647, %v7105_v31  ;;  %v4101_v21 = vmul.f32 %v4097_v54, %v4041_v15  ;;  %v4104_v50 = vmul.f32 1.442695, %v4100_v60  ;;  %vm4035_vm11 = vcmp.ge.f32.partialorder %v7105_v31, 0.0 }
 0xa20   : > { %5231 = vrcp.f32 %v4049_v3  ;;  %v4050_v29 = vadd.f32 1.0, %v4046_v0  ;;  %v4102_v47 = vmul.f32 %v4098_v56, %v4042_v61  ;;  %v4027_v31 = vmul.f32 0.5, %v7101_v49 }
 0xa21   : > { %v4047_v20 = vmul.f32 0.3275911, %v4043_v7  ;;  %v4099_v40 = vsub.f32 0.0, %v4043_v7  ;;  %v4106_v62 = vmul.f32 1.442695, %v4101_v21 }
 0xa22   : > { %5233 = vrcp.f32 %v4050_v29  ;;  %v4108_v13 = vmul.f32 1.442695, %v4102_v47  ;;  %v5674_v47 = vmov -1.0  }
 0xa23   : > { %v4051_v35 = vadd.f32 1.0, %v4047_v20  ;;  %v4103_v46 = vmul.f32 %v4099_v40, %v4043_v7 }
 0xa25   : > { %5235 = vrcp.f32 %v4051_v35  ;;  %v4110_v34 = vmul.f32 1.442695, %v4103_v46 }
 0xa26   : > { %5237 = vpow2.f32 %v4104_v50 }
 0xa27   : > { %5239 = vpow2.f32 %v4106_v62 }
 0xa28   : > { %5241 = vpow2.f32 %v4108_v13 }
 0xa29   : > { %5243 = vpow2.f32 %v4110_v34 }
 0xa2b   : > { %v5230_v63 = vpop.eup %5229 }
 0xa2c   : > { %v4060_v48 = vmul.f32 1.0614054, %v5230_v63 }
 0xa2d   : > { %v5232_v9 = vpop.eup %5231 }
 0xa2e   : > { %v4064_v43 = vadd.f32 -1.4531521, %v4060_v48  ;;  %v4061_v52 = vmul.f32 1.0614054, %v5232_v9 }
 0xa2f   : > { %v5234_v24 = vpop.eup %5233 }
 0xa30   : > { %v4068_v41 = vmul.f32 %v5230_v63, %v4064_v43  ;;  %v4065_v33 = vadd.f32 -1.4531521, %v4061_v52  ;;  %v4062_v23 = vmul.f32 1.0614054, %v5234_v24  ;;  %v4036_v43 = vsel %vm4032_vm8, 1.0, %v5674_v47 }
 0xa31   : > { %v4037_v52 = vsel %vm4033_vm9, 1.0, %v5674_v47 }
 0xa32   : > { %v4072_v51 = vadd.f32 1.4214138, %v4068_v41  ;;  %v5236_v39 = vpop.eup %5235  ;;  %v4069_v2 = vmul.f32 %v5232_v9, %v4065_v33  ;;  %v4066_v28 = vadd.f32 -1.4531521, %v4062_v23  ;;  %v4038_v33 = vsel %vm4034_vm10, 1.0, %v5674_v47 }
 0xa33   : > { %v4063_v6 = vmul.f32 1.0614054, %v5236_v39  ;;  %v5238_v61 = vpop.eup %5237 }
 0xa34   : > { %v4076_v22 = vmul.f32 %v5230_v63, %v4072_v51  ;;  %v4073_v5 = vadd.f32 1.4214138, %v4069_v2  ;;  %v4070_v18 = vmul.f32 %v5234_v24, %v4066_v28  ;;  %v5240_v35 = vpop.eup %5239  ;;  %v4026_v2 = vmul.f32 0.5, %v7095_v14 }
 0xa35   : > { %v4067_v53 = vadd.f32 -1.4531521, %v4063_v6  ;;  %v5242_v48 = vpop.eup %5241  ;;  %v4039_v28 = vsel %vm4035_vm11, 1.0, %v5674_v47 }
 0xa36   : > { %v4080_v37 = vadd.f32 -0.28449672, %v4076_v22  ;;  %v4077_v36 = vmul.f32 %v5232_v9, %v4073_v5  ;;  %v4074_v12 = vadd.f32 1.4214138, %v4070_v18  ;;  %v5244_v62 = vpop.eup %5243  ;;  %v4025_v22 = vmul.f32 0.5, %v7089_v16 }
 0xa37   : > { %v4071_v38 = vmul.f32 %v5236_v39, %v4067_v53 }
 0xa38   : > { %v4084_v57 = vmul.f32 %v5230_v63, %v4080_v37  ;;  %v4081_v8 = vadd.f32 -0.28449672, %v4077_v36  ;;  %v4078_v1 = vmul.f32 %v5234_v24, %v4074_v12 }
 0xa39   : > { %v4075_v55 = vadd.f32 1.4214138, %v4071_v38 }
 0xa3a   : > { %v4088_v4 = vadd.f32 0.2548296, %v4084_v57  ;;  %v4085_v19 = vmul.f32 %v5232_v9, %v4081_v8  ;;  %v4082_v15 = vadd.f32 -0.28449672, %v4078_v1 }
 0xa3b   : > { %v4079_v11 = vmul.f32 %v5236_v39, %v4075_v55 }
 0xa3c   : > { %v4092_v45 = vmul.f32 %v5230_v63, %v4088_v4  ;;  %v4089_v3 = vadd.f32 0.2548296, %v4085_v19  ;;  %v4086_v0 = vmul.f32 %v5234_v24, %v4082_v15 }
 0xa3d   : > { %v4083_v29 = vadd.f32 -0.28449672, %v4079_v11 }
 0xa3e   : > { %v4112_v7 = vmul.f32 %v5238_v61, %v4092_v45  ;;  %v4093_v20 = vmul.f32 %v5232_v9, %v4089_v3  ;;  %v4090_v26 = vadd.f32 0.2548296, %v4086_v0 }
 0xa3f   : > { %v4087_v54 = vmul.f32 %v5236_v39, %v4083_v29 }
 0xa40   : > { %v4116_v60 = vsub.f32 1.0, %v4112_v7  ;;  %v4113_v56 = vmul.f32 %v5240_v35, %v4093_v20  ;;  %v4094_v21 = vmul.f32 %v5234_v24, %v4090_v26 }
 0xa41   : > { %v4091_v50 = vadd.f32 0.2548296, %v4087_v54 }
 0xa42   : > { %v4117_v63 = vsub.f32 1.0, %v4113_v56  ;;  %v4114_v40 = vmul.f32 %v5242_v48, %v4094_v21  ;;  %v4120_v41 = vmul.f32 %v4116_v60, %v4036_v43 }
 0xa43   : > { %v4095_v9 = vmul.f32 %v5236_v39, %v4091_v50  ;;  %v4024_v39 = vmul.f32 0.5, %v7084_v30 }
 0xa44   : > { %v4121_v46 = vmul.f32 %v4117_v63, %v4037_v52  ;;  %v4118_v59 = vsub.f32 1.0, %v4114_v40  ;;  %v4124_v51 = vadd.f32 1.0, %v4120_v41 }
 0xa45   : > { %v4115_v44 = vmul.f32 %v5244_v62, %v4095_v9 }
 0xa46   : > { %v4122_v23 = vmul.f32 %v4118_v59, %v4038_v33  ;;  %v4125_v24 = vadd.f32 1.0, %v4121_v46  ;;  %v4128_v37 = vmul.f32 %v4124_v51, %v4024_v39 }
 0xa47   : > { %v4119_v13 = vsub.f32 1.0, %v4115_v44 }
 0xa48   : > { %v4126_v17 = vadd.f32 1.0, %v4122_v23  ;;  %v4129_v5 = vmul.f32 %v4125_v24, %v4025_v22  ;;  %v4132_v16 = vmul.f32 %v4128_v37, %v7076_v58 }
 0xa49   : > { %v4123_v6 = vmul.f32 %v4119_v13, %v4039_v28 }
 0xa4a   : > { %v4130_v34 = vmul.f32 %v4126_v17, %v4026_v2  ;;  %v4133_v14 = vmul.f32 %v4129_v5, %v7078_v25 }
 0xa4b   : > { %v4127_v18 = vadd.f32 1.0, %v4123_v6 }
 0xa4c   : > { %v4134_v36 = vmul.f32 %v4130_v34, %v7080_v32 }
 0xa4d   : > { %v4131_v53 = vmul.f32 %v4127_v18, %v4027_v31 }
 0xa4e   : > { %v4136_v38 = vpack.c.bf16 %v4134_v36, %v4132_v16 }
 0xa4f   : > { %v4135_v12 = vmul.f32 %v4131_v53, %v7082_v10 }
 0xa51   : > { %v4137_v57 = vpack.c.bf16 %v4135_v12, %v4133_v14 }
 0xa53   : > { %4298 = vmatprep.mubr.bf16.mxu0 %v4137_v57 }
 0xa54   : > { %4299 = vmatmul.mubr.bf16.vlgmr.msra.gmra.mxu0 %v4136_v38 }
 0xb14   : > { %v4824_v30 = vpop.f32.mrf.mxu0 }
 0xb16   : > { %v4825_v49 = vpop.f32.mrf.mxu0 }
 0xb17   : > { %v4826_v8 = vadd.f32 %v4825_v49, %v4824_v30 }
 0xb18   : > { %v4827_v32 = vpop.f32.mrf.mxu0 }
 0xb19   : > { %v4301_v25 = vadd.f32 %v4826_v8, %v7006_v42 }
 0xb1a   : > { %v4828_v58 = vpop.f32.mrf.mxu0 }
 0xb1b   : > { %4307 = vst.msk [vmem:[%s885_s12] sm:$0xff] %vm982_vm3, %v4301_v25  ;;  %v4829_v10 = vadd.f32 %v4828_v58, %v4827_v32 }
 0xb1d   : > { %v4304_v1 = vadd.f32 %v4829_v10, %v7011_v27 }
 0xb1f   : > { %4308 = vst.msk [vmem:[%s885_s12 + $0x8] sm:$0xff] %vm982_vm3, %v4304_v1 }
 0xb20   : > { %5504 = shalt.err (!%p5501_p6)
}
 0xb21   : > { %s5505_s27 = scalar_lea.hbm %s7128_s8, 256  ;;  %s5509_s5 = scalar_lea.hbm %s7358_s17, 1536 }
 0xb22   : > { %p5506_p3 = scmp.ne.s32.totalorder %s7128_s8, %s5505_s27  ;;  %p5510_p13 = scmp.lt.s32.totalorder %s7128_s8, %s7358_s17 }
 0xb23   : > { %p5511_p7 = scmp.lt.s32.totalorder %s5509_s5, %s5505_s27 }
 0xb24   : > { %p5507_p8 = pnand %p5506_p3, %p7359_p0 }
 0xb25   : > { %p5512_p12 = por %p5511_p7, %p5510_p13 }
 0xb26   : > { %p5508_p2 = pneg %p5507_p8 }
 0xb28   : > { %p5513_p9 = pnand %p5512_p12, %p5508_p2 }
 0xb2a   : > { %5516 = shalt.err (!%p5513_p9)
}
 0xb2b   : > { %s5676_s3 = smov 128   ;;  %s5677_s29 = smov 8  }
 0xb2c   : > { %4931 = dma.vmem_to_hbm [thread:$0]  (%p7359_p0), %s7130_s19, 256, %s7128_s8, %s7134_s21, %s5676_s3, %s5676_s3, %s5677_s29  }
 0xb2d PF: > { %p4976_p5 = scmp.ge.s32.totalorder %s5651_s22, 2  ;;  %s4340_s28 = sand.u32 1, %s5599_s24  }
 0xb2e   : > { %p7360_p11 = scmp.ne.s32.totalorder %s7315_s13, 0  ;;  %s4341_s12 = scalar_lea.sflag [#allocation4], %s4340_s28 }
 0xb30   : > { %p4963_p4 = pnand %p4976_p5, %p7360_p11 }
 0xb32   : > { %p4964_p1 = pneg %p4963_p4 }
 0xb34   : > { %5594 = dma.done.wait (%p4964_p1), %s4341_s12, 256  }
 0xb35   : > { %5596 = vsyncadd (%p4964_p1), %s4341_s12, 4294967040  ;;  %s41_s22 = sadd.s32 1, %s5651_s22   ;;  %s7362_s1 = sld [smem:[#allocation42_spill]] }
 0xb36   : > { %p7162_p10 = scmp.ge.s32.totalorder %s41_s22, 8   ;;  %s7363_s27 = sld [smem:[#allocation24_spill]] }
 0xb37   : > { %s7364_s28 = sld [smem:[#allocation25_spill]]  ;;  %s7372_s24 = smov %s5603_s25 }
 0xb38   : > { %s7365_s29 = sld [smem:[#allocation39_spill]]  ;;  %s7373_s25 = smov %s5607_s26 }
 0xb39   : > { %s7366_s0 = sld [smem:[#allocation26_spill]]  ;;  %s7375_s30 = smov %s5631_s18 }
 0xb3a   : > { %s7367_s13 = sld [smem:[#allocation41_spill]] }
 0xb3b   : > { %s7368_s19 = sld [smem:[#allocation29_spill]]  ;;  %s7374_s26 = smov %s7362_s1 }
 0xb3c   : > { %s7369_s8 = sld [smem:[#allocation30_spill]] }
 0xb3d   : > { %s7370_s20 = sld [smem:[#allocation36_spill]] }
 0xb3e   : > { %s7371_s21 = sld [smem:[#allocation38_spill]]  ;;  %40 = sbr.rel (!%p7162_p10) target bundleno = 34 (0x22), region = 203 }
 0xb40   : > { %s7376_s18 = smov %s7367_s13 }
 0xb42   : > { %s7377_s1 = smov %s7369_s8 }
 0xb43   :  { %4346 = vsyncpa [#allocation3], 1 }
 0xb44   :  { %4348 = vsyncpa [#allocation3 + $0x1], 1 }
 0xb45   :  { %4349 = vsyncpa [#allocation6], 1 }
 0xb46   :  { %4351 = vsyncpa [#allocation6 + $0x1], 1 }
 0xb47   :  { %4352 = vsyncpa [#allocation9], 1 }
 0xb48   :  { %4354 = vsyncpa [#allocation9 + $0x1], 1 }
 0xb49   :  { %4355 = vsyncpa [#allocation12], 1 }
 0xb4a   :  { %4356 = vsyncpa [#allocation15], 1 }
 0xb4b   :  { %4357 = vsyncpa [#allocation4], 1 }
 0xb4c   :  { %4359 = vsyncpa [#allocation4 + $0x1], 1 }

// kernel: tpu_custom_call.1
= control target key start
LH: loop header
LB: loop body
LE: loop exit
PB: predicated region body
PF: predicated region fallthrough
CT: control target
= control target key end

     0   :  { %s7209_s0 = inlined_call_operand.hbm [shape: f32[2,48,64], index: 0, kind: input, shape index: {}]   ;;  %s7210_s1 = inlined_call_operand.hbm [shape: f32[2,48,64], index: 1, kind: input, shape index: {}]   ;;  %s7211_s2 = inlined_call_operand.hbm [shape: f32[2,48,64], index: 2, kind: input, shape index: {}]   ;;  %s7212_s3 = inlined_call_operand.hbm [shape: f32[48,64], index: 3, kind: input, shape index: {}]   ;;  %s7213_s4 = inlined_call_operand.hbm [shape: f32[48,64], index: 4, kind: input, shape index: {}]   ;;  %s7214_s5 = inlined_call_operand.vmem [shape: f32[3,48,64], index: 5, kind: input, shape index: {}]   ;;  %s7215_s6 = inlined_call_operand.vmem [shape: f32[3,48,64], index: 6, kind: input, shape index: {}]   ;;  %s7216_s7 = inlined_call_operand.hbm [shape: bf16[64,128], index: 7, kind: input, shape index: {}]   ;;  %s7217_s8 = inlined_call_operand.hbm [shape: bf16[64,256], index: 8, kind: input, shape index: {}]   ;;  %s7218_s9 = inlined_call_operand.vmem [shape: f32[1,1,64], index: 9, kind: input, shape index: {}]   ;;  %s7219_s10 = inlined_call_operand.vmem [shape: f32[1,1,64], index: 10, kind: input, shape index: {}]   ;;  %s7220_s11 = inlined_call_operand.vmem [shape: bf16[128,64], index: 11, kind: input, shape index: {}]   ;;  %s7221_s12 = inlined_call_operand.vmem [shape: f32[1,64], index: 12, kind: input, shape index: {}]   ;;  %s7222_s13 = inlined_call_operand.vmem [shape: f32[1,64], index: 13, kind: input, shape index: {}]   ;;  %s7223_s14 = inlined_call_operand.hbm [shape: bf16[64,256], index: 14, kind: input, shape index: {}]   ;;  %s7224_s15 = inlined_call_operand.hbm [shape: bf16[64,256], index: 15, kind: input, shape index: {}]   ;;  %s7225_s16 = inlined_call_operand.vmem [shape: bf16[256,64], index: 16, kind: input, shape index: {}]   ;;  %s7226_s17 = inlined_call_operand.hbm [shape: f32[2,48,64], index: 17, kind: output, shape index: {}]  }
   0x1   :  { %7265 = sst [smem:[#allocation43_spill]] %s7209_s0 }
   0x2   :  { %7266 = sst [smem:[#allocation44_spill]] %s7210_s1 }
   0x3   :  { %7267 = sst [smem:[#allocation45_spill]] %s7211_s2 }
   0x4   :  { %7268 = sst [smem:[#allocation46_spill]] %s7212_s3 }
   0x5   :  { %7269 = sst [smem:[#allocation47_spill]] %s7213_s4 }
   0x6   :  { %7270 = sst [smem:[#allocation48_spill]] %s7214_s5 }
   0x7   :  { %7271 = sst [smem:[#allocation49_spill]] %s7215_s6 }
   0x8   :  { %7272 = sst [smem:[#allocation50_spill]] %s7216_s7 }
   0x9   :  { %7273 = sst [smem:[#allocation51_spill]] %s7217_s8 }
   0xa   :  { %7274 = sst [smem:[#allocation52_spill]] %s7218_s9 }
   0xb   :  { %7275 = sst [smem:[#allocation53_spill]] %s7219_s10 }
   0xc   :  { %7276 = sst [smem:[#allocation54_spill]] %s7220_s11 }
   0xd   :  { %7277 = sst [smem:[#allocation55_spill]] %s7221_s12 }
   0xe   :  { %7278 = sst [smem:[#allocation56_spill]] %s7222_s13 }
   0xf   :  { %7279 = sst [smem:[#allocation57_spill]] %s7223_s14 }
  0x10   :  { %7280 = sst [smem:[#allocation58_spill]] %s7225_s16 }
  0x11   :  { %7281 = sst [smem:[#allocation59_spill]] %s7226_s17 }
  0x12   :  { %22 = vsyncpa [#allocation3], 0 }
  0x13   :  { %24 = vsyncpa [#allocation3 + $0x1], 0 }
  0x14   :  { %25 = vsyncpa [#allocation6], 0 }
  0x15   :  { %27 = vsyncpa [#allocation6 + $0x1], 0 }
  0x16   :  { %28 = vsyncpa [#allocation9], 0 }
  0x17   :  { %30 = vsyncpa [#allocation9 + $0x1], 0 }
  0x18   :  { %31 = vsyncpa [#allocation12], 0 }
  0x19   :  { %32 = vsyncpa [#allocation15], 0 }
  0x1a   :  { %33 = vsyncpa [#allocation4], 0 }
  0x1b   :  { %35 = vsyncpa [#allocation4 + $0x1], 0  ;;  %s5768_s24 = smov 0   ;;  %s5770_s25 = smov 0  }
  0x1c   :  { %s5772_s26 = smov 0   ;;  %s5774_s27 = smov 0  }
  0x1d   :  { %s5776_s28 = smov 0   ;;  %s5778_s29 = smov 0  }
  0x1e   :  { %s5780_s0 = smov 0   ;;  %s5782_s30 = smov 0  }
  0x1f   :  { %s5784_s18 = smov 0   ;;  %s5786_s19 = smov 0  }
  0x20   :  { %s5788_s1 = smov 0   ;;  %s5790_s20 = smov 0  }
  0x21   :  { %s5792_s21 = smov 0   ;;  %s5794_s22 = smov 0  }
  0x22 LB: > { %7282 = sst [smem:[#allocation24_spill]] %s5615_s28  ;;  %s5837_s23 = sadd.s32 4294967295, %s5651_s22   ;;  %s5651_s22 = sphi %s5794_s22, %s41_s22   ;;  %s5647_s21 = sphi %s5792_s21, %s7371_s21   ;;  %s5643_s20 = sphi %s5790_s20, %s7370_s20   ;;  %s5639_s1 = sphi %s5788_s1, %s7377_s1   ;;  %s5635_s19 = sphi %s5786_s19, %s7368_s19   ;;  %s5631_s18 = sphi %s5784_s18, %s7376_s18   ;;  %s5627_s30 = sphi %s5782_s30, %s7375_s30   ;;  %s5623_s0 = sphi %s5780_s0, %s7366_s0   ;;  %s5619_s29 = sphi %s5778_s29, %s7365_s29   ;;  %s5615_s28 = sphi %s5776_s28, %s7364_s28   ;;  %s5611_s27 = sphi %s5774_s27, %s7363_s27   ;;  %s5607_s26 = sphi %s5772_s26, %s7374_s26   ;;  %s5603_s25 = sphi %s5770_s25, %s7373_s25   ;;  %s5599_s24 = sphi %s5768_s24, %s7372_s24  }
  0x23   : > { %7283 = sst [smem:[#allocation25_spill]] %s5619_s29  ;;  %p85_p0 = scmp.ne.s32.totalorder %s5627_s30, %s5623_s0 }
  0x24   : > { %7284 = sst [smem:[#allocation26_spill]] %s5627_s30  ;;  %p7259_p1 = scmp.eq.s32.totalorder %s5837_s23, 0 }
  0x25   : > { %7285 = sst [smem:[#allocation27_spill]] %s5635_s19  ;;  %p4609_p3 = scmp.ge.s32.totalorder %s5651_s22, 1 }
  0x26   : > { %7286 = sst [smem:[#allocation28_spill]] %s5639_s1  ;;  %p518_p4 = scmp.lt.s32.totalorder %s5651_s22, 7 }
  0x27   : > { %7287 = sst [smem:[#allocation29_spill]] %s5643_s20  ;;  %p5846_p5 = por %p7259_p1, %p85_p0 }
  0x28   : > { %7288 = sst [smem:[#allocation30_spill]] %s5647_s21  ;;  %p5850_p6 = pnand %p4609_p3, %p518_p4 }
  0x29   : > { %7289 = sst [smem:[#allocation31_spill]] %s5837_s23  ;;  %s5653_s16 = smov [#allocation11]  }
  0x2a   : > { %s7290_s17 = scalar_select %p5846_p5, 1, 0 }
  0x2b   : > { %s7292_s1 = scalar_select %p5850_p6, 1, 0 }
  0x2c   : > { %7291 = sst [smem:[#allocation32_spill]] %s7290_s17  ;;  %s530_s13 = sshll.u32 %s5653_s16, 4  ;;  %s531_s13 = int_to_ptr.vmem [resolvable:$true] %s530_s13 }
  0x2d   : > { %7293 = sst [smem:[#allocation33_spill]] %s7292_s1  ;;  %p4933_p7 = pneg %p5850_p6 }
  0x2e   : > { %s5654_s12 = smov [#allocation14]   ;;  %s5256_s5 = scalar_lea.vmem %s531_s13, 512 }
  0x2f   : > { %p5858_p8 = pnand %p4933_p7, %p7259_p1  ;;  %s571_s11 = sshll.u32 %s5654_s12, 4  ;;  %s572_s11 = int_to_ptr.vmem [resolvable:$true] %s571_s11 }
  0x30   : > { %p5257_p10 = scmp.ne.s32.totalorder %s531_s13, %s5256_s5  ;;  %p5264_p13 = scmp.lt.s32.totalorder %s531_s13, %s531_s13 }
  0x31   : > { %p7240_p9 = pneg %p5858_p8  ;;  %p5265_p0 = scmp.lt.s32.totalorder %s5256_s5, %s5256_s5 }
  0x33   : > { %p5259_p11 = pnand %p5257_p10, %p7240_p9  ;;  %p5266_p3 = por %p5265_p0, %p5264_p13 }
  0x35   : > { %p5260_p12 = pneg %p5259_p11 }
  0x37   : > { %p5267_p4 = pnand %p5266_p3, %p5260_p12 }
  0x39   : > { %5270 = shalt.err (!%p5267_p4)
}
  0x3a   : > { %s5655_s16 = smov 64   ;;  %s5656_s6 = smov 4  }
  0x3b   : > { %s7295_s7 = sld [smem:[#allocation50_spill]]  ;;  %s5282_s10 = scalar_lea.vmem %s572_s11, 1024 }
  0x3c   : > { %p5283_p7 = scmp.ne.s32.totalorder %s572_s11, %s5282_s10  ;;  %p5290_p2 = scmp.lt.s32.totalorder %s572_s11, %s572_s11 }
  0x3d   : > { %p5291_p13 = scmp.lt.s32.totalorder %s5282_s10, %s5282_s10 }
  0x3e   : > { %p5285_p10 = pnand %p5283_p7, %p7240_p9 }
  0x3f   : > { %p5292_p12 = por %p5291_p13, %p5290_p2 }
  0x40   : > { %p5286_p11 = pneg %p5285_p10 }
  0x41   : > { %4936 = dma.hbm_to_vmem [thread:$0]  (!%p5858_p8), %s7295_s7, 512, %s531_s13, [#allocation12], %s5655_s16, %s5655_s16, %s5656_s6  }
  0x42   : > { %p5293_p0 = pnand %p5292_p12, %p5286_p11 }
  0x44   : > { %5296 = shalt.err (!%p5293_p0)
}
  0x45   : > { %s7231_s5 = smov 128   ;;  %s7233_s6 = smov 8  }
  0x46   : > { %s7296_s14 = sld [smem:[#allocation57_spill]]  ;;  %p79_p2 = scmp.ne.s32.totalorder %s5631_s18, %s5627_s30 }
  0x47   : > { %p80_p3 = scmp.eq.s32.totalorder %s5651_s22, 0  ;;  %p7241_p4 = scmp.lt.s32.totalorder %s5651_s22, 6 }
  0x48   : > { %s7235_s16 = sand.u32 1, %s5631_s18   ;;  %s7242_s7 = sand.u32 1, %s5651_s22  }
  0x49   : > { %p81_p7 = por %p80_p3, %p79_p2  ;;  %s5893_s12 = sshll.u32 %s7235_s16, 4 }
  0x4a   : > { %s5897_s19 = smul.u32 768, %s5647_s21  ;;  %s7299_s13 = sld [smem:[#allocation44_spill]] }
  0x4b   : > { %p5901_p10 = pnand %p7241_p4, %p81_p7  ;;  %s5912_s17 = scalar_lea.sflag [#allocation6], %s7242_s7 }
  0x4c   : > { %4942 = dma.hbm_to_vmem [thread:$0]  (!%p5858_p8), %s7296_s14, 1024, %s572_s11, [#allocation15], %s7231_s5, %s7231_s5, %s7233_s6  }
  0x4d   : > { %s7297_s9 = scalar_select %p5901_p10, 1, 0 }
  0x4e   : > { %s633_s14 = scalar_lea.vmem [#allocation5], %s5893_s12  ;;  %7300 = sst [smem:[#allocation35_spill]] %s5912_s17 }
  0x4f   : > { %7298 = sst [smem:[#allocation34_spill]] %s7297_s9  ;;  %s648_s16 = sshll.u32 %s633_s14, 4  ;;  %s649_s16 = int_to_ptr.vmem [resolvable:$true] %s648_s16 }
  0x50   : > { %s4375_s5 = scalar_lea.hbm %s7299_s13, %s5897_s19  ;;  %p7245_p11 = pneg %p5901_p10 }
  0x51   : > { %s4376_s6 = scalar_lea.hbm %s4375_s5, 256  ;;  %s5310_s30 = scalar_lea.vmem %s649_s16, 256 }
  0x52   : > { %p5311_p13 = scmp.ne.s32.totalorder %s649_s16, %s5310_s30  ;;  %s5659_s1 = smov [#allocation5]  }
  0x53   : > { %s5315_s11 = sshll.u32 %s5659_s1, 4  ;;  %s5316_s11 = int_to_ptr.vmem [resolvable:$false] %s5315_s11 }
  0x54   : > { %p5313_p12 = pnand %p5311_p13, %p7245_p11  ;;  %s5317_s10 = scalar_lea.vmem %s5316_s11, 512 }
  0x55   : > { %p5318_p2 = scmp.lt.s32.totalorder %s649_s16, %s5316_s11  ;;  %p5319_p7 = scmp.lt.s32.totalorder %s5317_s10, %s5310_s30 }
  0x56   : > { %p5314_p0 = pneg %p5313_p12 }
  0x57   : > { %p5320_p9 = por %p5319_p7, %p5318_p2 }
  0x59   : > { %p5321_p4 = pnand %p5320_p9, %p5314_p0 }
  0x5b   : > { %5324 = shalt.err (!%p5321_p4)
}
  0x5c   : > { %s7301_s14 = smov 8   ;;  %s7302_s5 = smov 128  }
  0x5d   : > { %4952 = dma.hbm_to_vmem [thread:$0]  (!%p5901_p10), %s4376_s6, 256, %s649_s16, %s5912_s17, %s7302_s5, %s7302_s5, %s7301_s14  }
  0x5e   : > { %s4572_s30 = sadd.s32 4294967294, %s5651_s22   ;;  %s50_s1 = sadd.s32 1, %s5643_s20 }
  0x5f   : > { %s53_s13 = sadd.s32 1, %s5647_s21  ;;  %p51_p9 = scmp.ge.s32.totalorder %s50_s1, 3 }
  0x60   : > { %s178_s11 = sadd.s32 1, %s5619_s29  ;;  %p185_p4 = scmp.ne.s32.totalorder %s5619_s29, %s5615_s28 }
  0x61   : > { %p191_p13 = scmp.ne.s32.totalorder %s5615_s28, %s5611_s27  ;;  %s7379_s1 = smov (%p51_p9, %s50_s1), 0 }
  0x62   : > { %7303 = sst [smem:[#allocation36_spill]] %s7379_s1  ;;  %s7381_s13 = smov (!%p51_p9, %s53_s13), %s5647_s21 }
  0x63   : > { %s175_s6 = ssub.s32 %s5643_s20, %s7379_s1  ;;  %p5940_p12 = por %p185_p4, %p80_p3 }
  0x64   : > { %p55_p0 = scmp.ge.s32.totalorder %s7381_s13, 2  ;;  %p176_p2 = scmp.eq.s32.totalorder %s175_s6, 0 }
  0x65   : > { %p5946_p7 = por %p191_p13, %p7259_p1  ;;  %s494_s10 = sadd.s32 1, %s5607_s26 }
  0x66   : > { %s7383_s13 = smov (%p55_p0, %s7381_s13), 0  ;;  %p504_p3 = scmp.ne.s32.totalorder %s5607_s26, %s5603_s25 }
  0x67   : > { %s7305_s27 = scalar_select %p5946_p7, 1, 0 }
  0x68   : > { %7307 = sst [smem:[#allocation38_spill]] %s7383_s13  ;;  %s67_s1 = ssub.s32 %s5647_s21, %s7383_s13 }
  0x69   : > { %7306 = sst [smem:[#allocation37_spill]] %s7305_s27  ;;  %p70_p9 = scmp.eq.s32.totalorder %s67_s1, 0 }
  0x6a   : > { %s5954_s7 = scalar_select %p176_p2, %s5619_s29, %s178_s11  }
  0x6b   : > { %s491_s28 = sor.u32 %s175_s6, %s67_s1  ;;  %p7309_p11 = scmp.eq.s32.totalorder %s5837_s23, 5 }
  0x6c   : > { %7308 = sst [smem:[#allocation39_spill]] %s5954_s7  ;;  %p492_p4 = scmp.eq.s32.totalorder %s491_s28, 0 }
  0x6d   : > { %p5962_p5 = por %p7309_p11, %p504_p3  ;;  %s7312_s27 = sadd.s32 1, %s5631_s18 }
  0x6e   : > { %s5969_s2 = scalar_select %p70_p9, %s5631_s18, %s7312_s27  }
  0x6f   : > { %s7310_s17 = scalar_select %p5962_p5, 1, 0 }
  0x70   : > { %7313 = sst [smem:[#allocation41_spill]] %s5969_s2  ;;  %p510_p13 = scmp.ne.s32.totalorder %s5603_s25, %s5599_s24 }
  0x71   : > { %7311 = sst [smem:[#allocation40_spill]] %s7310_s17  ;;  %p511_p0 = scmp.eq.s32.totalorder %s4572_s30, 5 }
  0x72   : > { %s5972_s9 = scalar_select %p492_p4, %s5607_s26, %s494_s10  }
  0x73   : > { %s689_s11 = sand.u32 1, %s5619_s29   ;;  %p5977_p2 = por %p511_p0, %p510_p13 }
  0x74   : > { %7314 = sst [smem:[#allocation42_spill]] %s5972_s9  ;;  %s4642_s1 = sshll.u32 %s689_s11, 4 }
  0x75   : > { %s7315_s13 = scalar_select %p5977_p2, 1, 0 }
  0x76   : > { %s4776_s28 = sshll.u32 %s5643_s20, 8  ;;  %s7316_s3 = sld [smem:[#allocation46_spill]] }
  0x77   : > { %s691_s17 = scalar_lea.vmem [#allocation8], %s4642_s1  ;;  %p7317_p11 = scmp.lt.s32.totalorder %s5651_s22, 6 }
  0x78   : > { %s698_s23 = sshll.u32 %s691_s17, 4  ;;  %s7319_s4 = sld [smem:[#allocation47_spill]]  ;;  %s699_s23 = int_to_ptr.vmem [resolvable:$true] %s698_s23 }
  0x79   : > { %p5989_p3 = pnand %p7317_p11, %p5940_p12  ;;  %s712_s20 = scalar_lea.vmem [#allocation10], %s4642_s1 }
  0x7a   : > { %s719_s2 = sshll.u32 %s712_s20, 4  ;;  %s7320_s21 = sand.u32 1, %s5651_s22   ;;  %s6013_s2 = int_to_ptr.vmem [resolvable:$true] %s719_s2 }
  0x7b   : > { %s6000_s6 = scalar_lea.sflag [#allocation9], %s7320_s21  ;;  %p7260_p9 = pneg %p5989_p3 }
  0x7c   : > { %s697_s7 = scalar_lea.hbm %s7316_s3, %s4776_s28  ;;  %s5339_s17 = scalar_lea.vmem %s699_s23, 256 }
  0x7d   : > { %p5340_p4 = scmp.ne.s32.totalorder %s699_s23, %s5339_s17  ;;  %s5660_s16 = smov [#allocation8]  }
  0x7e   : > { %s5996_s11 = scalar_lea.hbm %s7319_s4, %s4776_s28  ;;  %s5344_s3 = sshll.u32 %s5660_s16, 4  ;;  %s5345_s3 = int_to_ptr.vmem [resolvable:$false] %s5344_s3 }
  0x7f   : > { %p5342_p12 = pnand %p5340_p4, %p7260_p9  ;;  %s5346_s30 = scalar_lea.vmem %s5345_s3, 512 }
  0x80   : > { %p5347_p0 = scmp.lt.s32.totalorder %s699_s23, %s5345_s3  ;;  %p5348_p11 = scmp.lt.s32.totalorder %s5346_s30, %s5339_s17 }
  0x81   : > { %p5343_p13 = pneg %p5342_p12 }
  0x82   : > { %p5349_p1 = por %p5348_p11, %p5347_p0 }
  0x84   : > { %p5350_p2 = pnand %p5349_p1, %p5343_p13 }
  0x86   : > { %5353 = shalt.err (!%p5350_p2)
}
  0x87   : > { %4958 = dma.hbm_to_vmem [thread:$0]  (!%p5989_p3), %s697_s7, 256, %s699_s23, %s6000_s6, %s7302_s5, %s7302_s5, %s7301_s14  }
  0x88   : > { %s5661_s20 = smov [#allocation13]   ;;  %s5662_s28 = smov [#allocation16]  }
  0x89   : > { %s543_s1 = sshll.u32 %s5661_s20, 4  ;;  %s584_s10 = sshll.u32 %s5662_s28, 4  ;;  %s544_s1 = int_to_ptr.vmem [resolvable:$true] %s543_s1  ;;  %s585_s10 = int_to_ptr.vmem [resolvable:$true] %s584_s10 }
  0x8a   : > { %s5365_s3 = scalar_lea.vmem %s544_s1, 1024  ;;  %p7321_p1 = pneg %p5858_p8 }
  0x8b   : > { %p5366_p4 = scmp.ne.s32.totalorder %s544_s1, %s5365_s3  ;;  %p5373_p13 = scmp.lt.s32.totalorder %s544_s1, %s544_s1 }
  0x8c   : > { %p5374_p0 = scmp.lt.s32.totalorder %s5365_s3, %s5365_s3 }
  0x8d   : > { %p5368_p2 = pnand %p5366_p4, %p7321_p1 }
  0x8e   : > { %p5375_p11 = por %p5374_p0, %p5373_p13 }
  0x8f   : > { %p5369_p12 = pneg %p5368_p2 }
  0x91   : > { %p5376_p9 = pnand %p5375_p11, %p5369_p12 }
  0x93   : > { %5379 = shalt.err (!%p5376_p9)
}
  0x94   : > { %s7322_s8 = sld [smem:[#allocation51_spill]]  ;;  %s5391_s21 = scalar_lea.vmem %s585_s10, 1024 }
  0x95   : > { %p5392_p5 = scmp.ne.s32.totalorder %s585_s10, %s5391_s21  ;;  %p7323_p4 = pmov %p7321_p1 }
  0x96   : > { %p5399_p13 = scmp.lt.s32.totalorder %s585_s10, %s585_s10  ;;  %p5400_p12 = scmp.lt.s32.totalorder %s5391_s21, %s5391_s21 }
  0x97   : > { %p5394_p1 = pnand %p5392_p5, %p7323_p4 }
  0x98   : > { %p5401_p9 = por %p5400_p12, %p5399_p13 }
  0x99   : > { %p5395_p2 = pneg %p5394_p1 }
  0x9a   : > { %4939 = dma.hbm_to_vmem [thread:$0]  (!%p5858_p8), %s7322_s8, 1024, %s544_s1, [#allocation12], %s7302_s5, %s7302_s5, %s7301_s14  }
  0x9b   : > { %p5402_p0 = pnand %p5401_p9, %p5395_p2 }
  0x9d   : > { %5405 = shalt.err (!%p5402_p0)
}
  0x9e   : > { %4945 = dma.hbm_to_vmem [thread:$0]  (!%p5858_p8), %s7224_s15, 1024, %s585_s10, [#allocation15], %s7302_s5, %s7302_s5, %s7301_s14  }
  0x9f   : > { %s7325_s28 = sld [smem:[#allocation43_spill]]  ;;  %s605_s7 = scalar_lea.vmem [#allocation2], %s5893_s12 }
  0xa0   : > { %s619_s23 = sshll.u32 %s605_s7, 4  ;;  %s7326_s4 = sld [smem:[#allocation45_spill]]  ;;  %s620_s23 = int_to_ptr.vmem [resolvable:$true] %s619_s23 }
  0xa1   : > { %s7327_s29 = sand.u32 1, %s5631_s18   ;;  %s5419_s17 = scalar_lea.vmem %s620_s23, 256 }
  0xa2   : > { %s602_s9 = scalar_lea.sflag [#allocation3], %s7327_s29  ;;  %p5420_p5 = scmp.ne.s32.totalorder %s620_s23, %s5419_s17 }
  0xa3   : > { %p7328_p11 = pneg %p5901_p10  ;;  %s5663_s10 = smov [#allocation2]  }
  0xa4   : > { %s5424_s16 = sshll.u32 %s5663_s10, 4  ;;  %s5425_s16 = int_to_ptr.vmem [resolvable:$false] %s5424_s16 }
  0xa5   : > { %s618_s3 = scalar_lea.hbm %s7325_s28, %s5897_s19  ;;  %p5422_p4 = pnand %p5420_p5, %p7328_p11 }
  0xa6   : > { %s4384_s8 = scalar_lea.hbm %s7326_s4, %s5897_s19  ;;  %s5426_s20 = scalar_lea.vmem %s5425_s16, 512 }
  0xa7   : > { %p5423_p1 = pneg %p5422_p4  ;;  %p5427_p8 = scmp.lt.s32.totalorder %s620_s23, %s5425_s16 }
  0xa8   : > { %p5428_p2 = scmp.lt.s32.totalorder %s5426_s20, %s5419_s17 }
  0xaa   : > { %p5429_p13 = por %p5428_p2, %p5427_p8 }
  0xac   : > { %p5430_p12 = pnand %p5429_p13, %p5423_p1 }
  0xae   : > { %5433 = shalt.err (!%p5430_p12)
}
  0xaf   : > { %4949 = dma.hbm_to_vmem [thread:$0]  (!%p5901_p10), %s618_s3, 256, %s620_s23, %s602_s9, %s7302_s5, %s7302_s5, %s7301_s14  }
  0xb0   : > { %s4385_s4 = scalar_lea.hbm %s4384_s8, 512  ;;  %s662_s29 = scalar_lea.vmem [#allocation7], %s5893_s12 }
  0xb1   : > { %s677_s19 = sshll.u32 %s662_s29, 4  ;;  %p7329_p0 = pmov %p7328_p11  ;;  %s678_s19 = int_to_ptr.vmem [resolvable:$true] %s677_s19 }
  0xb2   : > { %s5447_s1 = scalar_lea.vmem %s678_s19, 256  ;;  %s5664_s28 = smov [#allocation7]  }
  0xb3   : > { %p5448_p9 = scmp.ne.s32.totalorder %s678_s19, %s5447_s1  ;;  %s5452_s7 = sshll.u32 %s5664_s28, 4  ;;  %s5453_s7 = int_to_ptr.vmem [resolvable:$false] %s5452_s7 }
  0xb4   : > { %s5454_s0 = scalar_lea.vmem %s5453_s7, 512  ;;  %p5455_p4 = scmp.lt.s32.totalorder %s678_s19, %s5453_s7 }
  0xb5   : > { %p5450_p5 = pnand %p5448_p9, %p7329_p0  ;;  %p5456_p1 = scmp.lt.s32.totalorder %s5454_s0, %s5447_s1 }
  0xb7   : > { %p5451_p11 = pneg %p5450_p5  ;;  %p5457_p8 = por %p5456_p1, %p5455_p4 }
  0xb9   : > { %p5458_p2 = pnand %p5457_p8, %p5451_p11 }
  0xbb   : > { %5461 = shalt.err (!%p5458_p2)
}
  0xbc   : > { %s7330_s8 = sld [smem:[#allocation35_spill]]  ;;  %s5476_s12 = scalar_lea.vmem %s6013_s2, 256 }
  0xbd   : > { %p5477_p13 = scmp.ne.s32.totalorder %s6013_s2, %s5476_s12  ;;  %p7331_p12 = pneg %p5989_p3 }
  0xbe   : > { %s5665_s9 = smov [#allocation10]  }
  0xbf   : > { %p5479_p9 = pnand %p5477_p13, %p7331_p12  ;;  %s5481_s3 = sshll.u32 %s5665_s9, 4  ;;  %s5482_s3 = int_to_ptr.vmem [resolvable:$false] %s5481_s3 }
  0xc0   : > { %s5483_s23 = scalar_lea.vmem %s5482_s3, 512  ;;  %p5484_p5 = scmp.lt.s32.totalorder %s6013_s2, %s5482_s3 }
  0xc1   : > { %p5480_p0 = pneg %p5479_p9  ;;  %p5485_p11 = scmp.lt.s32.totalorder %s5483_s23, %s5476_s12 }
  0xc2   : > { %4955 = dma.hbm_to_vmem [thread:$0]  (!%p5901_p10), %s4385_s4, 256, %s678_s19, %s7330_s8, %s7302_s5, %s7302_s5, %s7301_s14  }
  0xc3   : > { %p5486_p4 = por %p5485_p11, %p5484_p5 }
  0xc5   : > { %p5487_p1 = pnand %p5486_p4, %p5480_p0 }
  0xc7   : > { %5490 = shalt.err (!%p5487_p1)
}
  0xc8   : > { %4961 = dma.hbm_to_vmem [thread:$0]  (!%p5989_p3), %s5996_s11, 256, %s6013_s2, %s6000_s6, %s7302_s5, %s7302_s5, %s7301_s14  }
  0xc9   : > { %747 = sbr.rel (%p5850_p6) target bundleno = 2861 (0xb2d), region = 88  ;;  %s7333_s21 = sld [smem:[#allocation26_spill]] (!%p5850_p6) }
  0xca   : > { %s7334_s17 = sld [smem:[#allocation32_spill]] (!%p5850_p6) }
  0xcf   : > { %s749_s10 = sand.u32 1, %s7333_s21  }
  0xd0   : > { %s6083_s16 = sshll.u32 %s749_s10, 4  ;;  %s750_s20 = scalar_lea.sflag [#allocation3], %s749_s10 }
  0xd1   : > { %s753_s4 = scalar_lea.vmem [#allocation2], %s6083_s16  ;;  %p7335_p10 = scmp.ne.s32.totalorder %s7334_s17, 0 }
  0xd3   : > { %5574 = dma.done.wait (%p7335_p10), %s750_s20, 256  }
  0xd4   : > { %5576 = vsyncadd (%p7335_p10), %s750_s20, 4294967040  ;;  %s7336_s27 = sld [smem:[#allocation31_spill]]  ;;  %s762_s5 = scalar_lea.vmem [#allocation5], %s6083_s16 }
  0xda   : > { %s758_s2 = sand.u32 1, %s7336_s27  }
  0xdb   : > { %s759_s14 = scalar_lea.sflag [#allocation6], %s758_s2 }
  0xdc   : > { %5578 = dma.done.wait (%p7335_p10), %s759_s14, 512  }
  0xdd   : > { %5580 = vsyncadd (%p7335_p10), %s759_s14, 4294966784  ;;  %s7337_s11 = sld [smem:[#allocation24_spill]]  ;;  %s771_s1 = scalar_lea.vmem [#allocation7], %s6083_s16 }
  0xde   : > { %s777_s28 = scalar_lea.sflag [#allocation9], %s758_s2 }
  0xe3   : > { %s778_s29 = sand.u32 1, %s7337_s11  }
  0xe4   : > { %s6097_s19 = sshll.u32 %s778_s29, 4 }
  0xe5   : > { %s780_s7 = scalar_lea.vmem [#allocation8], %s6097_s19 }
  0xe6   : > { %5582 = dma.done.wait (%p5946_p7), %s777_s28, 512  }
  0xe7   : > { %5584 = vsyncadd (%p5946_p7), %s777_s28, 4294966784  ;;  %s789_s0 = scalar_lea.vmem [#allocation10], %s6097_s19  ;;  %p7339_p6 = scmp.eq.s32.totalorder %s7336_s27, 0 }
  0xe9   : > { %5586 = dma.done.wait (%p7339_p6), [#allocation12], 1536   ;;  %p7340_p3 = pmov %p7339_p6 }
  0xeb   : > { %5588 = vsyncadd (%p7340_p3), [#allocation12], 4294965760  ;;  %p7341_p8 = pmov %p7340_p3 }
  0xec   : > { %p7342_p2 = pmov %p7340_p3 }
  0xed   : > { %5590 = dma.done.wait (%p7341_p8), [#allocation15], 2048  }
  0xee   : > { %5592 = vsyncadd (%p7342_p2), [#allocation15], 4294965248  ;;  %s7343_s8 = sld [smem:[#allocation27_spill]]  ;;  %v5666_v0 = vmov 0.0   ;;  %vm5667_vm0 = vmmov 0   ;;  %v5113_v1 = vld [vmem:[#allocation11 + $0x18] sm:$0xff]   ;;  %v1159_v48 = vlaneseq }
  0xef   : > { %4830 = vmatprep.subr.bf16.mxu1 %v5666_v0  ;;  %4838 = vmatprep.mubr.msk.bf16.mxu1 %vm5667_vm0, %v5666_v0  ;;  %v5114_v3 = vld [vmem:[#allocation11 + $0x10] sm:$0xff]   ;;  %v5115_v4 = vld [vmem:[#allocation11 + $0x8] sm:$0xff]   ;;  %v5116_v15 = vld [vmem:[#allocation11] sm:$0xff]   ;;  %vm982_vm3 = vcmask 523264   ;;  %v7263_v24 = vmov 0   ;;  %s5669_s3 = smov 64  }
  0xf0   : > { %4842 = vmatprep.subr.bf16.mxu0 %v5666_v0  ;;  %4848 = vmatprep.mubr.msk.bf16.mxu0 %vm5667_vm0, %v5666_v0  ;;  %v929_v5 = vld [vmem:[%s762_s5] sm:$0xff]  ;;  %v930_v8 = vld [vmem:[%s762_s5 + $0x8] sm:$0xff]  ;;  %v5670_v46 = vmov 1983009808   ;;  %v6183_v50 = vshrl.u32 %v1159_v48, 7  ;;  %s7346_s21 = sld [smem:[#allocation53_spill]] }
  0xf1   : > { %4831 = vmatpush3.bf16.msra.mxu1 %v5113_v1  ;;  %v931_v9 = vld [vmem:[%s771_s1] sm:$0xff]  ;;  %v932_v10 = vld [vmem:[%s771_s1 + $0x8] sm:$0xff]  ;;  %v946_v29 = vpack.c.bf16 %v930_v8, %v929_v5  ;;  %v1157_v47 = vunpack.c.l.s4 %v5670_v46  ;;  %v5671_v51 = vmov 1934713408   ;;  %s5672_s17 = smov 96   ;;  %s5673_s10 = smov 32  }
  0xf2   : > { %4832 = vmatprep.subr.bf16.mxu1 %v5666_v0  ;;  %v927_v11 = vld [vmem:[%s753_s4] sm:$0xff]  ;;  %v928_v12 = vld [vmem:[%s753_s4 + $0x8] sm:$0xff]  ;;  %v947_v30 = vpack.c.bf16 %v932_v10, %v931_v9  ;;  %v1188_v52 = vunpack.c.l.s4 %v5671_v51  ;;  %s7347_s4 = sld [smem:[#allocation52_spill]]  ;;  %vm3017_vm4 = vcmask 261120   ;;  %vm3304_vm6 = vcmask 392192   ;;  %s883_s5 = sand.u32 1, %s5603_s25  }
  0xf3   : > { %v5119_v18 = vld [vmem:[#allocation13 + $0x34] ss:$8 sps:$4 sm:$0xff]   ;;  %v5117_v19 = vld [vmem:[#allocation13 + $0x30] ss:$8 sps:$4 sm:$0xff]   ;;  %v5122_v21 = vld [vmem:[#allocation13 + $0x24] ss:$8 sps:$4 sm:$0xff]   ;;  %v945_v28 = vpack.c.bf16 %v928_v12, %v927_v11  ;;  %v1158_v49 = vunpack.c.0.s8 %v1157_v47 }
  0xf4   : > { %p934_p13 = scmp.eq.s32.totalorder %s7343_s8, 1  ;;  %p933_p7 = scmp.eq.s32.totalorder %s7343_s8, 0  ;;  %v5120_v22 = vld [vmem:[#allocation13 + $0x20] ss:$8 sps:$4 sm:$0xff]   ;;  %v5125_v23 = vld [vmem:[#allocation13 + $0x14] ss:$8 sps:$4 sm:$0xff]   ;;  %v1189_v54 = vunpack.c.0.s8 %v1188_v52 }
  0xf5   : > { %4833 = vmatpush3.bf16.msra.mxu1 %v5114_v3  ;;  %v5123_v25 = vld [vmem:[#allocation13 + $0x10] ss:$8 sps:$4 sm:$0xff]   ;;  %v5128_v26 = vld [vmem:[#allocation13 + $0x4] ss:$8 sps:$4 sm:$0xff]   ;;  %v5126_v27 = vld [vmem:[#allocation13] ss:$8 sps:$4 sm:$0xff]   ;;  %v6186_v53 = vsub.s32 %v1158_v49, %v6183_v50 }
  0xf6   : > { %s935_s12 = scalar_select %p934_p13, 1, 0  ;;  %4834 = vmatprep.subr.bf16.mxu1 %v5666_v0  ;;  %v6197_v1 = vsub.s32 %v1189_v54, %v6183_v50 }
  0xf7   : > { %s940_s9 = scalar_select %p933_p7, 1, 0 }
  0xf8   : > { %v936_v2 = vstv %s935_s12  ;;  %p908_p12 = scmp.lt.s32.totalorder %s7343_s8, 2  ;;  %s7348_s11 = sld [smem:[#allocation49_spill]] }
  0xf9   : > { %vm6125_vm1 = vcmp.eq.s32.totalorder %v936_v2, 1  ;;  %v941_v7 = vstv %s940_s9  ;;  %4835 = vmatpush3.bf16.msra.mxu1 %v5115_v4  ;;  %s7349_s28 = sld [smem:[#allocation48_spill]]  ;;  %s4661_s19 = sshll.u32 %s7343_s8, 4 }
  0xfa   : > { %v938_v13 = vsel %vm6125_vm1, %v929_v5, %v931_v9  ;;  %v939_v14 = vsel %vm6125_vm1, %v930_v8, %v932_v10  ;;  %vm942_vm2 = vcmp.eq.s32.totalorder %v941_v7, 1  ;;  %4836 = vmatprep.subr.bf16.mxu1 %v5666_v0  ;;  %s909_s27 = scalar_select %p908_p12, %s7343_s8, 2 }
  0xfb   : > { %v6144_v16 = vsel %vm942_vm2, %v927_v11, %v938_v13  ;;  %v6146_v17 = vsel %vm942_vm2, %v928_v12, %v939_v14  ;;  %s7351_s9 = sld [smem:[#allocation54_spill]]  ;;  %s5675_s16 = smov [#allocation17]  }
  0xfc   : > { %v949_v20 = vpack.c.bf16 %v6146_v17, %v6144_v16  ;;  %s4903_s2 = smul.u32 48, %s909_s27  ;;  %s7352_s1 = sld [smem:[#allocation55_spill]] }
  0xfd   : > { %4837 = vmatpush3.bf16.msra.mxu1 %v5116_v15  ;;  %s7354_s23 = sld [smem:[#allocation58_spill]]  ;;  %s5495_s20 = sshll.u32 %s5675_s16, 4  ;;  %s5496_s20 = int_to_ptr.vmem [resolvable:$false] %s5495_s20 }
  0xfe   : > { %1092 = vmatprep.subr.bf16.mxu1 %v5119_v18  ;;  %s6673_s6 = scalar_lea.vmem %s7348_s11, %s4903_s2  ;;  %s7355_s14 = sld [smem:[#allocation28_spill]] }
  0xff   : > { %s6678_s12 = scalar_lea.vmem %s7349_s28, %s4903_s2  ;;  %s7357_s30 = sld [smem:[#allocation59_spill]] }
 0x100   : > { %4839 = vmatmul.mubr.msk.bf16.vlgmr.msra.gmra.mxu1 %vm982_vm3, %v949_v20 }
 0x101   : > { %1093 = vmatpush1.bf16.msra.mxu1 %v5117_v19  ;;  %1116 = vmatprep.mubr.bf16.mxu1 %v7263_v24 }
 0x102   : > { %1094 = vmatprep.subr.bf16.mxu1 %v5122_v21 }
 0x104   : > { %s4904_s11 = smul.u32 6, %s7355_s14 }
 0x105   : > { %1095 = vmatpush1.bf16.msra.mxu1 %v5120_v22 }
 0x106   : > { %1096 = vmatprep.subr.bf16.mxu1 %v5125_v23 }
 0x109   : > { %1097 = vmatpush1.bf16.msra.mxu1 %v5123_v25 }
 0x10a   : > { %1098 = vmatprep.subr.bf16.mxu1 %v5128_v26 }
 0x10d   : > { %1099 = vmatpush1.bf16.msra.mxu1 %v5126_v27 }
 0x10e   : > { %4852 = vmatprep.subr.bf16.mxu1 %v5666_v0 }
 0x110   : > { %4682 = vmatmul.mubr.msk.bf16.vlgmr.msra.gmra.mxu1 %vm982_vm3, %v945_v28 }
 0x111   : > { %1126 = vmatprep.mubr.bf16.mxu1 %v7263_v24 }
 0x118   : > { %4683 = vmatmul.mubr.msk.bf16.gmra.mxu1 %vm982_vm3, %v946_v29 }
 0x119   : > { %1136 = vmatprep.mubr.bf16.mxu1 %v7263_v24 }
 0x120   : > { %4684 = vmatmul.mubr.msk.bf16.gmra.mxu1 %vm982_vm3, %v947_v30 }
 0x121   : > { %4858 = vmatprep.mubr.msk.bf16.mxu1 %vm5667_vm0, %v5666_v0 }
 0x1c0   : > { %v1020_v31 = vpop.f32.mrf.mxu1 }
 0x1c1   : > { %v1155_v55 = vcombine.high %v1020_v31, %v5666_v0  ;;  %v6200_v2 = vrot.slane %v1020_v31, %v6186_v53 }
 0x1c2   : > { %v4840_v32 = vpop.f32.mrf.mxu1 }
 0x1c3   : > { %v6203_v3 = vrot.slane %v1155_v55, %v6186_v53 }
 0x1c4   : > { %v1023_v33 = vpop.f32.mrf.mxu1 }
 0x1c5   : > { %v1221_v57 = vcombine.high %v1023_v33, %v5666_v0  ;;  %v6206_v4 = vrot.slane %v1023_v33, %v6186_v53 }
 0x1c6   : > { %v4841_v34 = vpop.f32.mrf.mxu1 }
 0x1c7   : > { %v6210_v7 = vrot.slane %v1221_v57, %v6186_v53 }
 0x1d0   : > { %v1118_v35 = vpop.f32.mrf.mxu1 }
 0x1d1   : > { %v1411_v61 = vcombine.high %v1118_v35, %v5666_v0  ;;  %v6218_v15 = vrot.slane %v1118_v35, %v6186_v53 }
 0x1d2   : > { %v6161_v36 = vpop.f32.mrf.mxu1 }
 0x1d3   : > { %v6221_v18 = vrot.slane %v1411_v61, %v6186_v53 }
 0x1d4   : > { %v1122_v37 = vpop.f32.mrf.mxu1 }
 0x1d5   : > { %v1477_v62 = vcombine.high %v1122_v37, %v5666_v0  ;;  %v1484_v19 = vrot.slane %v1122_v37, %v6186_v53 }
 0x1d6   : > { %v6163_v38 = vpop.f32.mrf.mxu1 }
 0x1d7   : > { %v6225_v20 = vrot.slane %v1477_v62, %v6186_v53 }
 0x1d8   : > { %v1128_v39 = vpop.f32.mrf.mxu1 }
 0x1d9   : > { %1397 = vrot.lane.b32.xlu1 %v1128_v39, %s5669_s3  ;;  %v1543_v60 = vcombine.high %v1128_v39, %v5666_v0  ;;  %v1550_v63 = vrot.slane %v1128_v39, %v6186_v53 }
 0x1da   : > { %v6166_v40 = vpop.f32.mrf.mxu1 }
 0x1db   : > { %v1557_v11 = vrot.slane %v1543_v60, %v6186_v53 }
 0x1dc   : > { %v1132_v41 = vpop.f32.mrf.mxu1 }
 0x1dd   : > { %1399 = vrot.lane.b32.xlu1 %v1132_v41, %s5669_s3  ;;  %v1609_v8 = vcombine.high %v1132_v41, %v5666_v0  ;;  %v1616_v12 = vrot.slane %v1132_v41, %v6186_v53 }
 0x1de   : > { %v6169_v42 = vpop.f32.mrf.mxu1 }
 0x1df   : > { %v1623_v28 = vrot.slane %v1609_v8, %v6186_v53 }
 0x1e0   : > { %v1138_v43 = vpop.f32.mrf.mxu1 }
 0x1e1   : > { %1395 = vrot.lane.b32.xlu1 %v1122_v37, %s5669_s3  ;;  %1401 = vrot.lane.b32.xlu0 %v1138_v43, %s5669_s3  ;;  %v1675_v32 = vcombine.high %v1138_v43, %v5666_v0 }
 0x1e2   : > { %v6173_v44 = vpop.f32.mrf.mxu1 }
 0x1e3   : > { %v1689_v57 = vrot.slane %v1675_v32, %v6186_v53 }
 0x1e4   : > { %v6175_v45 = vpop.f32.mrf.mxu1 }
 0x1e5   : > { %1151 = vrot.lane.b32.xlu1 %v1023_v33, %s5669_s3  ;;  %1403 = vrot.lane.b32.xlu0 %v6175_v45, %s5669_s3  ;;  %v1682_v33 = vrot.slane %v1138_v43, %v6186_v53  ;;  %v1741_v34 = vcombine.high %v6175_v45, %v5666_v0  ;;  %v1748_v62 = vrot.slane %v6175_v45, %v6186_v53 }
 0x1e9   : > { %1393 = vrot.lane.b32.xlu0 %v1118_v35, %s5669_s3 }
 0x1ed   : > { %1149 = vrot.lane.b32.xlu0 %v1020_v31, %s5669_s3 }
 0x24b   : > { %v1398_v56 = vpop.permute.xlu1 %1397 }
 0x24c   : > { %v1558_v58 = vcombine.high %v1398_v56, %v5666_v0  ;;  %v1565_v59 = vrot.slane %v1398_v56, %v6186_v53 }
 0x24e   : > { %v1572_v5 = vrot.slane %v1558_v58, %v6186_v53  ;;  %v1573_v9 = vcombine.low %v1550_v63, %v1565_v59  ;;  %v1574_v10 = vcombine.high %v1550_v63, %v1565_v59  ;;  %v6253_v63 = vrot.slane %v1741_v34, %v6186_v53 }
 0x24f   : > { %v1400_v6 = vpop.permute.xlu1 %1399 }
 0x250   : > { %v1624_v13 = vcombine.high %v1400_v6, %v5666_v0  ;;  %v1631_v14 = vrot.slane %v1400_v6, %v6186_v53  ;;  %v1589_v21 = vcombine.low %v1557_v11, %v1572_v5  ;;  %v1581_v29 = vrot.slane %v1573_v9, %v6197_v1 }
 0x251   : > { %v1588_v30 = vrot.slane %v1574_v10, %v6197_v1  ;;  %v1590_v31 = vcombine.high %v1557_v11, %v1572_v5 }
 0x252   : > { %v1638_v22 = vrot.slane %v1624_v13, %v6186_v53  ;;  %v1639_v23 = vcombine.low %v1616_v12, %v1631_v14  ;;  %v1640_v25 = vcombine.high %v1616_v12, %v1631_v14  ;;  %v6241_v47 = vrot.slane %v1589_v21, %v6197_v1 }
 0x253   : > { %v1396_v26 = vpop.permute.xlu1 %1395  ;;  %v1402_v27 = vpop.permute.xlu0 %1401  ;;  %v6245_v52 = vrot.slane %v1590_v31, %v6197_v1  ;;  %v1907_v54 = vcombine.low %v1581_v29, %v1588_v30  ;;  %v4693_v55 = vcombine.high %v1581_v29, %v1588_v30 }
 0x254   : > { %v1647_v35 = vrot.slane %v1639_v23, %v6197_v1  ;;  %v1654_v37 = vrot.slane %v1640_v25, %v6197_v1  ;;  %v1492_v39 = vcombine.high %v1396_v26, %v5666_v0  ;;  %v1499_v41 = vrot.slane %v1396_v26, %v6186_v53 }
 0x255   : > { %v1690_v46 = vcombine.high %v1402_v27, %v5666_v0  ;;  %v1655_v49 = vcombine.low %v1623_v28, %v1638_v22  ;;  %v1656_v51 = vcombine.high %v1623_v28, %v1638_v22  ;;  %v1697_v43 = vrot.slane %v1402_v27, %v6186_v53 }
 0x256   : > { %v1507_v56 = vcombine.low %v1484_v19, %v1499_v41  ;;  %v1506_v58 = vrot.slane %v1492_v39, %v6186_v53  ;;  %v1508_v59 = vcombine.high %v1484_v19, %v1499_v41  ;;  %v1957_v5 = vcombine.low %v1647_v35, %v1654_v37 }
 0x257   : > { %v1704_v60 = vrot.slane %v1690_v46, %v6186_v53  ;;  %v1404_v61 = vpop.permute.xlu0 %1403  ;;  %v4695_v6 = vcombine.high %v1647_v35, %v1654_v37  ;;  %v6256_v8 = vrot.slane %v1655_v49, %v6197_v1  ;;  %v6259_v9 = vrot.slane %v1656_v51, %v6197_v1  ;;  %v1152_v25 = vpop.permute.xlu1 %1151 }
 0x258   : > { %v1705_v10 = vcombine.low %v1682_v33, %v1697_v43  ;;  %v1706_v11 = vcombine.high %v1682_v33, %v1697_v43  ;;  %v6262_v12 = vrot.slane %v1907_v54, %v6186_v53  ;;  %v6265_v13 = vrot.slane %v4693_v55, %v6186_v53 }
 0x259   : > { %v1923_v45 = vcombine.low %v6241_v47, %v6245_v52  ;;  %v6270_v14 = vrot.slane %v1507_v56, %v6197_v1  ;;  %v6273_v19 = vrot.slane %v1508_v59, %v6197_v1  ;;  %v1523_v21 = vcombine.low %v6225_v20, %v1506_v58 }
 0x25a   : > { %v1524_v22 = vcombine.high %v6225_v20, %v1506_v58  ;;  %v1721_v23 = vcombine.low %v1689_v57, %v1704_v60  ;;  %v4694_v26 = vcombine.high %v6241_v47, %v6245_v52  ;;  %v6280_v27 = vrot.slane %v1957_v5, %v6186_v53 }
 0x25b   : > { %v6283_v28 = vrot.slane %v4695_v6, %v6186_v53  ;;  %v1722_v29 = vcombine.high %v1689_v57, %v1704_v60  ;;  %v1973_v30 = vcombine.low %v6256_v8, %v6259_v9  ;;  %v4696_v31 = vcombine.high %v6256_v8, %v6259_v9  ;;  %v1394_v33 = vpop.permute.xlu0 %1393 }
 0x25c   : > { %v1713_v20 = vrot.slane %v1705_v10, %v6197_v1  ;;  %v1720_v32 = vrot.slane %v1706_v11, %v6197_v1  ;;  %v1236_v34 = vcombine.high %v1152_v25, %v5666_v0  ;;  %v1243_v35 = vrot.slane %v1152_v25, %v6186_v53 }
 0x25d   : > { %v1756_v37 = vcombine.high %v1404_v61, %v5666_v0  ;;  %v1763_v39 = vrot.slane %v1404_v61, %v6186_v53  ;;  %v6296_v41 = vrot.slane %v1523_v21, %v6197_v1  ;;  %v6299_v46 = vrot.slane %v1524_v22, %v6197_v1 }
 0x25e   : > { %v1857_v49 = vcombine.low %v6270_v14, %v6273_v19  ;;  %v6304_v51 = vrot.slane %v1721_v23, %v6197_v1  ;;  %v6307_v43 = vrot.slane %v1722_v29, %v6197_v1  ;;  %v1426_v55 = vcombine.high %v1394_v33, %v5666_v0 }
 0x25f   : > { %v1770_v54 = vrot.slane %v1756_v37, %v6186_v53  ;;  %v1433_v56 = vrot.slane %v1394_v33, %v6186_v53  ;;  %v2007_v57 = vcombine.low %v1713_v20, %v1720_v32  ;;  %v4697_v58 = vcombine.high %v1713_v20, %v1720_v32 }
 0x260   : > { %v1771_v59 = vcombine.low %v1748_v62, %v1763_v39  ;;  %v1772_v60 = vcombine.high %v1748_v62, %v1763_v39  ;;  %v4691_v61 = vcombine.high %v6270_v14, %v6273_v19  ;;  %v1250_v5 = vrot.slane %v1236_v34, %v6186_v53 }
 0x261   : > { %v1251_v6 = vcombine.low %v6206_v4, %v1243_v35  ;;  %v1252_v10 = vcombine.high %v6206_v4, %v1243_v35  ;;  %v1787_v22 = vcombine.low %v6253_v63, %v1770_v54  ;;  %v1788_v23 = vcombine.high %v6253_v63, %v1770_v54  ;;  %v1150_v54 = vpop.permute.xlu0 %1149 }
 0x262   : > { %v1779_v11 = vrot.slane %v1771_v59, %v6197_v1  ;;  %v1786_v21 = vrot.slane %v1772_v60, %v6197_v1  ;;  %v1873_v62 = vcombine.low %v6296_v41, %v6299_v46  ;;  %v4692_v25 = vcombine.high %v6296_v41, %v6299_v46 }
 0x263   : > { %v1440_v29 = vrot.slane %v1426_v55, %v6186_v53  ;;  %v1441_v20 = vcombine.low %v6218_v15, %v1433_v56  ;;  %v6328_v4 = vrot.slane %v2007_v57, %v6186_v53  ;;  %v2022_v32 = vrot.slane %v4697_v58, %v6186_v53 }
 0x264   : > { %v2023_v33 = vcombine.low %v6304_v51, %v6307_v43  ;;  %v4698_v63 = vcombine.high %v6304_v51, %v6307_v43  ;;  %v6336_v34 = vrot.slane %v1251_v6, %v6197_v1  ;;  %v6339_v35 = vrot.slane %v1252_v10, %v6197_v1 }
 0x265   : > { %v1267_v37 = vcombine.low %v6210_v7, %v1250_v5  ;;  %v1268_v39 = vcombine.high %v6210_v7, %v1250_v5  ;;  %v1795_v55 = vrot.slane %v1787_v22, %v6197_v1  ;;  %v1802_v57 = vrot.slane %v1788_v23, %v6197_v1 }
 0x266   : > { %v2057_v58 = vcombine.low %v1779_v11, %v1786_v21  ;;  %v4699_v59 = vcombine.high %v1779_v11, %v1786_v21  ;;  %v1442_v60 = vcombine.high %v6218_v15, %v1433_v56  ;;  %v1449_v51 = vrot.slane %v1441_v20, %v6197_v1 }
 0x267   : > { %v1457_v43 = vcombine.low %v6221_v18, %v1440_v29  ;;  %v1458_v6 = vcombine.high %v6221_v18, %v1440_v29  ;;  %v1170_v10 = vcombine.high %v1150_v54, %v5666_v0  ;;  %v1177_v24 = vrot.slane %v1150_v54, %v6186_v53 }
 0x268   : > { %v1930_v7 = vrot.slane %v1923_v45, %v6186_v53  ;;  %v1938_v5 = vrot.slane %v4694_v26, %v6186_v53  ;;  %v1456_v11 = vrot.slane %v1442_v60, %v6197_v1  ;;  %v1939_v18 = vcombine.low %v6262_v12, %v6265_v13 }
 0x269   : > { %v1465_v15 = vrot.slane %v1457_v43, %v6197_v1  ;;  %v1472_v56 = vrot.slane %v1458_v6, %v6197_v1  ;;  %v1184_v21 = vrot.slane %v1170_v10, %v6186_v53  ;;  %v1185_v22 = vcombine.low %v6200_v2, %v1177_v24 }
 0x26a   : > { %v1186_v23 = vcombine.high %v6200_v2, %v1177_v24  ;;  %v1947_v29 = vcombine.low %v1930_v7, %v1938_v5  ;;  %v6365_v47 = vrot.slane %v1267_v37, %v6197_v1  ;;  %v6368_v52 = vrot.slane %v1268_v39, %v6197_v1 }
 0x26b   : > { %v2064_v45 = vrot.slane %v2057_v58, %v6186_v53  ;;  %v1807_v26 = vcombine.low %v1449_v51, %v1456_v11  ;;  %v4689_v20 = vcombine.high %v1449_v51, %v1456_v11  ;;  %v1193_v54 = vrot.slane %v1185_v22, %v6197_v1 }
 0x26c   : > { %v1200_v12 = vrot.slane %v1186_v23, %v6197_v1  ;;  %v1201_v13 = vcombine.low %v6203_v3, %v1184_v21  ;;  %v2072_v60 = vrot.slane %v4699_v59, %v6186_v53  ;;  %v2073_v24 = vcombine.low %v1795_v55, %v1802_v57 }
 0x26d   : > { %v1946_v2 = vrot.slane %v1939_v18, %v6197_v1  ;;  %v1954_v37 = vrot.slane %v1947_v29, %v6197_v1  ;;  %v4700_v43 = vcombine.high %v1795_v55, %v1802_v57  ;;  %v1823_v39 = vcombine.low %v1465_v15, %v1472_v56 }
 0x26e   : > { %v4690_v6 = vcombine.high %v1465_v15, %v1472_v56  ;;  %v1202_v58 = vcombine.high %v6203_v3, %v1184_v21  ;;  %v2030_v51 = vrot.slane %v2023_v33, %v6186_v53  ;;  %v2038_v7 = vrot.slane %v4698_v63, %v6186_v53 }
 0x26f   : > { %v6378_v10 = vcombine.low %v1946_v2, %v1954_v37  ;;  %v2039_v5 = vcombine.low %v6328_v4, %v2022_v32  ;;  %v1814_v59 = vrot.slane %v1807_v26, %v6186_v53  ;;  %v1822_v11 = vrot.slane %v4689_v20, %v6186_v53 }
 0x270   : > { %v1209_v18 = vrot.slane %v1201_v13, %v6197_v1  ;;  %v1287_v22 = vcombine.low %v1193_v54, %v1200_v12  ;;  %v4685_v55 = vcombine.high %v1193_v54, %v1200_v12  ;;  %v2047_v3 = vcombine.low %v2030_v51, %v2038_v7 }
 0x271   : > { %v2857_v57 = vmul.f32 %v6378_v10, %v6378_v10  ;;  %v2080_v15 = vrot.slane %v2073_v24, %v6186_v53  ;;  %v1216_v33 = vrot.slane %v1202_v58, %v6197_v1  ;;  %v2088_v63 = vrot.slane %v4700_v43, %v6186_v53 }
 0x272   : > { %v2089_v56 = vcombine.low %v2064_v45, %v2072_v60  ;;  %v1980_v4 = vrot.slane %v1973_v30, %v6186_v53  ;;  %v2046_v21 = vrot.slane %v2039_v5, %v6197_v1  ;;  %v2054_v23 = vrot.slane %v2047_v3, %v6197_v1 }
 0x273   : > { %v2873_v32 = vsel %vm982_vm3, %v2857_v57, 0.0  ;;  %v1988_v29 = vrot.slane %v4696_v31, %v6186_v53  ;;  %v1294_v26 = vrot.slane %v1287_v22, %v6186_v53  ;;  %v2097_v45 = vcombine.low %v2080_v15, %v2088_v63 }
 0x274   : > { %2874 = vadd.xlane.f32.xlu1 %v2873_v32  ;;  %v1989_v20 = vcombine.low %v6280_v27, %v6283_v28  ;;  %v1830_v30 = vrot.slane %v1823_v39, %v6186_v53  ;;  %v1302_v54 = vrot.slane %v4685_v55, %v6186_v53  ;;  %v6407_v12 = vcombine.low %v2046_v21, %v2054_v23 }
 0x275   : > { %v6409_v13 = vcombine.high %v2046_v21, %v2054_v23  ;;  %v1997_v60 = vcombine.low %v1980_v4, %v1988_v29  ;;  %v2096_v24 = vrot.slane %v2089_v56, %v6197_v1  ;;  %v2104_v8 = vrot.slane %v2097_v45, %v6197_v1 }
 0x276   : > { %v1838_v9 = vrot.slane %v4690_v6, %v6186_v53  ;;  %v1839_v31 = vcombine.low %v1814_v59, %v1822_v11  ;;  %v1303_v43 = vcombine.low %v1209_v18, %v1216_v33  ;;  %v4686_v58 = vcombine.high %v1209_v18, %v1216_v33 }
 0x277   : > { %v2859_v27 = vmul.f32 %v6407_v12, %v6407_v12  ;;  %v6416_v28 = vcombine.high %v1946_v2, %v1954_v37  ;;  %v6418_v39 = vcombine.low %v2096_v24, %v2104_v8  ;;  %v1996_v51 = vrot.slane %v1989_v20, %v6197_v1 }
 0x278   : > { %v2004_v7 = vrot.slane %v1997_v60, %v6197_v1  ;;  %v1847_v5 = vcombine.low %v1830_v30, %v1838_v9  ;;  %v2865_v6 = vmul.f32 %v6409_v13, %v6409_v13  ;;  %v6425_v59 = vcombine.high %v2096_v24, %v2104_v8 }
 0x279   : > { %v2879_v22 = vsel %vm982_vm3, %v2859_v27, 0.0  ;;  %v1880_v2 = vrot.slane %v1873_v62, %v6186_v53  ;;  %v2860_v37 = vmul.f32 %v6418_v39, %v6418_v39  ;;  %v1846_v11 = vrot.slane %v1839_v31, %v6197_v1 }
 0x27a   : > { %2880 = vadd.xlane.f32.xlu0 %v2879_v22  ;;  %v1854_v18 = vrot.slane %v1847_v5, %v6197_v1  ;;  %v1888_v55 = vrot.slane %v4692_v25, %v6186_v53  ;;  %v1864_v57 = vrot.slane %v1857_v49, %v6186_v53  ;;  %v1872_v62 = vrot.slane %v4691_v61, %v6186_v53 }
 0x27b   : > { %v1353_v3 = vcombine.low %v6365_v47, %v6368_v52  ;;  %v2863_v15 = vmul.f32 %v6416_v28, %v6416_v28  ;;  %v2882_v33 = vsel %vm982_vm3, %v2860_v37, 0.0  ;;  %v6452_v41 = vcombine.low %v1996_v51, %v2004_v7 }
 0x27c   : > { %v6454_v46 = vcombine.low %v1846_v11, %v1854_v18  ;;  %v1310_v25 = vrot.slane %v1303_v43, %v6186_v53  ;;  %v4688_v49 = vcombine.high %v6365_v47, %v6368_v52  ;;  %v2897_v14 = vsel %vm982_vm3, %v2865_v6, 0.0  ;;  %2883 = vadd.xlane.f32.xlu1 %v2882_v33 }
 0x27d   : > { %v2866_v19 = vmul.f32 %v6425_v59, %v6425_v59  ;;  %v1897_v61 = vcombine.low %v1880_v2, %v1888_v55  ;;  %v1337_v63 = vcombine.low %v6336_v34, %v6339_v35  ;;  %v1318_v56 = vrot.slane %v4686_v58, %v6186_v53 }
 0x27e   : > { %2898 = vadd.xlane.f32.xlu0 %v2897_v14  ;;  %v1319_v4 = vcombine.low %v1294_v26, %v1302_v54  ;;  %v4687_v32 = vcombine.high %v6336_v34, %v6339_v35  ;;  %v2891_v21 = vsel %vm982_vm3, %v2863_v15, 0.0  ;;  %v6468_v47 = vcombine.high %v1996_v51, %v2004_v7 }
 0x27f   : > { %v1889_v52 = vcombine.low %v1864_v57, %v1872_v62  ;;  %v2858_v23 = vmul.f32 %v6452_v41, %v6452_v41  ;;  %v2855_v29 = vmul.f32 %v6454_v46, %v6454_v46  ;;  %v6474_v45 = vcombine.high %v1846_v11, %v1854_v18 }
 0x280   : > { %v1327_v20 = vcombine.low %v1310_v25, %v1318_v56  ;;  %v2900_v30 = vsel %vm982_vm3, %v2866_v19, 0.0  ;;  %2892 = vadd.xlane.f32.xlu1 %v2891_v21  ;;  %v1904_v26 = vrot.slane %v1897_v61, %v6197_v1  ;;  %v1360_v34 = vrot.slane %v1353_v3, %v6186_v53 }
 0x281   : > { %v1368_v35 = vrot.slane %v4688_v49, %v6186_v53  ;;  %v1326_v54 = vrot.slane %v1319_v4, %v6197_v1  ;;  %v1344_v24 = vrot.slane %v1337_v63, %v6186_v53  ;;  %v1352_v8 = vrot.slane %v4687_v32, %v6186_v53 }
 0x282   : > { %2901 = vadd.xlane.f32.xlu0 %v2900_v30  ;;  %v1334_v60 = vrot.slane %v1327_v20, %v6197_v1  ;;  %v1896_v9 = vrot.slane %v1889_v52, %v6197_v1  ;;  %v2867_v31 = vsel %vm982_vm3, %v2855_v29, 0.0  ;;  %v2861_v43 = vmul.f32 %v6474_v45, %v6474_v45 }
 0x283   : > { %v2876_v27 = vsel %vm982_vm3, %v2858_v23, 0.0  ;;  %v2864_v51 = vmul.f32 %v6468_v47, %v6468_v47  ;;  %v1377_v5 = vcombine.low %v1360_v34, %v1368_v35  ;;  %v1369_v22 = vcombine.low %v1344_v24, %v1352_v8 }
 0x284   : > { %v6488_v58 = vcombine.low %v1326_v54, %v1334_v60  ;;  %2868 = vadd.xlane.f32.xlu1 %v2867_v31  ;;  %v6493_v7 = vcombine.low %v1896_v9, %v1904_v26  ;;  %v2885_v6 = vsel %vm982_vm3, %v2861_v43, 0.0  ;;  %v6498_v37 = vcombine.high %v1326_v54, %v1334_v60 }
 0x285   : > { %v2894_v11 = vsel %vm982_vm3, %v2864_v51, 0.0  ;;  %v6503_v55 = vcombine.high %v1896_v9, %v1904_v26  ;;  %v1384_v57 = vrot.slane %v1377_v5, %v6197_v1  ;;  %v1376_v62 = vrot.slane %v1369_v22, %v6197_v1 }
 0x286   : > { %2877 = vadd.xlane.f32.xlu0 %v2876_v27  ;;  %v2827_v2 = vmul.f32 %v6488_v58, %v6488_v58  ;;  %v2856_v18 = vmul.f32 %v6493_v7, %v6493_v7  ;;  %v2829_v15 = vmul.f32 %v6498_v37, %v6498_v37 }
 0x287   : > { %v2862_v25 = vmul.f32 %v6503_v55, %v6503_v55  ;;  %v6513_v49 = vcombine.low %v1376_v62, %v1384_v57  ;;  %v6519_v63 = vcombine.high %v1376_v62, %v1384_v57 }
 0x288   : > { %2886 = vadd.xlane.f32.xlu1 %v2885_v6  ;;  %v2831_v3 = vsel %vm982_vm3, %v2827_v2, 0.0  ;;  %v2870_v33 = vsel %vm982_vm3, %v2856_v18, 0.0  ;;  %v2837_v14 = vsel %vm982_vm3, %v2829_v15, 0.0 }
 0x289   : > { %v2888_v19 = vsel %vm982_vm3, %v2862_v25, 0.0  ;;  %v2828_v61 = vmul.f32 %v6513_v49, %v6513_v49  ;;  %v2830_v4 = vmul.f32 %v6519_v63, %v6519_v63 }
 0x28a   : > { %2895 = vadd.xlane.f32.xlu0 %v2894_v11  ;;  %v6531_v11 = vld [vmem:[%s7346_s21] ss:$0 sm:$0xff]  ;;  %s7134_s21 = scalar_lea.sflag [#allocation4], %s883_s5 }
 0x28b   : > { %v2834_v56 = vsel %vm982_vm3, %v2828_v61, 0.0  ;;  %v2840_v32 = vsel %vm982_vm3, %v2830_v4, 0.0 }
 0x28c   : > { %2832 = vadd.xlane.f32.xlu1 %v2831_v3 }
 0x28e   : > { %2871 = vadd.xlane.f32.xlu0 %v2870_v33 }
 0x290   : > { %2838 = vadd.xlane.f32.xlu1 %v2837_v14 }
 0x292   : > { %2889 = vadd.xlane.f32.xlu0 %v2888_v19 }
 0x296   : > { %2835 = vadd.xlane.f32.xlu0 %v2834_v56 }
 0x29a   : > { %2841 = vadd.xlane.f32.xlu0 %v2840_v32 }
 0x2fd   : > { %v2875_v21 = vpop.xlane.xlu1 %2874 }
 0x2fe   : > { %v2905_v54 = vmax.f32 %v2875_v21, 1e-24 }
 0x303   : > { %v2881_v52 = vpop.xlane.xlu0 %2880 }
 0x304   : > { %v2907_v57 = vmax.f32 %v2881_v52, 1e-24 }
 0x305   : > { %v2884_v23 = vpop.xlane.xlu1 %2883 }
 0x306   : > { %v2908_v56 = vmax.f32 %v2884_v23, 1e-24 }
 0x307   : > { %v2899_v29 = vpop.xlane.xlu0 %2898 }
 0x309   : > { %v2893_v20 = vpop.xlane.xlu1 %2892 }
 0x30a   : > { %v2911_v9 = vmax.f32 %v2893_v20, 1e-24 }
 0x30b   : > { %v6525_v30 = vpop.xlane.xlu0 %2901 }
 0x30d   : > { %v2869_v26 = vpop.xlane.xlu1 %2868 }
 0x30e   : > { %v2903_v35 = vmax.f32 %v2869_v26, 1e-24 }
 0x30f   : > { %v2878_v34 = vpop.xlane.xlu0 %2877 }
 0x310   : > { %5177 = vrsqrt.f32 %v2903_v35  ;;  %v2906_v27 = vmax.f32 %v2878_v34, 1e-24 }
 0x311   : > { %v2887_v60 = vpop.xlane.xlu1 %2886  ;;  %5179 = vrsqrt.f32 %v2905_v54 }
 0x312   : > { %v2909_v8 = vmax.f32 %v2887_v60, 1e-24 }
 0x313   : > { %v2896_v24 = vpop.xlane.xlu0 %2895 }
 0x314   : > { %5181 = vrsqrt.f32 %v2909_v8  ;;  %v2912_v6 = vmax.f32 %v2896_v24, 1e-24 }
 0x315   : > { %5183 = vrsqrt.f32 %v2911_v9  ;;  %v2833_v20 = vpop.xlane.xlu1 %2832 }
 0x317   : > { %v2872_v31 = vpop.xlane.xlu0 %2871 }
 0x318   : > { %v2904_v43 = vmax.f32 %v2872_v31, 1e-24 }
 0x319   : > { %v2839_v24 = vpop.xlane.xlu1 %2838 }
 0x31a   : > { %5185 = vrsqrt.f32 %v2904_v43 }
 0x31b   : > { %v2890_v51 = vpop.xlane.xlu0 %2889  ;;  %5187 = vrsqrt.f32 %v2906_v27 }
 0x31c   : > { %v2910_v5 = vmax.f32 %v2890_v51, 1e-24 }
 0x31d   : > { %v5178_v22 = vpop.eup %5177 }
 0x31e   : > { %5189 = vrsqrt.f32 %v2910_v5  ;;  %v2927_v2 = vmul.f32 %v5178_v22, %v6454_v46  ;;  %v5180_v18 = vpop.eup %5179  ;;  %v2913_v46 = vmax.f32 %v2899_v29, 1e-24 }
 0x31f   : > { %5191 = vrsqrt.f32 %v2912_v6  ;;  %v2929_v25 = vmul.f32 %v5180_v18, %v6378_v10 }
 0x320   : > { %v6534_v62 = vmul.f32 %v6531_v11, %v2927_v2  ;;  %5193 = vrsqrt.f32 %v2907_v57 }
 0x321   : > { %v5182_v3 = vpop.eup %5181  ;;  %5195 = vrsqrt.f32 %v2913_v46  ;;  %v6547_v4 = vmul.f32 %v6531_v11, %v2929_v25 }
 0x322   : > { %3054 = vrot.lane.b32.xlu0 %v6534_v62, %s5672_s17  ;;  %v2933_v15 = vmul.f32 %v5182_v3, %v6474_v45  ;;  %v5184_v14 = vpop.eup %5183  ;;  %5197 = vrsqrt.f32 %v2908_v56 }
 0x323   : > { %v2935_v45 = vmul.f32 %v5184_v14, %v6416_v28 }
 0x324   : > { %v6540_v33 = vmul.f32 %v6531_v11, %v2933_v15  ;;  %v4713_v15 = vld [vmem:[%s7347_s4] ss:$0 sm:$0xff]  ;;  %s5497_s4 = scalar_lea.vmem %s5496_s20, 512 }
 0x326   : > { %3066 = vrot.lane.b32.xlu0 %v6540_v33, %s5672_s17 }
 0x327   : > { %v5186_v19 = vpop.eup %5185 }
 0x328   : > { %v2928_v61 = vmul.f32 %v5186_v19, %v6493_v7  ;;  %v5188_v32 = vpop.eup %5187  ;;  %v6559_v7 = vmul.f32 %v6531_v11, %v2935_v45 }
 0x329   : > { %v2930_v28 = vmul.f32 %v5188_v32, %v6452_v41  ;;  %v2843_v41 = vmax.f32 %v2833_v20, 1e-24 }
 0x32a   : > { %v6551_v21 = vmul.f32 %v6531_v11, %v2928_v61  ;;  %3058 = vrot.lane.b32.xlu0 %v6547_v4, %s5672_s17 }
 0x32b   : > { %v5190_v52 = vpop.eup %5189  ;;  %v6571_v34 = vmul.f32 %v6531_v11, %v2930_v28 }
 0x32c   : > { %3056 = vrot.lane.b32.xlu1 %v6551_v21, %s5672_s17  ;;  %v2934_v10 = vmul.f32 %v5190_v52, %v6503_v55  ;;  %v5192_v29 = vpop.eup %5191  ;;  %v2914_v55 = vmax.f32 %v6525_v30, 1e-24 }
 0x32d   : > { %v5194_v26 = vpop.eup %5193  ;;  %v2936_v35 = vmul.f32 %v5192_v29, %v6468_v47  ;;  %v2845_v47 = vmax.f32 %v2839_v24, 1e-24 }
 0x32e   : > { %v6562_v23 = vmul.f32 %v6531_v11, %v2934_v10  ;;  %3070 = vrot.lane.b32.xlu0 %v6559_v7, %s5672_s17  ;;  %v2931_v54 = vmul.f32 %v5194_v26, %v6407_v12  ;;  %v5196_v60 = vpop.eup %5195  ;;  %5199 = vrsqrt.f32 %v2914_v55  ;;  %v2981_v26 = vld [vmem:[%s6673_s6 + $0x10] sm:$0xff] }
 0x32f   : > { %v6580_v30 = vmul.f32 %v6531_v11, %v2936_v35  ;;  %5201 = vrsqrt.f32 %v2843_v41  ;;  %v2937_v9 = vmul.f32 %v5196_v60, %v6409_v13  ;;  %v5198_v12 = vpop.eup %5197  ;;  %v2836_v13 = vpop.xlane.xlu0 %2835  ;;  %v2975_v35 = vld [vmem:[%s6678_s12 + $0x10] sm:$0xff]  ;;  %v2982_v60 = vld [vmem:[%s6673_s6 + $0x18] sm:$0xff] }
 0x330   : > { %3068 = vrot.lane.b32.xlu1 %v6562_v23, %s5672_s17  ;;  %v6587_v8 = vmul.f32 %v6531_v11, %v2931_v54  ;;  %5203 = vrsqrt.f32 %v2845_v47  ;;  %v2932_v43 = vmul.f32 %v5198_v12, %v6418_v39  ;;  %v2844_v22 = vmax.f32 %v2836_v13, 1e-24  ;;  %v2976_v54 = vld [vmem:[%s6678_s12 + $0x18] sm:$0xff] }
 0x331   : > { %v6595_v31 = vmul.f32 %v6531_v11, %v2937_v9  ;;  %v3033_v13 = vmul.f32 %v2976_v54, %v6571_v34 }
 0x332   : > { %3094 = vrot.lane.b32.xlu0 %v6547_v4, %s5673_s10  ;;  %v6603_v27 = vmul.f32 %v6531_v11, %v2932_v43  ;;  %5205 = vrsqrt.f32 %v2844_v22  ;;  %v3032_v43 = vmul.f32 %v2975_v35, %v6547_v4 }
 0x333   : > { %v2842_v6 = vpop.xlane.xlu0 %2841 }
 0x334   : > { %3060 = vrot.lane.b32.xlu1 %v6571_v34, %s5672_s17  ;;  %v2846_v57 = vmax.f32 %v2842_v6, 1e-24 }
 0x336   : > { %3106 = vrot.lane.b32.xlu0 %v6559_v7, %s5673_s10  ;;  %5207 = vrsqrt.f32 %v2846_v57  ;;  %v3038_v57 = vmul.f32 %v2975_v35, %v6559_v7 }
 0x338   : > { %3072 = vrot.lane.b32.xlu1 %v6580_v30, %s5672_s17 }
 0x33a   : > { %3098 = vrot.lane.b32.xlu0 %v6587_v8, %s5673_s10 }
 0x33b   : > { %v5200_v51 = vpop.eup %5199 }
 0x33c   : > { %3096 = vrot.lane.b32.xlu1 %v6571_v34, %s5673_s10  ;;  %v5202_v5 = vpop.eup %5201  ;;  %v2938_v39 = vmul.f32 %v5200_v51, %v6425_v59 }
 0x33d   : > { %v2851_v2 = vmul.f32 %v5202_v5, %v6488_v58  ;;  %v5204_v18 = vpop.eup %5203 }
 0x33e   : > { %3110 = vrot.lane.b32.xlu0 %v6595_v31, %s5673_s10  ;;  %v6616_v3 = vmul.f32 %v6531_v11, %v2938_v39  ;;  %v2853_v58 = vmul.f32 %v5204_v18, %v6498_v37 }
 0x33f   : > { %v6625_v59 = vmul.f32 %v4713_v15, %v2851_v2  ;;  %v5206_v46 = vpop.eup %5205 }
 0x340   : > { %3108 = vrot.lane.b32.xlu1 %v6580_v30, %s5673_s10  ;;  %v6632_v11 = vmul.f32 %v4713_v15, %v2853_v58  ;;  %v2852_v37 = vmul.f32 %v5206_v46, %v6513_v49 }
 0x342   : > { %3064 = vrot.lane.b32.xlu0 %v6603_v27, %s5672_s17  ;;  %v6647_v14 = vmul.f32 %v4713_v15, %v2852_v37 }
 0x343   : > { %v5208_v25 = vpop.eup %5207 }
 0x344   : > { %3062 = vrot.lane.b32.xlu1 %v6587_v8, %s5672_s17  ;;  %v2854_v19 = vmul.f32 %v5208_v25, %v6519_v63 }
 0x346   : > { %3090 = vrot.lane.b32.xlu0 %v6534_v62, %s5673_s10  ;;  %v6652_v61 = vmul.f32 %v4713_v15, %v2854_v19  ;;  %v3039_v15 = vmul.f32 %v2976_v54, %v6580_v30 }
 0x348   : > { %3074 = vrot.lane.b32.xlu1 %v6595_v31, %s5672_s17 }
 0x34a   : > { %3102 = vrot.lane.b32.xlu0 %v6540_v33, %s5673_s10 }
 0x34c   : > { %3076 = vrot.lane.b32.xlu1 %v6616_v3, %s5672_s17 }
 0x34e   : > { %2993 = vrot.lane.b32.xlu0 %v6625_v59, %s5672_s17 }
 0x350   : > { %3100 = vrot.lane.b32.xlu1 %v6603_v27, %s5673_s10 }
 0x352   : > { %2997 = vrot.lane.b32.xlu0 %v6632_v11, %s5672_s17 }
 0x354   : > { %3112 = vrot.lane.b32.xlu1 %v6616_v3, %s5673_s10 }
 0x356   : > { %3005 = vrot.lane.b32.xlu0 %v6625_v59, %s5673_s10 }
 0x358   : > { %3092 = vrot.lane.b32.xlu1 %v6551_v21, %s5673_s10 }
 0x35a   : > { %3009 = vrot.lane.b32.xlu0 %v6632_v11, %s5673_s10 }
 0x35c   : > { %3104 = vrot.lane.b32.xlu1 %v6562_v23, %s5673_s10 }
 0x360   : > { %2995 = vrot.lane.b32.xlu1 %v6647_v14, %s5672_s17 }
 0x364   : > { %2999 = vrot.lane.b32.xlu1 %v6652_v61, %s5672_s17  ;;  %s7358_s17 = smov %s7357_s30 }
 0x368   : > { %3007 = vrot.lane.b32.xlu1 %v6647_v14, %s5673_s10 }
 0x36c   : > { %3011 = vrot.lane.b32.xlu1 %v6652_v61, %s5673_s10 }
 0x394   : > { %v6660_v49 = vpop.permute.xlu0 %3054 }
 0x398   : > { %v6662_v56 = vpop.permute.xlu0 %3066 }
 0x39c   : > { %v3059_v45 = vpop.permute.xlu0 %3058 }
 0x39e   : > { %v6664_v63 = vpop.permute.xlu1 %3056 }
 0x3a0   : > { %v3071_v32 = vpop.permute.xlu0 %3070 }
 0x3a2   : > { %v6667_v52 = vpop.permute.xlu1 %3068 }
 0x3a4   : > { %v3095_v10 = vpop.permute.xlu0 %3094 }
 0x3a5   : > { %v3128_v55 = vsel %vm3017_vm4, %v3059_v45, %v3095_v10  ;;  %v2983_v10 = vld [vmem:[%s6673_s6 + $0x20] sm:$0xff] }
 0x3a6   : > { %v3061_v28 = vpop.permute.xlu1 %3060  ;;  %v3140_v24 = vmul.f32 %v3128_v55, %v2981_v26 }
 0x3a8   : > { %v3107_v29 = vpop.permute.xlu0 %3106  ;;  %v6689_v22 = vadd.f32 %v3140_v24, %v3032_v43 }
 0x3a9   : > { %v3134_v9 = vsel %vm3017_vm4, %v3071_v32, %v3107_v29  ;;  %v2977_v29 = vld [vmem:[%s6678_s12 + $0x20] sm:$0xff] }
 0x3aa   : > { %v3073_v20 = vpop.permute.xlu1 %3072  ;;  %v3146_v39 = vmul.f32 %v3134_v9, %v2981_v26  ;;  %v2978_v26 = vld [vmem:[%s6678_s12 + $0x28] sm:$0xff] }
 0x3ab   : > { %v3035_v9 = vmul.f32 %v2978_v26, %v6603_v27  ;;  %v2980_v27 = vld [vmem:[%s6673_s6 + $0x8] sm:$0xff] }
 0x3ac   : > { %v3099_v41 = vpop.permute.xlu0 %3098  ;;  %v6698_v46 = vadd.f32 %v3146_v39, %v3038_v57  ;;  %v2979_v39 = vld [vmem:[%s6673_s6] sm:$0xff]  ;;  %v3041_v57 = vmul.f32 %v2978_v26, %v6616_v3 }
 0x3ae   : > { %v3097_v47 = vpop.permute.xlu1 %3096 }
 0x3af   : > { %v3129_v12 = vsel %vm3017_vm4, %v3061_v28, %v3097_v47  ;;  %v3034_v47 = vmul.f32 %v2977_v29, %v6587_v8 }
 0x3b0   : > { %v3141_v51 = vmul.f32 %v3129_v12, %v2982_v60  ;;  %v3111_v5 = vpop.permute.xlu0 %3110 }
 0x3b2   : > { %v6691_v6 = vadd.f32 %v3141_v51, %v3033_v13  ;;  %v3109_v2 = vpop.permute.xlu1 %3108 }
 0x3b3   : > { %v3135_v18 = vsel %vm3017_vm4, %v3073_v20, %v3109_v2  ;;  %v2984_v20 = vld [vmem:[%s6673_s6 + $0x28] sm:$0xff]  ;;  %s4770_s6 = sshll.u32 %s7343_s8, 1 }
 0x3b4   : > { %v3147_v4 = vmul.f32 %v3135_v18, %v2982_v60  ;;  %v3165_v34 = vpack.c.bf16 %v6691_v6, %v6689_v22  ;;  %v3065_v58 = vpop.permute.xlu0 %3064  ;;  %v3040_v18 = vmul.f32 %v2977_v29, %v6595_v31  ;;  %v2969_v22 = vld [vmem:[%s780_s7] sm:$0xff]  ;;  %v2970_v6 = vld [vmem:[%s780_s7 + $0x8] sm:$0xff]  ;;  %s4322_s29 = sadd.s32 %s4904_s11, %s4770_s6 }
 0x3b5   : > { %s4771_s28 = sshll.u32 %s4322_s29, 7 }
 0x3b6   : > { %v6700_v37 = vadd.f32 %v3147_v4, %v3039_v15  ;;  %v3063_v25 = vpop.permute.xlu1 %3062  ;;  %v2973_v4 = vld [vmem:[%s6678_s12] sm:$0xff]  ;;  %s7128_s8 = scalar_lea.hbm %s7357_s30, %s4771_s28 }
 0x3b7   : > { %v3130_v30 = vsel %vm3017_vm4, %v3063_v25, %v3099_v41  ;;  %v3030_v31 = vmul.f32 %v2973_v4, %v6534_v62  ;;  %v3036_v62 = vmul.f32 %v2973_v4, %v6540_v33 }
 0x3b8   : > { %v3168_v19 = vpack.c.bf16 %v6700_v37, %v6698_v46  ;;  %v3091_v45 = vpop.permute.xlu0 %3090  ;;  %v3142_v55 = vmul.f32 %v3130_v30, %v2983_v10 }
 0x3b9   : > { %v3126_v2 = vsel %vm3017_vm4, %v6660_v49, %v3091_v45 }
 0x3ba   : > { %v3075_v32 = vpop.permute.xlu1 %3074  ;;  %v3154_v13 = vadd.f32 %v3142_v55, %v3034_v47  ;;  %v3138_v25 = vmul.f32 %v3126_v2, %v2979_v39 }
 0x3bb   : > { %v3136_v54 = vsel %vm3017_vm4, %v3075_v32, %v3111_v5 }
 0x3bc   : > { %v3103_v28 = vpop.permute.xlu0 %3102  ;;  %v3148_v41 = vmul.f32 %v3136_v54, %v2983_v10  ;;  %v3150_v26 = vadd.f32 %v3138_v25, %v3030_v31  ;;  %v3283_v31 = vand.u32 127, %v1159_v48 }
 0x3bd   : > { %v3132_v49 = vsel %vm3017_vm4, %v6662_v56, %v3103_v28 }
 0x3be   : > { %v3077_v7 = vpop.permute.xlu1 %3076  ;;  %v3160_v32 = vadd.f32 %v3148_v41, %v3040_v18 }
 0x3c0   : > { %v2994_v12 = vpop.permute.xlu0 %2993 }
 0x3c2   : > { %v3101_v35 = vpop.permute.xlu1 %3100 }
 0x3c3   : > { %v3131_v60 = vsel %vm3017_vm4, %v3065_v58, %v3101_v35  ;;  %v2974_v58 = vld [vmem:[%s6678_s12 + $0x8] sm:$0xff]  ;;  %v3144_v35 = vmul.f32 %v3132_v49, %v2979_v39 }
 0x3c4   : > { %v3143_v24 = vmul.f32 %v3131_v60, %v2984_v20  ;;  %v2998_v3 = vpop.permute.xlu0 %2997 }
 0x3c5   : > { %v3156_v47 = vadd.f32 %v3144_v35, %v3036_v62  ;;  %v1144_v62 = vpop.f32.mrf.mxu1 }
 0x3c6   : > { %v3113_v43 = vpop.permute.xlu1 %3112  ;;  %v3155_v51 = vadd.f32 %v3143_v24, %v3035_v9 }
 0x3c7   : > { %v3137_v5 = vsel %vm3017_vm4, %v3077_v7, %v3113_v43  ;;  %v3031_v7 = vmul.f32 %v2974_v58, %v6551_v21 }
 0x3c8   : > { %v3149_v15 = vmul.f32 %v3137_v5, %v2984_v20  ;;  %v3166_v8 = vpack.c.bf16 %v3155_v51, %v3154_v13  ;;  %v3006_v9 = vpop.permute.xlu0 %3005  ;;  %v3230_v13 = vsel %vm982_vm3, %v3168_v19, 0  ;;  %v2971_v51 = vld [vmem:[%s789_s0] sm:$0xff] }
 0x3c9   : > { %v3018_v39 = vsel %vm3017_vm4, %v2994_v12, %v3006_v9  ;;  %v2985_v12 = vmul.f32 %v2969_v22, %v6625_v59  ;;  %v2988_v59 = vmul.f32 %v2970_v6, %v6652_v61 }
 0x3ca   : > { %v3161_v10 = vadd.f32 %v3149_v15, %v3041_v57  ;;  %v3093_v30 = vpop.permute.xlu1 %3092  ;;  %v3180_v55 = vsel %vm982_vm3, %v3166_v8, 0  ;;  %v3022_v5 = vmul.f32 %v3018_v39, %v2971_v51  ;;  %v2986_v57 = vmul.f32 %v2970_v6, %v6647_v14 }
 0x3cb   : > { %v3127_v45 = vsel %vm3017_vm4, %v6664_v63, %v3093_v30  ;;  %4843 = vmatpush3.bf16.xpose.msra.mxu0 %v3180_v55  ;;  %v3037_v63 = vmul.f32 %v2974_v58, %v6562_v23 }
 0x3cc   : > { %v3139_v29 = vmul.f32 %v3127_v45, %v2980_v27  ;;  %v3169_v20 = vpack.c.bf16 %v3161_v10, %v3160_v32  ;;  %4844 = vmatprep.subr.bf16.mxu0 %v5666_v0  ;;  %v3010_v2 = vpop.permute.xlu0 %3009  ;;  %v3026_v8 = vadd.f32 %v3022_v5, %v2985_v12  ;;  %v2987_v10 = vmul.f32 %v2969_v22, %v6632_v11 }
 0x3cd   : > { %v3020_v37 = vsel %vm3017_vm4, %v2998_v3, %v3010_v2  ;;  %v3279_v11 = vstv %s4661_s19  ;;  %v3278_v3 = vadd.s32 8, %v6183_v50  ;;  %v2402_v12 = vrot.slane %v6173_v44, %v6186_v53  ;;  %s7353_s19 = sld [smem:[#allocation56_spill]] }
 0x3ce   : > { %v3151_v54 = vadd.f32 %v3139_v29, %v3031_v7  ;;  %v3105_v60 = vpop.permute.xlu1 %3104  ;;  %v3233_v24 = vsel %vm982_vm3, %v3169_v20, 0  ;;  %v3024_v4 = vmul.f32 %v3020_v37, %v2971_v51  ;;  %v3280_v61 = vadd.s32 %v3279_v11, %v6183_v50 }
 0x3cf   : > { %v3133_v56 = vsel %vm3017_vm4, %v6667_v52, %v3105_v60  ;;  %4853 = vmatpush3.bf16.xpose.msra.mxu1 %v3233_v24  ;;  %v3177_v52 = vsel %vm982_vm3, %v3165_v34, 0  ;;  %v2972_v34 = vld [vmem:[%s789_s0 + $0x8] sm:$0xff]  ;;  %v3281_v29 = vadd.s32 %v3279_v11, %v3278_v3 }
 0x3d0   : > { %v3145_v21 = vmul.f32 %v3133_v56, %v2980_v27  ;;  %4854 = vmatprep.subr.bf16.mxu1 %v5666_v0  ;;  %v3164_v28 = vpack.c.bf16 %v3151_v54, %v3150_v26  ;;  %v3028_v14 = vadd.f32 %v3024_v4, %v2987_v10  ;;  %v3286_v7 = vsub.s32 %v3280_v61, %v3283_v31 }
 0x3d1   : > { %v3287_v26 = vsub.s32 %v3281_v29, %v3283_v31 }
 0x3d2   : > { %v3157_v41 = vadd.f32 %v3145_v21, %v3037_v63  ;;  %v2996_v43 = vpop.permute.xlu1 %2995  ;;  %v3174_v46 = vsel %vm982_vm3, %v3164_v28, 0  ;;  %v3289_v20 = vsub.s32 0, %v3286_v7 }
 0x3d3   : > { %4845 = vmatpush3.bf16.xpose.msra.mxu0 %v3177_v52  ;;  %v3292_v54 = vsub.s32 0, %v3287_v26 }
 0x3d4   : > { %4846 = vmatprep.subr.bf16.mxu0 %v5666_v0  ;;  %v3167_v33 = vpack.c.bf16 %v3157_v41, %v3156_v47  ;;  %v4717_v35 = vmin.u32 %v3289_v20, %v3286_v7 }
 0x3d5   : > { %v4718_v60 = vmin.u32 %v3292_v54, %v3287_v26 }
 0x3d6   : > { %v3000_v23 = vpop.permute.xlu1 %2999  ;;  %v3227_v25 = vsel %vm982_vm3, %v3167_v33, 0  ;;  %vm3294_vm5 = vcmp.le.s32.totalorder %v4717_v35, 8  ;;  %v2468_v35 = vrot.slane %v1144_v62, %v6186_v53 }
 0x3d7   : > { %4855 = vmatpush3.bf16.xpose.msra.mxu1 %v3230_v13  ;;  %vm3295_vm7 = vcmp.le.s32.totalorder %v4718_v60, 8 }
 0x3d8   : > { %4856 = vmatprep.subr.bf16.mxu1 %v5666_v0 }
 0x3da   : > { %v3008_v18 = vpop.permute.xlu1 %3007 }
 0x3db   : > { %v3019_v19 = vsel %vm3017_vm4, %v2996_v43, %v3008_v18  ;;  %4847 = vmatpush3.bf16.xpose.msra.mxu0 %v3174_v46  ;;  %v2395_v46 = vcombine.high %v6173_v44, %v5666_v0 }
 0x3dc   : > { %v3023_v15 = vmul.f32 %v3019_v19, %v2972_v34  ;;  %4862 = vmatprep.subr.bf16.mxu0 %v5666_v0 }
 0x3de   : > { %v3027_v58 = vadd.f32 %v3023_v15, %v2986_v57  ;;  %v3012_v27 = vpop.permute.xlu1 %3011 }
 0x3df   : > { %v3021_v32 = vsel %vm3017_vm4, %v3000_v23, %v3012_v27  ;;  %4857 = vmatpush3.bf16.xpose.msra.mxu1 %v3227_v25  ;;  %v2409_v27 = vrot.slane %v2395_v46, %v6186_v53 }
 0x3e0   : > { %v3162_v30 = vpack.c.bf16 %v3027_v58, %v3026_v8  ;;  %v3025_v55 = vmul.f32 %v3021_v32, %v2972_v34  ;;  %4872 = vmatprep.subr.bf16.mxu1 %v5666_v0 }
 0x3e2   : > { %v3029_v49 = vadd.f32 %v3025_v55, %v2988_v59  ;;  %4849 = vmatmul.mubr.msk.bf16.vlgmr.msra.gmra.mxu0 %vm982_vm3, %v3162_v30 }
 0x3e3   : > { %4868 = vmatprep.mubr.msk.bf16.mxu0 %vm5667_vm0, %v5666_v0 }
 0x3e4   : > { %v3163_v45 = vpack.c.bf16 %v3029_v49, %v3028_v14 }
 0x3e6   : > { %4859 = vmatmul.mubr.msk.bf16.vlgmr.msra.gmra.mxu1 %vm982_vm3, %v3163_v45  ;;  %v2461_v45 = vcombine.high %v1144_v62, %v5666_v0 }
 0x3e7   : > { %4878 = vmatprep.mubr.msk.bf16.mxu1 %vm5667_vm0, %v5666_v0 }
 0x3e8   : > { %v2475_v54 = vrot.slane %v2461_v45, %v6186_v53 }
 0x4a2   : > { %v3216_v24 = vpop.f32.mrf.mxu0 }
 0x4a3   : > { %v3300_v56 = vsel %vm3294_vm5, %v3216_v24, -3.4e+38 }
 0x4a4   : > { %v4850_v63 = vpop.f32.mrf.mxu0  ;;  %v3305_v21 = vsel %vm3304_vm6, %v3300_v56, -inf }
 0x4a5   : > { %3306 = vmax.xlane.f32.xlu0 %v3305_v21 }
 0x4a6   : > { %v3219_v48 = vpop.f32.mrf.mxu0  ;;  %v3269_v28 = vpop.f32.mrf.mxu1 }
 0x4a7   : > { %v3301_v50 = vsel %vm3295_vm7, %v3219_v48, -3.4e+38  ;;  %v3302_v47 = vsel %vm3294_vm5, %v3269_v28, -3.4e+38 }
 0x4a8   : > { %v4851_v9 = vpop.f32.mrf.mxu0  ;;  %v4860_v41 = vpop.f32.mrf.mxu1  ;;  %v3308_v43 = vsel %vm3304_vm6, %v3301_v50, -inf  ;;  %v3311_v52 = vsel %vm3304_vm6, %v3302_v47, -inf }
 0x4a9   : > { %3309 = vmax.xlane.f32.xlu1 %v3308_v43  ;;  %3312 = vmax.xlane.f32.xlu0 %v3311_v52 }
 0x4aa   : > { %v3272_v33 = vpop.f32.mrf.mxu1 }
 0x4ab   : > { %v3303_v23 = vsel %vm3295_vm7, %v3272_v33, -3.4e+38 }
 0x4ac   : > { %v4861_v13 = vpop.f32.mrf.mxu1  ;;  %v3314_v51 = vsel %vm3304_vm6, %v3303_v23, -inf }
 0x4ad   : > { %3315 = vmax.xlane.f32.xlu0 %v3314_v51 }
 0x4ba   : > { %2121 = vrot.lane.b32.xlu1 %v6173_v44, %s5669_s3 }
 0x4be   : > { %2117 = vrot.lane.b32.xlu1 %v6166_v40, %s5669_s3 }
 0x4c3   : > { %2123 = vrot.lane.b32.xlu0 %v1144_v62, %s5669_s3 }
 0x52e   : > { %v3307_v39 = vpop.xlane.xlu0 %3306 }
 0x52f   : > { %v3317_v2 = vsub.f32 %v3300_v56, %v3307_v39 }
 0x531   : > { %v3321_v22 = vmul.f32 1.442695, %v3317_v2 }
 0x532   : > { %v3310_v6 = vpop.xlane.xlu1 %3309  ;;  %v3313_v34 = vpop.xlane.xlu0 %3312 }
 0x533   : > { %v3318_v5 = vsub.f32 %v3301_v50, %v3310_v6  ;;  %v3319_v18 = vsub.f32 %v3302_v47, %v3313_v34  ;;  %5209 = vpow2.f32 %v3321_v22 }
 0x535   : > { %v3323_v37 = vmul.f32 1.442695, %v3318_v5  ;;  %v3325_v19 = vmul.f32 1.442695, %v3319_v18 }
 0x536   : > { %v2122_v57 = vpop.permute.xlu1 %2121  ;;  %v3316_v15 = vpop.xlane.xlu0 %3315 }
 0x537   : > { %5211 = vpow2.f32 %v3323_v37  ;;  %v2410_v8 = vcombine.high %v2122_v57, %v5666_v0  ;;  %v2417_v4 = vrot.slane %v2122_v57, %v6186_v53  ;;  %v3320_v58 = vsub.f32 %v3303_v23, %v3316_v15 }
 0x538   : > { %5213 = vpow2.f32 %v3325_v19 }
 0x539   : > { %v2424_v25 = vrot.slane %v2410_v8, %v6186_v53  ;;  %v2425_v32 = vcombine.low %v2402_v12, %v2417_v4  ;;  %v2426_v10 = vcombine.high %v2402_v12, %v2417_v4  ;;  %v3327_v30 = vmul.f32 1.442695, %v3320_v58 }
 0x53a   : > { %v2124_v59 = vpop.permute.xlu0 %2123 }
 0x53b   : > { %v2441_v55 = vcombine.low %v2409_v27, %v2424_v25  ;;  %v2442_v44 = vcombine.high %v2409_v27, %v2424_v25  ;;  %v2433_v14 = vrot.slane %v2425_v32, %v6197_v1  ;;  %v2440_v49 = vrot.slane %v2426_v10, %v6197_v1 }
 0x53c   : > { %5215 = vpow2.f32 %v3327_v30  ;;  %v2476_v31 = vcombine.high %v2124_v59, %v5666_v0  ;;  %v2483_v3 = vrot.slane %v2124_v59, %v6186_v53 }
 0x53d   : > { %v2449_v11 = vrot.slane %v2441_v55, %v6197_v1  ;;  %v2456_v61 = vrot.slane %v2442_v44, %v6197_v1  ;;  %v2727_v7 = vcombine.low %v2433_v14, %v2440_v49  ;;  %v4709_v29 = vcombine.high %v2433_v14, %v2440_v49  ;;  %v2118_v49 = vpop.permute.xlu1 %2117 }
 0x53e   : > { %v2490_v60 = vrot.slane %v2476_v31, %v6186_v53  ;;  %v2491_v56 = vcombine.low %v2468_v35, %v2483_v3  ;;  %v2492_v63 = vcombine.high %v2468_v35, %v2483_v3  ;;  %v2278_v45 = vcombine.high %v2118_v49, %v5666_v0 }
 0x53f   : > { %v2743_v20 = vcombine.low %v2449_v11, %v2456_v61  ;;  %v4710_v26 = vcombine.high %v2449_v11, %v2456_v61  ;;  %v2734_v50 = vrot.slane %v2727_v7, %v6186_v53  ;;  %v2742_v47 = vrot.slane %v4709_v29, %v6186_v53 }
 0x540   : > { %v6803_v24 = vpop.eup %5209  ;;  %v2507_v21 = vcombine.low %v2475_v54, %v2490_v60  ;;  %v2508_v48 = vcombine.high %v2475_v54, %v2490_v60  ;;  %v2499_v43 = vrot.slane %v2491_v56, %v6197_v1  ;;  %v2506_v52 = vrot.slane %v2492_v63, %v6197_v1 }
 0x541   : > { %v2750_v9 = vrot.slane %v2743_v20, %v6186_v53  ;;  %v2758_v62 = vrot.slane %v4710_v26, %v6186_v53  ;;  %v3329_v13 = vsel %vm3304_vm6, %v6803_v24, 0.0  ;;  %v2759_v6 = vcombine.low %v2734_v50, %v2742_v47 }
 0x542   : > { %v2515_v33 = vrot.slane %v2507_v21, %v6197_v1  ;;  %v2522_v23 = vrot.slane %v2508_v48, %v6197_v1  ;;  %v2777_v51 = vcombine.low %v2499_v43, %v2506_v52  ;;  %v4711_v39 = vcombine.high %v2499_v43, %v2506_v52  ;;  %3330 = vadd.xlane.f32.xlu1 %v3329_v13 }
 0x543   : > { %v2767_v18 = vcombine.low %v2750_v9, %v2758_v62  ;;  %v2766_v27 = vrot.slane %v2759_v6, %v6197_v1  ;;  %v2263_v11 = vcombine.high %v6166_v40, %v5666_v0  ;;  %v2285_v61 = vrot.slane %v2118_v49, %v6186_v53 }
 0x544   : > { %v6805_v28 = vpop.eup %5211  ;;  %v2793_v2 = vcombine.low %v2515_v33, %v2522_v23  ;;  %v4712_v22 = vcombine.high %v2515_v33, %v2522_v23  ;;  %v2784_v37 = vrot.slane %v2777_v51, %v6186_v53  ;;  %v2792_v19 = vrot.slane %v4711_v39, %v6186_v53 }
 0x545   : > { %v6811_v41 = vpop.eup %5213  ;;  %v3332_v5 = vsel %vm3304_vm6, %v6805_v28, 0.0  ;;  %v2774_v4 = vrot.slane %v2767_v18, %v6197_v1  ;;  %v2292_v31 = vrot.slane %v2278_v45, %v6186_v53  ;;  %v2270_v3 = vrot.slane %v6166_v40, %v6186_v53 }
 0x546   : > { %v3335_v34 = vsel %vm3304_vm6, %v6811_v41, 0.0  ;;  %v2800_v12 = vrot.slane %v2793_v2, %v6186_v53  ;;  %v2808_v57 = vrot.slane %v4712_v22, %v6186_v53  ;;  %3333 = vadd.xlane.f32.xlu0 %v3332_v5  ;;  %v2809_v8 = vcombine.low %v2784_v37, %v2792_v19 }
 0x547   : > { %3336 = vadd.xlane.f32.xlu1 %v3335_v34  ;;  %v2775_v10 = vcombine.low %v2766_v27, %v2774_v4  ;;  %v2776_v59 = vcombine.high %v2766_v27, %v2774_v4  ;;  %v2277_v7 = vrot.slane %v2263_v11, %v6186_v53  ;;  %v2293_v29 = vcombine.low %v2270_v3, %v2285_v61 }
 0x548   : > { %v2817_v58 = vcombine.low %v2800_v12, %v2808_v57  ;;  %v2816_v25 = vrot.slane %v2809_v8, %v6197_v1  ;;  %v2294_v20 = vcombine.high %v2270_v3, %v2285_v61  ;;  %v2131_v40 = vcombine.high %v6161_v36, %v5666_v0 }
 0x549   : > { %v6823_v46 = vpop.eup %5215  ;;  %v2309_v26 = vcombine.low %v2277_v7, %v2292_v31  ;;  %v2310_v35 = vcombine.high %v2277_v7, %v2292_v31  ;;  %v2301_v56 = vrot.slane %v2293_v29, %v6197_v1  ;;  %v2197_v47 = vcombine.high %v6163_v38, %v5666_v0 }
 0x54a   : > { %v3338_v15 = vsel %vm3304_vm6, %v6823_v46, 0.0  ;;  %v2824_v32 = vrot.slane %v2817_v58, %v6197_v1  ;;  %v2308_v63 = vrot.slane %v2294_v20, %v6197_v1  ;;  %v2329_v9 = vcombine.high %v6169_v42, %v5666_v0 }
 0x54b   : > { %3339 = vadd.xlane.f32.xlu0 %v3338_v15  ;;  %v2317_v21 = vrot.slane %v2309_v26, %v6197_v1  ;;  %v2324_v48 = vrot.slane %v2310_v35, %v6197_v1  ;;  %v2138_v51 = vrot.slane %v6161_v36, %v6186_v53  ;;  %v2145_v39 = vrot.slane %v2131_v40, %v6186_v53 }
 0x54c   : > { %v2825_v30 = vcombine.low %v2816_v25, %v2824_v32  ;;  %v2826_v55 = vcombine.high %v2816_v25, %v2824_v32  ;;  %v2627_v43 = vcombine.low %v2301_v56, %v2308_v63  ;;  %v4705_v52 = vcombine.high %v2301_v56, %v2308_v63 }
 0x54d   : > { %v2643_v33 = vcombine.low %v2317_v21, %v2324_v48  ;;  %v4706_v23 = vcombine.high %v2317_v21, %v2324_v48  ;;  %v2204_v6 = vrot.slane %v6163_v38, %v6186_v53  ;;  %v2211_v34 = vrot.slane %v2197_v47, %v6186_v53 }
 0x54e   : > { %v3353_v44 = vpack.c.bf16 %v2825_v30, %v2775_v10  ;;  %v3356_v14 = vpack.c.bf16 %v2826_v55, %v2776_v59  ;;  %v2336_v5 = vrot.slane %v6169_v42, %v6186_v53  ;;  %v2343_v18 = vrot.slane %v2329_v9, %v6186_v53 }
 0x54f   : > { %v6873_v19 = vrot.slane %v2627_v43, %v6186_v53  ;;  %v6877_v15 = vrot.slane %v4705_v52, %v6186_v53  ;;  %v6883_v8 = vrot.slane %v4706_v23, %v6186_v53 }
 0x550   : > { %4863 = vmatpush3.bf16.msra.mxu0 %v3353_v44  ;;  %4873 = vmatpush3.bf16.msra.mxu1 %v3356_v14 }
 0x551   : > { %4864 = vmatprep.subr.bf16.mxu0 %v5666_v0  ;;  %4874 = vmatprep.subr.bf16.mxu1 %v5666_v0 }
 0x558   : > { %2113 = vrot.lane.b32.xlu1 %v6161_v36, %s5669_s3 }
 0x55c   : > { %2115 = vrot.lane.b32.xlu1 %v6163_v38, %s5669_s3  ;;  %v6880_v38 = vrot.slane %v2643_v33, %v6186_v53 }
 0x55e   : > { %v2667_v56 = vcombine.low %v6880_v38, %v6883_v8  ;;  %v2659_v38 = vcombine.low %v6873_v19, %v6877_v15 }
 0x560   : > { %v2666_v19 = vrot.slane %v2659_v38, %v6197_v1 }
 0x561   : > { %2119 = vrot.lane.b32.xlu0 %v6169_v42, %s5669_s3 }
 0x5cb   : > { %v3331_v54 = vpop.xlane.xlu1 %3330 }
 0x5cc   : > { %5217 = vrcp.f32 %v3331_v54 }
 0x5cf   : > { %v3334_v60 = vpop.xlane.xlu0 %3333 }
 0x5d0   : > { %v3337_v50 = vpop.xlane.xlu1 %3336  ;;  %5219 = vrcp.f32 %v3334_v60 }
 0x5d1   : > { %5221 = vrcp.f32 %v3337_v50 }
 0x5d4   : > { %v3340_v62 = vpop.xlane.xlu0 %3339  ;;  %v2114_v13 = vpop.permute.xlu1 %2113 }
 0x5d5   : > { %v2146_v2 = vcombine.high %v2114_v13, %v5666_v0  ;;  %v2153_v22 = vrot.slane %v2114_v13, %v6186_v53  ;;  %5223 = vrcp.f32 %v3340_v62 }
 0x5d7   : > { %v2160_v36 = vrot.slane %v2146_v2, %v6186_v53  ;;  %v2161_v12 = vcombine.low %v2138_v51, %v2153_v22  ;;  %v2162_v57 = vcombine.high %v2138_v51, %v2153_v22 }
 0x5d8   : > { %v2120_v37 = vpop.permute.xlu0 %2119  ;;  %v2116_v42 = vpop.permute.xlu1 %2115 }
 0x5d9   : > { %v2351_v4 = vrot.slane %v2120_v37, %v6186_v53  ;;  %v2177_v58 = vcombine.low %v2145_v39, %v2160_v36  ;;  %v2178_v27 = vcombine.high %v2145_v39, %v2160_v36  ;;  %v2344_v25 = vcombine.high %v2120_v37, %v5666_v0 }
 0x5da   : > { %v2169_v32 = vrot.slane %v2161_v12, %v6197_v1  ;;  %v2212_v10 = vcombine.high %v2116_v42, %v5666_v0  ;;  %v2219_v30 = vrot.slane %v2116_v42, %v6186_v53  ;;  %v2176_v59 = vrot.slane %v2162_v57, %v6197_v1  ;;  %v5218_v57 = vpop.eup %5217 }
 0x5db   : > { %v2185_v55 = vrot.slane %v2177_v58, %v6197_v1  ;;  %v2192_v44 = vrot.slane %v2178_v27, %v6197_v1  ;;  %v2359_v14 = vcombine.low %v2336_v5, %v2351_v4  ;;  %v2358_v3 = vrot.slane %v2344_v25, %v6186_v53 }
 0x5dc   : > { %v2226_v49 = vrot.slane %v2212_v10, %v6186_v53  ;;  %v2227_v45 = vcombine.low %v2204_v6, %v2219_v30  ;;  %v2228_v11 = vcombine.high %v2204_v6, %v2219_v30  ;;  %v2360_v7 = vcombine.high %v2336_v5, %v2351_v4 }
 0x5dd   : > { %v2543_v61 = vcombine.low %v2185_v55, %v2192_v44  ;;  %v4702_v31 = vcombine.high %v2185_v55, %v2192_v44  ;;  %v2527_v54 = vcombine.low %v2169_v32, %v2176_v59  ;;  %v2367_v60 = vrot.slane %v2359_v14, %v6197_v1  ;;  %v5220_v4 = vpop.eup %5219 }
 0x5de   : > { %v2235_v29 = vrot.slane %v2227_v45, %v6197_v1  ;;  %v2242_v20 = vrot.slane %v2228_v11, %v6197_v1  ;;  %v2243_v26 = vcombine.low %v2211_v34, %v2226_v49  ;;  %v2244_v35 = vcombine.high %v2211_v34, %v2226_v49  ;;  %v5222_v30 = vpop.eup %5221 }
 0x5df   : > { %v4701_v40 = vcombine.high %v2169_v32, %v2176_v59  ;;  %v2374_v47 = vrot.slane %v2360_v7, %v6197_v1  ;;  %v2375_v9 = vcombine.low %v2343_v18, %v2358_v3  ;;  %v2376_v43 = vcombine.high %v2343_v18, %v2358_v3 }
 0x5e0   : > { %v2251_v63 = vrot.slane %v2243_v26, %v6197_v1  ;;  %v2258_v21 = vrot.slane %v2244_v35, %v6197_v1  ;;  %v2577_v48 = vcombine.low %v2235_v29, %v2242_v20  ;;  %v4703_v50 = vcombine.high %v2235_v29, %v2242_v20 }
 0x5e1   : > { %v2550_v52 = vrot.slane %v2543_v61, %v6186_v53  ;;  %v2558_v62 = vrot.slane %v4702_v31, %v6186_v53  ;;  %v2383_v13 = vrot.slane %v2375_v9, %v6197_v1  ;;  %v2390_v51 = vrot.slane %v2376_v43, %v6197_v1 }
 0x5e2   : > { %v2593_v33 = vcombine.low %v2251_v63, %v2258_v21  ;;  %v4704_v23 = vcombine.high %v2251_v63, %v2258_v21  ;;  %v2677_v39 = vcombine.low %v2367_v60, %v2374_v47  ;;  %v4707_v2 = vcombine.high %v2367_v60, %v2374_v47  ;;  %v5224_v11 = vpop.eup %5223 }
 0x5e3   : > { %v2584_v22 = vrot.slane %v2577_v48, %v6186_v53  ;;  %v2592_v6 = vrot.slane %v4703_v50, %v6186_v53  ;;  %v2693_v36 = vcombine.low %v2383_v13, %v2390_v51  ;;  %v4708_v12 = vcombine.high %v2383_v13, %v2390_v51  ;;  %v5134_v13 = vld [vmem:[%s7351_s9 + $0x10] sm:$0xff]   ;;  %v5135_v51 = vld [vmem:[%s7351_s9 + $0x8] sm:$0xff]  }
 0x5e4   : > { %v2600_v34 = vrot.slane %v2593_v33, %v6186_v53  ;;  %v2608_v5 = vrot.slane %v4704_v23, %v6186_v53  ;;  %v2684_v18 = vrot.slane %v2677_v39, %v6186_v53  ;;  %v2692_v37 = vrot.slane %v4707_v2, %v6186_v53  ;;  %v5132_v33 = vld [vmem:[%s7351_s9 + $0x20] sm:$0xff]   ;;  %v5133_v23 = vld [vmem:[%s7351_s9 + $0x18] sm:$0xff]  }
 0x5e5   : > { %v2534_v8 = vrot.slane %v2527_v54, %v6186_v53  ;;  %v2542_v42 = vrot.slane %v4701_v40, %v6186_v53  ;;  %v2700_v58 = vrot.slane %v2693_v36, %v6186_v53  ;;  %v2708_v27 = vrot.slane %v4708_v12, %v6186_v53 }
 0x5e6   : > { %v2709_v25 = vcombine.low %v2684_v18, %v2692_v37  ;;  %v2617_v32 = vcombine.low %v2600_v34, %v2608_v5  ;;  %v2674_v10 = vrot.slane %v2667_v56, %v6197_v1  ;;  %v2609_v59 = vcombine.low %v2584_v22, %v2592_v6 }
 0x5e7   : > { %v2717_v55 = vcombine.low %v2700_v58, %v2708_v27  ;;  %v2567_v44 = vcombine.low %v2550_v52, %v2558_v62  ;;  %v2559_v14 = vcombine.low %v2534_v8, %v2542_v42  ;;  %v3346_v48 = vmul.f32 %v5220_v4, %v6805_v28 }
 0x5e8   : > { %v2716_v15 = vrot.slane %v2709_v25, %v6197_v1  ;;  %v2624_v45 = vrot.slane %v2617_v32, %v6197_v1  ;;  %v2675_v61 = vcombine.low %v2666_v19, %v2674_v10  ;;  %v2676_v31 = vcombine.high %v2666_v19, %v2674_v10 }
 0x5e9   : > { %v2724_v49 = vrot.slane %v2717_v55, %v6197_v1  ;;  %v2574_v29 = vrot.slane %v2567_v44, %v6197_v1  ;;  %v2616_v20 = vrot.slane %v2609_v59, %v6197_v1  ;;  %v2566_v26 = vrot.slane %v2559_v14, %v6197_v1 }
 0x5ea   : > { %v3348_v50 = vmul.f32 %v5224_v11, %v6823_v46  ;;  %v3345_v9 = vmul.f32 %v5218_v57, %v6803_v24  ;;  %v3347_v43 = vmul.f32 %v5222_v30, %v6811_v41  ;;  %v7350_v28 = vmov 0   ;;  %v5129_v24 = vld [vmem:[%s7351_s9 + $0x38] sm:$0xff]   ;;  %v5130_v41 = vld [vmem:[%s7351_s9 + $0x30] sm:$0xff]   ;;  %v5131_v46 = vld [vmem:[%s7351_s9 + $0x28] sm:$0xff]  }
 0x5eb   : > { %v2725_v3 = vcombine.low %v2716_v15, %v2724_v49  ;;  %v2726_v7 = vcombine.high %v2716_v15, %v2724_v49  ;;  %v2625_v60 = vcombine.low %v2616_v20, %v2624_v45  ;;  %v2626_v56 = vcombine.high %v2616_v20, %v2624_v45 }
 0x5ec   : > { %v2575_v63 = vcombine.low %v2566_v26, %v2574_v29  ;;  %v2576_v21 = vcombine.high %v2566_v26, %v2574_v29  ;;  %v3349_v52 = vpack.c.bf16 %v3346_v48, %v3345_v9  ;;  %v3350_v62 = vpack.c.bf16 %v3348_v50, %v3347_v43 }
 0x5ed   : > { %v3352_v35 = vpack.c.bf16 %v2725_v3, %v2675_v61  ;;  %v3355_v54 = vpack.c.bf16 %v2726_v7, %v2676_v31 }
 0x5ee   : > { %v3351_v40 = vpack.c.bf16 %v2625_v60, %v2575_v63  ;;  %v3354_v47 = vpack.c.bf16 %v2626_v56, %v2576_v21 }
 0x5ef   : > { %4865 = vmatpush3.bf16.msra.mxu0 %v3352_v35  ;;  %4875 = vmatpush3.bf16.msra.mxu1 %v3355_v54 }
 0x5f0   : > { %4866 = vmatprep.subr.bf16.mxu0 %v5666_v0  ;;  %4876 = vmatprep.subr.bf16.mxu1 %v5666_v0 }
 0x5f3   : > { %4867 = vmatpush3.bf16.msra.mxu0 %v3351_v40  ;;  %4877 = vmatpush3.bf16.msra.mxu1 %v3354_v47 }
 0x5f4   : > { %4882 = vmatprep.subr.bf16.mxu0 %v5666_v0 }
 0x5f6   : > { %4869 = vmatmul.mubr.msk.bf16.vlgmr.msra.gmra.mxu0 %vm3304_vm6, %v3349_v52  ;;  %4879 = vmatmul.mubr.msk.bf16.vlgmr.msra.gmra.mxu1 %vm3304_vm6, %v3350_v62 }
 0x5f7   : > { %4898 = vmatprep.mubr.msk.bf16.mxu0 %vm5667_vm0, %v5666_v0  ;;  %3922 = vmatprep.mubr.bf16.mxu1 %v7350_v28 }
 0x5f8   : > { %4883 = vmatpush3.bf16.msra.mxu0 %v5129_v24 }
 0x5f9   : > { %4884 = vmatprep.subr.bf16.mxu0 %v5666_v0 }
 0x5fc   : > { %4885 = vmatpush3.bf16.msra.mxu0 %v5130_v41 }
 0x5fd   : > { %4886 = vmatprep.subr.bf16.mxu0 %v5666_v0 }
 0x600   : > { %4887 = vmatpush3.bf16.msra.mxu0 %v5131_v46 }
 0x601   : > { %4888 = vmatprep.subr.bf16.mxu0 %v5666_v0 }
 0x604   : > { %4889 = vmatpush3.bf16.msra.mxu0 %v5132_v33 }
 0x605   : > { %4890 = vmatprep.subr.bf16.mxu0 %v5666_v0 }
 0x608   : > { %4891 = vmatpush3.bf16.msra.mxu0 %v5133_v23 }
 0x609   : > { %4892 = vmatprep.subr.bf16.mxu0 %v5666_v0 }
 0x60c   : > { %4893 = vmatpush3.bf16.msra.mxu0 %v5134_v13  ;;  %v5136_v13 = vld [vmem:[%s7351_s9] sm:$0xff]  }
 0x60d   : > { %4894 = vmatprep.subr.bf16.mxu0 %v5666_v0 }
 0x610   : > { %4895 = vmatpush3.bf16.msra.mxu0 %v5135_v51 }
 0x611   : > { %4896 = vmatprep.subr.bf16.mxu0 %v5666_v0 }
 0x614   : > { %4897 = vmatpush3.bf16.msra.mxu0 %v5136_v13  ;;  %v5155_v13 = vld [vmem:[#allocation16 + $0x10] ss:$8 sps:$4 sm:$0xff]  }
 0x6b6   : > { %v3394_v39 = vpop.f32.mrf.mxu0  ;;  %v3438_v2 = vpop.f32.mrf.mxu1 }
 0x6b7   : > { %v3445_v22 = vcombine.high %v3394_v39, %v5666_v0  ;;  %v3452_v6 = vrot.slane %v3394_v39, %v6186_v53  ;;  %v3460_v34 = vcombine.high %v3438_v2, %v5666_v0  ;;  %v3467_v5 = vrot.slane %v3438_v2, %v6186_v53 }
 0x6b8   : > { %v4870_v18 = vpop.f32.mrf.mxu0  ;;  %v4880_v37 = vpop.f32.mrf.mxu1 }
 0x6b9   : > { %v3459_v36 = vrot.slane %v3445_v22, %v6186_v53  ;;  %v3474_v12 = vrot.slane %v3460_v34, %v6186_v53  ;;  %v3475_v57 = vcombine.low %v3452_v6, %v3467_v5  ;;  %v3476_v38 = vcombine.high %v3452_v6, %v3467_v5 }
 0x6ba   : > { %v3397_v8 = vpop.f32.mrf.mxu0  ;;  %v3441_v42 = vpop.f32.mrf.mxu1 }
 0x6bb   : > { %v3483_v4 = vrot.slane %v3475_v57, %v6197_v1  ;;  %v3490_v58 = vrot.slane %v3476_v38, %v6197_v1  ;;  %v3491_v27 = vcombine.low %v3459_v36, %v3474_v12  ;;  %v3492_v25 = vcombine.high %v3459_v36, %v3474_v12 }
 0x6bc   : > { %v3511_v32 = vcombine.high %v3397_v8, %v5666_v0  ;;  %v3518_v10 = vrot.slane %v3397_v8, %v6186_v53  ;;  %v3526_v30 = vcombine.high %v3441_v42, %v5666_v0  ;;  %v3533_v59 = vrot.slane %v3441_v42, %v6186_v53  ;;  %v4871_v55 = vpop.f32.mrf.mxu0  ;;  %v4881_v44 = vpop.f32.mrf.mxu1 }
 0x6bd   : > { %v3499_v14 = vrot.slane %v3491_v27, %v6197_v1  ;;  %v3506_v19 = vrot.slane %v3492_v25, %v6197_v1  ;;  %v3577_v15 = vcombine.low %v3483_v4, %v3490_v58  ;;  %v4721_v49 = vcombine.high %v3483_v4, %v3490_v58 }
 0x6be   : > { %v3525_v45 = vrot.slane %v3511_v32, %v6186_v53  ;;  %v3540_v11 = vrot.slane %v3526_v30, %v6186_v53  ;;  %v3541_v61 = vcombine.low %v3518_v10, %v3533_v59  ;;  %v3542_v31 = vcombine.high %v3518_v10, %v3533_v59 }
 0x6bf   : > { %v3584_v3 = vrot.slane %v3577_v15, %v6186_v53  ;;  %v3592_v0 = vrot.slane %v4721_v49, %v6186_v53  ;;  %v3593_v7 = vcombine.low %v3499_v14, %v3506_v19  ;;  %v4722_v29 = vcombine.high %v3499_v14, %v3506_v19  ;;  %v5139_v49 = vld [vmem:[#allocation14 + $0x34] ss:$8 sps:$4 sm:$0xff]  }
 0x6c0   : > { %v3549_v20 = vrot.slane %v3541_v61, %v6197_v1  ;;  %v3556_v26 = vrot.slane %v3542_v31, %v6197_v1  ;;  %v3557_v35 = vcombine.low %v3525_v45, %v3540_v11  ;;  %v3558_v54 = vcombine.high %v3525_v45, %v3540_v11  ;;  %v5137_v45 = vld [vmem:[#allocation14 + $0x30] ss:$8 sps:$4 sm:$0xff]   ;;  %3898 = vmatprep.subr.bf16.mxu1 %v5139_v49  ;;  %v5142_v11 = vld [vmem:[#allocation14 + $0x24] ss:$8 sps:$4 sm:$0xff]   ;;  %v5140_v61 = vld [vmem:[#allocation14 + $0x20] ss:$8 sps:$4 sm:$0xff]  }
 0x6c1   : > { %v3600_v60 = vrot.slane %v3593_v7, %v6186_v53  ;;  %v3608_v56 = vrot.slane %v4722_v29, %v6186_v53  ;;  %v3609_v63 = vcombine.low %v3584_v3, %v3592_v0  ;;  %3899 = vmatpush1.bf16.msra.mxu1 %v5137_v45  ;;  %v5145_v31 = vld [vmem:[#allocation14 + $0x14] ss:$8 sps:$4 sm:$0xff]   ;;  %v5143_v3 = vld [vmem:[#allocation14 + $0x10] ss:$8 sps:$4 sm:$0xff]   ;;  %v5148_v0 = vld [vmem:[#allocation14 + $0x4] ss:$8 sps:$4 sm:$0xff]  }
 0x6c2   : > { %v3565_v21 = vrot.slane %v3557_v35, %v6197_v1  ;;  %v3572_v48 = vrot.slane %v3558_v54, %v6197_v1  ;;  %v3627_v50 = vcombine.low %v3549_v20, %v3556_v26  ;;  %v4723_v40 = vcombine.high %v3549_v20, %v3556_v26  ;;  %3900 = vmatprep.subr.bf16.mxu1 %v5142_v11  ;;  %v5146_v7 = vld [vmem:[#allocation14] ss:$8 sps:$4 sm:$0xff]   ;;  %v5151_v29 = vld [vmem:[#allocation16 + $0x34] ss:$8 sps:$4 sm:$0xff]  }
 0x6c3   : > { %v3617_v47 = vcombine.low %v3600_v60, %v3608_v56  ;;  %v3616_v24 = vrot.slane %v3609_v63, %v6197_v1 }
 0x6c4   : > { %v3634_v9 = vrot.slane %v3627_v50, %v6186_v53  ;;  %v3642_v43 = vrot.slane %v4723_v40, %v6186_v53  ;;  %v3643_v52 = vcombine.low %v3565_v21, %v3572_v48  ;;  %v4724_v62 = vcombine.high %v3565_v21, %v3572_v48  ;;  %v4733_v48 = vld [vmem:[%s7352_s1] ss:$0 sm:$0xff]  ;;  %s7356_s1 = sld [smem:[#allocation40_spill]] }
 0x6c5   : > { %v3624_v41 = vrot.slane %v3617_v47, %v6197_v1  ;;  %3901 = vmatpush1.bf16.msra.mxu1 %v5140_v61 }
 0x6c6   : > { %v3650_v46 = vrot.slane %v3643_v52, %v6186_v53  ;;  %v3658_v33 = vrot.slane %v4724_v62, %v6186_v53  ;;  %v3659_v23 = vcombine.low %v3634_v9, %v3642_v43  ;;  %3902 = vmatprep.subr.bf16.mxu1 %v5145_v31  ;;  %v4734_v9 = vld [vmem:[%s7353_s19] ss:$0 sm:$0xff] }
 0x6c7   : > { %v3625_v51 = vcombine.low %v3616_v24, %v3624_v41  ;;  %v3626_v6 = vcombine.high %v3616_v24, %v3624_v41  ;;  %v5149_v24 = vld [vmem:[#allocation16 + $0x30] ss:$8 sps:$4 sm:$0xff]  }
 0x6c8   : > { %v3667_v39 = vcombine.low %v3650_v46, %v3658_v33  ;;  %v3666_v2 = vrot.slane %v3659_v23, %v6197_v1  ;;  %v5154_v46 = vld [vmem:[#allocation16 + $0x24] ss:$8 sps:$4 sm:$0xff]   ;;  %v5152_v33 = vld [vmem:[#allocation16 + $0x20] ss:$8 sps:$4 sm:$0xff]   ;;  %v5157_v23 = vld [vmem:[#allocation16 + $0x14] ss:$8 sps:$4 sm:$0xff]  }
 0x6c9   : > { %3903 = vmatpush1.bf16.msra.mxu1 %v5143_v3 }
 0x6ca   : > { %v3674_v22 = vrot.slane %v3667_v39, %v6197_v1  ;;  %3904 = vmatprep.subr.bf16.mxu1 %v5148_v0  ;;  %v5158_v39 = vld [vmem:[#allocation16] ss:$8 sps:$4 sm:$0xff]   ;;  %p7359_p0 = scmp.ne.s32.totalorder %s7356_s1, 0 }
 0x6cc   : > { %v3676_v34 = vcombine.high %v3666_v2, %v3674_v22  ;;  %v3675_v5 = vcombine.low %v3666_v2, %v3674_v22  ;;  %v5161_v2 = vld [vmem:[%s7354_s23 + $0x78] sm:$0xff]   ;;  %v5163_v22 = vld [vmem:[%s7354_s23 + $0x70] sm:$0xff]  }
 0x6cd   : > { %3905 = vmatpush1.bf16.msra.mxu1 %v5146_v7  ;;  %4808 = vmatprep.subr.bf16.mxu0 %v5161_v2 }
 0x6ce   : > { %v5108_v18 = vpack.i.bf16 %v3676_v34, %v3626_v6  ;;  %3989 = vmatprep.subr.bf16.mxu1 %v5151_v29  ;;  %v5164_v6 = vld [vmem:[%s7354_s23 + $0x30] sm:$0xff]   ;;  %v5165_v34 = vld [vmem:[%s7354_s23 + $0x68] sm:$0xff]  }
 0x6d0   : > { %5109 = vrot.lane.b32.xlu0 %v5108_v18, %s5669_s3  ;;  %v5167_v18 = vld [vmem:[%s7354_s23 + $0x60] sm:$0xff]   ;;  %s4658_s3 = sshll.u32 %s883_s5, 4 }
 0x6d1   : > { %s885_s12 = scalar_lea.vmem [#allocation17], %s4658_s3 }
 0x6d2   : > { %s4325_s19 = sshll.u32 %s885_s12, 4  ;;  %s7130_s19 = int_to_ptr.vmem [resolvable:$true] %s4325_s19 }
 0x6d3   : > { %s5491_s10 = scalar_lea.vmem %s7130_s19, 256  ;;  %p5498_p4 = scmp.lt.s32.totalorder %s7130_s19, %s5496_s20 }
 0x6d4   : > { %p5492_p9 = scmp.ne.s32.totalorder %s7130_s19, %s5491_s10  ;;  %p5499_p1 = scmp.lt.s32.totalorder %s5497_s4, %s5491_s10 }
 0x6d6   : > { %p5493_p5 = pnand %p5492_p9, %p7359_p0  ;;  %p5500_p10 = por %p5499_p1, %p5498_p4 }
 0x6d8   : > { %p5494_p11 = pneg %p5493_p5 }
 0x6da   : > { %p5501_p6 = pnand %p5500_p10, %p5494_p11 }
 0x742   : > { %v5110_v37 = vpop.permute.xlu0 %5109 }
 0x743   : > { %v5112_v53 = vunpack.i.h.bf16 %v5110_v37  ;;  %v5111_v36 = vunpack.i.l.bf16 %v5110_v37  ;;  %v5168_v37 = vld [vmem:[%s7354_s23 + $0x20] sm:$0xff]  }
 0x745   : > { %v3685_v12 = vsel %vm982_vm3, %v3625_v51, %v5111_v36  ;;  %v3686_v57 = vsel %vm982_vm3, %v3675_v5, %v5112_v53  ;;  %v5160_v51 = vld [vmem:[#allocation16 + $0x4] ss:$8 sps:$4 sm:$0xff]   ;;  %v5169_v53 = vld [vmem:[%s7354_s23 + $0x58] sm:$0xff]  }
 0x746   : > { %v3687_v38 = vpack.c.bf16 %v3686_v57, %v3685_v12  ;;  %v5166_v5 = vld [vmem:[%s7354_s23 + $0x28] sm:$0xff]   ;;  %v5170_v36 = vld [vmem:[%s7354_s23 + $0x18] sm:$0xff]   ;;  %v5171_v12 = vld [vmem:[%s7354_s23 + $0x50] sm:$0xff]  }
 0x747   : > { %v5172_v57 = vld [vmem:[%s7354_s23 + $0x10] sm:$0xff]  }
 0x748   : > { %4899 = vmatmul.mubr.bf16.vlgmr.msra.gmra.mxu0 %v3687_v38  ;;  %v5173_v38 = vld [vmem:[%s7354_s23 + $0x48] sm:$0xff]  }
 0x808   : > { %v3786_v8 = vpop.f32.mrf.mxu0 }
 0x809   : > { %v7006_v42 = vadd.f32 %v3786_v8, %v6144_v16  ;;  %v5174_v8 = vld [vmem:[%s7354_s23 + $0x8] sm:$0xff]  }
 0x80a   : > { %v4900_v1 = vpop.f32.mrf.mxu0 }
 0x80b   : > { %v3793_v4 = vsel %vm982_vm3, %v7006_v42, 0.0  ;;  %v5175_v1 = vld [vmem:[%s7354_s23 + $0x40] sm:$0xff]  }
 0x80c   : > { %3794 = vadd.xlane.f32.xlu1 %v3793_v4  ;;  %v3789_v58 = vpop.f32.mrf.mxu0  ;;  %v5176_v4 = vld [vmem:[%s7354_s23] sm:$0xff]  }
 0x80d   : > { %v7011_v27 = vadd.f32 %v3789_v58, %v6146_v17 }
 0x80e   : > { %v4901_v25 = vpop.f32.mrf.mxu0 }
 0x80f   : > { %v3796_v32 = vsel %vm982_vm3, %v7011_v27, 0.0 }
 0x810   : > { %3797 = vadd.xlane.f32.xlu0 %v3796_v32 }
 0x895   : > { %v3795_v10 = vpop.xlane.xlu1 %3794 }
 0x896   : > { %v3800_v30 = vmul.f32 0.015625, %v3795_v10 }
 0x898   : > { %v3802_v59 = vsub.f32 %v7006_v42, %v3800_v30 }
 0x899   : > { %v3798_v16 = vpop.xlane.xlu0 %3797 }
 0x89a   : > { %v3801_v55 = vmul.f32 0.015625, %v3798_v16  ;;  %v3804_v44 = vmul.f32 %v3802_v59, %v3802_v59 }
 0x89c   : > { %v3803_v14 = vsub.f32 %v7011_v27, %v3801_v55  ;;  %v3806_v19 = vsel %vm982_vm3, %v3804_v44, 0.0 }
 0x89d   : > { %3807 = vadd.xlane.f32.xlu0 %v3806_v19 }
 0x89e   : > { %v3805_v15 = vmul.f32 %v3803_v14, %v3803_v14 }
 0x8a0   : > { %v3809_v17 = vsel %vm982_vm3, %v3805_v15, 0.0 }
 0x8a1   : > { %3810 = vadd.xlane.f32.xlu1 %v3809_v17 }
 0x926   : > { %v3808_v20 = vpop.xlane.xlu0 %3807 }
 0x927   : > { %v3812_v26 = vmul.f32 0.015625, %v3808_v20 }
 0x929   : > { %v3814_v35 = vadd.f32 1e-05, %v3812_v26 }
 0x92a   : > { %v3811_v54 = vpop.xlane.xlu1 %3810 }
 0x92b   : > { %5225 = vrsqrt.f32 %v3814_v35  ;;  %v3813_v60 = vmul.f32 0.015625, %v3811_v54 }
 0x92d   : > { %v3815_v56 = vadd.f32 1e-05, %v3813_v60 }
 0x92f   : > { %5227 = vrsqrt.f32 %v3815_v56 }
 0x938   : > { %v5226_v63 = vpop.eup %5225 }
 0x939   : > { %v3818_v21 = vmul.f32 %v5226_v63, %v3802_v59 }
 0x93b   : > { %v3827_v47 = vmul.f32 %v4733_v48, %v3818_v21 }
 0x93c   : > { %v5228_v50 = vpop.eup %5227 }
 0x93d   : > { %v3819_v40 = vmul.f32 %v5228_v50, %v3803_v14  ;;  %v3836_v52 = vadd.f32 %v4734_v9, %v3827_v47 }
 0x93f   : > { %v3828_v43 = vmul.f32 %v4733_v48, %v3819_v40 }
 0x941   : > { %v3837_v62 = vadd.f32 %v4734_v9, %v3828_v43 }
 0x943   : > { %v3838_v41 = vpack.c.bf16 %v3837_v62, %v3836_v52 }
 0x945   : > { %4743 = vmatmul.mubr.msk.bf16.vlgmr.msra.gmra.mxu1 %vm982_vm3, %v3838_v41 }
 0x946   : > { %3990 = vmatpush1.bf16.msra.mxu1 %v5149_v24  ;;  %4013 = vmatprep.mubr.bf16.mxu1 %v7350_v28  ;;  %v5162_v28 = vld [vmem:[%s7354_s23 + $0x38] sm:$0xff]  }
 0x947   : > { %3991 = vmatprep.subr.bf16.mxu1 %v5154_v46  ;;  %4809 = vmatpush3.bf16.msra.mxu0 %v5162_v28 }
 0x948   : > { %4810 = vmatprep.subr.bf16.mxu0 %v5163_v22 }
 0x94a   : > { %3992 = vmatpush1.bf16.msra.mxu1 %v5152_v33 }
 0x94b   : > { %3993 = vmatprep.subr.bf16.mxu1 %v5157_v23  ;;  %4811 = vmatpush3.bf16.msra.mxu0 %v5164_v6 }
 0x94c   : > { %4812 = vmatprep.subr.bf16.mxu0 %v5165_v34 }
 0x94e   : > { %3994 = vmatpush1.bf16.msra.mxu1 %v5155_v13 }
 0x94f   : > { %3995 = vmatprep.subr.bf16.mxu1 %v5160_v51  ;;  %4813 = vmatpush3.bf16.msra.mxu0 %v5166_v5 }
 0x950   : > { %4814 = vmatprep.subr.bf16.mxu0 %v5167_v18 }
 0x952   : > { %3996 = vmatpush1.bf16.msra.mxu1 %v5158_v39 }
 0x953   : > { %4815 = vmatpush3.bf16.msra.mxu0 %v5168_v37 }
 0x954   : > { %4816 = vmatprep.subr.bf16.mxu0 %v5169_v53 }
 0x955   : > { %4752 = vmatmul.mubr.msk.bf16.vlgmr.msra.gmra.mxu1 %vm982_vm3, %v3838_v41 }
 0x957   : > { %4817 = vmatpush3.bf16.msra.mxu0 %v5170_v36 }
 0x958   : > { %4818 = vmatprep.subr.bf16.mxu0 %v5171_v12 }
 0x95b   : > { %4819 = vmatpush3.bf16.msra.mxu0 %v5172_v57 }
 0x95c   : > { %4820 = vmatprep.subr.bf16.mxu0 %v5173_v38 }
 0x95f   : > { %4821 = vmatpush3.bf16.msra.mxu0 %v5174_v8 }
 0x960   : > { %4822 = vmatprep.subr.bf16.mxu0 %v5175_v1 }
 0x963   : > { %4823 = vmatpush3.bf16.msra.mxu0 %v5176_v4 }
 0xa05   : > { %v7076_v58 = vpop.f32.mrf.mxu1 }
 0xa07   : > { %v7078_v25 = vpop.f32.mrf.mxu1 }
 0xa09   : > { %v7080_v32 = vpop.f32.mrf.mxu1 }
 0xa0b   : > { %v7082_v10 = vpop.f32.mrf.mxu1 }
 0xa15   : > { %v7084_v30 = vpop.f32.mrf.mxu1 }
 0xa16   : > { %v7087_v59 = vmul.f32 0.70710677, %v7084_v30 }
 0xa17   : > { %v7089_v16 = vpop.f32.mrf.mxu1 }
 0xa18   : > { %v4040_v55 = vand.u32 2147483647, %v7087_v59  ;;  %v7093_v44 = vmul.f32 0.70710677, %v7089_v16  ;;  %vm4032_vm8 = vcmp.ge.f32.partialorder %v7087_v59, 0.0 }
 0xa19   : > { %v7095_v14 = vpop.f32.mrf.mxu1 }
 0xa1a   : > { %v4044_v19 = vmul.f32 0.3275911, %v4040_v55  ;;  %v4041_v15 = vand.u32 2147483647, %v7093_v44  ;;  %v7099_v17 = vmul.f32 0.70710677, %v7095_v14 }
 0xa1b   : > { %v7101_v49 = vpop.f32.mrf.mxu1  ;;  %v4096_v26 = vsub.f32 0.0, %v4040_v55  ;;  %vm4033_vm9 = vcmp.ge.f32.partialorder %v7093_v44, 0.0 }
 0xa1c   : > { %v4048_v45 = vadd.f32 1.0, %v4044_v19  ;;  %v4045_v11 = vmul.f32 0.3275911, %v4041_v15  ;;  %v4042_v61 = vand.u32 2147483647, %v7099_v17  ;;  %v4097_v54 = vsub.f32 0.0, %v4041_v15 }
 0xa1d   : > { %v7105_v31 = vmul.f32 0.70710677, %v7101_v49  ;;  %v4100_v60 = vmul.f32 %v4096_v26, %v4040_v55  ;;  %vm4034_vm10 = vcmp.ge.f32.partialorder %v7099_v17, 0.0 }
 0xa1e   : > { %5229 = vrcp.f32 %v4048_v45  ;;  %v4049_v3 = vadd.f32 1.0, %v4045_v11  ;;  %v4046_v0 = vmul.f32 0.3275911, %v4042_v61  ;;  %v4098_v56 = vsub.f32 0.0, %v4042_v61 }
 0xa1f   : > { %v4043_v7 = vand.u32 2147483647, %v7105_v31  ;;  %v4101_v21 = vmul.f32 %v4097_v54, %v4041_v15  ;;  %v4104_v50 = vmul.f32 1.442695, %v4100_v60  ;;  %vm4035_vm11 = vcmp.ge.f32.partialorder %v7105_v31, 0.0 }
 0xa20   : > { %5231 = vrcp.f32 %v4049_v3  ;;  %v4050_v29 = vadd.f32 1.0, %v4046_v0  ;;  %v4102_v47 = vmul.f32 %v4098_v56, %v4042_v61  ;;  %v4027_v31 = vmul.f32 0.5, %v7101_v49 }
 0xa21   : > { %v4047_v20 = vmul.f32 0.3275911, %v4043_v7  ;;  %v4099_v40 = vsub.f32 0.0, %v4043_v7  ;;  %v4106_v62 = vmul.f32 1.442695, %v4101_v21 }
 0xa22   : > { %5233 = vrcp.f32 %v4050_v29  ;;  %v4108_v13 = vmul.f32 1.442695, %v4102_v47  ;;  %v5674_v47 = vmov -1.0  }
 0xa23   : > { %v4051_v35 = vadd.f32 1.0, %v4047_v20  ;;  %v4103_v46 = vmul.f32 %v4099_v40, %v4043_v7 }
 0xa25   : > { %5235 = vrcp.f32 %v4051_v35  ;;  %v4110_v34 = vmul.f32 1.442695, %v4103_v46 }
 0xa26   : > { %5237 = vpow2.f32 %v4104_v50 }
 0xa27   : > { %5239 = vpow2.f32 %v4106_v62 }
 0xa28   : > { %5241 = vpow2.f32 %v4108_v13 }
 0xa29   : > { %5243 = vpow2.f32 %v4110_v34 }
 0xa2b   : > { %v5230_v63 = vpop.eup %5229 }
 0xa2c   : > { %v4060_v48 = vmul.f32 1.0614054, %v5230_v63 }
 0xa2d   : > { %v5232_v9 = vpop.eup %5231 }
 0xa2e   : > { %v4064_v43 = vadd.f32 -1.4531521, %v4060_v48  ;;  %v4061_v52 = vmul.f32 1.0614054, %v5232_v9 }
 0xa2f   : > { %v5234_v24 = vpop.eup %5233 }
 0xa30   : > { %v4068_v41 = vmul.f32 %v5230_v63, %v4064_v43  ;;  %v4065_v33 = vadd.f32 -1.4531521, %v4061_v52  ;;  %v4062_v23 = vmul.f32 1.0614054, %v5234_v24  ;;  %v4036_v43 = vsel %vm4032_vm8, 1.0, %v5674_v47 }
 0xa31   : > { %v4037_v52 = vsel %vm4033_vm9, 1.0, %v5674_v47 }
 0xa32   : > { %v4072_v51 = vadd.f32 1.4214138, %v4068_v41  ;;  %v5236_v39 = vpop.eup %5235  ;;  %v4069_v2 = vmul.f32 %v5232_v9, %v4065_v33  ;;  %v4066_v28 = vadd.f32 -1.4531521, %v4062_v23  ;;  %v4038_v33 = vsel %vm4034_vm10, 1.0, %v5674_v47 }
 0xa33   : > { %v4063_v6 = vmul.f32 1.0614054, %v5236_v39  ;;  %v5238_v61 = vpop.eup %5237 }
 0xa34   : > { %v4076_v22 = vmul.f32 %v5230_v63, %v4072_v51  ;;  %v4073_v5 = vadd.f32 1.4214138, %v4069_v2  ;;  %v4070_v18 = vmul.f32 %v5234_v24, %v4066_v28  ;;  %v5240_v35 = vpop.eup %5239  ;;  %v4026_v2 = vmul.f32 0.5, %v7095_v14 }
 0xa35   : > { %v4067_v53 = vadd.f32 -1.4531521, %v4063_v6  ;;  %v5242_v48 = vpop.eup %5241  ;;  %v4039_v28 = vsel %vm4035_vm11, 1.0, %v5674_v47 }
 0xa36   : > { %v4080_v37 = vadd.f32 -0.28449672, %v4076_v22  ;;  %v4077_v36 = vmul.f32 %v5232_v9, %v4073_v5  ;;  %v4074_v12 = vadd.f32 1.4214138, %v4070_v18  ;;  %v5244_v62 = vpop.eup %5243  ;;  %v4025_v22 = vmul.f32 0.5, %v7089_v16 }
 0xa37   : > { %v4071_v38 = vmul.f32 %v5236_v39, %v4067_v53 }
 0xa38   : > { %v4084_v57 = vmul.f32 %v5230_v63, %v4080_v37  ;;  %v4081_v8 = vadd.f32 -0.28449672, %v4077_v36  ;;  %v4078_v1 = vmul.f32 %v5234_v24, %v4074_v12 }
 0xa39   : > { %v4075_v55 = vadd.f32 1.4214138, %v4071_v38 }
 0xa3a   : > { %v4088_v4 = vadd.f32 0.2548296, %v4084_v57  ;;  %v4085_v19 = vmul.f32 %v5232_v9, %v4081_v8  ;;  %v4082_v15 = vadd.f32 -0.28449672, %v4078_v1 }
 0xa3b   : > { %v4079_v11 = vmul.f32 %v5236_v39, %v4075_v55 }
 0xa3c   : > { %v4092_v45 = vmul.f32 %v5230_v63, %v4088_v4  ;;  %v4089_v3 = vadd.f32 0.2548296, %v4085_v19  ;;  %v4086_v0 = vmul.f32 %v5234_v24, %v4082_v15 }
 0xa3d   : > { %v4083_v29 = vadd.f32 -0.28449672, %v4079_v11 }
 0xa3e   : > { %v4112_v7 = vmul.f32 %v5238_v61, %v4092_v45  ;;  %v4093_v20 = vmul.f32 %v5232_v9, %v4089_v3  ;;  %v4090_v26 = vadd.f32 0.2548296, %v4086_v0 }
 0xa3f   : > { %v4087_v54 = vmul.f32 %v5236_v39, %v4083_v29 }
 0xa40   : > { %v4116_v60 = vsub.f32 1.0, %v4112_v7  ;;  %v4113_v56 = vmul.f32 %v5240_v35, %v4093_v20  ;;  %v4094_v21 = vmul.f32 %v5234_v24, %v4090_v26 }
 0xa41   : > { %v4091_v50 = vadd.f32 0.2548296, %v4087_v54 }
 0xa42   : > { %v4117_v63 = vsub.f32 1.0, %v4113_v56  ;;  %v4114_v40 = vmul.f32 %v5242_v48, %v4094_v21  ;;  %v4120_v41 = vmul.f32 %v4116_v60, %v4036_v43 }
 0xa43   : > { %v4095_v9 = vmul.f32 %v5236_v39, %v4091_v50  ;;  %v4024_v39 = vmul.f32 0.5, %v7084_v30 }
 0xa44   : > { %v4121_v46 = vmul.f32 %v4117_v63, %v4037_v52  ;;  %v4118_v59 = vsub.f32 1.0, %v4114_v40  ;;  %v4124_v51 = vadd.f32 1.0, %v4120_v41 }
 0xa45   : > { %v4115_v44 = vmul.f32 %v5244_v62, %v4095_v9 }
 0xa46   : > { %v4122_v23 = vmul.f32 %v4118_v59, %v4038_v33  ;;  %v4125_v24 = vadd.f32 1.0, %v4121_v46  ;;  %v4128_v37 = vmul.f32 %v4124_v51, %v4024_v39 }
 0xa47   : > { %v4119_v13 = vsub.f32 1.0, %v4115_v44 }
 0xa48   : > { %v4126_v17 = vadd.f32 1.0, %v4122_v23  ;;  %v4129_v5 = vmul.f32 %v4125_v24, %v4025_v22  ;;  %v4132_v16 = vmul.f32 %v4128_v37, %v7076_v58 }
 0xa49   : > { %v4123_v6 = vmul.f32 %v4119_v13, %v4039_v28 }
 0xa4a   : > { %v4130_v34 = vmul.f32 %v4126_v17, %v4026_v2  ;;  %v4133_v14 = vmul.f32 %v4129_v5, %v7078_v25 }
 0xa4b   : > { %v4127_v18 = vadd.f32 1.0, %v4123_v6 }
 0xa4c   : > { %v4134_v36 = vmul.f32 %v4130_v34, %v7080_v32 }
 0xa4d   : > { %v4131_v53 = vmul.f32 %v4127_v18, %v4027_v31 }
 0xa4e   : > { %v4136_v38 = vpack.c.bf16 %v4134_v36, %v4132_v16 }
 0xa4f   : > { %v4135_v12 = vmul.f32 %v4131_v53, %v7082_v10 }
 0xa51   : > { %v4137_v57 = vpack.c.bf16 %v4135_v12, %v4133_v14 }
 0xa53   : > { %4298 = vmatprep.mubr.bf16.mxu0 %v4137_v57 }
 0xa54   : > { %4299 = vmatmul.mubr.bf16.vlgmr.msra.gmra.mxu0 %v4136_v38 }
 0xb14   : > { %v4824_v30 = vpop.f32.mrf.mxu0 }
 0xb16   : > { %v4825_v49 = vpop.f32.mrf.mxu0 }
 0xb17   : > { %v4826_v8 = vadd.f32 %v4825_v49, %v4824_v30 }
 0xb18   : > { %v4827_v32 = vpop.f32.mrf.mxu0 }
 0xb19   : > { %v4301_v25 = vadd.f32 %v4826_v8, %v7006_v42 }
 0xb1a   : > { %v4828_v58 = vpop.f32.mrf.mxu0 }
 0xb1b   : > { %4307 = vst.msk [vmem:[%s885_s12] sm:$0xff] %vm982_vm3, %v4301_v25  ;;  %v4829_v10 = vadd.f32 %v4828_v58, %v4827_v32 }
 0xb1d   : > { %v4304_v1 = vadd.f32 %v4829_v10, %v7011_v27 }
 0xb1f   : > { %4308 = vst.msk [vmem:[%s885_s12 + $0x8] sm:$0xff] %vm982_vm3, %v4304_v1 }
 0xb20   : > { %5504 = shalt.err (!%p5501_p6)
}
 0xb21   : > { %s5505_s27 = scalar_lea.hbm %s7128_s8, 256  ;;  %s5509_s5 = scalar_lea.hbm %s7358_s17, 1536 }
 0xb22   : > { %p5506_p3 = scmp.ne.s32.totalorder %s7128_s8, %s5505_s27  ;;  %p5510_p13 = scmp.lt.s32.totalorder %s7128_s8, %s7358_s17 }
 0xb23   : > { %p5511_p7 = scmp.lt.s32.totalorder %s5509_s5, %s5505_s27 }
 0xb24   : > { %p5507_p8 = pnand %p5506_p3, %p7359_p0 }
 0xb25   : > { %p5512_p12 = por %p5511_p7, %p5510_p13 }
 0xb26   : > { %p5508_p2 = pneg %p5507_p8 }
 0xb28   : > { %p5513_p9 = pnand %p5512_p12, %p5508_p2 }
 0xb2a   : > { %5516 = shalt.err (!%p5513_p9)
}
 0xb2b   : > { %s5676_s3 = smov 128   ;;  %s5677_s29 = smov 8  }
 0xb2c   : > { %4931 = dma.vmem_to_hbm [thread:$0]  (%p7359_p0), %s7130_s19, 256, %s7128_s8, %s7134_s21, %s5676_s3, %s5676_s3, %s5677_s29  }
 0xb2d PF: > { %p4976_p5 = scmp.ge.s32.totalorder %s5651_s22, 2  ;;  %s4340_s28 = sand.u32 1, %s5599_s24  }
 0xb2e   : > { %p7360_p11 = scmp.ne.s32.totalorder %s7315_s13, 0  ;;  %s4341_s12 = scalar_lea.sflag [#allocation4], %s4340_s28 }
 0xb30   : > { %p4963_p4 = pnand %p4976_p5, %p7360_p11 }
 0xb32   : > { %p4964_p1 = pneg %p4963_p4 }
 0xb34   : > { %5594 = dma.done.wait (%p4964_p1), %s4341_s12, 256  }
 0xb35   : > { %5596 = vsyncadd (%p4964_p1), %s4341_s12, 4294967040  ;;  %s41_s22 = sadd.s32 1, %s5651_s22   ;;  %s7362_s1 = sld [smem:[#allocation42_spill]] }
 0xb36   : > { %p7162_p10 = scmp.ge.s32.totalorder %s41_s22, 8   ;;  %s7363_s27 = sld [smem:[#allocation24_spill]] }
 0xb37   : > { %s7364_s28 = sld [smem:[#allocation25_spill]]  ;;  %s7372_s24 = smov %s5603_s25 }
 0xb38   : > { %s7365_s29 = sld [smem:[#allocation39_spill]]  ;;  %s7373_s25 = smov %s5607_s26 }
 0xb39   : > { %s7366_s0 = sld [smem:[#allocation26_spill]]  ;;  %s7375_s30 = smov %s5631_s18 }
 0xb3a   : > { %s7367_s13 = sld [smem:[#allocation41_spill]] }
 0xb3b   : > { %s7368_s19 = sld [smem:[#allocation29_spill]]  ;;  %s7374_s26 = smov %s7362_s1 }
 0xb3c   : > { %s7369_s8 = sld [smem:[#allocation30_spill]] }
 0xb3d   : > { %s7370_s20 = sld [smem:[#allocation36_spill]] }
 0xb3e   : > { %s7371_s21 = sld [smem:[#allocation38_spill]]  ;;  %40 = sbr.rel (!%p7162_p10) target bundleno = 34 (0x22), region = 203 }
 0xb40   : > { %s7376_s18 = smov %s7367_s13 }
 0xb42   : > { %s7377_s1 = smov %s7369_s8 }
 0xb43   :  { %4346 = vsyncpa [#allocation3], 1 }
 0xb44   :  { %4348 = vsyncpa [#allocation3 + $0x1], 1 }
 0xb45   :  { %4349 = vsyncpa [#allocation6], 1 }
 0xb46   :  { %4351 = vsyncpa [#allocation6 + $0x1], 1 }
 0xb47   :  { %4352 = vsyncpa [#allocation9], 1 }
 0xb48   :  { %4354 = vsyncpa [#allocation9 + $0x1], 1 }
 0xb49   :  { %4355 = vsyncpa [#allocation12], 1 }
 0xb4a   :  { %4356 = vsyncpa [#allocation15], 1 }
 0xb4b   :  { %4357 = vsyncpa [#allocation4], 1 }
 0xb4c   :  { %4359 = vsyncpa [#allocation4 + $0x1], 1 }

</bundles_post_ra>
